<compile_context>
chip_gen: v7x
topology: tpu7x:2x2x1
jax: 0.10.0
libtpu: 0.0.40
codegen_flags: <defaults>
</compile_context>

<pallas_src>
import functools

import jax
import jax.numpy as jnp
from jax.experimental import pallas as pl

EPS = 1e-6        # reparam_noise in the PyTorch module
BN_EPS = 1e-5     # nn.BatchNorm2d default eps

# Flip to jnp.bfloat16 on v6e/v7x for native-rate MXU + half the DMA bytes
# (accumulation stays f32 via preferred_element_type).  Kept at float32 because
# this workload is launch/latency bound, not bandwidth bound, and f32 keeps the
# bit-fidelity check against the reference tight.
COMPUTE_DTYPE = jnp.float32


def _zero_index_map(ndim):
    return lambda: (0,) * ndim


# ---------------------------------------------------------------------------
# The fused kernel: whole forward pass, one launch, zero HBM intermediates.
#   p1r_ref : (25, B*25, 25)  per-conv2-tap conv1 patches, rows in (oh2,ow2,b)
#   z_ref   : (B, (5+2)*(M+1))
#   conv weights are per-tap blocks; BN(eval)+bias already folded in.
# ---------------------------------------------------------------------------
def _fused_actor_kernel(p1r_ref, z_ref,
                        w1_ref, b1_ref, w2_ref, b2_ref, w3_ref, b3_ref,
                        w11_ref, b11_ref, w12_ref, b12_ref,
                        w21x_ref, w21z_ref, b21_ref, wh_ref, bh_ref,
                        out_ref):
    f32 = jnp.float32

    def elu(v):
        return jnp.where(v > 0, v, jnp.exp(jnp.minimum(v, 0.0)) - 1.0)

    n_taps = p1r_ref.shape[0]          # 25 (5x5 kernel taps)
    B = z_ref.shape[0]
    n_act = bh_ref.shape[1] // 2
    cdt = w1_ref.dtype

    # conv1 + conv2: accumulate over conv2 taps; each tap uses the conv1
    # outputs it needs, recomputed from that tap's own patch block.
    acc2 = None
    for t in range(n_taps):
        patches = p1r_ref[t]                                           # (B*25, 25)
        y1 = jnp.dot(patches, w1_ref[...], preferred_element_type=f32) + b1_ref[...]
        y1 = elu(y1).astype(cdt)                                       # conv1 out (B*25, 16)
        d = jnp.dot(y1, w2_ref[t], preferred_element_type=f32)         # (B*25, 32)
        acc2 = d if acc2 is None else acc2 + d
    y2 = elu(acc2 + b2_ref[...]).astype(cdt)                           # (B*25, 32), rows (oh2,ow2,b)

    # conv3 (output spatial 1x1): tap t reads the contiguous row block t*B:(t+1)*B.
    acc3 = None
    for t in range(w3_ref.shape[0]):
        d = jnp.dot(y2[t * B:(t + 1) * B, :], w3_ref[t], preferred_element_type=f32)
        acc3 = d if acc3 is None else acc3 + d
    x_flat = elu(acc3 + b3_ref[...]).astype(cdt)                       # (B, 32) == NCHW flatten

    # FC tail: z branch, fc21 with concat folded into split weights, merged heads.
    z1 = jnp.maximum(jnp.dot(z_ref[...], w11_ref[...], preferred_element_type=f32)
                     + b11_ref[...], 0.0).astype(cdt)
    z2 = jnp.maximum(jnp.dot(z1, w12_ref[...], preferred_element_type=f32)
                     + b12_ref[...], 0.0).astype(cdt)
    h = elu(jnp.dot(x_flat, w21x_ref[...], preferred_element_type=f32)
            + jnp.dot(z2, w21z_ref[...], preferred_element_type=f32)
            + b21_ref[...]).astype(cdt)
    o = jnp.dot(h, wh_ref[...], preferred_element_type=f32) + bh_ref[...]   # (B, 2*n_act) = [mu|sigma]
    col = jax.lax.broadcasted_iota(jnp.int32, o.shape, 1)
    out_ref[...] = jnp.where(col >= n_act, jnp.clip(o, EPS, 1.0), o)


# ---------------------------------------------------------------------------
# Parameters (deterministic init mirroring init_layer's uniform ranges).
# ---------------------------------------------------------------------------
def init_params(key, n_actions, M, linear_input_size):
    ks = jax.random.split(key, 16)

    def u(k, shape, sc):
        return jax.random.uniform(k, shape, jnp.float32, minval=-sc, maxval=sc)

    p = {}
    conv_cfg = [(1, 16), (16, 32), (32, 32)]
    for i, (ci, co) in enumerate(conv_cfg, start=1):
        sc = float(co) ** -0.5                       # 1/sqrt(weight.size(0)) = 1/sqrt(CO)
        p[f"conv{i}_w"] = u(ks[2 * i - 2], (co, ci, 5, 5), sc)   # PyTorch (CO,CI,KH,KW)
        p[f"conv{i}_b"] = u(ks[2 * i - 1], (co,), sc)
        p[f"bn{i}_gamma"] = jnp.ones((co,), jnp.float32)
        p[f"bn{i}_beta"] = jnp.zeros((co,), jnp.float32)
        p[f"bn{i}_mean"] = jnp.zeros((co,), jnp.float32)
        p[f"bn{i}_var"] = jnp.ones((co,), jnp.float32)

    def linear(kw_key, kb_key, d_in, d_out, sc):
        # PyTorch Linear weight is (out,in); store transposed as (in,out).
        w = u(kw_key, (d_out, d_in), sc).T
        b = u(kb_key, (d_out,), sc)
        return w, b

    z_in = (5 + 2) * (M + 1)
    p["fc11_w"], p["fc11_b"] = linear(ks[6], ks[7], z_in, 128, 128.0 ** -0.5)
    p["fc12_w"], p["fc12_b"] = linear(ks[8], ks[9], 128, 16, 16.0 ** -0.5)
    p["fc21_w"], p["fc21_b"] = linear(ks[10], ks[11], linear_input_size, 128, 128.0 ** -0.5)
    p["fc22mu_w"], p["fc22mu_b"] = linear(ks[12], ks[13], 128, n_actions, 0.003)
    p["fc22sigma_w"], p["fc22sigma_b"] = linear(ks[14], ks[15], 128, n_actions, 0.003)
    return p


# ---------------------------------------------------------------------------
# One-time parameter folding:
#  * conv weight -> per-tap matmul blocks, BN(eval) scale folded; bias'=b*s+t
#  * fc21 split into x / z blocks (kills the concat)
#  * mu/sigma heads merged into one weight/bias (one dot, one output)
# ---------------------------------------------------------------------------
def fold_params(p, compute_dtype=COMPUTE_DTYPE):
    f = {}
    for i in (1, 2, 3):
        w = p[f"conv{i}_w"]                               # (CO, CI, 5, 5)
        co, ci = w.shape[0], w.shape[1]
        scale = p[f"bn{i}_gamma"] * jax.lax.rsqrt(p[f"bn{i}_var"] + BN_EPS)
        shift = p[f"bn{i}_beta"] - p[f"bn{i}_mean"] * scale
        wt = jnp.transpose(w, (2, 3, 1, 0)).reshape(25, ci, co) * scale[None, None, :]
        if i == 1:                                        # ci == 1: 2-D matrix, cols = tap kh*5+kw
            wt = wt.reshape(25 * ci, co)
        f[f"conv{i}_w"] = wt.astype(compute_dtype)
        f[f"conv{i}_b"] = (p[f"conv{i}_b"] * scale + shift).reshape(1, co).astype(jnp.float32)

    for name in ("fc11", "fc12"):
        f[name + "_w"] = p[name + "_w"].astype(compute_dtype)
        f[name + "_b"] = p[name + "_b"].reshape(1, -1).astype(jnp.float32)

    n_z = p["fc12_w"].shape[1]                            # 16 (z branch width)
    n_x = p["fc21_w"].shape[0] - n_z
    f["fc21_wx"] = p["fc21_w"][:n_x].astype(compute_dtype)     # cat order: x first
    f["fc21_wz"] = p["fc21_w"][n_x:].astype(compute_dtype)
    f["fc21_b"] = p["fc21_b"].reshape(1, -1).astype(jnp.float32)

    f["heads_w"] = jnp.concatenate([p["fc22mu_w"], p["fc22sigma_w"]],
                                   axis=1).astype(compute_dtype)          # (128, 2*n_actions)
    f["heads_b"] = jnp.concatenate([p["fc22mu_b"], p["fc22sigma_b"]]
                                   ).reshape(1, -1).astype(jnp.float32)
    return f


# ---------------------------------------------------------------------------
# Forward pass == ActorNetwork.forward(x, z) -> (mu, sigma); ONE pallas_call.
# ---------------------------------------------------------------------------
def actor_forward(folded, x_nchw, z):
    B, C, H, W = x_nchw.shape
    assert C == 1
    o1, ow1 = (H - 5) // 2 + 1, (W - 5) // 2 + 1
    o2, ow2 = (o1 - 5) // 2 + 1, (ow1 - 5) // 2 + 1
    o3, ow3 = (o2 - 5) // 2 + 1, (ow2 - 5) // 2 + 1
    assert o3 == 1 and ow3 == 1 and o2 * ow2 == 25, "fused kernel needs 1x1 conv3 output"

    cdt = folded["conv1_w"].dtype
    img = x_nchw[:, 0, :, :].astype(cdt)                               # (B, H, W); CI == 1

    # Stage 1: conv1 im2col (kernel 5, stride 2); columns ordered kh*5 + kw.
    cols = []
    for kh in range(5):
        for kw in range(5):
            cols.append(img[:, kh:kh + 2 * (o1 - 1) + 1:2, kw:kw + 2 * (ow1 - 1) + 1:2])
    p1 = jnp.stack(cols, axis=-1)                                      # (B, o1, ow1, 25)

    # Stage 2: per conv2 tap, the 5x5(stride 2) window of conv1-output positions it
    # reads.  Rows ordered (oh2, ow2, b) so each conv3 tap is a contiguous row block
    # inside the kernel.  All static slices; XLA fuses this into one gather fusion.
    taps = []
    for kh in range(5):
        for kw in range(5):
            taps.append(p1[:, kh:kh + 2 * (o2 - 1) + 1:2, kw:kw + 2 * (ow2 - 1) + 1:2, :])
    r = jnp.stack(taps, axis=0)                                        # (25, B, o2, ow2, 25)
    r = jnp.transpose(r, (0, 2, 3, 1, 4)).reshape(25, o2 * ow2 * B, 25)

    zf = z.reshape(B, -1).astype(cdt)
    n2 = folded["heads_w"].shape[1]                                    # 2 * n_actions

    ins = (r, zf,
           folded["conv1_w"], folded["conv1_b"], folded["conv2_w"], folded["conv2_b"],
           folded["conv3_w"], folded["conv3_b"],
           folded["fc11_w"], folded["fc11_b"], folded["fc12_w"], folded["fc12_b"],
           folded["fc21_wx"], folded["fc21_wz"], folded["fc21_b"],
           folded["heads_w"], folded["heads_b"])
    in_specs = [pl.BlockSpec(a.shape, _zero_index_map(a.ndim)) for a in ins]

    out = pl.pallas_call(
        _fused_actor_kernel,
        out_shape=jax.ShapeDtypeStruct((B, n2), jnp.float32),
        in_specs=in_specs,
        out_specs=pl.BlockSpec((B, n2), lambda: (0, 0)),
    )(*ins)

    na = n2 // 2
    return out[:, :na], out[:, na:]                                    # free slices


# ---------------------------------------------------------------------------
# Pure-JAX reference (no Pallas) for correctness validation.
# ---------------------------------------------------------------------------
def _im2col(x_nhwc, ksize, stride):
    B, H, W, C = x_nhwc.shape
    OH = (H - ksize) // stride + 1
    OW = (W - ksize) // stride + 1
    cols = []
    for kh in range(ksize):
        for kw in range(ksize):
            cols.append(
                x_nhwc[:, kh:kh + stride * (OH - 1) + 1:stride,
                          kw:kw + stride * (OW - 1) + 1:stride, :]
            )
    p = jnp.stack(cols, axis=3)  # (B, OH, OW, K*K, C); col index = (kh*K+kw)*C + ci
    return p.reshape(B * OH * OW, ksize * ksize * C), OH, OW


def actor_forward_ref(params, x_nchw, z):
    hp = jax.lax.Precision.HIGHEST
    mm = functools.partial(jnp.dot, precision=hp)
    elu = lambda v: jnp.where(v > 0, v, jnp.exp(jnp.minimum(v, 0.0)) - 1.0)

    B = x_nchw.shape[0]
    x = jnp.transpose(x_nchw.astype(jnp.float32), (0, 2, 3, 1))
    for i in (1, 2, 3):
        w = params[f"conv{i}_w"]
        co, ci = w.shape[0], w.shape[1]
        patches, OH, OW = _im2col(x, 5, 2)
        wmat = jnp.transpose(w, (2, 3, 1, 0)).reshape(5 * 5 * ci, co)
        y = mm(patches, wmat) + params[f"conv{i}_b"]
        scale = params[f"bn{i}_gamma"] / jnp.sqrt(params[f"bn{i}_var"] + BN_EPS)
        shift = params[f"bn{i}_beta"] - params[f"bn{i}_mean"] * scale
        x = elu(y * scale + shift).reshape(B, OH, OW, co)

    x_flat = jnp.transpose(x, (0, 3, 1, 2)).reshape(B, -1)
    zz = z.reshape(B, -1).astype(jnp.float32)
    zz = jnp.maximum(mm(zz, params["fc11_w"]) + params["fc11_b"], 0.0)
    zz = jnp.maximum(mm(zz, params["fc12_w"]) + params["fc12_b"], 0.0)
    xz = jnp.concatenate([x_flat, zz], axis=1)
    h = elu(mm(xz, params["fc21_w"]) + params["fc21_b"])
    mu = mm(h, params["fc22mu_w"]) + params["fc22mu_b"]
    sigma = jnp.clip(mm(h, params["fc22sigma_w"]) + params["fc22sigma_b"], EPS, 1.0)
    return mu, sigma


if __name__ == "__main__":
    key = jax.random.PRNGKey(0)
    B, H, W = 2, 32, 32          # spatial must survive three stride-2 k=5 convs
    M, n_actions = 3, 4

    def conv2d_size_out(size, kernel_size=5, stride=2):
        return (size - (kernel_size - 1) - 1) // stride + 1

    convw = conv2d_size_out(conv2d_size_out(conv2d_size_out(W)))
    convh = conv2d_size_out(conv2d_size_out(conv2d_size_out(H)))
    linear_input_size = convw * convh * 32 + 16

    kp, kx, kz = jax.random.split(key, 3)
    params = init_params(kp, n_actions, M, linear_input_size)
    folded = fold_params(params)                                   # one-time fold
    x = jax.random.normal(kx, (B, 1, H, W), jnp.float32)           # NCHW like PyTorch
    z = jax.random.normal(kz, (B, (5 + 2) * (M + 1)), jnp.float32)

    mu, sigma = jax.jit(actor_forward)(folded, x, z)
    jax.block_until_ready((mu, sigma))

    # Validate against the pure-JAX reference.
    mu_ref, sigma_ref = jax.jit(actor_forward_ref)(params, x, z)
    jax.block_until_ready((mu_ref, sigma_ref))

    assert mu.shape == (B, n_actions) and sigma.shape == (B, n_actions)
    assert bool(jnp.all(sigma >= EPS)) and bool(jnp.all(sigma <= 1.0))
    assert bool(jnp.allclose(mu, mu_ref, atol=1e-3, rtol=1e-2)), "mu mismatch vs reference"
    assert bool(jnp.allclose(sigma, sigma_ref, atol=1e-3, rtol=1e-2)), "sigma mismatch vs reference"
    print("KERNEL_OK")
</pallas_src>

<mosaic_0001>
module attributes {stable_mosaic.version = 11 : i64} {
  func.func @_fused_actor_kernel(%arg0: memref<25x50x25xf32, #tpu.memory_space<vmem>>, %arg1: memref<2x28xf32, #tpu.memory_space<vmem>>, %arg2: memref<25x16xf32, #tpu.memory_space<vmem>>, %arg3: memref<1x16xf32, #tpu.memory_space<vmem>>, %arg4: memref<25x16x32xf32, #tpu.memory_space<vmem>>, %arg5: memref<1x32xf32, #tpu.memory_space<vmem>>, %arg6: memref<25x32x32xf32, #tpu.memory_space<vmem>>, %arg7: memref<1x32xf32, #tpu.memory_space<vmem>>, %arg8: memref<28x128xf32, #tpu.memory_space<vmem>>, %arg9: memref<1x128xf32, #tpu.memory_space<vmem>>, %arg10: memref<128x16xf32, #tpu.memory_space<vmem>>, %arg11: memref<1x16xf32, #tpu.memory_space<vmem>>, %arg12: memref<32x128xf32, #tpu.memory_space<vmem>>, %arg13: memref<16x128xf32, #tpu.memory_space<vmem>>, %arg14: memref<1x128xf32, #tpu.memory_space<vmem>>, %arg15: memref<128x8xf32, #tpu.memory_space<vmem>>, %arg16: memref<1x8xf32, #tpu.memory_space<vmem>>, %arg17: memref<2x8xf32, #tpu.memory_space<vmem>>) attributes {dimension_semantics = [], scalar_prefetch = 0 : i64, scratch_operands = 0 : i64, tpu.core_type = #tpu.core_type<tc>} {
    %c0 = arith.constant 0 : index
    %c0_0 = arith.constant 0 : index
    %c0_1 = arith.constant 0 : index
    %0 = vector.load %arg0[%c0, %c0_0, %c0_1] : memref<25x50x25xf32, #tpu.memory_space<vmem>>, vector<1x50x25xf32>
    %1 = vector.shape_cast %0 : vector<1x50x25xf32> to vector<50x25xf32>
    %c0_2 = arith.constant 0 : index
    %c0_3 = arith.constant 0 : index
    %2 = vector.load %arg2[%c0_2, %c0_3] : memref<25x16xf32, #tpu.memory_space<vmem>>, vector<25x16xf32>
    %cst = arith.constant dense<0.000000e+00> : vector<50x16xf32>
    %3 = tpu.matmul %1, %2, %cst {dimension_numbers = #tpu.dot_dimension_numbers<[1], [0], [0], [1], [0, 0, 1, 1], [], []>} : vector<50x25xf32>, vector<25x16xf32>, vector<50x16xf32> -> vector<50x16xf32>
    %c0_4 = arith.constant 0 : index
    %c0_5 = arith.constant 0 : index
    %4 = vector.load %arg3[%c0_4, %c0_5] : memref<1x16xf32, #tpu.memory_space<vmem>>, vector<1x16xf32>
    %5 = vector.broadcast %4 : vector<1x16xf32> to vector<50x16xf32>
    %6 = arith.addf %3, %5 : vector<50x16xf32>
    %cst_6 = arith.constant 0.000000e+00 : f32
    %7 = vector.broadcast %cst_6 : f32 to vector<50x16xf32>
    %8 = arith.cmpf ogt, %6, %7 : vector<50x16xf32>
    %cst_7 = arith.constant 0.000000e+00 : f32
    %9 = vector.broadcast %cst_7 : f32 to vector<50x16xf32>
    %10 = arith.minimumf %6, %9 : vector<50x16xf32>
    %11 = math.exp %10 : vector<50x16xf32>
    %cst_8 = arith.constant 1.000000e+00 : f32
    %12 = vector.broadcast %cst_8 : f32 to vector<50x16xf32>
    %13 = arith.subf %11, %12 : vector<50x16xf32>
    %14 = arith.select %8, %6, %13 : vector<50x16xi1>, vector<50x16xf32>
    %c0_9 = arith.constant 0 : index
    %c0_10 = arith.constant 0 : index
    %c0_11 = arith.constant 0 : index
    %15 = vector.load %arg4[%c0_9, %c0_10, %c0_11] : memref<25x16x32xf32, #tpu.memory_space<vmem>>, vector<1x16x32xf32>
    %16 = vector.shape_cast %15 : vector<1x16x32xf32> to vector<16x32xf32>
    %cst_12 = arith.constant dense<0.000000e+00> : vector<50x32xf32>
    %17 = tpu.matmul %14, %16, %cst_12 {dimension_numbers = #tpu.dot_dimension_numbers<[1], [0], [0], [1], [0, 0, 1, 1], [], []>} : vector<50x16xf32>, vector<16x32xf32>, vector<50x32xf32> -> vector<50x32xf32>
    %c1 = arith.constant 1 : index
    %c0_13 = arith.constant 0 : index
    %c0_14 = arith.constant 0 : index
    %18 = vector.load %arg0[%c1, %c0_13, %c0_14] : memref<25x50x25xf32, #tpu.memory_space<vmem>>, vector<1x50x25xf32>
    %19 = vector.shape_cast %18 : vector<1x50x25xf32> to vector<50x25xf32>
    %c0_15 = arith.constant 0 : index
    %c0_16 = arith.constant 0 : index
    %20 = vector.load %arg2[%c0_15, %c0_16] : memref<25x16xf32, #tpu.memory_space<vmem>>, vector<25x16xf32>
    %cst_17 = arith.constant dense<0.000000e+00> : vector<50x16xf32>
    %21 = tpu.matmul %19, %20, %cst_17 {dimension_numbers = #tpu.dot_dimension_numbers<[1], [0], [0], [1], [0, 0, 1, 1], [], []>} : vector<50x25xf32>, vector<25x16xf32>, vector<50x16xf32> -> vector<50x16xf32>
    %c0_18 = arith.constant 0 : index
    %c0_19 = arith.constant 0 : index
    %22 = vector.load %arg3[%c0_18, %c0_19] : memref<1x16xf32, #tpu.memory_space<vmem>>, vector<1x16xf32>
    %23 = vector.broadcast %22 : vector<1x16xf32> to vector<50x16xf32>
    %24 = arith.addf %21, %23 : vector<50x16xf32>
    %cst_20 = arith.constant 0.000000e+00 : f32
    %25 = vector.broadcast %cst_20 : f32 to vector<50x16xf32>
    %26 = arith.cmpf ogt, %24, %25 : vector<50x16xf32>
    %cst_21 = arith.constant 0.000000e+00 : f32
    %27 = vector.broadcast %cst_21 : f32 to vector<50x16xf32>
    %28 = arith.minimumf %24, %27 : vector<50x16xf32>
    %29 = math.exp %28 : vector<50x16xf32>
    %cst_22 = arith.constant 1.000000e+00 : f32
    %30 = vector.broadcast %cst_22 : f32 to vector<50x16xf32>
    %31 = arith.subf %29, %30 : vector<50x16xf32>
    %32 = arith.select %26, %24, %31 : vector<50x16xi1>, vector<50x16xf32>
    %c1_23 = arith.constant 1 : index
    %c0_24 = arith.constant 0 : index
    %c0_25 = arith.constant 0 : index
    %33 = vector.load %arg4[%c1_23, %c0_24, %c0_25] : memref<25x16x32xf32, #tpu.memory_space<vmem>>, vector<1x16x32xf32>
    %34 = vector.shape_cast %33 : vector<1x16x32xf32> to vector<16x32xf32>
    %cst_26 = arith.constant dense<0.000000e+00> : vector<50x32xf32>
    %35 = tpu.matmul %32, %34, %cst_26 {dimension_numbers = #tpu.dot_dimension_numbers<[1], [0], [0], [1], [0, 0, 1, 1], [], []>} : vector<50x16xf32>, vector<16x32xf32>, vector<50x32xf32> -> vector<50x32xf32>
    %36 = arith.addf %17, %35 : vector<50x32xf32>
    %c2 = arith.constant 2 : index
    %c0_27 = arith.constant 0 : index
    %c0_28 = arith.constant 0 : index
    %37 = vector.load %arg0[%c2, %c0_27, %c0_28] : memref<25x50x25xf32, #tpu.memory_space<vmem>>, vector<1x50x25xf32>
    %38 = vector.shape_cast %37 : vector<1x50x25xf32> to vector<50x25xf32>
    %c0_29 = arith.constant 0 : index
    %c0_30 = arith.constant 0 : index
    %39 = vector.load %arg2[%c0_29, %c0_30] : memref<25x16xf32, #tpu.memory_space<vmem>>, vector<25x16xf32>
    %cst_31 = arith.constant dense<0.000000e+00> : vector<50x16xf32>
    %40 = tpu.matmul %38, %39, %cst_31 {dimension_numbers = #tpu.dot_dimension_numbers<[1], [0], [0], [1], [0, 0, 1, 1], [], []>} : vector<50x25xf32>, vector<25x16xf32>, vector<50x16xf32> -> vector<50x16xf32>
    %c0_32 = arith.constant 0 : index
    %c0_33 = arith.constant 0 : index
    %41 = vector.load %arg3[%c0_32, %c0_33] : memref<1x16xf32, #tpu.memory_space<vmem>>, vector<1x16xf32>
    %42 = vector.broadcast %41 : vector<1x16xf32> to vector<50x16xf32>
    %43 = arith.addf %40, %42 : vector<50x16xf32>
    %cst_34 = arith.constant 0.000000e+00 : f32
    %44 = vector.broadcast %cst_34 : f32 to vector<50x16xf32>
    %45 = arith.cmpf ogt, %43, %44 : vector<50x16xf32>
    %cst_35 = arith.constant 0.000000e+00 : f32
    %46 = vector.broadcast %cst_35 : f32 to vector<50x16xf32>
    %47 = arith.minimumf %43, %46 : vector<50x16xf32>
    %48 = math.exp %47 : vector<50x16xf32>
    %cst_36 = arith.constant 1.000000e+00 : f32
    %49 = vector.broadcast %cst_36 : f32 to vector<50x16xf32>
    %50 = arith.subf %48, %49 : vector<50x16xf32>
    %51 = arith.select %45, %43, %50 : vector<50x16xi1>, vector<50x16xf32>
    %c2_37 = arith.constant 2 : index
    %c0_38 = arith.constant 0 : index
    %c0_39 = arith.constant 0 : index
    %52 = vector.load %arg4[%c2_37, %c0_38, %c0_39] : memref<25x16x32xf32, #tpu.memory_space<vmem>>, vector<1x16x32xf32>
    %53 = vector.shape_cast %52 : vector<1x16x32xf32> to vector<16x32xf32>
    %cst_40 = arith.constant dense<0.000000e+00> : vector<50x32xf32>
    %54 = tpu.matmul %51, %53, %cst_40 {dimension_numbers = #tpu.dot_dimension_numbers<[1], [0], [0], [1], [0, 0, 1, 1], [], []>} : vector<50x16xf32>, vector<16x32xf32>, vector<50x32xf32> -> vector<50x32xf32>
    %55 = arith.addf %36, %54 : vector<50x32xf32>
    %c3 = arith.constant 3 : index
    %c0_41 = arith.constant 0 : index
    %c0_42 = arith.constant 0 : index
    %56 = vector.load %arg0[%c3, %c0_41, %c0_42] : memref<25x50x25xf32, #tpu.memory_space<vmem>>, vector<1x50x25xf32>
    %57 = vector.shape_cast %56 : vector<1x50x25xf32> to vector<50x25xf32>
    %c0_43 = arith.constant 0 : index
    %c0_44 = arith.constant 0 : index
    %58 = vector.load %arg2[%c0_43, %c0_44] : memref<25x16xf32, #tpu.memory_space<vmem>>, vector<25x16xf32>
    %cst_45 = arith.constant dense<0.000000e+00> : vector<50x16xf32>
    %59 = tpu.matmul %57, %58, %cst_45 {dimension_numbers = #tpu.dot_dimension_numbers<[1], [0], [0], [1], [0, 0, 1, 1], [], []>} : vector<50x25xf32>, vector<25x16xf32>, vector<50x16xf32> -> vector<50x16xf32>
    %c0_46 = arith.constant 0 : index
    %c0_47 = arith.constant 0 : index
    %60 = vector.load %arg3[%c0_46, %c0_47] : memref<1x16xf32, #tpu.memory_space<vmem>>, vector<1x16xf32>
    %61 = vector.broadcast %60 : vector<1x16xf32> to vector<50x16xf32>
    %62 = arith.addf %59, %61 : vector<50x16xf32>
    %cst_48 = arith.constant 0.000000e+00 : f32
    %63 = vector.broadcast %cst_48 : f32 to vector<50x16xf32>
    %64 = arith.cmpf ogt, %62, %63 : vector<50x16xf32>
    %cst_49 = arith.constant 0.000000e+00 : f32
    %65 = vector.broadcast %cst_49 : f32 to vector<50x16xf32>
    %66 = arith.minimumf %62, %65 : vector<50x16xf32>
    %67 = math.exp %66 : vector<50x16xf32>
    %cst_50 = arith.constant 1.000000e+00 : f32
    %68 = vector.broadcast %cst_50 : f32 to vector<50x16xf32>
    %69 = arith.subf %67, %68 : vector<50x16xf32>
    %70 = arith.select %64, %62, %69 : vector<50x16xi1>, vector<50x16xf32>
    %c3_51 = arith.constant 3 : index
    %c0_52 = arith.constant 0 : index
    %c0_53 = arith.constant 0 : index
    %71 = vector.load %arg4[%c3_51, %c0_52, %c0_53] : memref<25x16x32xf32, #tpu.memory_space<vmem>>, vector<1x16x32xf32>
    %72 = vector.shape_cast %71 : vector<1x16x32xf32> to vector<16x32xf32>
    %cst_54 = arith.constant dense<0.000000e+00> : vector<50x32xf32>
    %73 = tpu.matmul %70, %72, %cst_54 {dimension_numbers = #tpu.dot_dimension_numbers<[1], [0], [0], [1], [0, 0, 1, 1], [], []>} : vector<50x16xf32>, vector<16x32xf32>, vector<50x32xf32> -> vector<50x32xf32>
    %74 = arith.addf %55, %73 : vector<50x32xf32>
    %c4 = arith.constant 4 : index
    %c0_55 = arith.constant 0 : index
    %c0_56 = arith.constant 0 : index
    %75 = vector.load %arg0[%c4, %c0_55, %c0_56] : memref<25x50x25xf32, #tpu.memory_space<vmem>>, vector<1x50x25xf32>
    %76 = vector.shape_cast %75 : vector<1x50x25xf32> to vector<50x25xf32>
    %c0_57 = arith.constant 0 : index
    %c0_58 = arith.constant 0 : index
    %77 = vector.load %arg2[%c0_57, %c0_58] : memref<25x16xf32, #tpu.memory_space<vmem>>, vector<25x16xf32>
    %cst_59 = arith.constant dense<0.000000e+00> : vector<50x16xf32>
    %78 = tpu.matmul %76, %77, %cst_59 {dimension_numbers = #tpu.dot_dimension_numbers<[1], [0], [0], [1], [0, 0, 1, 1], [], []>} : vector<50x25xf32>, vector<25x16xf32>, vector<50x16xf32> -> vector<50x16xf32>
    %c0_60 = arith.constant 0 : index
    %c0_61 = arith.constant 0 : index
    %79 = vector.load %arg3[%c0_60, %c0_61] : memref<1x16xf32, #tpu.memory_space<vmem>>, vector<1x16xf32>
    %80 = vector.broadcast %79 : vector<1x16xf32> to vector<50x16xf32>
    %81 = arith.addf %78, %80 : vector<50x16xf32>
    %cst_62 = arith.constant 0.000000e+00 : f32
    %82 = vector.broadcast %cst_62 : f32 to vector<50x16xf32>
    %83 = arith.cmpf ogt, %81, %82 : vector<50x16xf32>
    %cst_63 = arith.constant 0.000000e+00 : f32
    %84 = vector.broadcast %cst_63 : f32 to vector<50x16xf32>
    %85 = arith.minimumf %81, %84 : vector<50x16xf32>
    %86 = math.exp %85 : vector<50x16xf32>
    %cst_64 = arith.constant 1.000000e+00 : f32
    %87 = vector.broadcast %cst_64 : f32 to vector<50x16xf32>
    %88 = arith.subf %86, %87 : vector<50x16xf32>
    %89 = arith.select %83, %81, %88 : vector<50x16xi1>, vector<50x16xf32>
    %c4_65 = arith.constant 4 : index
    %c0_66 = arith.constant 0 : index
    %c0_67 = arith.constant 0 : index
    %90 = vector.load %arg4[%c4_65, %c0_66, %c0_67] : memref<25x16x32xf32, #tpu.memory_space<vmem>>, vector<1x16x32xf32>
    %91 = vector.shape_cast %90 : vector<1x16x32xf32> to vector<16x32xf32>
    %cst_68 = arith.constant dense<0.000000e+00> : vector<50x32xf32>
    %92 = tpu.matmul %89, %91, %cst_68 {dimension_numbers = #tpu.dot_dimension_numbers<[1], [0], [0], [1], [0, 0, 1, 1], [], []>} : vector<50x16xf32>, vector<16x32xf32>, vector<50x32xf32> -> vector<50x32xf32>
    %93 = arith.addf %74, %92 : vector<50x32xf32>
    %c5 = arith.constant 5 : index
    %c0_69 = arith.constant 0 : index
    %c0_70 = arith.constant 0 : index
    %94 = vector.load %arg0[%c5, %c0_69, %c0_70] : memref<25x50x25xf32, #tpu.memory_space<vmem>>, vector<1x50x25xf32>
    %95 = vector.shape_cast %94 : vector<1x50x25xf32> to vector<50x25xf32>
    %c0_71 = arith.constant 0 : index
    %c0_72 = arith.constant 0 : index
    %96 = vector.load %arg2[%c0_71, %c0_72] : memref<25x16xf32, #tpu.memory_space<vmem>>, vector<25x16xf32>
    %cst_73 = arith.constant dense<0.000000e+00> : vector<50x16xf32>
    %97 = tpu.matmul %95, %96, %cst_73 {dimension_numbers = #tpu.dot_dimension_numbers<[1], [0], [0], [1], [0, 0, 1, 1], [], []>} : vector<50x25xf32>, vector<25x16xf32>, vector<50x16xf32> -> vector<50x16xf32>
    %c0_74 = arith.constant 0 : index
    %c0_75 = arith.constant 0 : index
    %98 = vector.load %arg3[%c0_74, %c0_75] : memref<1x16xf32, #tpu.memory_space<vmem>>, vector<1x16xf32>
    %99 = vector.broadcast %98 : vector<1x16xf32> to vector<50x16xf32>
    %100 = arith.addf %97, %99 : vector<50x16xf32>
    %cst_76 = arith.constant 0.000000e+00 : f32
    %101 = vector.broadcast %cst_76 : f32 to vector<50x16xf32>
    %102 = arith.cmpf ogt, %100, %101 : vector<50x16xf32>
    %cst_77 = arith.constant 0.000000e+00 : f32
    %103 = vector.broadcast %cst_77 : f32 to vector<50x16xf32>
    %104 = arith.minimumf %100, %103 : vector<50x16xf32>
    %105 = math.exp %104 : vector<50x16xf32>
    %cst_78 = arith.constant 1.000000e+00 : f32
    %106 = vector.broadcast %cst_78 : f32 to vector<50x16xf32>
    %107 = arith.subf %105, %106 : vector<50x16xf32>
    %108 = arith.select %102, %100, %107 : vector<50x16xi1>, vector<50x16xf32>
    %c5_79 = arith.constant 5 : index
    %c0_80 = arith.constant 0 : index
    %c0_81 = arith.constant 0 : index
    %109 = vector.load %arg4[%c5_79, %c0_80, %c0_81] : memref<25x16x32xf32, #tpu.memory_space<vmem>>, vector<1x16x32xf32>
    %110 = vector.shape_cast %109 : vector<1x16x32xf32> to vector<16x32xf32>
    %cst_82 = arith.constant dense<0.000000e+00> : vector<50x32xf32>
    %111 = tpu.matmul %108, %110, %cst_82 {dimension_numbers = #tpu.dot_dimension_numbers<[1], [0], [0], [1], [0, 0, 1, 1], [], []>} : vector<50x16xf32>, vector<16x32xf32>, vector<50x32xf32> -> vector<50x32xf32>
    %112 = arith.addf %93, %111 : vector<50x32xf32>
    %c6 = arith.constant 6 : index
    %c0_83 = arith.constant 0 : index
    %c0_84 = arith.constant 0 : index
    %113 = vector.load %arg0[%c6, %c0_83, %c0_84] : memref<25x50x25xf32, #tpu.memory_space<vmem>>, vector<1x50x25xf32>
    %114 = vector.shape_cast %113 : vector<1x50x25xf32> to vector<50x25xf32>
    %c0_85 = arith.constant 0 : index
    %c0_86 = arith.constant 0 : index
    %115 = vector.load %arg2[%c0_85, %c0_86] : memref<25x16xf32, #tpu.memory_space<vmem>>, vector<25x16xf32>
    %cst_87 = arith.constant dense<0.000000e+00> : vector<50x16xf32>
    %116 = tpu.matmul %114, %115, %cst_87 {dimension_numbers = #tpu.dot_dimension_numbers<[1], [0], [0], [1], [0, 0, 1, 1], [], []>} : vector<50x25xf32>, vector<25x16xf32>, vector<50x16xf32> -> vector<50x16xf32>
    %c0_88 = arith.constant 0 : index
    %c0_89 = arith.constant 0 : index
    %117 = vector.load %arg3[%c0_88, %c0_89] : memref<1x16xf32, #tpu.memory_space<vmem>>, vector<1x16xf32>
    %118 = vector.broadcast %117 : vector<1x16xf32> to vector<50x16xf32>
    %119 = arith.addf %116, %118 : vector<50x16xf32>
    %cst_90 = arith.constant 0.000000e+00 : f32
    %120 = vector.broadcast %cst_90 : f32 to vector<50x16xf32>
    %121 = arith.cmpf ogt, %119, %120 : vector<50x16xf32>
    %cst_91 = arith.constant 0.000000e+00 : f32
    %122 = vector.broadcast %cst_91 : f32 to vector<50x16xf32>
    %123 = arith.minimumf %119, %122 : vector<50x16xf32>
    %124 = math.exp %123 : vector<50x16xf32>
    %cst_92 = arith.constant 1.000000e+00 : f32
    %125 = vector.broadcast %cst_92 : f32 to vector<50x16xf32>
    %126 = arith.subf %124, %125 : vector<50x16xf32>
    %127 = arith.select %121, %119, %126 : vector<50x16xi1>, vector<50x16xf32>
    %c6_93 = arith.constant 6 : index
    %c0_94 = arith.constant 0 : index
    %c0_95 = arith.constant 0 : index
    %128 = vector.load %arg4[%c6_93, %c0_94, %c0_95] : memref<25x16x32xf32, #tpu.memory_space<vmem>>, vector<1x16x32xf32>
    %129 = vector.shape_cast %128 : vector<1x16x32xf32> to vector<16x32xf32>
    %cst_96 = arith.constant dense<0.000000e+00> : vector<50x32xf32>
    %130 = tpu.matmul %127, %129, %cst_96 {dimension_numbers = #tpu.dot_dimension_numbers<[1], [0], [0], [1], [0, 0, 1, 1], [], []>} : vector<50x16xf32>, vector<16x32xf32>, vector<50x32xf32> -> vector<50x32xf32>
    %131 = arith.addf %112, %130 : vector<50x32xf32>
    %c7 = arith.constant 7 : index
    %c0_97 = arith.constant 0 : index
    %c0_98 = arith.constant 0 : index
    %132 = vector.load %arg0[%c7, %c0_97, %c0_98] : memref<25x50x25xf32, #tpu.memory_space<vmem>>, vector<1x50x25xf32>
    %133 = vector.shape_cast %132 : vector<1x50x25xf32> to vector<50x25xf32>
    %c0_99 = arith.constant 0 : index
    %c0_100 = arith.constant 0 : index
    %134 = vector.load %arg2[%c0_99, %c0_100] : memref<25x16xf32, #tpu.memory_space<vmem>>, vector<25x16xf32>
    %cst_101 = arith.constant dense<0.000000e+00> : vector<50x16xf32>
    %135 = tpu.matmul %133, %134, %cst_101 {dimension_numbers = #tpu.dot_dimension_numbers<[1], [0], [0], [1], [0, 0, 1, 1], [], []>} : vector<50x25xf32>, vector<25x16xf32>, vector<50x16xf32> -> vector<50x16xf32>
    %c0_102 = arith.constant 0 : index
    %c0_103 = arith.constant 0 : index
    %136 = vector.load %arg3[%c0_102, %c0_103] : memref<1x16xf32, #tpu.memory_space<vmem>>, vector<1x16xf32>
    %137 = vector.broadcast %136 : vector<1x16xf32> to vector<50x16xf32>
    %138 = arith.addf %135, %137 : vector<50x16xf32>
    %cst_104 = arith.constant 0.000000e+00 : f32
    %139 = vector.broadcast %cst_104 : f32 to vector<50x16xf32>
    %140 = arith.cmpf ogt, %138, %139 : vector<50x16xf32>
    %cst_105 = arith.constant 0.000000e+00 : f32
    %141 = vector.broadcast %cst_105 : f32 to vector<50x16xf32>
    %142 = arith.minimumf %138, %141 : vector<50x16xf32>
    %143 = math.exp %142 : vector<50x16xf32>
    %cst_106 = arith.constant 1.000000e+00 : f32
    %144 = vector.broadcast %cst_106 : f32 to vector<50x16xf32>
    %145 = arith.subf %143, %144 : vector<50x16xf32>
    %146 = arith.select %140, %138, %145 : vector<50x16xi1>, vector<50x16xf32>
    %c7_107 = arith.constant 7 : index
    %c0_108 = arith.constant 0 : index
    %c0_109 = arith.constant 0 : index
    %147 = vector.load %arg4[%c7_107, %c0_108, %c0_109] : memref<25x16x32xf32, #tpu.memory_space<vmem>>, vector<1x16x32xf32>
    %148 = vector.shape_cast %147 : vector<1x16x32xf32> to vector<16x32xf32>
    %cst_110 = arith.constant dense<0.000000e+00> : vector<50x32xf32>
    %149 = tpu.matmul %146, %148, %cst_110 {dimension_numbers = #tpu.dot_dimension_numbers<[1], [0], [0], [1], [0, 0, 1, 1], [], []>} : vector<50x16xf32>, vector<16x32xf32>, vector<50x32xf32> -> vector<50x32xf32>
    %150 = arith.addf %131, %149 : vector<50x32xf32>
    %c8 = arith.constant 8 : index
    %c0_111 = arith.constant 0 : index
    %c0_112 = arith.constant 0 : index
    %151 = vector.load %arg0[%c8, %c0_111, %c0_112] : memref<25x50x25xf32, #tpu.memory_space<vmem>>, vector<1x50x25xf32>
    %152 = vector.shape_cast %151 : vector<1x50x25xf32> to vector<50x25xf32>
    %c0_113 = arith.constant 0 : index
    %c0_114 = arith.constant 0 : index
    %153 = vector.load %arg2[%c0_113, %c0_114] : memref<25x16xf32, #tpu.memory_space<vmem>>, vector<25x16xf32>
    %cst_115 = arith.constant dense<0.000000e+00> : vector<50x16xf32>
    %154 = tpu.matmul %152, %153, %cst_115 {dimension_numbers = #tpu.dot_dimension_numbers<[1], [0], [0], [1], [0, 0, 1, 1], [], []>} : vector<50x25xf32>, vector<25x16xf32>, vector<50x16xf32> -> vector<50x16xf32>
    %c0_116 = arith.constant 0 : index
    %c0_117 = arith.constant 0 : index
    %155 = vector.load %arg3[%c0_116, %c0_117] : memref<1x16xf32, #tpu.memory_space<vmem>>, vector<1x16xf32>
    %156 = vector.broadcast %155 : vector<1x16xf32> to vector<50x16xf32>
    %157 = arith.addf %154, %156 : vector<50x16xf32>
    %cst_118 = arith.constant 0.000000e+00 : f32
    %158 = vector.broadcast %cst_118 : f32 to vector<50x16xf32>
    %159 = arith.cmpf ogt, %157, %158 : vector<50x16xf32>
    %cst_119 = arith.constant 0.000000e+00 : f32
    %160 = vector.broadcast %cst_119 : f32 to vector<50x16xf32>
    %161 = arith.minimumf %157, %160 : vector<50x16xf32>
    %162 = math.exp %161 : vector<50x16xf32>
    %cst_120 = arith.constant 1.000000e+00 : f32
    %163 = vector.broadcast %cst_120 : f32 to vector<50x16xf32>
    %164 = arith.subf %162, %163 : vector<50x16xf32>
    %165 = arith.select %159, %157, %164 : vector<50x16xi1>, vector<50x16xf32>
    %c8_121 = arith.constant 8 : index
    %c0_122 = arith.constant 0 : index
    %c0_123 = arith.constant 0 : index
    %166 = vector.load %arg4[%c8_121, %c0_122, %c0_123] : memref<25x16x32xf32, #tpu.memory_space<vmem>>, vector<1x16x32xf32>
    %167 = vector.shape_cast %166 : vector<1x16x32xf32> to vector<16x32xf32>
    %cst_124 = arith.constant dense<0.000000e+00> : vector<50x32xf32>
    %168 = tpu.matmul %165, %167, %cst_124 {dimension_numbers = #tpu.dot_dimension_numbers<[1], [0], [0], [1], [0, 0, 1, 1], [], []>} : vector<50x16xf32>, vector<16x32xf32>, vector<50x32xf32> -> vector<50x32xf32>
    %169 = arith.addf %150, %168 : vector<50x32xf32>
    %c9 = arith.constant 9 : index
    %c0_125 = arith.constant 0 : index
    %c0_126 = arith.constant 0 : index
    %170 = vector.load %arg0[%c9, %c0_125, %c0_126] : memref<25x50x25xf32, #tpu.memory_space<vmem>>, vector<1x50x25xf32>
    %171 = vector.shape_cast %170 : vector<1x50x25xf32> to vector<50x25xf32>
    %c0_127 = arith.constant 0 : index
    %c0_128 = arith.constant 0 : index
    %172 = vector.load %arg2[%c0_127, %c0_128] : memref<25x16xf32, #tpu.memory_space<vmem>>, vector<25x16xf32>
    %cst_129 = arith.constant dense<0.000000e+00> : vector<50x16xf32>
    %173 = tpu.matmul %171, %172, %cst_129 {dimension_numbers = #tpu.dot_dimension_numbers<[1], [0], [0], [1], [0, 0, 1, 1], [], []>} : vector<50x25xf32>, vector<25x16xf32>, vector<50x16xf32> -> vector<50x16xf32>
    %c0_130 = arith.constant 0 : index
    %c0_131 = arith.constant 0 : index
    %174 = vector.load %arg3[%c0_130, %c0_131] : memref<1x16xf32, #tpu.memory_space<vmem>>, vector<1x16xf32>
    %175 = vector.broadcast %174 : vector<1x16xf32> to vector<50x16xf32>
    %176 = arith.addf %173, %175 : vector<50x16xf32>
    %cst_132 = arith.constant 0.000000e+00 : f32
    %177 = vector.broadcast %cst_132 : f32 to vector<50x16xf32>
    %178 = arith.cmpf ogt, %176, %177 : vector<50x16xf32>
    %cst_133 = arith.constant 0.000000e+00 : f32
    %179 = vector.broadcast %cst_133 : f32 to vector<50x16xf32>
    %180 = arith.minimumf %176, %179 : vector<50x16xf32>
    %181 = math.exp %180 : vector<50x16xf32>
    %cst_134 = arith.constant 1.000000e+00 : f32
    %182 = vector.broadcast %cst_134 : f32 to vector<50x16xf32>
    %183 = arith.subf %181, %182 : vector<50x16xf32>
    %184 = arith.select %178, %176, %183 : vector<50x16xi1>, vector<50x16xf32>
    %c9_135 = arith.constant 9 : index
    %c0_136 = arith.constant 0 : index
    %c0_137 = arith.constant 0 : index
    %185 = vector.load %arg4[%c9_135, %c0_136, %c0_137] : memref<25x16x32xf32, #tpu.memory_space<vmem>>, vector<1x16x32xf32>
    %186 = vector.shape_cast %185 : vector<1x16x32xf32> to vector<16x32xf32>
    %cst_138 = arith.constant dense<0.000000e+00> : vector<50x32xf32>
    %187 = tpu.matmul %184, %186, %cst_138 {dimension_numbers = #tpu.dot_dimension_numbers<[1], [0], [0], [1], [0, 0, 1, 1], [], []>} : vector<50x16xf32>, vector<16x32xf32>, vector<50x32xf32> -> vector<50x32xf32>
    %188 = arith.addf %169, %187 : vector<50x32xf32>
    %c10 = arith.constant 10 : index
    %c0_139 = arith.constant 0 : index
    %c0_140 = arith.constant 0 : index
    %189 = vector.load %arg0[%c10, %c0_139, %c0_140] : memref<25x50x25xf32, #tpu.memory_space<vmem>>, vector<1x50x25xf32>
    %190 = vector.shape_cast %189 : vector<1x50x25xf32> to vector<50x25xf32>
    %c0_141 = arith.constant 0 : index
    %c0_142 = arith.constant 0 : index
    %191 = vector.load %arg2[%c0_141, %c0_142] : memref<25x16xf32, #tpu.memory_space<vmem>>, vector<25x16xf32>
    %cst_143 = arith.constant dense<0.000000e+00> : vector<50x16xf32>
    %192 = tpu.matmul %190, %191, %cst_143 {dimension_numbers = #tpu.dot_dimension_numbers<[1], [0], [0], [1], [0, 0, 1, 1], [], []>} : vector<50x25xf32>, vector<25x16xf32>, vector<50x16xf32> -> vector<50x16xf32>
    %c0_144 = arith.constant 0 : index
    %c0_145 = arith.constant 0 : index
    %193 = vector.load %arg3[%c0_144, %c0_145] : memref<1x16xf32, #tpu.memory_space<vmem>>, vector<1x16xf32>
    %194 = vector.broadcast %193 : vector<1x16xf32> to vector<50x16xf32>
    %195 = arith.addf %192, %194 : vector<50x16xf32>
    %cst_146 = arith.constant 0.000000e+00 : f32
    %196 = vector.broadcast %cst_146 : f32 to vector<50x16xf32>
    %197 = arith.cmpf ogt, %195, %196 : vector<50x16xf32>
    %cst_147 = arith.constant 0.000000e+00 : f32
    %198 = vector.broadcast %cst_147 : f32 to vector<50x16xf32>
    %199 = arith.minimumf %195, %198 : vector<50x16xf32>
    %200 = math.exp %199 : vector<50x16xf32>
    %cst_148 = arith.constant 1.000000e+00 : f32
    %201 = vector.broadcast %cst_148 : f32 to vector<50x16xf32>
    %202 = arith.subf %200, %201 : vector<50x16xf32>
    %203 = arith.select %197, %195, %202 : vector<50x16xi1>, vector<50x16xf32>
    %c10_149 = arith.constant 10 : index
    %c0_150 = arith.constant 0 : index
    %c0_151 = arith.constant 0 : index
    %204 = vector.load %arg4[%c10_149, %c0_150, %c0_151] : memref<25x16x32xf32, #tpu.memory_space<vmem>>, vector<1x16x32xf32>
    %205 = vector.shape_cast %204 : vector<1x16x32xf32> to vector<16x32xf32>
    %cst_152 = arith.constant dense<0.000000e+00> : vector<50x32xf32>
    %206 = tpu.matmul %203, %205, %cst_152 {dimension_numbers = #tpu.dot_dimension_numbers<[1], [0], [0], [1], [0, 0, 1, 1], [], []>} : vector<50x16xf32>, vector<16x32xf32>, vector<50x32xf32> -> vector<50x32xf32>
    %207 = arith.addf %188, %206 : vector<50x32xf32>
    %c11 = arith.constant 11 : index
    %c0_153 = arith.constant 0 : index
    %c0_154 = arith.constant 0 : index
    %208 = vector.load %arg0[%c11, %c0_153, %c0_154] : memref<25x50x25xf32, #tpu.memory_space<vmem>>, vector<1x50x25xf32>
    %209 = vector.shape_cast %208 : vector<1x50x25xf32> to vector<50x25xf32>
    %c0_155 = arith.constant 0 : index
    %c0_156 = arith.constant 0 : index
    %210 = vector.load %arg2[%c0_155, %c0_156] : memref<25x16xf32, #tpu.memory_space<vmem>>, vector<25x16xf32>
    %cst_157 = arith.constant dense<0.000000e+00> : vector<50x16xf32>
    %211 = tpu.matmul %209, %210, %cst_157 {dimension_numbers = #tpu.dot_dimension_numbers<[1], [0], [0], [1], [0, 0, 1, 1], [], []>} : vector<50x25xf32>, vector<25x16xf32>, vector<50x16xf32> -> vector<50x16xf32>
    %c0_158 = arith.constant 0 : index
    %c0_159 = arith.constant 0 : index
    %212 = vector.load %arg3[%c0_158, %c0_159] : memref<1x16xf32, #tpu.memory_space<vmem>>, vector<1x16xf32>
    %213 = vector.broadcast %212 : vector<1x16xf32> to vector<50x16xf32>
    %214 = arith.addf %211, %213 : vector<50x16xf32>
    %cst_160 = arith.constant 0.000000e+00 : f32
    %215 = vector.broadcast %cst_160 : f32 to vector<50x16xf32>
    %216 = arith.cmpf ogt, %214, %215 : vector<50x16xf32>
    %cst_161 = arith.constant 0.000000e+00 : f32
    %217 = vector.broadcast %cst_161 : f32 to vector<50x16xf32>
    %218 = arith.minimumf %214, %217 : vector<50x16xf32>
    %219 = math.exp %218 : vector<50x16xf32>
    %cst_162 = arith.constant 1.000000e+00 : f32
    %220 = vector.broadcast %cst_162 : f32 to vector<50x16xf32>
    %221 = arith.subf %219, %220 : vector<50x16xf32>
    %222 = arith.select %216, %214, %221 : vector<50x16xi1>, vector<50x16xf32>
    %c11_163 = arith.constant 11 : index
    %c0_164 = arith.constant 0 : index
    %c0_165 = arith.constant 0 : index
    %223 = vector.load %arg4[%c11_163, %c0_164, %c0_165] : memref<25x16x32xf32, #tpu.memory_space<vmem>>, vector<1x16x32xf32>
    %224 = vector.shape_cast %223 : vector<1x16x32xf32> to vector<16x32xf32>
    %cst_166 = arith.constant dense<0.000000e+00> : vector<50x32xf32>
    %225 = tpu.matmul %222, %224, %cst_166 {dimension_numbers = #tpu.dot_dimension_numbers<[1], [0], [0], [1], [0, 0, 1, 1], [], []>} : vector<50x16xf32>, vector<16x32xf32>, vector<50x32xf32> -> vector<50x32xf32>
    %226 = arith.addf %207, %225 : vector<50x32xf32>
    %c12 = arith.constant 12 : index
    %c0_167 = arith.constant 0 : index
    %c0_168 = arith.constant 0 : index
    %227 = vector.load %arg0[%c12, %c0_167, %c0_168] : memref<25x50x25xf32, #tpu.memory_space<vmem>>, vector<1x50x25xf32>
    %228 = vector.shape_cast %227 : vector<1x50x25xf32> to vector<50x25xf32>
    %c0_169 = arith.constant 0 : index
    %c0_170 = arith.constant 0 : index
    %229 = vector.load %arg2[%c0_169, %c0_170] : memref<25x16xf32, #tpu.memory_space<vmem>>, vector<25x16xf32>
    %cst_171 = arith.constant dense<0.000000e+00> : vector<50x16xf32>
    %230 = tpu.matmul %228, %229, %cst_171 {dimension_numbers = #tpu.dot_dimension_numbers<[1], [0], [0], [1], [0, 0, 1, 1], [], []>} : vector<50x25xf32>, vector<25x16xf32>, vector<50x16xf32> -> vector<50x16xf32>
    %c0_172 = arith.constant 0 : index
    %c0_173 = arith.constant 0 : index
    %231 = vector.load %arg3[%c0_172, %c0_173] : memref<1x16xf32, #tpu.memory_space<vmem>>, vector<1x16xf32>
    %232 = vector.broadcast %231 : vector<1x16xf32> to vector<50x16xf32>
    %233 = arith.addf %230, %232 : vector<50x16xf32>
    %cst_174 = arith.constant 0.000000e+00 : f32
    %234 = vector.broadcast %cst_174 : f32 to vector<50x16xf32>
    %235 = arith.cmpf ogt, %233, %234 : vector<50x16xf32>
    %cst_175 = arith.constant 0.000000e+00 : f32
    %236 = vector.broadcast %cst_175 : f32 to vector<50x16xf32>
    %237 = arith.minimumf %233, %236 : vector<50x16xf32>
    %238 = math.exp %237 : vector<50x16xf32>
    %cst_176 = arith.constant 1.000000e+00 : f32
    %239 = vector.broadcast %cst_176 : f32 to vector<50x16xf32>
    %240 = arith.subf %238, %239 : vector<50x16xf32>
    %241 = arith.select %235, %233, %240 : vector<50x16xi1>, vector<50x16xf32>
    %c12_177 = arith.constant 12 : index
    %c0_178 = arith.constant 0 : index
    %c0_179 = arith.constant 0 : index
    %242 = vector.load %arg4[%c12_177, %c0_178, %c0_179] : memref<25x16x32xf32, #tpu.memory_space<vmem>>, vector<1x16x32xf32>
    %243 = vector.shape_cast %242 : vector<1x16x32xf32> to vector<16x32xf32>
    %cst_180 = arith.constant dense<0.000000e+00> : vector<50x32xf32>
    %244 = tpu.matmul %241, %243, %cst_180 {dimension_numbers = #tpu.dot_dimension_numbers<[1], [0], [0], [1], [0, 0, 1, 1], [], []>} : vector<50x16xf32>, vector<16x32xf32>, vector<50x32xf32> -> vector<50x32xf32>
    %245 = arith.addf %226, %244 : vector<50x32xf32>
    %c13 = arith.constant 13 : index
    %c0_181 = arith.constant 0 : index
    %c0_182 = arith.constant 0 : index
    %246 = vector.load %arg0[%c13, %c0_181, %c0_182] : memref<25x50x25xf32, #tpu.memory_space<vmem>>, vector<1x50x25xf32>
    %247 = vector.shape_cast %246 : vector<1x50x25xf32> to vector<50x25xf32>
    %c0_183 = arith.constant 0 : index
    %c0_184 = arith.constant 0 : index
    %248 = vector.load %arg2[%c0_183, %c0_184] : memref<25x16xf32, #tpu.memory_space<vmem>>, vector<25x16xf32>
    %cst_185 = arith.constant dense<0.000000e+00> : vector<50x16xf32>
    %249 = tpu.matmul %247, %248, %cst_185 {dimension_numbers = #tpu.dot_dimension_numbers<[1], [0], [0], [1], [0, 0, 1, 1], [], []>} : vector<50x25xf32>, vector<25x16xf32>, vector<50x16xf32> -> vector<50x16xf32>
    %c0_186 = arith.constant 0 : index
    %c0_187 = arith.constant 0 : index
    %250 = vector.load %arg3[%c0_186, %c0_187] : memref<1x16xf32, #tpu.memory_space<vmem>>, vector<1x16xf32>
    %251 = vector.broadcast %250 : vector<1x16xf32> to vector<50x16xf32>
    %252 = arith.addf %249, %251 : vector<50x16xf32>
    %cst_188 = arith.constant 0.000000e+00 : f32
    %253 = vector.broadcast %cst_188 : f32 to vector<50x16xf32>
    %254 = arith.cmpf ogt, %252, %253 : vector<50x16xf32>
    %cst_189 = arith.constant 0.000000e+00 : f32
    %255 = vector.broadcast %cst_189 : f32 to vector<50x16xf32>
    %256 = arith.minimumf %252, %255 : vector<50x16xf32>
    %257 = math.exp %256 : vector<50x16xf32>
    %cst_190 = arith.constant 1.000000e+00 : f32
    %258 = vector.broadcast %cst_190 : f32 to vector<50x16xf32>
    %259 = arith.subf %257, %258 : vector<50x16xf32>
    %260 = arith.select %254, %252, %259 : vector<50x16xi1>, vector<50x16xf32>
    %c13_191 = arith.constant 13 : index
    %c0_192 = arith.constant 0 : index
    %c0_193 = arith.constant 0 : index
    %261 = vector.load %arg4[%c13_191, %c0_192, %c0_193] : memref<25x16x32xf32, #tpu.memory_space<vmem>>, vector<1x16x32xf32>
    %262 = vector.shape_cast %261 : vector<1x16x32xf32> to vector<16x32xf32>
    %cst_194 = arith.constant dense<0.000000e+00> : vector<50x32xf32>
    %263 = tpu.matmul %260, %262, %cst_194 {dimension_numbers = #tpu.dot_dimension_numbers<[1], [0], [0], [1], [0, 0, 1, 1], [], []>} : vector<50x16xf32>, vector<16x32xf32>, vector<50x32xf32> -> vector<50x32xf32>
    %264 = arith.addf %245, %263 : vector<50x32xf32>
    %c14 = arith.constant 14 : index
    %c0_195 = arith.constant 0 : index
    %c0_196 = arith.constant 0 : index
    %265 = vector.load %arg0[%c14, %c0_195, %c0_196] : memref<25x50x25xf32, #tpu.memory_space<vmem>>, vector<1x50x25xf32>
    %266 = vector.shape_cast %265 : vector<1x50x25xf32> to vector<50x25xf32>
    %c0_197 = arith.constant 0 : index
    %c0_198 = arith.constant 0 : index
    %267 = vector.load %arg2[%c0_197, %c0_198] : memref<25x16xf32, #tpu.memory_space<vmem>>, vector<25x16xf32>
    %cst_199 = arith.constant dense<0.000000e+00> : vector<50x16xf32>
    %268 = tpu.matmul %266, %267, %cst_199 {dimension_numbers = #tpu.dot_dimension_numbers<[1], [0], [0], [1], [0, 0, 1, 1], [], []>} : vector<50x25xf32>, vector<25x16xf32>, vector<50x16xf32> -> vector<50x16xf32>
    %c0_200 = arith.constant 0 : index
    %c0_201 = arith.constant 0 : index
    %269 = vector.load %arg3[%c0_200, %c0_201] : memref<1x16xf32, #tpu.memory_space<vmem>>, vector<1x16xf32>
    %270 = vector.broadcast %269 : vector<1x16xf32> to vector<50x16xf32>
    %271 = arith.addf %268, %270 : vector<50x16xf32>
    %cst_202 = arith.constant 0.000000e+00 : f32
    %272 = vector.broadcast %cst_202 : f32 to vector<50x16xf32>
    %273 = arith.cmpf ogt, %271, %272 : vector<50x16xf32>
    %cst_203 = arith.constant 0.000000e+00 : f32
    %274 = vector.broadcast %cst_203 : f32 to vector<50x16xf32>
    %275 = arith.minimumf %271, %274 : vector<50x16xf32>
    %276 = math.exp %275 : vector<50x16xf32>
    %cst_204 = arith.constant 1.000000e+00 : f32
    %277 = vector.broadcast %cst_204 : f32 to vector<50x16xf32>
    %278 = arith.subf %276, %277 : vector<50x16xf32>
    %279 = arith.select %273, %271, %278 : vector<50x16xi1>, vector<50x16xf32>
    %c14_205 = arith.constant 14 : index
    %c0_206 = arith.constant 0 : index
    %c0_207 = arith.constant 0 : index
    %280 = vector.load %arg4[%c14_205, %c0_206, %c0_207] : memref<25x16x32xf32, #tpu.memory_space<vmem>>, vector<1x16x32xf32>
    %281 = vector.shape_cast %280 : vector<1x16x32xf32> to vector<16x32xf32>
    %cst_208 = arith.constant dense<0.000000e+00> : vector<50x32xf32>
    %282 = tpu.matmul %279, %281, %cst_208 {dimension_numbers = #tpu.dot_dimension_numbers<[1], [0], [0], [1], [0, 0, 1, 1], [], []>} : vector<50x16xf32>, vector<16x32xf32>, vector<50x32xf32> -> vector<50x32xf32>
    %283 = arith.addf %264, %282 : vector<50x32xf32>
    %c15 = arith.constant 15 : index
    %c0_209 = arith.constant 0 : index
    %c0_210 = arith.constant 0 : index
    %284 = vector.load %arg0[%c15, %c0_209, %c0_210] : memref<25x50x25xf32, #tpu.memory_space<vmem>>, vector<1x50x25xf32>
    %285 = vector.shape_cast %284 : vector<1x50x25xf32> to vector<50x25xf32>
    %c0_211 = arith.constant 0 : index
    %c0_212 = arith.constant 0 : index
    %286 = vector.load %arg2[%c0_211, %c0_212] : memref<25x16xf32, #tpu.memory_space<vmem>>, vector<25x16xf32>
    %cst_213 = arith.constant dense<0.000000e+00> : vector<50x16xf32>
    %287 = tpu.matmul %285, %286, %cst_213 {dimension_numbers = #tpu.dot_dimension_numbers<[1], [0], [0], [1], [0, 0, 1, 1], [], []>} : vector<50x25xf32>, vector<25x16xf32>, vector<50x16xf32> -> vector<50x16xf32>
    %c0_214 = arith.constant 0 : index
    %c0_215 = arith.constant 0 : index
    %288 = vector.load %arg3[%c0_214, %c0_215] : memref<1x16xf32, #tpu.memory_space<vmem>>, vector<1x16xf32>
    %289 = vector.broadcast %288 : vector<1x16xf32> to vector<50x16xf32>
    %290 = arith.addf %287, %289 : vector<50x16xf32>
    %cst_216 = arith.constant 0.000000e+00 : f32
    %291 = vector.broadcast %cst_216 : f32 to vector<50x16xf32>
    %292 = arith.cmpf ogt, %290, %291 : vector<50x16xf32>
    %cst_217 = arith.constant 0.000000e+00 : f32
    %293 = vector.broadcast %cst_217 : f32 to vector<50x16xf32>
    %294 = arith.minimumf %290, %293 : vector<50x16xf32>
    %295 = math.exp %294 : vector<50x16xf32>
    %cst_218 = arith.constant 1.000000e+00 : f32
    %296 = vector.broadcast %cst_218 : f32 to vector<50x16xf32>
    %297 = arith.subf %295, %296 : vector<50x16xf32>
    %298 = arith.select %292, %290, %297 : vector<50x16xi1>, vector<50x16xf32>
    %c15_219 = arith.constant 15 : index
    %c0_220 = arith.constant 0 : index
    %c0_221 = arith.constant 0 : index
    %299 = vector.load %arg4[%c15_219, %c0_220, %c0_221] : memref<25x16x32xf32, #tpu.memory_space<vmem>>, vector<1x16x32xf32>
    %300 = vector.shape_cast %299 : vector<1x16x32xf32> to vector<16x32xf32>
    %cst_222 = arith.constant dense<0.000000e+00> : vector<50x32xf32>
    %301 = tpu.matmul %298, %300, %cst_222 {dimension_numbers = #tpu.dot_dimension_numbers<[1], [0], [0], [1], [0, 0, 1, 1], [], []>} : vector<50x16xf32>, vector<16x32xf32>, vector<50x32xf32> -> vector<50x32xf32>
    %302 = arith.addf %283, %301 : vector<50x32xf32>
    %c16 = arith.constant 16 : index
    %c0_223 = arith.constant 0 : index
    %c0_224 = arith.constant 0 : index
    %303 = vector.load %arg0[%c16, %c0_223, %c0_224] : memref<25x50x25xf32, #tpu.memory_space<vmem>>, vector<1x50x25xf32>
    %304 = vector.shape_cast %303 : vector<1x50x25xf32> to vector<50x25xf32>
    %c0_225 = arith.constant 0 : index
    %c0_226 = arith.constant 0 : index
    %305 = vector.load %arg2[%c0_225, %c0_226] : memref<25x16xf32, #tpu.memory_space<vmem>>, vector<25x16xf32>
    %cst_227 = arith.constant dense<0.000000e+00> : vector<50x16xf32>
    %306 = tpu.matmul %304, %305, %cst_227 {dimension_numbers = #tpu.dot_dimension_numbers<[1], [0], [0], [1], [0, 0, 1, 1], [], []>} : vector<50x25xf32>, vector<25x16xf32>, vector<50x16xf32> -> vector<50x16xf32>
    %c0_228 = arith.constant 0 : index
    %c0_229 = arith.constant 0 : index
    %307 = vector.load %arg3[%c0_228, %c0_229] : memref<1x16xf32, #tpu.memory_space<vmem>>, vector<1x16xf32>
    %308 = vector.broadcast %307 : vector<1x16xf32> to vector<50x16xf32>
    %309 = arith.addf %306, %308 : vector<50x16xf32>
    %cst_230 = arith.constant 0.000000e+00 : f32
    %310 = vector.broadcast %cst_230 : f32 to vector<50x16xf32>
    %311 = arith.cmpf ogt, %309, %310 : vector<50x16xf32>
    %cst_231 = arith.constant 0.000000e+00 : f32
    %312 = vector.broadcast %cst_231 : f32 to vector<50x16xf32>
    %313 = arith.minimumf %309, %312 : vector<50x16xf32>
    %314 = math.exp %313 : vector<50x16xf32>
    %cst_232 = arith.constant 1.000000e+00 : f32
    %315 = vector.broadcast %cst_232 : f32 to vector<50x16xf32>
    %316 = arith.subf %314, %315 : vector<50x16xf32>
    %317 = arith.select %311, %309, %316 : vector<50x16xi1>, vector<50x16xf32>
    %c16_233 = arith.constant 16 : index
    %c0_234 = arith.constant 0 : index
    %c0_235 = arith.constant 0 : index
    %318 = vector.load %arg4[%c16_233, %c0_234, %c0_235] : memref<25x16x32xf32, #tpu.memory_space<vmem>>, vector<1x16x32xf32>
    %319 = vector.shape_cast %318 : vector<1x16x32xf32> to vector<16x32xf32>
    %cst_236 = arith.constant dense<0.000000e+00> : vector<50x32xf32>
    %320 = tpu.matmul %317, %319, %cst_236 {dimension_numbers = #tpu.dot_dimension_numbers<[1], [0], [0], [1], [0, 0, 1, 1], [], []>} : vector<50x16xf32>, vector<16x32xf32>, vector<50x32xf32> -> vector<50x32xf32>
    %321 = arith.addf %302, %320 : vector<50x32xf32>
    %c17 = arith.constant 17 : index
    %c0_237 = arith.constant 0 : index
    %c0_238 = arith.constant 0 : index
    %322 = vector.load %arg0[%c17, %c0_237, %c0_238] : memref<25x50x25xf32, #tpu.memory_space<vmem>>, vector<1x50x25xf32>
    %323 = vector.shape_cast %322 : vector<1x50x25xf32> to vector<50x25xf32>
    %c0_239 = arith.constant 0 : index
    %c0_240 = arith.constant 0 : index
    %324 = vector.load %arg2[%c0_239, %c0_240] : memref<25x16xf32, #tpu.memory_space<vmem>>, vector<25x16xf32>
    %cst_241 = arith.constant dense<0.000000e+00> : vector<50x16xf32>
    %325 = tpu.matmul %323, %324, %cst_241 {dimension_numbers = #tpu.dot_dimension_numbers<[1], [0], [0], [1], [0, 0, 1, 1], [], []>} : vector<50x25xf32>, vector<25x16xf32>, vector<50x16xf32> -> vector<50x16xf32>
    %c0_242 = arith.constant 0 : index
    %c0_243 = arith.constant 0 : index
    %326 = vector.load %arg3[%c0_242, %c0_243] : memref<1x16xf32, #tpu.memory_space<vmem>>, vector<1x16xf32>
    %327 = vector.broadcast %326 : vector<1x16xf32> to vector<50x16xf32>
    %328 = arith.addf %325, %327 : vector<50x16xf32>
    %cst_244 = arith.constant 0.000000e+00 : f32
    %329 = vector.broadcast %cst_244 : f32 to vector<50x16xf32>
    %330 = arith.cmpf ogt, %328, %329 : vector<50x16xf32>
    %cst_245 = arith.constant 0.000000e+00 : f32
    %331 = vector.broadcast %cst_245 : f32 to vector<50x16xf32>
    %332 = arith.minimumf %328, %331 : vector<50x16xf32>
    %333 = math.exp %332 : vector<50x16xf32>
    %cst_246 = arith.constant 1.000000e+00 : f32
    %334 = vector.broadcast %cst_246 : f32 to vector<50x16xf32>
    %335 = arith.subf %333, %334 : vector<50x16xf32>
    %336 = arith.select %330, %328, %335 : vector<50x16xi1>, vector<50x16xf32>
    %c17_247 = arith.constant 17 : index
    %c0_248 = arith.constant 0 : index
    %c0_249 = arith.constant 0 : index
    %337 = vector.load %arg4[%c17_247, %c0_248, %c0_249] : memref<25x16x32xf32, #tpu.memory_space<vmem>>, vector<1x16x32xf32>
    %338 = vector.shape_cast %337 : vector<1x16x32xf32> to vector<16x32xf32>
    %cst_250 = arith.constant dense<0.000000e+00> : vector<50x32xf32>
    %339 = tpu.matmul %336, %338, %cst_250 {dimension_numbers = #tpu.dot_dimension_numbers<[1], [0], [0], [1], [0, 0, 1, 1], [], []>} : vector<50x16xf32>, vector<16x32xf32>, vector<50x32xf32> -> vector<50x32xf32>
    %340 = arith.addf %321, %339 : vector<50x32xf32>
    %c18 = arith.constant 18 : index
    %c0_251 = arith.constant 0 : index
    %c0_252 = arith.constant 0 : index
    %341 = vector.load %arg0[%c18, %c0_251, %c0_252] : memref<25x50x25xf32, #tpu.memory_space<vmem>>, vector<1x50x25xf32>
    %342 = vector.shape_cast %341 : vector<1x50x25xf32> to vector<50x25xf32>
    %c0_253 = arith.constant 0 : index
    %c0_254 = arith.constant 0 : index
    %343 = vector.load %arg2[%c0_253, %c0_254] : memref<25x16xf32, #tpu.memory_space<vmem>>, vector<25x16xf32>
    %cst_255 = arith.constant dense<0.000000e+00> : vector<50x16xf32>
    %344 = tpu.matmul %342, %343, %cst_255 {dimension_numbers = #tpu.dot_dimension_numbers<[1], [0], [0], [1], [0, 0, 1, 1], [], []>} : vector<50x25xf32>, vector<25x16xf32>, vector<50x16xf32> -> vector<50x16xf32>
    %c0_256 = arith.constant 0 : index
    %c0_257 = arith.constant 0 : index
    %345 = vector.load %arg3[%c0_256, %c0_257] : memref<1x16xf32, #tpu.memory_space<vmem>>, vector<1x16xf32>
    %346 = vector.broadcast %345 : vector<1x16xf32> to vector<50x16xf32>
    %347 = arith.addf %344, %346 : vector<50x16xf32>
    %cst_258 = arith.constant 0.000000e+00 : f32
    %348 = vector.broadcast %cst_258 : f32 to vector<50x16xf32>
    %349 = arith.cmpf ogt, %347, %348 : vector<50x16xf32>
    %cst_259 = arith.constant 0.000000e+00 : f32
    %350 = vector.broadcast %cst_259 : f32 to vector<50x16xf32>
    %351 = arith.minimumf %347, %350 : vector<50x16xf32>
    %352 = math.exp %351 : vector<50x16xf32>
    %cst_260 = arith.constant 1.000000e+00 : f32
    %353 = vector.broadcast %cst_260 : f32 to vector<50x16xf32>
    %354 = arith.subf %352, %353 : vector<50x16xf32>
    %355 = arith.select %349, %347, %354 : vector<50x16xi1>, vector<50x16xf32>
    %c18_261 = arith.constant 18 : index
    %c0_262 = arith.constant 0 : index
    %c0_263 = arith.constant 0 : index
    %356 = vector.load %arg4[%c18_261, %c0_262, %c0_263] : memref<25x16x32xf32, #tpu.memory_space<vmem>>, vector<1x16x32xf32>
    %357 = vector.shape_cast %356 : vector<1x16x32xf32> to vector<16x32xf32>
    %cst_264 = arith.constant dense<0.000000e+00> : vector<50x32xf32>
    %358 = tpu.matmul %355, %357, %cst_264 {dimension_numbers = #tpu.dot_dimension_numbers<[1], [0], [0], [1], [0, 0, 1, 1], [], []>} : vector<50x16xf32>, vector<16x32xf32>, vector<50x32xf32> -> vector<50x32xf32>
    %359 = arith.addf %340, %358 : vector<50x32xf32>
    %c19 = arith.constant 19 : index
    %c0_265 = arith.constant 0 : index
    %c0_266 = arith.constant 0 : index
    %360 = vector.load %arg0[%c19, %c0_265, %c0_266] : memref<25x50x25xf32, #tpu.memory_space<vmem>>, vector<1x50x25xf32>
    %361 = vector.shape_cast %360 : vector<1x50x25xf32> to vector<50x25xf32>
    %c0_267 = arith.constant 0 : index
    %c0_268 = arith.constant 0 : index
    %362 = vector.load %arg2[%c0_267, %c0_268] : memref<25x16xf32, #tpu.memory_space<vmem>>, vector<25x16xf32>
    %cst_269 = arith.constant dense<0.000000e+00> : vector<50x16xf32>
    %363 = tpu.matmul %361, %362, %cst_269 {dimension_numbers = #tpu.dot_dimension_numbers<[1], [0], [0], [1], [0, 0, 1, 1], [], []>} : vector<50x25xf32>, vector<25x16xf32>, vector<50x16xf32> -> vector<50x16xf32>
    %c0_270 = arith.constant 0 : index
    %c0_271 = arith.constant 0 : index
    %364 = vector.load %arg3[%c0_270, %c0_271] : memref<1x16xf32, #tpu.memory_space<vmem>>, vector<1x16xf32>
    %365 = vector.broadcast %364 : vector<1x16xf32> to vector<50x16xf32>
    %366 = arith.addf %363, %365 : vector<50x16xf32>
    %cst_272 = arith.constant 0.000000e+00 : f32
    %367 = vector.broadcast %cst_272 : f32 to vector<50x16xf32>
    %368 = arith.cmpf ogt, %366, %367 : vector<50x16xf32>
    %cst_273 = arith.constant 0.000000e+00 : f32
    %369 = vector.broadcast %cst_273 : f32 to vector<50x16xf32>
    %370 = arith.minimumf %366, %369 : vector<50x16xf32>
    %371 = math.exp %370 : vector<50x16xf32>
    %cst_274 = arith.constant 1.000000e+00 : f32
    %372 = vector.broadcast %cst_274 : f32 to vector<50x16xf32>
    %373 = arith.subf %371, %372 : vector<50x16xf32>
    %374 = arith.select %368, %366, %373 : vector<50x16xi1>, vector<50x16xf32>
    %c19_275 = arith.constant 19 : index
    %c0_276 = arith.constant 0 : index
    %c0_277 = arith.constant 0 : index
    %375 = vector.load %arg4[%c19_275, %c0_276, %c0_277] : memref<25x16x32xf32, #tpu.memory_space<vmem>>, vector<1x16x32xf32>
    %376 = vector.shape_cast %375 : vector<1x16x32xf32> to vector<16x32xf32>
    %cst_278 = arith.constant dense<0.000000e+00> : vector<50x32xf32>
    %377 = tpu.matmul %374, %376, %cst_278 {dimension_numbers = #tpu.dot_dimension_numbers<[1], [0], [0], [1], [0, 0, 1, 1], [], []>} : vector<50x16xf32>, vector<16x32xf32>, vector<50x32xf32> -> vector<50x32xf32>
    %378 = arith.addf %359, %377 : vector<50x32xf32>
    %c20 = arith.constant 20 : index
    %c0_279 = arith.constant 0 : index
    %c0_280 = arith.constant 0 : index
    %379 = vector.load %arg0[%c20, %c0_279, %c0_280] : memref<25x50x25xf32, #tpu.memory_space<vmem>>, vector<1x50x25xf32>
    %380 = vector.shape_cast %379 : vector<1x50x25xf32> to vector<50x25xf32>
    %c0_281 = arith.constant 0 : index
    %c0_282 = arith.constant 0 : index
    %381 = vector.load %arg2[%c0_281, %c0_282] : memref<25x16xf32, #tpu.memory_space<vmem>>, vector<25x16xf32>
    %cst_283 = arith.constant dense<0.000000e+00> : vector<50x16xf32>
    %382 = tpu.matmul %380, %381, %cst_283 {dimension_numbers = #tpu.dot_dimension_numbers<[1], [0], [0], [1], [0, 0, 1, 1], [], []>} : vector<50x25xf32>, vector<25x16xf32>, vector<50x16xf32> -> vector<50x16xf32>
    %c0_284 = arith.constant 0 : index
    %c0_285 = arith.constant 0 : index
    %383 = vector.load %arg3[%c0_284, %c0_285] : memref<1x16xf32, #tpu.memory_space<vmem>>, vector<1x16xf32>
    %384 = vector.broadcast %383 : vector<1x16xf32> to vector<50x16xf32>
    %385 = arith.addf %382, %384 : vector<50x16xf32>
    %cst_286 = arith.constant 0.000000e+00 : f32
    %386 = vector.broadcast %cst_286 : f32 to vector<50x16xf32>
    %387 = arith.cmpf ogt, %385, %386 : vector<50x16xf32>
    %cst_287 = arith.constant 0.000000e+00 : f32
    %388 = vector.broadcast %cst_287 : f32 to vector<50x16xf32>
    %389 = arith.minimumf %385, %388 : vector<50x16xf32>
    %390 = math.exp %389 : vector<50x16xf32>
    %cst_288 = arith.constant 1.000000e+00 : f32
    %391 = vector.broadcast %cst_288 : f32 to vector<50x16xf32>
    %392 = arith.subf %390, %391 : vector<50x16xf32>
    %393 = arith.select %387, %385, %392 : vector<50x16xi1>, vector<50x16xf32>
    %c20_289 = arith.constant 20 : index
    %c0_290 = arith.constant 0 : index
    %c0_291 = arith.constant 0 : index
    %394 = vector.load %arg4[%c20_289, %c0_290, %c0_291] : memref<25x16x32xf32, #tpu.memory_space<vmem>>, vector<1x16x32xf32>
    %395 = vector.shape_cast %394 : vector<1x16x32xf32> to vector<16x32xf32>
    %cst_292 = arith.constant dense<0.000000e+00> : vector<50x32xf32>
    %396 = tpu.matmul %393, %395, %cst_292 {dimension_numbers = #tpu.dot_dimension_numbers<[1], [0], [0], [1], [0, 0, 1, 1], [], []>} : vector<50x16xf32>, vector<16x32xf32>, vector<50x32xf32> -> vector<50x32xf32>
    %397 = arith.addf %378, %396 : vector<50x32xf32>
    %c21 = arith.constant 21 : index
    %c0_293 = arith.constant 0 : index
    %c0_294 = arith.constant 0 : index
    %398 = vector.load %arg0[%c21, %c0_293, %c0_294] : memref<25x50x25xf32, #tpu.memory_space<vmem>>, vector<1x50x25xf32>
    %399 = vector.shape_cast %398 : vector<1x50x25xf32> to vector<50x25xf32>
    %c0_295 = arith.constant 0 : index
    %c0_296 = arith.constant 0 : index
    %400 = vector.load %arg2[%c0_295, %c0_296] : memref<25x16xf32, #tpu.memory_space<vmem>>, vector<25x16xf32>
    %cst_297 = arith.constant dense<0.000000e+00> : vector<50x16xf32>
    %401 = tpu.matmul %399, %400, %cst_297 {dimension_numbers = #tpu.dot_dimension_numbers<[1], [0], [0], [1], [0, 0, 1, 1], [], []>} : vector<50x25xf32>, vector<25x16xf32>, vector<50x16xf32> -> vector<50x16xf32>
    %c0_298 = arith.constant 0 : index
    %c0_299 = arith.constant 0 : index
    %402 = vector.load %arg3[%c0_298, %c0_299] : memref<1x16xf32, #tpu.memory_space<vmem>>, vector<1x16xf32>
    %403 = vector.broadcast %402 : vector<1x16xf32> to vector<50x16xf32>
    %404 = arith.addf %401, %403 : vector<50x16xf32>
    %cst_300 = arith.constant 0.000000e+00 : f32
    %405 = vector.broadcast %cst_300 : f32 to vector<50x16xf32>
    %406 = arith.cmpf ogt, %404, %405 : vector<50x16xf32>
    %cst_301 = arith.constant 0.000000e+00 : f32
    %407 = vector.broadcast %cst_301 : f32 to vector<50x16xf32>
    %408 = arith.minimumf %404, %407 : vector<50x16xf32>
    %409 = math.exp %408 : vector<50x16xf32>
    %cst_302 = arith.constant 1.000000e+00 : f32
    %410 = vector.broadcast %cst_302 : f32 to vector<50x16xf32>
    %411 = arith.subf %409, %410 : vector<50x16xf32>
    %412 = arith.select %406, %404, %411 : vector<50x16xi1>, vector<50x16xf32>
    %c21_303 = arith.constant 21 : index
    %c0_304 = arith.constant 0 : index
    %c0_305 = arith.constant 0 : index
    %413 = vector.load %arg4[%c21_303, %c0_304, %c0_305] : memref<25x16x32xf32, #tpu.memory_space<vmem>>, vector<1x16x32xf32>
    %414 = vector.shape_cast %413 : vector<1x16x32xf32> to vector<16x32xf32>
    %cst_306 = arith.constant dense<0.000000e+00> : vector<50x32xf32>
    %415 = tpu.matmul %412, %414, %cst_306 {dimension_numbers = #tpu.dot_dimension_numbers<[1], [0], [0], [1], [0, 0, 1, 1], [], []>} : vector<50x16xf32>, vector<16x32xf32>, vector<50x32xf32> -> vector<50x32xf32>
    %416 = arith.addf %397, %415 : vector<50x32xf32>
    %c22 = arith.constant 22 : index
    %c0_307 = arith.constant 0 : index
    %c0_308 = arith.constant 0 : index
    %417 = vector.load %arg0[%c22, %c0_307, %c0_308] : memref<25x50x25xf32, #tpu.memory_space<vmem>>, vector<1x50x25xf32>
    %418 = vector.shape_cast %417 : vector<1x50x25xf32> to vector<50x25xf32>
    %c0_309 = arith.constant 0 : index
    %c0_310 = arith.constant 0 : index
    %419 = vector.load %arg2[%c0_309, %c0_310] : memref<25x16xf32, #tpu.memory_space<vmem>>, vector<25x16xf32>
    %cst_311 = arith.constant dense<0.000000e+00> : vector<50x16xf32>
    %420 = tpu.matmul %418, %419, %cst_311 {dimension_numbers = #tpu.dot_dimension_numbers<[1], [0], [0], [1], [0, 0, 1, 1], [], []>} : vector<50x25xf32>, vector<25x16xf32>, vector<50x16xf32> -> vector<50x16xf32>
    %c0_312 = arith.constant 0 : index
    %c0_313 = arith.constant 0 : index
    %421 = vector.load %arg3[%c0_312, %c0_313] : memref<1x16xf32, #tpu.memory_space<vmem>>, vector<1x16xf32>
    %422 = vector.broadcast %421 : vector<1x16xf32> to vector<50x16xf32>
    %423 = arith.addf %420, %422 : vector<50x16xf32>
    %cst_314 = arith.constant 0.000000e+00 : f32
    %424 = vector.broadcast %cst_314 : f32 to vector<50x16xf32>
    %425 = arith.cmpf ogt, %423, %424 : vector<50x16xf32>
    %cst_315 = arith.constant 0.000000e+00 : f32
    %426 = vector.broadcast %cst_315 : f32 to vector<50x16xf32>
    %427 = arith.minimumf %423, %426 : vector<50x16xf32>
    %428 = math.exp %427 : vector<50x16xf32>
    %cst_316 = arith.constant 1.000000e+00 : f32
    %429 = vector.broadcast %cst_316 : f32 to vector<50x16xf32>
    %430 = arith.subf %428, %429 : vector<50x16xf32>
    %431 = arith.select %425, %423, %430 : vector<50x16xi1>, vector<50x16xf32>
    %c22_317 = arith.constant 22 : index
    %c0_318 = arith.constant 0 : index
    %c0_319 = arith.constant 0 : index
    %432 = vector.load %arg4[%c22_317, %c0_318, %c0_319] : memref<25x16x32xf32, #tpu.memory_space<vmem>>, vector<1x16x32xf32>
    %433 = vector.shape_cast %432 : vector<1x16x32xf32> to vector<16x32xf32>
    %cst_320 = arith.constant dense<0.000000e+00> : vector<50x32xf32>
    %434 = tpu.matmul %431, %433, %cst_320 {dimension_numbers = #tpu.dot_dimension_numbers<[1], [0], [0], [1], [0, 0, 1, 1], [], []>} : vector<50x16xf32>, vector<16x32xf32>, vector<50x32xf32> -> vector<50x32xf32>
    %435 = arith.addf %416, %434 : vector<50x32xf32>
    %c23 = arith.constant 23 : index
    %c0_321 = arith.constant 0 : index
    %c0_322 = arith.constant 0 : index
    %436 = vector.load %arg0[%c23, %c0_321, %c0_322] : memref<25x50x25xf32, #tpu.memory_space<vmem>>, vector<1x50x25xf32>
    %437 = vector.shape_cast %436 : vector<1x50x25xf32> to vector<50x25xf32>
    %c0_323 = arith.constant 0 : index
    %c0_324 = arith.constant 0 : index
    %438 = vector.load %arg2[%c0_323, %c0_324] : memref<25x16xf32, #tpu.memory_space<vmem>>, vector<25x16xf32>
    %cst_325 = arith.constant dense<0.000000e+00> : vector<50x16xf32>
    %439 = tpu.matmul %437, %438, %cst_325 {dimension_numbers = #tpu.dot_dimension_numbers<[1], [0], [0], [1], [0, 0, 1, 1], [], []>} : vector<50x25xf32>, vector<25x16xf32>, vector<50x16xf32> -> vector<50x16xf32>
    %c0_326 = arith.constant 0 : index
    %c0_327 = arith.constant 0 : index
    %440 = vector.load %arg3[%c0_326, %c0_327] : memref<1x16xf32, #tpu.memory_space<vmem>>, vector<1x16xf32>
    %441 = vector.broadcast %440 : vector<1x16xf32> to vector<50x16xf32>
    %442 = arith.addf %439, %441 : vector<50x16xf32>
    %cst_328 = arith.constant 0.000000e+00 : f32
    %443 = vector.broadcast %cst_328 : f32 to vector<50x16xf32>
    %444 = arith.cmpf ogt, %442, %443 : vector<50x16xf32>
    %cst_329 = arith.constant 0.000000e+00 : f32
    %445 = vector.broadcast %cst_329 : f32 to vector<50x16xf32>
    %446 = arith.minimumf %442, %445 : vector<50x16xf32>
    %447 = math.exp %446 : vector<50x16xf32>
    %cst_330 = arith.constant 1.000000e+00 : f32
    %448 = vector.broadcast %cst_330 : f32 to vector<50x16xf32>
    %449 = arith.subf %447, %448 : vector<50x16xf32>
    %450 = arith.select %444, %442, %449 : vector<50x16xi1>, vector<50x16xf32>
    %c23_331 = arith.constant 23 : index
    %c0_332 = arith.constant 0 : index
    %c0_333 = arith.constant 0 : index
    %451 = vector.load %arg4[%c23_331, %c0_332, %c0_333] : memref<25x16x32xf32, #tpu.memory_space<vmem>>, vector<1x16x32xf32>
    %452 = vector.shape_cast %451 : vector<1x16x32xf32> to vector<16x32xf32>
    %cst_334 = arith.constant dense<0.000000e+00> : vector<50x32xf32>
    %453 = tpu.matmul %450, %452, %cst_334 {dimension_numbers = #tpu.dot_dimension_numbers<[1], [0], [0], [1], [0, 0, 1, 1], [], []>} : vector<50x16xf32>, vector<16x32xf32>, vector<50x32xf32> -> vector<50x32xf32>
    %454 = arith.addf %435, %453 : vector<50x32xf32>
    %c24 = arith.constant 24 : index
    %c0_335 = arith.constant 0 : index
    %c0_336 = arith.constant 0 : index
    %455 = vector.load %arg0[%c24, %c0_335, %c0_336] : memref<25x50x25xf32, #tpu.memory_space<vmem>>, vector<1x50x25xf32>
    %456 = vector.shape_cast %455 : vector<1x50x25xf32> to vector<50x25xf32>
    %c0_337 = arith.constant 0 : index
    %c0_338 = arith.constant 0 : index
    %457 = vector.load %arg2[%c0_337, %c0_338] : memref<25x16xf32, #tpu.memory_space<vmem>>, vector<25x16xf32>
    %cst_339 = arith.constant dense<0.000000e+00> : vector<50x16xf32>
    %458 = tpu.matmul %456, %457, %cst_339 {dimension_numbers = #tpu.dot_dimension_numbers<[1], [0], [0], [1], [0, 0, 1, 1], [], []>} : vector<50x25xf32>, vector<25x16xf32>, vector<50x16xf32> -> vector<50x16xf32>
    %c0_340 = arith.constant 0 : index
    %c0_341 = arith.constant 0 : index
    %459 = vector.load %arg3[%c0_340, %c0_341] : memref<1x16xf32, #tpu.memory_space<vmem>>, vector<1x16xf32>
    %460 = vector.broadcast %459 : vector<1x16xf32> to vector<50x16xf32>
    %461 = arith.addf %458, %460 : vector<50x16xf32>
    %cst_342 = arith.constant 0.000000e+00 : f32
    %462 = vector.broadcast %cst_342 : f32 to vector<50x16xf32>
    %463 = arith.cmpf ogt, %461, %462 : vector<50x16xf32>
    %cst_343 = arith.constant 0.000000e+00 : f32
    %464 = vector.broadcast %cst_343 : f32 to vector<50x16xf32>
    %465 = arith.minimumf %461, %464 : vector<50x16xf32>
    %466 = math.exp %465 : vector<50x16xf32>
    %cst_344 = arith.constant 1.000000e+00 : f32
    %467 = vector.broadcast %cst_344 : f32 to vector<50x16xf32>
    %468 = arith.subf %466, %467 : vector<50x16xf32>
    %469 = arith.select %463, %461, %468 : vector<50x16xi1>, vector<50x16xf32>
    %c24_345 = arith.constant 24 : index
    %c0_346 = arith.constant 0 : index
    %c0_347 = arith.constant 0 : index
    %470 = vector.load %arg4[%c24_345, %c0_346, %c0_347] : memref<25x16x32xf32, #tpu.memory_space<vmem>>, vector<1x16x32xf32>
    %471 = vector.shape_cast %470 : vector<1x16x32xf32> to vector<16x32xf32>
    %cst_348 = arith.constant dense<0.000000e+00> : vector<50x32xf32>
    %472 = tpu.matmul %469, %471, %cst_348 {dimension_numbers = #tpu.dot_dimension_numbers<[1], [0], [0], [1], [0, 0, 1, 1], [], []>} : vector<50x16xf32>, vector<16x32xf32>, vector<50x32xf32> -> vector<50x32xf32>
    %473 = arith.addf %454, %472 : vector<50x32xf32>
    %c0_349 = arith.constant 0 : index
    %c0_350 = arith.constant 0 : index
    %474 = vector.load %arg5[%c0_349, %c0_350] : memref<1x32xf32, #tpu.memory_space<vmem>>, vector<1x32xf32>
    %475 = vector.broadcast %474 : vector<1x32xf32> to vector<50x32xf32>
    %476 = arith.addf %473, %475 : vector<50x32xf32>
    %cst_351 = arith.constant 0.000000e+00 : f32
    %477 = vector.broadcast %cst_351 : f32 to vector<50x32xf32>
    %478 = arith.cmpf ogt, %476, %477 : vector<50x32xf32>
    %cst_352 = arith.constant 0.000000e+00 : f32
    %479 = vector.broadcast %cst_352 : f32 to vector<50x32xf32>
    %480 = arith.minimumf %476, %479 : vector<50x32xf32>
    %481 = math.exp %480 : vector<50x32xf32>
    %cst_353 = arith.constant 1.000000e+00 : f32
    %482 = vector.broadcast %cst_353 : f32 to vector<50x32xf32>
    %483 = arith.subf %481, %482 : vector<50x32xf32>
    %484 = arith.select %478, %476, %483 : vector<50x32xi1>, vector<50x32xf32>
    %485 = vector.extract_strided_slice %484 {offsets = [0, 0], sizes = [2, 32], strides = [1, 1]} : vector<50x32xf32> to vector<2x32xf32>
    %c0_354 = arith.constant 0 : index
    %c0_355 = arith.constant 0 : index
    %c0_356 = arith.constant 0 : index
    %486 = vector.load %arg6[%c0_354, %c0_355, %c0_356] : memref<25x32x32xf32, #tpu.memory_space<vmem>>, vector<1x32x32xf32>
    %487 = vector.shape_cast %486 : vector<1x32x32xf32> to vector<32x32xf32>
    %cst_357 = arith.constant dense<0.000000e+00> : vector<2x32xf32>
    %488 = tpu.matmul %485, %487, %cst_357 {dimension_numbers = #tpu.dot_dimension_numbers<[1], [0], [0], [1], [0, 0, 1, 1], [], []>} : vector<2x32xf32>, vector<32x32xf32>, vector<2x32xf32> -> vector<2x32xf32>
    %489 = vector.extract_strided_slice %484 {offsets = [2, 0], sizes = [2, 32], strides = [1, 1]} : vector<50x32xf32> to vector<2x32xf32>
    %c1_358 = arith.constant 1 : index
    %c0_359 = arith.constant 0 : index
    %c0_360 = arith.constant 0 : index
    %490 = vector.load %arg6[%c1_358, %c0_359, %c0_360] : memref<25x32x32xf32, #tpu.memory_space<vmem>>, vector<1x32x32xf32>
    %491 = vector.shape_cast %490 : vector<1x32x32xf32> to vector<32x32xf32>
    %cst_361 = arith.constant dense<0.000000e+00> : vector<2x32xf32>
    %492 = tpu.matmul %489, %491, %cst_361 {dimension_numbers = #tpu.dot_dimension_numbers<[1], [0], [0], [1], [0, 0, 1, 1], [], []>} : vector<2x32xf32>, vector<32x32xf32>, vector<2x32xf32> -> vector<2x32xf32>
    %493 = arith.addf %488, %492 : vector<2x32xf32>
    %494 = vector.extract_strided_slice %484 {offsets = [4, 0], sizes = [2, 32], strides = [1, 1]} : vector<50x32xf32> to vector<2x32xf32>
    %c2_362 = arith.constant 2 : index
    %c0_363 = arith.constant 0 : index
    %c0_364 = arith.constant 0 : index
    %495 = vector.load %arg6[%c2_362, %c0_363, %c0_364] : memref<25x32x32xf32, #tpu.memory_space<vmem>>, vector<1x32x32xf32>
    %496 = vector.shape_cast %495 : vector<1x32x32xf32> to vector<32x32xf32>
    %cst_365 = arith.constant dense<0.000000e+00> : vector<2x32xf32>
    %497 = tpu.matmul %494, %496, %cst_365 {dimension_numbers = #tpu.dot_dimension_numbers<[1], [0], [0], [1], [0, 0, 1, 1], [], []>} : vector<2x32xf32>, vector<32x32xf32>, vector<2x32xf32> -> vector<2x32xf32>
    %498 = arith.addf %493, %497 : vector<2x32xf32>
    %499 = vector.extract_strided_slice %484 {offsets = [6, 0], sizes = [2, 32], strides = [1, 1]} : vector<50x32xf32> to vector<2x32xf32>
    %c3_366 = arith.constant 3 : index
    %c0_367 = arith.constant 0 : index
    %c0_368 = arith.constant 0 : index
    %500 = vector.load %arg6[%c3_366, %c0_367, %c0_368] : memref<25x32x32xf32, #tpu.memory_space<vmem>>, vector<1x32x32xf32>
    %501 = vector.shape_cast %500 : vector<1x32x32xf32> to vector<32x32xf32>
    %cst_369 = arith.constant dense<0.000000e+00> : vector<2x32xf32>
    %502 = tpu.matmul %499, %501, %cst_369 {dimension_numbers = #tpu.dot_dimension_numbers<[1], [0], [0], [1], [0, 0, 1, 1], [], []>} : vector<2x32xf32>, vector<32x32xf32>, vector<2x32xf32> -> vector<2x32xf32>
    %503 = arith.addf %498, %502 : vector<2x32xf32>
    %504 = vector.extract_strided_slice %484 {offsets = [8, 0], sizes = [2, 32], strides = [1, 1]} : vector<50x32xf32> to vector<2x32xf32>
    %c4_370 = arith.constant 4 : index
    %c0_371 = arith.constant 0 : index
    %c0_372 = arith.constant 0 : index
    %505 = vector.load %arg6[%c4_370, %c0_371, %c0_372] : memref<25x32x32xf32, #tpu.memory_space<vmem>>, vector<1x32x32xf32>
    %506 = vector.shape_cast %505 : vector<1x32x32xf32> to vector<32x32xf32>
    %cst_373 = arith.constant dense<0.000000e+00> : vector<2x32xf32>
    %507 = tpu.matmul %504, %506, %cst_373 {dimension_numbers = #tpu.dot_dimension_numbers<[1], [0], [0], [1], [0, 0, 1, 1], [], []>} : vector<2x32xf32>, vector<32x32xf32>, vector<2x32xf32> -> vector<2x32xf32>
    %508 = arith.addf %503, %507 : vector<2x32xf32>
    %509 = vector.extract_strided_slice %484 {offsets = [10, 0], sizes = [2, 32], strides = [1, 1]} : vector<50x32xf32> to vector<2x32xf32>
    %c5_374 = arith.constant 5 : index
    %c0_375 = arith.constant 0 : index
    %c0_376 = arith.constant 0 : index
    %510 = vector.load %arg6[%c5_374, %c0_375, %c0_376] : memref<25x32x32xf32, #tpu.memory_space<vmem>>, vector<1x32x32xf32>
    %511 = vector.shape_cast %510 : vector<1x32x32xf32> to vector<32x32xf32>
    %cst_377 = arith.constant dense<0.000000e+00> : vector<2x32xf32>
    %512 = tpu.matmul %509, %511, %cst_377 {dimension_numbers = #tpu.dot_dimension_numbers<[1], [0], [0], [1], [0, 0, 1, 1], [], []>} : vector<2x32xf32>, vector<32x32xf32>, vector<2x32xf32> -> vector<2x32xf32>
    %513 = arith.addf %508, %512 : vector<2x32xf32>
    %514 = vector.extract_strided_slice %484 {offsets = [12, 0], sizes = [2, 32], strides = [1, 1]} : vector<50x32xf32> to vector<2x32xf32>
    %c6_378 = arith.constant 6 : index
    %c0_379 = arith.constant 0 : index
    %c0_380 = arith.constant 0 : index
    %515 = vector.load %arg6[%c6_378, %c0_379, %c0_380] : memref<25x32x32xf32, #tpu.memory_space<vmem>>, vector<1x32x32xf32>
    %516 = vector.shape_cast %515 : vector<1x32x32xf32> to vector<32x32xf32>
    %cst_381 = arith.constant dense<0.000000e+00> : vector<2x32xf32>
    %517 = tpu.matmul %514, %516, %cst_381 {dimension_numbers = #tpu.dot_dimension_numbers<[1], [0], [0], [1], [0, 0, 1, 1], [], []>} : vector<2x32xf32>, vector<32x32xf32>, vector<2x32xf32> -> vector<2x32xf32>
    %518 = arith.addf %513, %517 : vector<2x32xf32>
    %519 = vector.extract_strided_slice %484 {offsets = [14, 0], sizes = [2, 32], strides = [1, 1]} : vector<50x32xf32> to vector<2x32xf32>
    %c7_382 = arith.constant 7 : index
    %c0_383 = arith.constant 0 : index
    %c0_384 = arith.constant 0 : index
    %520 = vector.load %arg6[%c7_382, %c0_383, %c0_384] : memref<25x32x32xf32, #tpu.memory_space<vmem>>, vector<1x32x32xf32>
    %521 = vector.shape_cast %520 : vector<1x32x32xf32> to vector<32x32xf32>
    %cst_385 = arith.constant dense<0.000000e+00> : vector<2x32xf32>
    %522 = tpu.matmul %519, %521, %cst_385 {dimension_numbers = #tpu.dot_dimension_numbers<[1], [0], [0], [1], [0, 0, 1, 1], [], []>} : vector<2x32xf32>, vector<32x32xf32>, vector<2x32xf32> -> vector<2x32xf32>
    %523 = arith.addf %518, %522 : vector<2x32xf32>
    %524 = vector.extract_strided_slice %484 {offsets = [16, 0], sizes = [2, 32], strides = [1, 1]} : vector<50x32xf32> to vector<2x32xf32>
    %c8_386 = arith.constant 8 : index
    %c0_387 = arith.constant 0 : index
    %c0_388 = arith.constant 0 : index
    %525 = vector.load %arg6[%c8_386, %c0_387, %c0_388] : memref<25x32x32xf32, #tpu.memory_space<vmem>>, vector<1x32x32xf32>
    %526 = vector.shape_cast %525 : vector<1x32x32xf32> to vector<32x32xf32>
    %cst_389 = arith.constant dense<0.000000e+00> : vector<2x32xf32>
    %527 = tpu.matmul %524, %526, %cst_389 {dimension_numbers = #tpu.dot_dimension_numbers<[1], [0], [0], [1], [0, 0, 1, 1], [], []>} : vector<2x32xf32>, vector<32x32xf32>, vector<2x32xf32> -> vector<2x32xf32>
    %528 = arith.addf %523, %527 : vector<2x32xf32>
    %529 = vector.extract_strided_slice %484 {offsets = [18, 0], sizes = [2, 32], strides = [1, 1]} : vector<50x32xf32> to vector<2x32xf32>
    %c9_390 = arith.constant 9 : index
    %c0_391 = arith.constant 0 : index
    %c0_392 = arith.constant 0 : index
    %530 = vector.load %arg6[%c9_390, %c0_391, %c0_392] : memref<25x32x32xf32, #tpu.memory_space<vmem>>, vector<1x32x32xf32>
    %531 = vector.shape_cast %530 : vector<1x32x32xf32> to vector<32x32xf32>
    %cst_393 = arith.constant dense<0.000000e+00> : vector<2x32xf32>
    %532 = tpu.matmul %529, %531, %cst_393 {dimension_numbers = #tpu.dot_dimension_numbers<[1], [0], [0], [1], [0, 0, 1, 1], [], []>} : vector<2x32xf32>, vector<32x32xf32>, vector<2x32xf32> -> vector<2x32xf32>
    %533 = arith.addf %528, %532 : vector<2x32xf32>
    %534 = vector.extract_strided_slice %484 {offsets = [20, 0], sizes = [2, 32], strides = [1, 1]} : vector<50x32xf32> to vector<2x32xf32>
    %c10_394 = arith.constant 10 : index
    %c0_395 = arith.constant 0 : index
    %c0_396 = arith.constant 0 : index
    %535 = vector.load %arg6[%c10_394, %c0_395, %c0_396] : memref<25x32x32xf32, #tpu.memory_space<vmem>>, vector<1x32x32xf32>
    %536 = vector.shape_cast %535 : vector<1x32x32xf32> to vector<32x32xf32>
    %cst_397 = arith.constant dense<0.000000e+00> : vector<2x32xf32>
    %537 = tpu.matmul %534, %536, %cst_397 {dimension_numbers = #tpu.dot_dimension_numbers<[1], [0], [0], [1], [0, 0, 1, 1], [], []>} : vector<2x32xf32>, vector<32x32xf32>, vector<2x32xf32> -> vector<2x32xf32>
    %538 = arith.addf %533, %537 : vector<2x32xf32>
    %539 = vector.extract_strided_slice %484 {offsets = [22, 0], sizes = [2, 32], strides = [1, 1]} : vector<50x32xf32> to vector<2x32xf32>
    %c11_398 = arith.constant 11 : index
    %c0_399 = arith.constant 0 : index
    %c0_400 = arith.constant 0 : index
    %540 = vector.load %arg6[%c11_398, %c0_399, %c0_400] : memref<25x32x32xf32, #tpu.memory_space<vmem>>, vector<1x32x32xf32>
    %541 = vector.shape_cast %540 : vector<1x32x32xf32> to vector<32x32xf32>
    %cst_401 = arith.constant dense<0.000000e+00> : vector<2x32xf32>
    %542 = tpu.matmul %539, %541, %cst_401 {dimension_numbers = #tpu.dot_dimension_numbers<[1], [0], [0], [1], [0, 0, 1, 1], [], []>} : vector<2x32xf32>, vector<32x32xf32>, vector<2x32xf32> -> vector<2x32xf32>
    %543 = arith.addf %538, %542 : vector<2x32xf32>
    %544 = vector.extract_strided_slice %484 {offsets = [24, 0], sizes = [2, 32], strides = [1, 1]} : vector<50x32xf32> to vector<2x32xf32>
    %c12_402 = arith.constant 12 : index
    %c0_403 = arith.constant 0 : index
    %c0_404 = arith.constant 0 : index
    %545 = vector.load %arg6[%c12_402, %c0_403, %c0_404] : memref<25x32x32xf32, #tpu.memory_space<vmem>>, vector<1x32x32xf32>
    %546 = vector.shape_cast %545 : vector<1x32x32xf32> to vector<32x32xf32>
    %cst_405 = arith.constant dense<0.000000e+00> : vector<2x32xf32>
    %547 = tpu.matmul %544, %546, %cst_405 {dimension_numbers = #tpu.dot_dimension_numbers<[1], [0], [0], [1], [0, 0, 1, 1], [], []>} : vector<2x32xf32>, vector<32x32xf32>, vector<2x32xf32> -> vector<2x32xf32>
    %548 = arith.addf %543, %547 : vector<2x32xf32>
    %549 = vector.extract_strided_slice %484 {offsets = [26, 0], sizes = [2, 32], strides = [1, 1]} : vector<50x32xf32> to vector<2x32xf32>
    %c13_406 = arith.constant 13 : index
    %c0_407 = arith.constant 0 : index
    %c0_408 = arith.constant 0 : index
    %550 = vector.load %arg6[%c13_406, %c0_407, %c0_408] : memref<25x32x32xf32, #tpu.memory_space<vmem>>, vector<1x32x32xf32>
    %551 = vector.shape_cast %550 : vector<1x32x32xf32> to vector<32x32xf32>
    %cst_409 = arith.constant dense<0.000000e+00> : vector<2x32xf32>
    %552 = tpu.matmul %549, %551, %cst_409 {dimension_numbers = #tpu.dot_dimension_numbers<[1], [0], [0], [1], [0, 0, 1, 1], [], []>} : vector<2x32xf32>, vector<32x32xf32>, vector<2x32xf32> -> vector<2x32xf32>
    %553 = arith.addf %548, %552 : vector<2x32xf32>
    %554 = vector.extract_strided_slice %484 {offsets = [28, 0], sizes = [2, 32], strides = [1, 1]} : vector<50x32xf32> to vector<2x32xf32>
    %c14_410 = arith.constant 14 : index
    %c0_411 = arith.constant 0 : index
    %c0_412 = arith.constant 0 : index
    %555 = vector.load %arg6[%c14_410, %c0_411, %c0_412] : memref<25x32x32xf32, #tpu.memory_space<vmem>>, vector<1x32x32xf32>
    %556 = vector.shape_cast %555 : vector<1x32x32xf32> to vector<32x32xf32>
    %cst_413 = arith.constant dense<0.000000e+00> : vector<2x32xf32>
    %557 = tpu.matmul %554, %556, %cst_413 {dimension_numbers = #tpu.dot_dimension_numbers<[1], [0], [0], [1], [0, 0, 1, 1], [], []>} : vector<2x32xf32>, vector<32x32xf32>, vector<2x32xf32> -> vector<2x32xf32>
    %558 = arith.addf %553, %557 : vector<2x32xf32>
    %559 = vector.extract_strided_slice %484 {offsets = [30, 0], sizes = [2, 32], strides = [1, 1]} : vector<50x32xf32> to vector<2x32xf32>
    %c15_414 = arith.constant 15 : index
    %c0_415 = arith.constant 0 : index
    %c0_416 = arith.constant 0 : index
    %560 = vector.load %arg6[%c15_414, %c0_415, %c0_416] : memref<25x32x32xf32, #tpu.memory_space<vmem>>, vector<1x32x32xf32>
    %561 = vector.shape_cast %560 : vector<1x32x32xf32> to vector<32x32xf32>
    %cst_417 = arith.constant dense<0.000000e+00> : vector<2x32xf32>
    %562 = tpu.matmul %559, %561, %cst_417 {dimension_numbers = #tpu.dot_dimension_numbers<[1], [0], [0], [1], [0, 0, 1, 1], [], []>} : vector<2x32xf32>, vector<32x32xf32>, vector<2x32xf32> -> vector<2x32xf32>
    %563 = arith.addf %558, %562 : vector<2x32xf32>
    %564 = vector.extract_strided_slice %484 {offsets = [32, 0], sizes = [2, 32], strides = [1, 1]} : vector<50x32xf32> to vector<2x32xf32>
    %c16_418 = arith.constant 16 : index
    %c0_419 = arith.constant 0 : index
    %c0_420 = arith.constant 0 : index
    %565 = vector.load %arg6[%c16_418, %c0_419, %c0_420] : memref<25x32x32xf32, #tpu.memory_space<vmem>>, vector<1x32x32xf32>
    %566 = vector.shape_cast %565 : vector<1x32x32xf32> to vector<32x32xf32>
    %cst_421 = arith.constant dense<0.000000e+00> : vector<2x32xf32>
    %567 = tpu.matmul %564, %566, %cst_421 {dimension_numbers = #tpu.dot_dimension_numbers<[1], [0], [0], [1], [0, 0, 1, 1], [], []>} : vector<2x32xf32>, vector<32x32xf32>, vector<2x32xf32> -> vector<2x32xf32>
    %568 = arith.addf %563, %567 : vector<2x32xf32>
    %569 = vector.extract_strided_slice %484 {offsets = [34, 0], sizes = [2, 32], strides = [1, 1]} : vector<50x32xf32> to vector<2x32xf32>
    %c17_422 = arith.constant 17 : index
    %c0_423 = arith.constant 0 : index
    %c0_424 = arith.constant 0 : index
    %570 = vector.load %arg6[%c17_422, %c0_423, %c0_424] : memref<25x32x32xf32, #tpu.memory_space<vmem>>, vector<1x32x32xf32>
    %571 = vector.shape_cast %570 : vector<1x32x32xf32> to vector<32x32xf32>
    %cst_425 = arith.constant dense<0.000000e+00> : vector<2x32xf32>
    %572 = tpu.matmul %569, %571, %cst_425 {dimension_numbers = #tpu.dot_dimension_numbers<[1], [0], [0], [1], [0, 0, 1, 1], [], []>} : vector<2x32xf32>, vector<32x32xf32>, vector<2x32xf32> -> vector<2x32xf32>
    %573 = arith.addf %568, %572 : vector<2x32xf32>
    %574 = vector.extract_strided_slice %484 {offsets = [36, 0], sizes = [2, 32], strides = [1, 1]} : vector<50x32xf32> to vector<2x32xf32>
    %c18_426 = arith.constant 18 : index
    %c0_427 = arith.constant 0 : index
    %c0_428 = arith.constant 0 : index
    %575 = vector.load %arg6[%c18_426, %c0_427, %c0_428] : memref<25x32x32xf32, #tpu.memory_space<vmem>>, vector<1x32x32xf32>
    %576 = vector.shape_cast %575 : vector<1x32x32xf32> to vector<32x32xf32>
    %cst_429 = arith.constant dense<0.000000e+00> : vector<2x32xf32>
    %577 = tpu.matmul %574, %576, %cst_429 {dimension_numbers = #tpu.dot_dimension_numbers<[1], [0], [0], [1], [0, 0, 1, 1], [], []>} : vector<2x32xf32>, vector<32x32xf32>, vector<2x32xf32> -> vector<2x32xf32>
    %578 = arith.addf %573, %577 : vector<2x32xf32>
    %579 = vector.extract_strided_slice %484 {offsets = [38, 0], sizes = [2, 32], strides = [1, 1]} : vector<50x32xf32> to vector<2x32xf32>
    %c19_430 = arith.constant 19 : index
    %c0_431 = arith.constant 0 : index
    %c0_432 = arith.constant 0 : index
    %580 = vector.load %arg6[%c19_430, %c0_431, %c0_432] : memref<25x32x32xf32, #tpu.memory_space<vmem>>, vector<1x32x32xf32>
    %581 = vector.shape_cast %580 : vector<1x32x32xf32> to vector<32x32xf32>
    %cst_433 = arith.constant dense<0.000000e+00> : vector<2x32xf32>
    %582 = tpu.matmul %579, %581, %cst_433 {dimension_numbers = #tpu.dot_dimension_numbers<[1], [0], [0], [1], [0, 0, 1, 1], [], []>} : vector<2x32xf32>, vector<32x32xf32>, vector<2x32xf32> -> vector<2x32xf32>
    %583 = arith.addf %578, %582 : vector<2x32xf32>
    %584 = vector.extract_strided_slice %484 {offsets = [40, 0], sizes = [2, 32], strides = [1, 1]} : vector<50x32xf32> to vector<2x32xf32>
    %c20_434 = arith.constant 20 : index
    %c0_435 = arith.constant 0 : index
    %c0_436 = arith.constant 0 : index
    %585 = vector.load %arg6[%c20_434, %c0_435, %c0_436] : memref<25x32x32xf32, #tpu.memory_space<vmem>>, vector<1x32x32xf32>
    %586 = vector.shape_cast %585 : vector<1x32x32xf32> to vector<32x32xf32>
    %cst_437 = arith.constant dense<0.000000e+00> : vector<2x32xf32>
    %587 = tpu.matmul %584, %586, %cst_437 {dimension_numbers = #tpu.dot_dimension_numbers<[1], [0], [0], [1], [0, 0, 1, 1], [], []>} : vector<2x32xf32>, vector<32x32xf32>, vector<2x32xf32> -> vector<2x32xf32>
    %588 = arith.addf %583, %587 : vector<2x32xf32>
    %589 = vector.extract_strided_slice %484 {offsets = [42, 0], sizes = [2, 32], strides = [1, 1]} : vector<50x32xf32> to vector<2x32xf32>
    %c21_438 = arith.constant 21 : index
    %c0_439 = arith.constant 0 : index
    %c0_440 = arith.constant 0 : index
    %590 = vector.load %arg6[%c21_438, %c0_439, %c0_440] : memref<25x32x32xf32, #tpu.memory_space<vmem>>, vector<1x32x32xf32>
    %591 = vector.shape_cast %590 : vector<1x32x32xf32> to vector<32x32xf32>
    %cst_441 = arith.constant dense<0.000000e+00> : vector<2x32xf32>
    %592 = tpu.matmul %589, %591, %cst_441 {dimension_numbers = #tpu.dot_dimension_numbers<[1], [0], [0], [1], [0, 0, 1, 1], [], []>} : vector<2x32xf32>, vector<32x32xf32>, vector<2x32xf32> -> vector<2x32xf32>
    %593 = arith.addf %588, %592 : vector<2x32xf32>
    %594 = vector.extract_strided_slice %484 {offsets = [44, 0], sizes = [2, 32], strides = [1, 1]} : vector<50x32xf32> to vector<2x32xf32>
    %c22_442 = arith.constant 22 : index
    %c0_443 = arith.constant 0 : index
    %c0_444 = arith.constant 0 : index
    %595 = vector.load %arg6[%c22_442, %c0_443, %c0_444] : memref<25x32x32xf32, #tpu.memory_space<vmem>>, vector<1x32x32xf32>
    %596 = vector.shape_cast %595 : vector<1x32x32xf32> to vector<32x32xf32>
    %cst_445 = arith.constant dense<0.000000e+00> : vector<2x32xf32>
    %597 = tpu.matmul %594, %596, %cst_445 {dimension_numbers = #tpu.dot_dimension_numbers<[1], [0], [0], [1], [0, 0, 1, 1], [], []>} : vector<2x32xf32>, vector<32x32xf32>, vector<2x32xf32> -> vector<2x32xf32>
    %598 = arith.addf %593, %597 : vector<2x32xf32>
    %599 = vector.extract_strided_slice %484 {offsets = [46, 0], sizes = [2, 32], strides = [1, 1]} : vector<50x32xf32> to vector<2x32xf32>
    %c23_446 = arith.constant 23 : index
    %c0_447 = arith.constant 0 : index
    %c0_448 = arith.constant 0 : index
    %600 = vector.load %arg6[%c23_446, %c0_447, %c0_448] : memref<25x32x32xf32, #tpu.memory_space<vmem>>, vector<1x32x32xf32>
    %601 = vector.shape_cast %600 : vector<1x32x32xf32> to vector<32x32xf32>
    %cst_449 = arith.constant dense<0.000000e+00> : vector<2x32xf32>
    %602 = tpu.matmul %599, %601, %cst_449 {dimension_numbers = #tpu.dot_dimension_numbers<[1], [0], [0], [1], [0, 0, 1, 1], [], []>} : vector<2x32xf32>, vector<32x32xf32>, vector<2x32xf32> -> vector<2x32xf32>
    %603 = arith.addf %598, %602 : vector<2x32xf32>
    %604 = vector.extract_strided_slice %484 {offsets = [48, 0], sizes = [2, 32], strides = [1, 1]} : vector<50x32xf32> to vector<2x32xf32>
    %c24_450 = arith.constant 24 : index
    %c0_451 = arith.constant 0 : index
    %c0_452 = arith.constant 0 : index
    %605 = vector.load %arg6[%c24_450, %c0_451, %c0_452] : memref<25x32x32xf32, #tpu.memory_space<vmem>>, vector<1x32x32xf32>
    %606 = vector.shape_cast %605 : vector<1x32x32xf32> to vector<32x32xf32>
    %cst_453 = arith.constant dense<0.000000e+00> : vector<2x32xf32>
    %607 = tpu.matmul %604, %606, %cst_453 {dimension_numbers = #tpu.dot_dimension_numbers<[1], [0], [0], [1], [0, 0, 1, 1], [], []>} : vector<2x32xf32>, vector<32x32xf32>, vector<2x32xf32> -> vector<2x32xf32>
    %608 = arith.addf %603, %607 : vector<2x32xf32>
    %c0_454 = arith.constant 0 : index
    %c0_455 = arith.constant 0 : index
    %609 = vector.load %arg7[%c0_454, %c0_455] : memref<1x32xf32, #tpu.memory_space<vmem>>, vector<1x32xf32>
    %610 = vector.broadcast %609 : vector<1x32xf32> to vector<2x32xf32>
    %611 = arith.addf %608, %610 : vector<2x32xf32>
    %cst_456 = arith.constant 0.000000e+00 : f32
    %612 = vector.broadcast %cst_456 : f32 to vector<2x32xf32>
    %613 = arith.cmpf ogt, %611, %612 : vector<2x32xf32>
    %cst_457 = arith.constant 0.000000e+00 : f32
    %614 = vector.broadcast %cst_457 : f32 to vector<2x32xf32>
    %615 = arith.minimumf %611, %614 : vector<2x32xf32>
    %616 = math.exp %615 : vector<2x32xf32>
    %cst_458 = arith.constant 1.000000e+00 : f32
    %617 = vector.broadcast %cst_458 : f32 to vector<2x32xf32>
    %618 = arith.subf %616, %617 : vector<2x32xf32>
    %619 = arith.select %613, %611, %618 : vector<2x32xi1>, vector<2x32xf32>
    %c0_459 = arith.constant 0 : index
    %c0_460 = arith.constant 0 : index
    %620 = vector.load %arg1[%c0_459, %c0_460] : memref<2x28xf32, #tpu.memory_space<vmem>>, vector<2x28xf32>
    %c0_461 = arith.constant 0 : index
    %c0_462 = arith.constant 0 : index
    %621 = vector.load %arg8[%c0_461, %c0_462] : memref<28x128xf32, #tpu.memory_space<vmem>>, vector<28x128xf32>
    %cst_463 = arith.constant dense<0.000000e+00> : vector<2x128xf32>
    %622 = tpu.matmul %620, %621, %cst_463 {dimension_numbers = #tpu.dot_dimension_numbers<[1], [0], [0], [1], [0, 0, 1, 1], [], []>} : vector<2x28xf32>, vector<28x128xf32>, vector<2x128xf32> -> vector<2x128xf32>
    %c0_464 = arith.constant 0 : index
    %c0_465 = arith.constant 0 : index
    %623 = vector.load %arg9[%c0_464, %c0_465] : memref<1x128xf32, #tpu.memory_space<vmem>>, vector<1x128xf32>
    %624 = vector.broadcast %623 : vector<1x128xf32> to vector<2x128xf32>
    %625 = arith.addf %622, %624 : vector<2x128xf32>
    %cst_466 = arith.constant 0.000000e+00 : f32
    %626 = vector.broadcast %cst_466 : f32 to vector<2x128xf32>
    %627 = arith.maximumf %625, %626 : vector<2x128xf32>
    %c0_467 = arith.constant 0 : index
    %c0_468 = arith.constant 0 : index
    %628 = vector.load %arg10[%c0_467, %c0_468] : memref<128x16xf32, #tpu.memory_space<vmem>>, vector<128x16xf32>
    %cst_469 = arith.constant dense<0.000000e+00> : vector<2x16xf32>
    %629 = tpu.matmul %627, %628, %cst_469 {dimension_numbers = #tpu.dot_dimension_numbers<[1], [0], [0], [1], [0, 0, 1, 1], [], []>} : vector<2x128xf32>, vector<128x16xf32>, vector<2x16xf32> -> vector<2x16xf32>
    %c0_470 = arith.constant 0 : index
    %c0_471 = arith.constant 0 : index
    %630 = vector.load %arg11[%c0_470, %c0_471] : memref<1x16xf32, #tpu.memory_space<vmem>>, vector<1x16xf32>
    %631 = vector.broadcast %630 : vector<1x16xf32> to vector<2x16xf32>
    %632 = arith.addf %629, %631 : vector<2x16xf32>
    %cst_472 = arith.constant 0.000000e+00 : f32
    %633 = vector.broadcast %cst_472 : f32 to vector<2x16xf32>
    %634 = arith.maximumf %632, %633 : vector<2x16xf32>
    %c0_473 = arith.constant 0 : index
    %c0_474 = arith.constant 0 : index
    %635 = vector.load %arg12[%c0_473, %c0_474] : memref<32x128xf32, #tpu.memory_space<vmem>>, vector<32x128xf32>
    %cst_475 = arith.constant dense<0.000000e+00> : vector<2x128xf32>
    %636 = tpu.matmul %619, %635, %cst_475 {dimension_numbers = #tpu.dot_dimension_numbers<[1], [0], [0], [1], [0, 0, 1, 1], [], []>} : vector<2x32xf32>, vector<32x128xf32>, vector<2x128xf32> -> vector<2x128xf32>
    %c0_476 = arith.constant 0 : index
    %c0_477 = arith.constant 0 : index
    %637 = vector.load %arg13[%c0_476, %c0_477] : memref<16x128xf32, #tpu.memory_space<vmem>>, vector<16x128xf32>
    %cst_478 = arith.constant dense<0.000000e+00> : vector<2x128xf32>
    %638 = tpu.matmul %634, %637, %cst_478 {dimension_numbers = #tpu.dot_dimension_numbers<[1], [0], [0], [1], [0, 0, 1, 1], [], []>} : vector<2x16xf32>, vector<16x128xf32>, vector<2x128xf32> -> vector<2x128xf32>
    %639 = arith.addf %636, %638 : vector<2x128xf32>
    %c0_479 = arith.constant 0 : index
    %c0_480 = arith.constant 0 : index
    %640 = vector.load %arg14[%c0_479, %c0_480] : memref<1x128xf32, #tpu.memory_space<vmem>>, vector<1x128xf32>
    %641 = vector.broadcast %640 : vector<1x128xf32> to vector<2x128xf32>
    %642 = arith.addf %639, %641 : vector<2x128xf32>
    %cst_481 = arith.constant 0.000000e+00 : f32
    %643 = vector.broadcast %cst_481 : f32 to vector<2x128xf32>
    %644 = arith.cmpf ogt, %642, %643 : vector<2x128xf32>
    %cst_482 = arith.constant 0.000000e+00 : f32
    %645 = vector.broadcast %cst_482 : f32 to vector<2x128xf32>
    %646 = arith.minimumf %642, %645 : vector<2x128xf32>
    %647 = math.exp %646 : vector<2x128xf32>
    %cst_483 = arith.constant 1.000000e+00 : f32
    %648 = vector.broadcast %cst_483 : f32 to vector<2x128xf32>
    %649 = arith.subf %647, %648 : vector<2x128xf32>
    %650 = arith.select %644, %642, %649 : vector<2x128xi1>, vector<2x128xf32>
    %c0_484 = arith.constant 0 : index
    %c0_485 = arith.constant 0 : index
    %651 = vector.load %arg15[%c0_484, %c0_485] : memref<128x8xf32, #tpu.memory_space<vmem>>, vector<128x8xf32>
    %cst_486 = arith.constant dense<0.000000e+00> : vector<2x8xf32>
    %652 = tpu.matmul %650, %651, %cst_486 {dimension_numbers = #tpu.dot_dimension_numbers<[1], [0], [0], [1], [0, 0, 1, 1], [], []>} : vector<2x128xf32>, vector<128x8xf32>, vector<2x8xf32> -> vector<2x8xf32>
    %c0_487 = arith.constant 0 : index
    %c0_488 = arith.constant 0 : index
    %653 = vector.load %arg16[%c0_487, %c0_488] : memref<1x8xf32, #tpu.memory_space<vmem>>, vector<1x8xf32>
    %654 = vector.broadcast %653 : vector<1x8xf32> to vector<2x8xf32>
    %655 = arith.addf %652, %654 : vector<2x8xf32>
    %656 = tpu.iota {dimensions = array<i32: 1>} : vector<2x8xi32>
    %c4_i32 = arith.constant 4 : i32
    %657 = vector.broadcast %c4_i32 : i32 to vector<2x8xi32>
    %658 = arith.cmpi sge, %656, %657 : vector<2x8xi32>
    %cst_489 = arith.constant 9.99999997E-7 : f32
    %cst_490 = arith.constant 1.000000e+00 : f32
    %659 = vector.broadcast %cst_489 : f32 to vector<2x8xf32>
    %660 = arith.maximumf %659, %655 : vector<2x8xf32>
    %661 = vector.broadcast %cst_490 : f32 to vector<2x8xf32>
    %662 = arith.minimumf %661, %660 : vector<2x8xf32>
    %663 = arith.select %658, %662, %655 : vector<2x8xi1>, vector<2x8xf32>
    %c0_491 = arith.constant 0 : index
    %c0_492 = arith.constant 0 : index
    %664 = vector.load %arg17[%c0_491, %c0_492] : memref<2x8xf32, #tpu.memory_space<vmem>>, vector<2x8xf32>
    tpu.vector_store %arg17[%c0_491, %c0_492], %663 {strides = array<i32>} : memref<2x8xf32, #tpu.memory_space<vmem>>, vector<2x8xf32>,
    return
  }
}

</mosaic_0001>

<bundles_post_ra>
// kernel: actor_forward.1
= control target key start
LH: loop header
LB: loop body
LE: loop exit
PB: predicated region body
PF: predicated region fallthrough
CT: control target
= control target key end

     0   :  { %v14254_v0 = vmov 0.0|0.0   ;;  %vm96_vm0 = vcmask 1040384   ;;  %vm14255_vm1 = vmmov 0   ;;  %v14256_v6 = vmov 0.0   ;;  %s18283_s2 = inlined_call_operand.vmem [shape: f32[25,16], index: 2, kind: input, shape index: {}]   ;;  %s18284_s0 = inlined_call_operand.vmem [shape: f32[25,50,25], index: 0, kind: input, shape index: {}]   ;;  %s18285_s4 = inlined_call_operand.vmem [shape: f32[25,16,32], index: 4, kind: input, shape index: {}]   ;;  %s18286_s3 = inlined_call_operand.vmem [shape: f32[1,16], index: 3, kind: input, shape index: {}]   ;;  %s18287_s6 = inlined_call_operand.vmem [shape: f32[25,32,32], index: 6, kind: input, shape index: {}]   ;;  %s18288_s5 = inlined_call_operand.vmem [shape: f32[1,32], index: 5, kind: input, shape index: {}]   ;;  %s18289_s8 = inlined_call_operand.vmem [shape: f32[28,128], index: 8, kind: input, shape index: {}]   ;;  %s18290_s1 = inlined_call_operand.vmem [shape: f32[2,28], index: 1, kind: input, shape index: {}]   ;;  %s18291_s10 = inlined_call_operand.vmem [shape: f32[128,16], index: 10, kind: input, shape index: {}]   ;;  %s18292_s9 = inlined_call_operand.vmem [shape: f32[1,128], index: 9, kind: input, shape index: {}]   ;;  %s18293_s13 = inlined_call_operand.vmem [shape: f32[16,128], index: 13, kind: input, shape index: {}]   ;;  %s18294_s7 = inlined_call_operand.vmem [shape: f32[1,32], index: 7, kind: input, shape index: {}]   ;;  %s18295_s11 = inlined_call_operand.vmem [shape: f32[1,16], index: 11, kind: input, shape index: {}]   ;;  %s18296_s12 = inlined_call_operand.vmem [shape: f32[32,128], index: 12, kind: input, shape index: {}]   ;;  %s18297_s15 = inlined_call_operand.vmem [shape: f32[128,8], index: 15, kind: input, shape index: {}]   ;;  %s18298_s14 = inlined_call_operand.vmem [shape: f32[1,128], index: 14, kind: input, shape index: {}]   ;;  %s18299_s16 = inlined_call_operand.vmem [shape: f32[1,8], index: 16, kind: input, shape index: {}]   ;;  %s18300_s17 = inlined_call_operand.vmem [shape: f32[2,8], index: 17, kind: output, shape index: {}]  }
   0x1   :  { %18303 = sst [smem:[#allocation2_spill]] %s18283_s2  ;;  %13409 = vmatprep.subr.bf16.mxu0 %v14254_v0  ;;  %13873 = vmatprep.subr.bf16.mxu1 %v14254_v0  ;;  %vm14257_vm2 = vmmov 1   ;;  %vm74_vm4 = vcmask 203776   ;;  %v242_v23 = vld [vmem:[%s18285_s4] sm:$0xff]  ;;  %v243_v24 = vld [vmem:[%s18285_s4 + $0x8] sm:$0xff]  ;;  %v10144_v26 = vld [vmem:[%s18285_s4 + $0x10] sm:$0xff] }
   0x2   :  { %18304 = sst [smem:[#allocation3_spill]] %s18284_s0  ;;  %s18305_s26 = sld [smem:[#allocation2_spill]]  ;;  %11693 = vmatprep.mubr.msk.f32.mxu0 %vm14255_vm1, %v14256_v6  ;;  %11725 = vmatprep.mubr.msk.f32.mxu1 %vm14255_vm1, %v14256_v6  ;;  %vm14374_vm3 = vmpackc.low %vm96_vm0, %vm14257_vm2  ;;  %v13427_v25 = vpack.c.bf16 %v243_v24, %v242_v23  ;;  %v10145_v27 = vld [vmem:[%s18285_s4 + $0x18] sm:$0xff]  ;;  %v14494_v29 = vld [vmem:[%s18286_s3] ss:$0 sm:$0xff]  ;;  %vm418_vm5 = vcmask 130048  }
   0x3   :  { %s18308_s20 = sld [smem:[#allocation3_spill]]  ;;  %v13424_v28 = vpack.c.bf16 %v10145_v27, %v10144_v26 }
   0x8   :  { %v63_v1 = vld [vmem:[%s18305_s26] sm:$0xff]  ;;  %v64_v2 = vld [vmem:[%s18305_s26 + $0x8] sm:$0xff]  ;;  %v65_v3 = vld [vmem:[%s18305_s26 + $0x10] sm:$0xff] }
   0x9   :  { %v14359_v4 = vpack.c.bf16 %v64_v2, %v63_v1  ;;  %v66_v5 = vld [vmem:[%s18305_s26 + $0x18] sm:$0x1]  ;;  %v56_v9 = vld [vmem:[%s18308_s20] sm:$0xff]  ;;  %v57_v11 = vld [vmem:[%s18308_s20 + $0x8] sm:$0xff] }
   0xa   :  { %v14369_v7 = vpack.c.bf16 %v66_v5, %v65_v3  ;;  %v10123_v10 = vld [vmem:[%s18308_s20 + $0x40] sm:$0xff]  ;;  %v10124_v12 = vld [vmem:[%s18308_s20 + $0x48] sm:$0xff]  ;;  %v58_v13 = vld [vmem:[%s18308_s20 + $0x10] sm:$0xff] }
   0xb   :  { %13411 = vmatpush3.bf16.msra.mxu0 %v14359_v4  ;;  %13875 = vmatpush3.bf16.msra.mxu1 %v14359_v4  ;;  %v10125_v14 = vld [vmem:[%s18308_s20 + $0x50] sm:$0xff]  ;;  %v59_v15 = vld [vmem:[%s18308_s20 + $0x18] sm:$0xff]  ;;  %v60_v17 = vld [vmem:[%s18308_s20 + $0x20] sm:$0xff] }
   0xc   :  { %13412 = vmatprep.subr.bf16.mxu0 %v14254_v0  ;;  %13874 = vmatprep.subr.bf16.mxu1 %v14254_v0  ;;  %v10126_v16 = vld [vmem:[%s18308_s20 + $0x58] sm:$0xff]  ;;  %v10127_v18 = vld [vmem:[%s18308_s20 + $0x60] sm:$0xff]  ;;  %v61_v19 = vld [vmem:[%s18308_s20 + $0x28] sm:$0xff] }
   0xd   :  { %v10128_v20 = vld [vmem:[%s18308_s20 + $0x68] sm:$0x3]  ;;  %v62_v21 = vld [vmem:[%s18308_s20 + $0x30] sm:$0x3]  ;;  %v10122_v22 = vld [vmem:[%s18308_s20 + $0x38] sm:$0xff] }
   0xe   :  { %v10814_v8 = vld [vmem:[%s18308_s20 + $0x520] sm:$0xff] }
   0xf   :  { %13415 = vmatpush3.bf16.msk.msra.mxu0 %vm14374_vm3, %v14369_v7  ;;  %13876 = vmatpush3.bf16.msk.msra.mxu1 %vm14374_vm3, %v14369_v7 }
  0x10   :  { %13416 = vmatprep.subr.bf16.mxu0 %v14254_v0  ;;  %13426 = vmatprep.subr.bf16.mxu1 %v14254_v0 }
  0x12   :  { %11694 = vmatmul.mubr.msk.f32.vlgmr.msra.gmra.mrb[0].mxu0 %vm74_vm4, %v56_v9  ;;  %11726 = vmatmul.mubr.msk.f32.vlgmr.msra.gmra.mrb[0].mxu1 %vm74_vm4, %v10123_v10 }
  0x13   :  { %13418 = vmatpush3.bf16.msra.mxu0 %v14359_v4  ;;  %11696 = vmatprep.mubr.msk.f32.mxu0 %vm14255_vm1, %v14256_v6 }
  0x14   :  { %13419 = vmatprep.subr.bf16.mxu0 %v14254_v0  ;;  %11728 = vmatprep.mubr.msk.f32.mxu1 %vm14255_vm1, %v14256_v6 }
  0x15   :  { %13428 = vmatpush3.bf16.msra.mxu1 %v13427_v25 }
  0x16   :  { %11697 = vmatmul.mubr.msk.f32.gmra.mrb[2].mxu0 %vm74_vm4, %v57_v11  ;;  %11729 = vmatmul.mubr.msk.f32.gmra.mrb[2].mxu1 %vm74_vm4, %v10124_v12 }
  0x17   :  { %11699 = vmatprep.mubr.msk.f32.mxu0 %vm14255_vm1, %v14256_v6  ;;  %13422 = vmatpush3.bf16.msk.msra.mxu0 %vm14374_vm3, %v14369_v7 }
  0x18   :  { %11731 = vmatprep.mubr.msk.f32.mxu1 %vm14255_vm1, %v14256_v6  ;;  %13423 = vmatprep.subr.bf16.mxu0 %v14254_v0 }
  0x19   :  { %13436 = vmatprep.subr.bf16.mxu1 %v14254_v0 }
  0x1a   :  { %11700 = vmatmul.mubr.msk.f32.gmra.mrb[4].mxu0 %vm74_vm4, %v58_v13  ;;  %11732 = vmatmul.mubr.msk.f32.gmra.mrb[4].mxu1 %vm74_vm4, %v10125_v14 }
  0x1b   :  { %11702 = vmatprep.mubr.msk.f32.mxu0 %vm14255_vm1, %v14256_v6  ;;  %11734 = vmatprep.mubr.msk.f32.mxu1 %vm14255_vm1, %v14256_v6 }
  0x1e   :  { %11703 = vmatmul.mubr.msk.f32.gmra.mrb[6].mxu0 %vm74_vm4, %v59_v15  ;;  %11735 = vmatmul.mubr.msk.f32.gmra.mrb[6].mxu1 %vm74_vm4, %v10126_v16 }
  0x1f   :  { %11705 = vmatprep.mubr.msk.f32.mxu0 %vm14255_vm1, %v14256_v6  ;;  %11737 = vmatprep.mubr.msk.f32.mxu1 %vm14255_vm1, %v14256_v6 }
  0x22   :  { %11706 = vmatmul.mubr.msk.f32.gmra.mrb[8].mxu0 %vm74_vm4, %v60_v17  ;;  %11738 = vmatmul.mubr.msk.f32.gmra.mrb[8].mxu1 %vm74_vm4, %v10127_v18 }
  0x23   :  { %11708 = vmatprep.mubr.msk.f32.mxu0 %vm14255_vm1, %v14256_v6  ;;  %11740 = vmatprep.mubr.msk.f32.mxu1 %vm14255_vm1, %v14256_v6 }
  0x26   :  { %11709 = vmatmul.mubr.msk.f32.gmra.mrb[10].mxu0 %vm74_vm4, %v61_v19  ;;  %11741 = vmatmul.mubr.msk.f32.gmra.mrb[10].mxu1 %vm74_vm4, %v10128_v20 }
  0x27   :  { %11711 = vmatprep.mubr.msk.f32.mxu0 %vm14255_vm1, %v14256_v6  ;;  %11772 = vmatprep.mubr.msk.f32.mxu1 %vm14255_vm1, %v14256_v6 }
  0x2a   :  { %11712 = vmatmul.mubr.msk.f32.gmra.mrb[12].mxu0 %vm74_vm4, %v62_v21 }
  0x2b   :  { %11722 = vmatprep.mubr.msk.f32.mxu0 %vm14255_vm1, %v14256_v6 }
  0x2e   :  { %11723 = vmatmul.mubr.msk.f32.vlgmr.msra.gmra.mrb[14].mxu0 %vm74_vm4, %v10122_v22 }
  0x2f   :  { %11747 = vmatprep.mubr.msk.f32.mxu0 %vm14255_vm1, %v14256_v6  ;;  %13425 = vmatpush3.bf16.msra.mxu0 %v13424_v28 }
  0x30   :  { %13429 = vmatprep.subr.bf16.mxu0 %v14254_v0 }
  0xe5   :  { %v166_v30 = vpop.f32.mrb[0].mxu0  ;;  %v344_v31 = vpop.f32.mrb[0].mxu1 }
  0xe6   :  { %v167_v32 = vadd.f32 %v14494_v29, %v166_v30  ;;  %v11695_v33 = vpop.f32.mrb[1].mxu0  ;;  %v11727_v34 = vpop.f32.mrb[1].mxu1  ;;  %v14515_v15 = vadd.f32 %v14494_v29, %v344_v31 }
  0xe8   :  { %v207_v35 = vmin.f32 %v167_v32, 0.0  ;;  %vm200_vm6 = vcmp.gt.f32.partialorder %v167_v32, 0.0  ;;  %v381_v24 = vmin.f32 %v14515_v15, 0.0  ;;  %vm374_vm14 = vcmp.gt.f32.partialorder %v14515_v15, 0.0 }
  0xe9   :  { %v171_v36 = vpop.f32.mrb[2].mxu0  ;;  %v349_v37 = vpop.f32.mrb[2].mxu1 }
  0xea   :  { %v214_v38 = vmul.f32 1.442695, %v207_v35  ;;  %v172_v39 = vadd.f32 %v14494_v29, %v171_v36  ;;  %v11698_v40 = vpop.f32.mrb[3].mxu0  ;;  %v11730_v41 = vpop.f32.mrb[3].mxu1  ;;  %v14525_v26 = vadd.f32 %v14494_v29, %v349_v37  ;;  %v389_v35 = vmul.f32 1.442695, %v381_v24 }
  0xec   :  { %13881 = vpow2.f32 %v214_v38  ;;  %v208_v42 = vmin.f32 %v172_v39, 0.0  ;;  %vm201_vm7 = vcmp.gt.f32.partialorder %v172_v39, 0.0  ;;  %v382_v38 = vmin.f32 %v14525_v26, 0.0 }
  0xed   :  { %v176_v43 = vpop.f32.mrb[4].mxu0  ;;  %v14498_v44 = vpop.f32.mrb[4].mxu1  ;;  %vm375_vm15 = vcmp.gt.f32.partialorder %v14525_v26, 0.0 }
  0xee   :  { %v216_v45 = vmul.f32 1.442695, %v208_v42  ;;  %v177_v46 = vadd.f32 %v14494_v29, %v176_v43  ;;  %v11701_v47 = vpop.f32.mrb[5].mxu0  ;;  %v11733_v48 = vpop.f32.mrb[5].mxu1  ;;  %v14531_v36 = vadd.f32 %v14494_v29, %v14498_v44 }
  0xf0   :  { %13883 = vpow2.f32 %v216_v45  ;;  %v209_v49 = vmin.f32 %v177_v46, 0.0  ;;  %vm202_vm8 = vcmp.gt.f32.partialorder %v177_v46, 0.0  ;;  %v383_v43 = vmin.f32 %v14531_v36, 0.0 }
  0xf1   :  { %v181_v50 = vpop.f32.mrb[6].mxu0  ;;  %v14501_v51 = vpop.f32.mrb[6].mxu1  ;;  %v391_v45 = vmul.f32 1.442695, %v382_v38  ;;  %vm376_vm0 = vcmp.gt.f32.partialorder %v14531_v36, 0.0  ;;  %v10196_v38 = vld [vmem:[%s18308_s20 + $0xd0] sm:$0xff] }
  0xf2   :  { %v218_v52 = vmul.f32 1.442695, %v209_v49  ;;  %v182_v53 = vadd.f32 %v14494_v29, %v181_v50  ;;  %v11704_v54 = vpop.f32.mrb[7].mxu0  ;;  %v11736_v55 = vpop.f32.mrb[7].mxu1  ;;  %v393_v49 = vmul.f32 1.442695, %v383_v43 }
  0xf3   :  { %v10225_v43 = vld [vmem:[%s18308_s20 + $0xf8] sm:$0xff] }
  0xf4   :  { %13885 = vpow2.f32 %v218_v52  ;;  %v210_v56 = vmin.f32 %v182_v53, 0.0  ;;  %vm203_vm9 = vcmp.gt.f32.partialorder %v182_v53, 0.0 }
  0xf5   :  { %v186_v57 = vpop.f32.mrb[8].mxu0  ;;  %v14504_v58 = vpop.f32.mrb[8].mxu1 }
  0xf6   :  { %v13882_v59 = vpop.eup %13881  ;;  %v220_v60 = vmul.f32 1.442695, %v210_v56  ;;  %v14507_v61 = vadd.f32 %v14494_v29, %v186_v57  ;;  %v11707_v62 = vpop.f32.mrb[9].mxu0 }
  0xf7   :  { %v11739_v63 = vpop.f32.mrb[9].mxu1  ;;  %v10115_v1 = vadd.f32 -1.0, %v13882_v59 }
  0xf8   :  { %13887 = vpow2.f32 %v220_v60  ;;  %v211_v2 = vmin.f32 %v14507_v61, 0.0  ;;  %vm204_vm10 = vcmp.gt.f32.partialorder %v14507_v61, 0.0 }
  0xf9   :  { %v235_v3 = vsel %vm200_vm6, %v167_v32, %v10115_v1  ;;  %v191_v5 = vpop.f32.mrb[10].mxu0  ;;  %v14510_v9 = vpop.f32.mrb[10].mxu1 }
  0xfa   :  { %v13884_v10 = vpop.eup %13883  ;;  %v222_v11 = vmul.f32 1.442695, %v211_v2  ;;  %v192_v12 = vadd.f32 %v14494_v29, %v191_v5  ;;  %v11710_v13 = vpop.f32.mrb[11].mxu0  ;;  %11773 = vmatmul.mubr.msk.f32.vlgmr.msra.gmra.mrb[12].mxu1 %vm418_vm5, %v235_v3  ;;  %v370_v59 = vadd.f32 %v14494_v29, %v14510_v9 }
  0xfb   :  { %v11742_v14 = vpop.f32.mrb[11].mxu1  ;;  %11775 = vmatprep.mubr.msk.f32.mxu1 %vm14255_vm1, %v14256_v6  ;;  %v10116_v16 = vadd.f32 -1.0, %v13884_v10 }
  0xfc   :  { %13889 = vpow2.f32 %v222_v11  ;;  %v212_v17 = vmin.f32 %v192_v12, 0.0  ;;  %vm205_vm11 = vcmp.gt.f32.partialorder %v192_v12, 0.0  ;;  %v386_v1 = vmin.f32 %v370_v59, 0.0 }
  0xfd   :  { %v196_v18 = vpop.f32.mrb[12].mxu0  ;;  %v236_v19 = vsel %vm201_vm7, %v172_v39, %v10116_v16 }
  0xfe   :  { %v13886_v20 = vpop.eup %13885  ;;  %v224_v21 = vmul.f32 1.442695, %v212_v17  ;;  %v197_v22 = vadd.f32 %v14494_v29, %v196_v18  ;;  %v11713_v23 = vpop.f32.mrb[13].mxu0  ;;  %11776 = vmatmul.mubr.msk.f32.gmra.mrb[14].mxu1 %vm418_vm5, %v236_v19  ;;  %v399_v9 = vmul.f32 1.442695, %v386_v1  ;;  %v10315_v1 = vld [vmem:[%s18308_s20 + $0x188] sm:$0xff] }
  0xff   :  { %11778 = vmatprep.mubr.msk.f32.mxu1 %vm14255_vm1, %v14256_v6  ;;  %v10117_v25 = vadd.f32 -1.0, %v13886_v20 }
 0x100   :  { %13891 = vpow2.f32 %v224_v21  ;;  %v213_v27 = vmin.f32 %v197_v22, 0.0  ;;  %vm206_vm12 = vcmp.gt.f32.partialorder %v197_v22, 0.0 }
 0x101   :  { %v339_v28 = vpop.f32.mrb[14].mxu0  ;;  %v237_v30 = vsel %vm202_vm8, %v177_v46, %v10117_v25  ;;  %v14542_v46 = vadd.f32 %v14494_v29, %v14501_v51  ;;  %vm379_vm8 = vcmp.gt.f32.partialorder %v370_v59, 0.0  ;;  %v10160_v25 = vld [vmem:[%s18308_s20 + $0x70] sm:$0xff] }
 0x102   :  { %v13888_v31 = vpop.eup %13887  ;;  %v226_v32 = vmul.f32 1.442695, %v213_v27  ;;  %v340_v33 = vadd.f32 %v14494_v29, %v339_v28  ;;  %v11724_v34 = vpop.f32.mrb[15].mxu0  ;;  %11779 = vmatmul.mubr.msk.f32.gmra.mrb[16].mxu1 %vm418_vm5, %v237_v30  ;;  %v10162_v27 = vld [vmem:[%s18308_s20 + $0x80] sm:$0xff]  ;;  %v10163_v28 = vld [vmem:[%s18308_s20 + $0x88] sm:$0xff]  ;;  %v10164_v30 = vld [vmem:[%s18308_s20 + $0x90] sm:$0xff] }
 0x103   :  { %11781 = vmatprep.mubr.msk.f32.mxu1 %vm14255_vm1, %v14256_v6  ;;  %v10118_v37 = vadd.f32 -1.0, %v13888_v31  ;;  %v384_v52 = vmin.f32 %v14542_v46, 0.0  ;;  %vm377_vm6 = vcmp.gt.f32.partialorder %v14542_v46, 0.0  ;;  %v10165_v31 = vld [vmem:[%s18308_s20 + $0x98] sm:$0xff]  ;;  %v10192_v34 = vld [vmem:[%s18308_s20 + $0xb0] sm:$0xff] }
 0x104   :  { %13893 = vpow2.f32 %v226_v32  ;;  %v380_v39 = vmin.f32 %v340_v33, 0.0  ;;  %vm373_vm13 = vcmp.gt.f32.partialorder %v340_v33, 0.0  ;;  %v10166_v32 = vld [vmem:[%s18308_s20 + $0xa0] sm:$0x3] }
 0x105   :  { %v238_v40 = vsel %vm203_vm9, %v182_v53, %v10118_v37  ;;  %13895 = vpow2.f32 %v389_v35  ;;  %v365_v53 = vadd.f32 %v14494_v29, %v14504_v58  ;;  %v395_v56 = vmul.f32 1.442695, %v384_v52  ;;  %v10193_v35 = vld [vmem:[%s18308_s20 + $0xb8] sm:$0xff]  ;;  %v10195_v37 = vld [vmem:[%s18308_s20 + $0xc8] sm:$0xff]  ;;  %v10254_v52 = vld [vmem:[%s18308_s20 + $0x120] sm:$0xff] }
 0x106   :  { %v13890_v41 = vpop.eup %13889  ;;  %v387_v42 = vmul.f32 1.442695, %v380_v39  ;;  %11782 = vmatmul.mubr.msk.f32.gmra.mrb[18].mxu1 %vm418_vm5, %v238_v40  ;;  %v10197_v39 = vld [vmem:[%s18308_s20 + $0xd8] sm:$0x3]  ;;  %v10222_v40 = vld [vmem:[%s18308_s20 + $0xe0] sm:$0xff] }
 0x107   :  { %11784 = vmatprep.mubr.msk.f32.mxu1 %vm14255_vm1, %v14256_v6  ;;  %v10119_v44 = vadd.f32 -1.0, %v13890_v41  ;;  %v385_v57 = vmin.f32 %v365_v53, 0.0  ;;  %vm378_vm7 = vcmp.gt.f32.partialorder %v365_v53, 0.0  ;;  %v10223_v41 = vld [vmem:[%s18308_s20 + $0xe8] sm:$0xff] }
 0x108   :  { %13897 = vpow2.f32 %v387_v42  ;;  %v10224_v42 = vld [vmem:[%s18308_s20 + $0xf0] sm:$0xff] }
 0x109   :  { %v239_v47 = vsel %vm204_vm10, %v14507_v61, %v10119_v44  ;;  %13899 = vpow2.f32 %v391_v45  ;;  %v397_v63 = vmul.f32 1.442695, %v385_v57  ;;  %v10226_v44 = vld [vmem:[%s18308_s20 + $0x100] sm:$0xff]  ;;  %v10227_v45 = vld [vmem:[%s18308_s20 + $0x108] sm:$0xff]  ;;  %v10284_v57 = vld [vmem:[%s18308_s20 + $0x150] sm:$0xff] }
 0x10a   :  { %v13892_v48 = vpop.eup %13891  ;;  %11785 = vmatmul.mubr.msk.f32.gmra.mrb[20].mxu1 %vm418_vm5, %v239_v47  ;;  %13901 = vpow2.f32 %v393_v49  ;;  %v10183_v47 = vld [vmem:[%s18285_s4 + $0x28] sm:$0xff] }
 0x10b   :  { %11787 = vmatprep.mubr.msk.f32.mxu1 %vm14255_vm1, %v14256_v6  ;;  %v10120_v50 = vadd.f32 -1.0, %v13892_v48  ;;  %13903 = vpow2.f32 %v395_v56  ;;  %v10228_v48 = vld [vmem:[%s18308_s20 + $0x110] sm:$0x3]  ;;  %v10259_v56 = vld [vmem:[%s18308_s20 + $0x148] sm:$0x3] }
 0x10c   :  { %13905 = vpow2.f32 %v397_v63  ;;  %v10290_v63 = vld [vmem:[%s18308_s20 + $0x180] sm:$0x3] }
 0x10d   :  { %v240_v51 = vsel %vm205_vm11, %v192_v12, %v10120_v50  ;;  %13907 = vpow2.f32 %v399_v9  ;;  %v10253_v50 = vld [vmem:[%s18308_s20 + $0x118] sm:$0xff]  ;;  %v10319_v9 = vld [vmem:[%s18308_s20 + $0x1a8] sm:$0xff] }
 0x10e   :  { %v13894_v54 = vpop.eup %13893  ;;  %11788 = vmatmul.mubr.msk.f32.gmra.mrb[22].mxu1 %vm418_vm5, %v240_v51  ;;  %v10256_v51 = vld [vmem:[%s18308_s20 + $0x130] sm:$0xff] }
 0x10f   :  { %11790 = vmatprep.mubr.msk.f32.mxu1 %vm14255_vm1, %v14256_v6  ;;  %v10121_v55 = vadd.f32 -1.0, %v13894_v54  ;;  %v13896_v60 = vpop.eup %13895  ;;  %v10257_v54 = vld [vmem:[%s18308_s20 + $0x138] sm:$0xff] }
 0x110   :  { %v10138_v3 = vadd.f32 -1.0, %v13896_v60  ;;  %v10286_v60 = vld [vmem:[%s18308_s20 + $0x160] sm:$0xff] }
 0x111   :  { %v241_v61 = vsel %vm206_vm12, %v197_v22, %v10121_v55  ;;  %v10258_v55 = vld [vmem:[%s18308_s20 + $0x140] sm:$0xff] }
 0x112   :  { %v13898_v62 = vpop.eup %13897  ;;  %11791 = vmatmul.mubr.msk.f32.gmra.mrb[24].mxu1 %vm418_vm5, %v241_v61  ;;  %v409_v11 = vsel %vm374_vm14, %v14515_v15, %v10138_v3  ;;  %v10287_v61 = vld [vmem:[%s18308_s20 + $0x168] sm:$0xff]  ;;  %v10317_v3 = vld [vmem:[%s18308_s20 + $0x198] sm:$0xff] }
 0x113   :  { %v10137_v58 = vadd.f32 -1.0, %v13898_v62  ;;  %11826 = vmatprep.mubr.msk.f32.mxu1 %vm14255_vm1, %v14256_v6  ;;  %v13900_v5 = vpop.eup %13899  ;;  %v10288_v62 = vld [vmem:[%s18308_s20 + $0x170] sm:$0xff] }
 0x114   :  { %v13902_v10 = vpop.eup %13901  ;;  %v10139_v12 = vadd.f32 -1.0, %v13900_v5  ;;  %v10318_v5 = vld [vmem:[%s18308_s20 + $0x1a0] sm:$0xff] }
 0x115   :  { %v408_v2 = vsel %vm373_vm13, %v340_v33, %v10137_v58  ;;  %v10140_v14 = vadd.f32 -1.0, %v13902_v10  ;;  %v13904_v16 = vpop.eup %13903  ;;  %v10191_v33 = vld [vmem:[%s18308_s20 + $0xa8] sm:$0xff]  ;;  %v10289_v58 = vld [vmem:[%s18308_s20 + $0x178] sm:$0xff] }
 0x116   :  { %11748 = vmatmul.mubr.msk.f32.vlgmr.msra.gmra.mrb[16].mxu0 %vm418_vm5, %v408_v2  ;;  %v410_v13 = vsel %vm375_vm15, %v14525_v26, %v10139_v12  ;;  %v10141_v17 = vadd.f32 -1.0, %v13904_v16  ;;  %v13906_v18 = vpop.eup %13905  ;;  %v10161_v26 = vld [vmem:[%s18308_s20 + $0x78] sm:$0xff]  ;;  %v10316_v2 = vld [vmem:[%s18308_s20 + $0x190] sm:$0xff] }
 0x117   :  { %13431 = vmatpush3.bf16.msra.mxu0 %v14359_v4  ;;  %11750 = vmatprep.mubr.msk.f32.mxu0 %vm14255_vm1, %v14256_v6  ;;  %v411_v15 = vsel %vm376_vm0, %v14531_v36, %v10140_v14  ;;  %v10142_v20 = vadd.f32 -1.0, %v13906_v18  ;;  %v13908_v21 = vpop.eup %13907  ;;  %v10194_v36 = vld [vmem:[%s18308_s20 + $0xc0] sm:$0xff]  ;;  %v10320_v12 = vld [vmem:[%s18308_s20 + $0x1b0] sm:$0xff]  ;;  %v10321_v16 = vld [vmem:[%s18308_s20 + $0x1b8] sm:$0x3] }
 0x118   :  { %13432 = vmatprep.subr.bf16.mxu0 %v14254_v0  ;;  %v412_v19 = vsel %vm377_vm6, %v14542_v46, %v10141_v17  ;;  %v10143_v23 = vadd.f32 -1.0, %v13908_v21  ;;  %v10182_v46 = vld [vmem:[%s18285_s4 + $0x20] sm:$0xff]  ;;  %v10347_v21 = vld [vmem:[%s18308_s20 + $0x1c8] sm:$0xff] }
 0x119   :  { %v413_v22 = vsel %vm378_vm7, %v365_v53, %v10142_v20  ;;  %v13437_v49 = vpack.c.bf16 %v10183_v47, %v10182_v46  ;;  %v10255_v53 = vld [vmem:[%s18308_s20 + $0x128] sm:$0xff]  ;;  %v10346_v18 = vld [vmem:[%s18308_s20 + $0x1c0] sm:$0xff] }
 0x11a   :  { %11751 = vmatmul.mubr.msk.f32.gmra.mrb[18].mxu0 %vm418_vm5, %v409_v11  ;;  %v414_v24 = vsel %vm379_vm8, %v370_v59, %v10143_v23  ;;  %v10285_v59 = vld [vmem:[%s18308_s20 + $0x158] sm:$0xff]  ;;  %v10378_v47 = vld [vmem:[%s18308_s20 + $0x200] sm:$0xff] }
 0x11b   :  { %11753 = vmatprep.mubr.msk.f32.mxu0 %vm14255_vm1, %v14256_v6  ;;  %13435 = vmatpush3.bf16.msk.msra.mxu0 %vm14374_vm3, %v14369_v7 }
 0x11c   :  { %13439 = vmatprep.subr.bf16.mxu0 %v14254_v0  ;;  %13438 = vmatpush3.bf16.msra.mxu1 %v13437_v49 }
 0x11d   :  { %13446 = vmatprep.subr.bf16.mxu1 %v14254_v0 }
 0x11e   :  { %11754 = vmatmul.mubr.msk.f32.gmra.mrb[20].mxu0 %vm418_vm5, %v410_v13 }
 0x11f   :  { %11756 = vmatprep.mubr.msk.f32.mxu0 %vm14255_vm1, %v14256_v6 }
 0x122   :  { %11757 = vmatmul.mubr.msk.f32.gmra.mrb[22].mxu0 %vm418_vm5, %v411_v15 }
 0x123   :  { %11759 = vmatprep.mubr.msk.f32.mxu0 %vm14255_vm1, %v14256_v6 }
 0x126   :  { %11760 = vmatmul.mubr.msk.f32.gmra.mrb[24].mxu0 %vm418_vm5, %v412_v19 }
 0x127   :  { %11762 = vmatprep.mubr.msk.f32.mxu0 %vm14255_vm1, %v14256_v6 }
 0x12a   :  { %11763 = vmatmul.mubr.msk.f32.gmra.mrb[26].mxu0 %vm418_vm5, %v413_v22 }
 0x12b   :  { %11765 = vmatprep.mubr.msk.f32.mxu0 %vm14255_vm1, %v14256_v6 }
 0x12e   :  { %11766 = vmatmul.mubr.msk.f32.gmra.mrb[28].mxu0 %vm418_vm5, %v414_v24  ;;  %v10348_v24 = vld [vmem:[%s18308_s20 + $0x1d0] sm:$0xff] }
 0x12f   :  { %11801 = vmatprep.mubr.msk.f32.mxu0 %vm14255_vm1, %v14256_v6 }
 0x132   :  { %11802 = vmatmul.mubr.msk.f32.vlgmr.msra.gmra.mrb[30].mxu0 %vm74_vm4, %v10160_v25 }
 0x133   :  { %13441 = vmatpush3.bf16.msra.mxu0 %v14359_v4  ;;  %11804 = vmatprep.mubr.msk.f32.mxu0 %vm14255_vm1, %v14256_v6 }
 0x134   :  { %13442 = vmatprep.subr.bf16.mxu0 %v14254_v0 }
 0x136   :  { %11805 = vmatmul.mubr.msk.f32.gmra.mrb[32].mxu0 %vm74_vm4, %v10161_v26 }
 0x137   :  { %11807 = vmatprep.mubr.msk.f32.mxu0 %vm14255_vm1, %v14256_v6  ;;  %13445 = vmatpush3.bf16.msk.msra.mxu0 %vm14374_vm3, %v14369_v7 }
 0x138   :  { %13449 = vmatprep.subr.bf16.mxu0 %v14254_v0 }
 0x13a   :  { %11808 = vmatmul.mubr.msk.f32.gmra.mrb[34].mxu0 %vm74_vm4, %v10162_v27  ;;  %v10349_v27 = vld [vmem:[%s18308_s20 + $0x1d8] sm:$0xff] }
 0x13b   :  { %11810 = vmatprep.mubr.msk.f32.mxu0 %vm14255_vm1, %v14256_v6 }
 0x13e   :  { %11811 = vmatmul.mubr.msk.f32.gmra.mrb[36].mxu0 %vm74_vm4, %v10163_v28 }
 0x13f   :  { %11813 = vmatprep.mubr.msk.f32.mxu0 %vm14255_vm1, %v14256_v6 }
 0x142   :  { %11814 = vmatmul.mubr.msk.f32.gmra.mrb[38].mxu0 %vm74_vm4, %v10164_v30 }
 0x143   :  { %11816 = vmatprep.mubr.msk.f32.mxu0 %vm14255_vm1, %v14256_v6 }
 0x146   :  { %11817 = vmatmul.mubr.msk.f32.gmra.mrb[40].mxu0 %vm74_vm4, %v10165_v31  ;;  %v10350_v31 = vld [vmem:[%s18308_s20 + $0x1e0] sm:$0xff] }
 0x147   :  { %11819 = vmatprep.mubr.msk.f32.mxu0 %vm14255_vm1, %v14256_v6 }
 0x14a   :  { %11820 = vmatmul.mubr.msk.f32.gmra.mrb[42].mxu0 %vm74_vm4, %v10166_v32 }
 0x14b   :  { %11855 = vmatprep.mubr.msk.f32.mxu0 %vm14255_vm1, %v14256_v6 }
 0x14e   :  { %11856 = vmatmul.mubr.msk.f32.vlgmr.msra.gmra.mrb[44].mxu0 %vm74_vm4, %v10191_v33 }
 0x14f   :  { %13451 = vmatpush3.bf16.msra.mxu0 %v14359_v4  ;;  %11858 = vmatprep.mubr.msk.f32.mxu0 %vm14255_vm1, %v14256_v6 }
 0x150   :  { %13452 = vmatprep.subr.bf16.mxu0 %v14254_v0 }
 0x152   :  { %11859 = vmatmul.mubr.msk.f32.gmra.mrb[46].mxu0 %vm74_vm4, %v10192_v34 }
 0x153   :  { %11861 = vmatprep.mubr.msk.f32.mxu0 %vm14255_vm1, %v14256_v6  ;;  %13455 = vmatpush3.bf16.msk.msra.mxu0 %vm14374_vm3, %v14369_v7 }
 0x154   :  { %13459 = vmatprep.subr.bf16.mxu0 %v14254_v0 }
 0x156   :  { %11862 = vmatmul.mubr.msk.f32.gmra.mrb[48].mxu0 %vm74_vm4, %v10193_v35  ;;  %v10351_v35 = vld [vmem:[%s18308_s20 + $0x1e8] sm:$0xff] }
 0x157   :  { %11864 = vmatprep.mubr.msk.f32.mxu0 %vm14255_vm1, %v14256_v6 }
 0x15a   :  { %11865 = vmatmul.mubr.msk.f32.gmra.mrb[50].mxu0 %vm74_vm4, %v10194_v36 }
 0x15b   :  { %11867 = vmatprep.mubr.msk.f32.mxu0 %vm14255_vm1, %v14256_v6 }
 0x15e   :  { %11868 = vmatmul.mubr.msk.f32.gmra.mrb[52].mxu0 %vm74_vm4, %v10195_v37 }
 0x15f   :  { %11870 = vmatprep.mubr.msk.f32.mxu0 %vm14255_vm1, %v14256_v6 }
 0x162   :  { %11871 = vmatmul.mubr.msk.f32.gmra.mrb[54].mxu0 %vm74_vm4, %v10196_v38 }
 0x163   :  { %11873 = vmatprep.mubr.msk.f32.mxu0 %vm14255_vm1, %v14256_v6 }
 0x166   :  { %11874 = vmatmul.mubr.msk.f32.gmra.mrb[56].mxu0 %vm74_vm4, %v10197_v39  ;;  %v10352_v39 = vld [vmem:[%s18308_s20 + $0x1f0] sm:$0x3] }
 0x167   :  { %11909 = vmatprep.mubr.msk.f32.mxu0 %vm14255_vm1, %v14256_v6 }
 0x16a   :  { %11910 = vmatmul.mubr.msk.f32.vlgmr.msra.gmra.mrb[58].mxu0 %vm74_vm4, %v10222_v40 }
 0x16b   :  { %13461 = vmatpush3.bf16.msra.mxu0 %v14359_v4  ;;  %11912 = vmatprep.mubr.msk.f32.mxu0 %vm14255_vm1, %v14256_v6 }
 0x16c   :  { %13462 = vmatprep.subr.bf16.mxu0 %v14254_v0 }
 0x16e   :  { %11913 = vmatmul.mubr.msk.f32.gmra.mrb[60].mxu0 %vm74_vm4, %v10223_v41 }
 0x16f   :  { %11915 = vmatprep.mubr.msk.f32.mxu0 %vm14255_vm1, %v14256_v6  ;;  %13465 = vmatpush3.bf16.msk.msra.mxu0 %vm14374_vm3, %v14369_v7 }
 0x170   :  { %13469 = vmatprep.subr.bf16.mxu0 %v14254_v0 }
 0x172   :  { %11916 = vmatmul.mubr.msk.f32.gmra.mrb[62].mxu0 %vm74_vm4, %v10224_v42 }
 0x173   :  { %11918 = vmatprep.mubr.msk.f32.mxu0 %vm14255_vm1, %v14256_v6 }
 0x176   :  { %11919 = vmatmul.mubr.msk.f32.gmra.mrb[64].mxu0 %vm74_vm4, %v10225_v43  ;;  %v10377_v43 = vld [vmem:[%s18308_s20 + $0x1f8] sm:$0xff] }
 0x177   :  { %11921 = vmatprep.mubr.msk.f32.mxu0 %vm14255_vm1, %v14256_v6 }
 0x17a   :  { %11922 = vmatmul.mubr.msk.f32.gmra.mrb[66].mxu0 %vm74_vm4, %v10226_v44 }
 0x17b   :  { %11924 = vmatprep.mubr.msk.f32.mxu0 %vm14255_vm1, %v14256_v6 }
 0x17e   :  { %11925 = vmatmul.mubr.msk.f32.gmra.mrb[68].mxu0 %vm74_vm4, %v10227_v45 }
 0x17f   :  { %11927 = vmatprep.mubr.msk.f32.mxu0 %vm14255_vm1, %v14256_v6 }
 0x182   :  { %11928 = vmatmul.mubr.msk.f32.gmra.mrb[70].mxu0 %vm74_vm4, %v10228_v48 }
 0x183   :  { %11963 = vmatprep.mubr.msk.f32.mxu0 %vm14255_vm1, %v14256_v6 }
 0x186   :  { %11964 = vmatmul.mubr.msk.f32.vlgmr.msra.gmra.mrb[72].mxu0 %vm74_vm4, %v10253_v50 }
 0x187   :  { %13471 = vmatpush3.bf16.msra.mxu0 %v14359_v4  ;;  %11966 = vmatprep.mubr.msk.f32.mxu0 %vm14255_vm1, %v14256_v6 }
 0x188   :  { %13472 = vmatprep.subr.bf16.mxu0 %v14254_v0 }
 0x18a   :  { %11967 = vmatmul.mubr.msk.f32.gmra.mrb[74].mxu0 %vm74_vm4, %v10254_v52  ;;  %v10379_v52 = vld [vmem:[%s18308_s20 + $0x208] sm:$0xff] }
 0x18b   :  { %11969 = vmatprep.mubr.msk.f32.mxu0 %vm14255_vm1, %v14256_v6  ;;  %13475 = vmatpush3.bf16.msk.msra.mxu0 %vm14374_vm3, %v14369_v7 }
 0x18c   :  { %13479 = vmatprep.subr.bf16.mxu0 %v14254_v0 }
 0x18e   :  { %11970 = vmatmul.mubr.msk.f32.gmra.mrb[76].mxu0 %vm74_vm4, %v10255_v53 }
 0x18f   :  { %11972 = vmatprep.mubr.msk.f32.mxu0 %vm14255_vm1, %v14256_v6 }
 0x192   :  { %11973 = vmatmul.mubr.msk.f32.gmra.mrb[78].mxu0 %vm74_vm4, %v10256_v51 }
 0x193   :  { %11975 = vmatprep.mubr.msk.f32.mxu0 %vm14255_vm1, %v14256_v6 }
 0x196   :  { %11976 = vmatmul.mubr.msk.f32.gmra.mrb[80].mxu0 %vm74_vm4, %v10257_v54 }
 0x197   :  { %11978 = vmatprep.mubr.msk.f32.mxu0 %vm14255_vm1, %v14256_v6 }
 0x19a   :  { %11979 = vmatmul.mubr.msk.f32.gmra.mrb[82].mxu0 %vm74_vm4, %v10258_v55  ;;  %v10380_v55 = vld [vmem:[%s18308_s20 + $0x210] sm:$0xff] }
 0x19b   :  { %11981 = vmatprep.mubr.msk.f32.mxu0 %vm14255_vm1, %v14256_v6 }
 0x19e   :  { %11982 = vmatmul.mubr.msk.f32.gmra.mrb[84].mxu0 %vm74_vm4, %v10259_v56 }
 0x19f   :  { %12017 = vmatprep.mubr.msk.f32.mxu0 %vm14255_vm1, %v14256_v6 }
 0x1a2   :  { %12018 = vmatmul.mubr.msk.f32.vlgmr.msra.gmra.mrb[86].mxu0 %vm74_vm4, %v10284_v57 }
 0x1a3   :  { %13481 = vmatpush3.bf16.msra.mxu0 %v14359_v4  ;;  %12020 = vmatprep.mubr.msk.f32.mxu0 %vm14255_vm1, %v14256_v6 }
 0x1a4   :  { %13482 = vmatprep.subr.bf16.mxu0 %v14254_v0 }
 0x1a6   :  { %12021 = vmatmul.mubr.msk.f32.gmra.mrb[88].mxu0 %vm74_vm4, %v10285_v59 }
 0x1a7   :  { %12023 = vmatprep.mubr.msk.f32.mxu0 %vm14255_vm1, %v14256_v6  ;;  %13485 = vmatpush3.bf16.msk.msra.mxu0 %vm14374_vm3, %v14369_v7 }
 0x1a8   :  { %13489 = vmatprep.subr.bf16.mxu0 %v14254_v0 }
 0x1aa   :  { %12024 = vmatmul.mubr.msk.f32.gmra.mrb[90].mxu0 %vm74_vm4, %v10286_v60  ;;  %v10381_v60 = vld [vmem:[%s18308_s20 + $0x218] sm:$0xff] }
 0x1ab   :  { %12026 = vmatprep.mubr.msk.f32.mxu0 %vm14255_vm1, %v14256_v6 }
 0x1ae   :  { %12027 = vmatmul.mubr.msk.f32.gmra.mrb[92].mxu0 %vm74_vm4, %v10287_v61 }
 0x1af   :  { %12029 = vmatprep.mubr.msk.f32.mxu0 %vm14255_vm1, %v14256_v6 }
 0x1b2   :  { %12030 = vmatmul.mubr.msk.f32.gmra.mrb[94].mxu0 %vm74_vm4, %v10288_v62 }
 0x1b3   :  { %12032 = vmatprep.mubr.msk.f32.mxu0 %vm14255_vm1, %v14256_v6 }
 0x1b6   :  { %12033 = vmatmul.mubr.msk.f32.gmra.mrb[96].mxu0 %vm74_vm4, %v10289_v58 }
 0x1b7   :  { %12035 = vmatprep.mubr.msk.f32.mxu0 %vm14255_vm1, %v14256_v6 }
 0x1ba   :  { %12036 = vmatmul.mubr.msk.f32.gmra.mrb[98].mxu0 %vm74_vm4, %v10290_v63  ;;  %v10382_v63 = vld [vmem:[%s18308_s20 + $0x220] sm:$0xff] }
 0x1bb   :  { %12071 = vmatprep.mubr.msk.f32.mxu0 %vm14255_vm1, %v14256_v6 }
 0x1be   :  { %12072 = vmatmul.mubr.msk.f32.vlgmr.msra.gmra.mrb[100].mxu0 %vm74_vm4, %v10315_v1 }
 0x1bf   :  { %13491 = vmatpush3.bf16.msra.mxu0 %v14359_v4  ;;  %12074 = vmatprep.mubr.msk.f32.mxu0 %vm14255_vm1, %v14256_v6 }
 0x1c0   :  { %13492 = vmatprep.subr.bf16.mxu0 %v14254_v0 }
 0x1c2   :  { %12075 = vmatmul.mubr.msk.f32.gmra.mrb[102].mxu0 %vm74_vm4, %v10316_v2 }
 0x1c3   :  { %12077 = vmatprep.mubr.msk.f32.mxu0 %vm14255_vm1, %v14256_v6  ;;  %13495 = vmatpush3.bf16.msk.msra.mxu0 %vm14374_vm3, %v14369_v7 }
 0x1c4   :  { %13499 = vmatprep.subr.bf16.mxu0 %v14254_v0 }
 0x1c6   :  { %12078 = vmatmul.mubr.msk.f32.gmra.mrb[104].mxu0 %vm74_vm4, %v10317_v3 }
 0x1c7   :  { %12080 = vmatprep.mubr.msk.f32.mxu0 %vm14255_vm1, %v14256_v6 }
 0x1ca   :  { %12081 = vmatmul.mubr.msk.f32.gmra.mrb[106].mxu0 %vm74_vm4, %v10318_v5 }
 0x1cb   :  { %12083 = vmatprep.mubr.msk.f32.mxu0 %vm14255_vm1, %v14256_v6 }
 0x1cd   :  { %v627_v10 = vpop.f32.mrb[12].mxu1 }
 0x1ce   :  { %v11774_v11 = vpop.f32.mrb[13].mxu1  ;;  %12084 = vmatmul.mubr.msk.f32.gmra.mrb[108].mxu0 %vm74_vm4, %v10319_v9 }
 0x1cf   :  { %12086 = vmatprep.mubr.msk.f32.mxu0 %vm14255_vm1, %v14256_v6 }
 0x1d1   :  { %v632_v13 = vpop.f32.mrb[14].mxu1 }
 0x1d2   :  { %v11777_v14 = vpop.f32.mrb[15].mxu1  ;;  %12087 = vmatmul.mubr.msk.f32.gmra.mrb[110].mxu0 %vm74_vm4, %v10320_v12 }
 0x1d3   :  { %12089 = vmatprep.mubr.msk.f32.mxu0 %vm14255_vm1, %v14256_v6 }
 0x1d5   :  { %v637_v15 = vpop.f32.mrb[16].mxu1 }
 0x1d6   :  { %v11780_v17 = vpop.f32.mrb[17].mxu1  ;;  %12090 = vmatmul.mubr.msk.f32.gmra.mrb[112].mxu0 %vm74_vm4, %v10321_v16 }
 0x1d7   :  { %12125 = vmatprep.mubr.msk.f32.mxu0 %vm14255_vm1, %v14256_v6 }
 0x1d9   :  { %v642_v19 = vpop.f32.mrb[18].mxu1 }
 0x1da   :  { %v11783_v20 = vpop.f32.mrb[19].mxu1  ;;  %12126 = vmatmul.mubr.msk.f32.vlgmr.msra.gmra.mrb[114].mxu0 %vm74_vm4, %v10346_v18 }
 0x1db   :  { %13501 = vmatpush3.bf16.msra.mxu0 %v14359_v4  ;;  %12128 = vmatprep.mubr.msk.f32.mxu0 %vm14255_vm1, %v14256_v6 }
 0x1dc   :  { %13502 = vmatprep.subr.bf16.mxu0 %v14254_v0 }
 0x1dd   :  { %v647_v22 = vpop.f32.mrb[20].mxu1 }
 0x1de   :  { %v11786_v23 = vpop.f32.mrb[21].mxu1  ;;  %12129 = vmatmul.mubr.msk.f32.gmra.mrb[116].mxu0 %vm74_vm4, %v10347_v21 }
 0x1df   :  { %12131 = vmatprep.mubr.msk.f32.mxu0 %vm14255_vm1, %v14256_v6  ;;  %13505 = vmatpush3.bf16.msk.msra.mxu0 %vm14374_vm3, %v14369_v7 }
 0x1e0   :  { %13509 = vmatprep.subr.bf16.mxu0 %v14254_v0 }
 0x1e1   :  { %v652_v25 = vpop.f32.mrb[22].mxu1 }
 0x1e2   :  { %v11789_v26 = vpop.f32.mrb[23].mxu1  ;;  %12132 = vmatmul.mubr.msk.f32.gmra.mrb[118].mxu0 %vm74_vm4, %v10348_v24  ;;  %v10213_v24 = vld [vmem:[%s18285_s4 + $0x30] sm:$0xff] }
 0x1e3   :  { %12134 = vmatprep.mubr.msk.f32.mxu0 %vm14255_vm1, %v14256_v6 }
 0x1e5   :  { %v657_v28 = vpop.f32.mrb[24].mxu1 }
 0x1e6   :  { %v11792_v30 = vpop.f32.mrb[25].mxu1  ;;  %12135 = vmatmul.mubr.msk.f32.gmra.mrb[120].mxu0 %vm74_vm4, %v10349_v27 }
 0x1e7   :  { %12137 = vmatprep.mubr.msk.f32.mxu0 %vm14255_vm1, %v14256_v6 }
 0x1e9   :  { %v506_v32 = vpop.f32.mrb[16].mxu0 }
 0x1ea   :  { %v14923_v33 = vadd.f32 %v627_v10, %v506_v32  ;;  %v11749_v34 = vpop.f32.mrb[17].mxu0  ;;  %12138 = vmatmul.mubr.msk.f32.gmra.mrb[122].mxu0 %vm74_vm4, %v10350_v31  ;;  %v10383_v10 = vld [vmem:[%s18308_s20 + $0x228] sm:$0x3] }
 0x1eb   :  { %12140 = vmatprep.mubr.msk.f32.mxu0 %vm14255_vm1, %v14256_v6  ;;  %v10410_v34 = vld [vmem:[%s18308_s20 + $0x240] sm:$0xff] }
 0x1ed   :  { %v511_v36 = vpop.f32.mrb[18].mxu0 }
 0x1ee   :  { %v14931_v37 = vadd.f32 %v632_v13, %v511_v36  ;;  %v11752_v38 = vpop.f32.mrb[19].mxu0  ;;  %12141 = vmatmul.mubr.msk.f32.gmra.mrb[124].mxu0 %vm74_vm4, %v10351_v35 }
 0x1ef   :  { %12143 = vmatprep.mubr.msk.f32.mxu0 %vm14255_vm1, %v14256_v6 }
 0x1f1   :  { %v516_v40 = vpop.f32.mrb[20].mxu0 }
 0x1f2   :  { %v14939_v41 = vadd.f32 %v637_v15, %v516_v40  ;;  %v11755_v42 = vpop.f32.mrb[21].mxu0  ;;  %12144 = vmatmul.mubr.msk.f32.gmra.mrb[126].mxu0 %vm74_vm4, %v10352_v39  ;;  %v10408_v15 = vld [vmem:[%s18308_s20 + $0x230] sm:$0xff] }
 0x1f3   :  { %12179 = vmatprep.mubr.msk.f32.mxu0 %vm14255_vm1, %v14256_v6 }
 0x1f5   :  { %v521_v44 = vpop.f32.mrb[22].mxu0 }
 0x1f6   :  { %v14947_v45 = vadd.f32 %v642_v19, %v521_v44  ;;  %v11758_v46 = vpop.f32.mrb[23].mxu0  ;;  %12180 = vmatmul.mubr.msk.f32.vlgmr.msra.gmra.mrb[128].mxu0 %vm74_vm4, %v10377_v43 }
 0x1f7   :  { %13511 = vmatpush3.bf16.msra.mxu0 %v14359_v4  ;;  %12182 = vmatprep.mubr.msk.f32.mxu0 %vm14255_vm1, %v14256_v6 }
 0x1f8   :  { %13512 = vmatprep.subr.bf16.mxu0 %v14254_v0 }
 0x1f9   :  { %v526_v48 = vpop.f32.mrb[24].mxu0 }
 0x1fa   :  { %v14957_v49 = vadd.f32 %v647_v22, %v526_v48  ;;  %v11761_v50 = vpop.f32.mrb[25].mxu0  ;;  %12183 = vmatmul.mubr.msk.f32.gmra.mrb[130].mxu0 %vm74_vm4, %v10378_v47  ;;  %v10409_v22 = vld [vmem:[%s18308_s20 + $0x238] sm:$0xff]  ;;  %v10411_v47 = vld [vmem:[%s18308_s20 + $0x248] sm:$0xff] }
 0x1fb   :  { %12185 = vmatprep.mubr.msk.f32.mxu0 %vm14255_vm1, %v14256_v6  ;;  %13515 = vmatpush3.bf16.msk.msra.mxu0 %vm14374_vm3, %v14369_v7 }
 0x1fc   :  { %13519 = vmatprep.subr.bf16.mxu0 %v14254_v0 }
 0x1fd   :  { %v531_v53 = vpop.f32.mrb[26].mxu0 }
 0x1fe   :  { %v14969_v51 = vadd.f32 %v652_v25, %v531_v53  ;;  %v11764_v54 = vpop.f32.mrb[27].mxu0  ;;  %12186 = vmatmul.mubr.msk.f32.gmra.mrb[132].mxu0 %vm74_vm4, %v10379_v52  ;;  %v10214_v25 = vld [vmem:[%s18285_s4 + $0x38] sm:$0xff] }
 0x1ff   :  { %12188 = vmatprep.mubr.msk.f32.mxu0 %vm14255_vm1, %v14256_v6  ;;  %v13447_v35 = vpack.c.bf16 %v10214_v25, %v10213_v24 }
 0x201   :  { %v536_v56 = vpop.f32.mrb[28].mxu0 }
 0x202   :  { %v14977_v57 = vadd.f32 %v657_v28, %v536_v56  ;;  %v11767_v59 = vpop.f32.mrb[29].mxu0  ;;  %12189 = vmatmul.mubr.msk.f32.gmra.mrb[134].mxu0 %vm74_vm4, %v10380_v55 }
 0x203   :  { %12191 = vmatprep.mubr.msk.f32.mxu0 %vm14255_vm1, %v14256_v6 }
 0x205   :  { %v756_v61 = vpop.f32.mrb[30].mxu0 }
 0x206   :  { %v757_v62 = vadd.f32 %v14494_v29, %v756_v61  ;;  %v11803_v58 = vpop.f32.mrb[31].mxu0  ;;  %12192 = vmatmul.mubr.msk.f32.gmra.mrb[136].mxu0 %vm74_vm4, %v10381_v60  ;;  %v10412_v60 = vld [vmem:[%s18308_s20 + $0x250] sm:$0xff] }
 0x207   :  { %12194 = vmatprep.mubr.msk.f32.mxu0 %vm14255_vm1, %v14256_v6 }
 0x208   :  { %v797_v1 = vmin.f32 %v757_v62, 0.0  ;;  %vm790_vm9 = vcmp.gt.f32.partialorder %v757_v62, 0.0 }
 0x209   :  { %v761_v2 = vpop.f32.mrb[32].mxu0 }
 0x20a   :  { %v804_v3 = vmul.f32 1.442695, %v797_v1  ;;  %v14993_v5 = vadd.f32 %v14494_v29, %v761_v2  ;;  %v11806_v9 = vpop.f32.mrb[33].mxu0  ;;  %12195 = vmatmul.mubr.msk.f32.gmra.mrb[138].mxu0 %vm74_vm4, %v10382_v63 }
 0x20b   :  { %12197 = vmatprep.mubr.msk.f32.mxu0 %vm14255_vm1, %v14256_v6  ;;  %v10413_v9 = vld [vmem:[%s18308_s20 + $0x258] sm:$0xff] }
 0x20c   :  { %13909 = vpow2.f32 %v804_v3  ;;  %v798_v11 = vmin.f32 %v14993_v5, 0.0  ;;  %vm791_vm10 = vcmp.gt.f32.partialorder %v14993_v5, 0.0 }
 0x20d   :  { %v766_v12 = vpop.f32.mrb[34].mxu0 }
 0x20e   :  { %v806_v13 = vmul.f32 1.442695, %v798_v11  ;;  %v15003_v14 = vadd.f32 %v14494_v29, %v766_v12  ;;  %v11809_v16 = vpop.f32.mrb[35].mxu0  ;;  %12198 = vmatmul.mubr.msk.f32.gmra.mrb[140].mxu0 %vm74_vm4, %v10383_v10 }
 0x20f   :  { %12233 = vmatprep.mubr.msk.f32.mxu0 %vm14255_vm1, %v14256_v6 }
 0x210   :  { %13911 = vpow2.f32 %v806_v13  ;;  %v799_v17 = vmin.f32 %v15003_v14, 0.0  ;;  %vm792_vm11 = vcmp.gt.f32.partialorder %v15003_v14, 0.0 }
 0x211   :  { %v771_v18 = vpop.f32.mrb[36].mxu0 }
 0x212   :  { %v808_v19 = vmul.f32 1.442695, %v799_v17  ;;  %v15013_v20 = vadd.f32 %v14494_v29, %v771_v18  ;;  %v11812_v21 = vpop.f32.mrb[37].mxu0  ;;  %12234 = vmatmul.mubr.msk.f32.vlgmr.msra.gmra.mrb[142].mxu0 %vm74_vm4, %v10408_v15  ;;  %v10414_v18 = vld [vmem:[%s18308_s20 + $0x260] sm:$0x3] }
 0x213   :  { %13521 = vmatpush3.bf16.msra.mxu0 %v14359_v4  ;;  %12236 = vmatprep.mubr.msk.f32.mxu0 %vm14255_vm1, %v14256_v6 }
 0x214   :  { %13913 = vpow2.f32 %v808_v19  ;;  %v800_v23 = vmin.f32 %v15013_v20, 0.0  ;;  %13522 = vmatprep.subr.bf16.mxu0 %v14254_v0  ;;  %vm793_vm12 = vcmp.gt.f32.partialorder %v15013_v20, 0.0 }
 0x215   :  { %v776_v26 = vpop.f32.mrb[38].mxu0 }
 0x216   :  { %v13910_v27 = vpop.eup %13909  ;;  %v810_v28 = vmul.f32 1.442695, %v800_v23  ;;  %v15031_v30 = vadd.f32 %v14494_v29, %v776_v26  ;;  %v11815_v31 = vpop.f32.mrb[39].mxu0  ;;  %12237 = vmatmul.mubr.msk.f32.gmra.mrb[144].mxu0 %vm74_vm4, %v10409_v22  ;;  %v15108_v23 = vld [vmem:[%s18286_s3] ss:$0 sm:$0xff] }
 0x217   :  { %v10175_v32 = vadd.f32 -1.0, %v13910_v27  ;;  %12239 = vmatprep.mubr.msk.f32.mxu0 %vm14255_vm1, %v14256_v6  ;;  %13525 = vmatpush3.bf16.msk.msra.mxu0 %vm14374_vm3, %v14369_v7  ;;  %v10439_v27 = vld [vmem:[%s18308_s20 + $0x268] sm:$0xff] }
 0x218   :  { %13915 = vpow2.f32 %v810_v28  ;;  %v801_v36 = vmin.f32 %v15031_v30, 0.0  ;;  %13529 = vmatprep.subr.bf16.mxu0 %v14254_v0  ;;  %vm794_vm13 = vcmp.gt.f32.partialorder %v15031_v30, 0.0 }
 0x219   :  { %v825_v38 = vsel %vm790_vm9, %v757_v62, %v10175_v32  ;;  %v781_v39 = vpop.f32.mrb[40].mxu0 }
 0x21a   :  { %v13912_v40 = vpop.eup %13911  ;;  %v812_v42 = vmul.f32 1.442695, %v801_v36  ;;  %v15045_v43 = vadd.f32 %v14494_v29, %v781_v39  ;;  %v11818_v44 = vpop.f32.mrb[41].mxu0  ;;  %11827 = vmatmul.mubr.msk.f32.vlgmr.msra.gmra.mrb[26].mxu1 %vm418_vm5, %v825_v38  ;;  %12240 = vmatmul.mubr.msk.f32.gmra.mrb[146].mxu0 %vm74_vm4, %v10410_v34  ;;  %v10440_v39 = vld [vmem:[%s18308_s20 + $0x270] sm:$0xff] }
 0x21b   :  { %13448 = vmatpush3.bf16.msra.mxu1 %v13447_v35  ;;  %11829 = vmatprep.mubr.msk.f32.mxu1 %vm14255_vm1, %v14256_v6  ;;  %v10176_v46 = vadd.f32 -1.0, %v13912_v40 }
 0x21c   :  { %13917 = vpow2.f32 %v812_v42  ;;  %v802_v48 = vmin.f32 %v15045_v43, 0.0  ;;  %12242 = vmatprep.mubr.msk.f32.mxu0 %vm14255_vm1, %v14256_v6  ;;  %13456 = vmatprep.subr.bf16.mxu1 %v14254_v0  ;;  %vm795_vm14 = vcmp.gt.f32.partialorder %v15045_v43, 0.0  ;;  %v10244_v42 = vld [vmem:[%s18285_s4 + $0x40] sm:$0xff] }
 0x21d   :  { %v786_v50 = vpop.f32.mrb[42].mxu0  ;;  %v826_v52 = vsel %vm791_vm10, %v14993_v5, %v10176_v46 }
 0x21e   :  { %v13914_v53 = vpop.eup %13913  ;;  %v814_v54 = vmul.f32 1.442695, %v802_v48  ;;  %v15061_v55 = vadd.f32 %v14494_v29, %v786_v50  ;;  %v11821_v56 = vpop.f32.mrb[43].mxu0  ;;  %11830 = vmatmul.mubr.msk.f32.gmra.mrb[28].mxu1 %vm418_vm5, %v826_v52  ;;  %12243 = vmatmul.mubr.msk.f32.gmra.mrb[148].mxu0 %vm74_vm4, %v10411_v47 }
 0x21f   :  { %11832 = vmatprep.mubr.msk.f32.mxu1 %vm14255_vm1, %v14256_v6  ;;  %12245 = vmatprep.mubr.msk.f32.mxu0 %vm14255_vm1, %v14256_v6  ;;  %v10177_v59 = vadd.f32 -1.0, %v13914_v53 }
 0x220   :  { %13919 = vpow2.f32 %v814_v54  ;;  %v803_v61 = vmin.f32 %v15061_v55, 0.0  ;;  %vm796_vm15 = vcmp.gt.f32.partialorder %v15061_v55, 0.0  ;;  %v10441_v54 = vld [vmem:[%s18308_s20 + $0x278] sm:$0xff] }
 0x221   :  { %v1058_v62 = vpop.f32.mrb[44].mxu0  ;;  %v827_v58 = vsel %vm792_vm11, %v15003_v14, %v10177_v59 }
 0x222   :  { %v13916_v63 = vpop.eup %13915  ;;  %v816_v1 = vmul.f32 1.442695, %v803_v61  ;;  %v15076_v2 = vadd.f32 %v14494_v29, %v1058_v62  ;;  %11833 = vmatmul.mubr.msk.f32.gmra.mrb[30].mxu1 %vm418_vm5, %v827_v58  ;;  %v11857_v3 = vpop.f32.mrb[45].mxu0  ;;  %12246 = vmatmul.mubr.msk.f32.gmra.mrb[150].mxu0 %vm74_vm4, %v10412_v60 }
 0x223   :  { %11835 = vmatprep.mubr.msk.f32.mxu1 %vm14255_vm1, %v14256_v6  ;;  %12248 = vmatprep.mubr.msk.f32.mxu0 %vm14255_vm1, %v14256_v6  ;;  %v10178_v5 = vadd.f32 -1.0, %v13916_v63 }
 0x224   :  { %13921 = vpow2.f32 %v816_v1  ;;  %v1099_v10 = vmin.f32 %v15076_v2, 0.0  ;;  %vm1092_vm0 = vcmp.gt.f32.partialorder %v15076_v2, 0.0 }
 0x225   :  { %v1063_v11 = vpop.f32.mrb[46].mxu0  ;;  %v828_v12 = vsel %vm793_vm12, %v15013_v20, %v10178_v5 }
 0x226   :  { %v13918_v13 = vpop.eup %13917  ;;  %v1106_v14 = vmul.f32 1.442695, %v1099_v10  ;;  %v15091_v16 = vadd.f32 %v14494_v29, %v1063_v11  ;;  %11836 = vmatmul.mubr.msk.f32.gmra.mrb[32].mxu1 %vm418_vm5, %v828_v12  ;;  %v11860_v15 = vpop.f32.mrb[47].mxu0  ;;  %12249 = vmatmul.mubr.msk.f32.gmra.mrb[152].mxu0 %vm74_vm4, %v10413_v9 }
 0x227   :  { %11838 = vmatprep.mubr.msk.f32.mxu1 %vm14255_vm1, %v14256_v6  ;;  %12251 = vmatprep.mubr.msk.f32.mxu0 %vm14255_vm1, %v14256_v6  ;;  %v10179_v17 = vadd.f32 -1.0, %v13918_v13 }
 0x228   :  { %13923 = vpow2.f32 %v1106_v14  ;;  %v1100_v29 = vmin.f32 %v15091_v16, 0.0  ;;  %vm1093_vm6 = vcmp.gt.f32.partialorder %v15091_v16, 0.0 }
 0x229   :  { %v1068_v19 = vpop.f32.mrb[48].mxu0  ;;  %v829_v20 = vsel %vm794_vm13, %v15031_v30, %v10179_v17 }
 0x22a   :  { %v13920_v21 = vpop.eup %13919  ;;  %v1108_v22 = vmul.f32 1.442695, %v1100_v29  ;;  %v15111_v24 = vadd.f32 %v15108_v23, %v1068_v19  ;;  %11839 = vmatmul.mubr.msk.f32.gmra.mrb[34].mxu1 %vm418_vm5, %v829_v20  ;;  %v11863_v25 = vpop.f32.mrb[49].mxu0  ;;  %12252 = vmatmul.mubr.msk.f32.gmra.mrb[154].mxu0 %vm74_vm4, %v10414_v18 }
 0x22b   :  { %11841 = vmatprep.mubr.msk.f32.mxu1 %vm14255_vm1, %v14256_v6  ;;  %12287 = vmatprep.mubr.msk.f32.mxu0 %vm14255_vm1, %v14256_v6  ;;  %v10180_v26 = vadd.f32 -1.0, %v13920_v21 }
 0x22c   :  { %13925 = vpow2.f32 %v1108_v22  ;;  %v1101_v28 = vmin.f32 %v15111_v24, 0.0  ;;  %vm1094_vm7 = vcmp.gt.f32.partialorder %v15111_v24, 0.0 }
 0x22d   :  { %v1073_v30 = vpop.f32.mrb[50].mxu0  ;;  %v830_v31 = vsel %vm795_vm14, %v15045_v43, %v10180_v26  ;;  %v10245_v43 = vld [vmem:[%s18285_s4 + $0x48] sm:$0xff] }
 0x22e   :  { %v13922_v32 = vpop.eup %13921  ;;  %v1110_v34 = vmul.f32 1.442695, %v1101_v28  ;;  %v15126_v35 = vadd.f32 %v15108_v23, %v1073_v30  ;;  %11842 = vmatmul.mubr.msk.f32.gmra.mrb[36].mxu1 %vm418_vm5, %v830_v31  ;;  %v11866_v36 = vpop.f32.mrb[51].mxu0  ;;  %12288 = vmatmul.mubr.msk.f32.vlgmr.msra.gmra.mrb[156].mxu0 %vm74_vm4, %v10439_v27 }
 0x22f   :  { %13531 = vmatpush3.bf16.msra.mxu0 %v14359_v4  ;;  %11844 = vmatprep.mubr.msk.f32.mxu1 %vm14255_vm1, %v14256_v6  ;;  %v10181_v38 = vadd.f32 -1.0, %v13922_v32 }
 0x230   :  { %13927 = vpow2.f32 %v1110_v34  ;;  %v1102_v40 = vmin.f32 %v15126_v35, 0.0  ;;  %12290 = vmatprep.mubr.msk.f32.mxu0 %vm14255_vm1, %v14256_v6  ;;  %13532 = vmatprep.subr.bf16.mxu0 %v14254_v0  ;;  %vm1095_vm8 = vcmp.gt.f32.partialorder %v15126_v35, 0.0 }
 0x231   :  { %v1078_v44 = vpop.f32.mrb[52].mxu0  ;;  %v831_v46 = vsel %vm796_vm15, %v15061_v55, %v10181_v38  ;;  %v13457_v55 = vpack.c.bf16 %v10245_v43, %v10244_v42 }
 0x232   :  { %v13924_v47 = vpop.eup %13923  ;;  %v1112_v48 = vmul.f32 1.442695, %v1102_v40  ;;  %v15149_v50 = vadd.f32 %v15108_v23, %v1078_v44  ;;  %11845 = vmatmul.mubr.msk.f32.gmra.mrb[38].mxu1 %vm418_vm5, %v831_v46  ;;  %v11869_v52 = vpop.f32.mrb[53].mxu0  ;;  %12291 = vmatmul.mubr.msk.f32.gmra.mrb[158].mxu0 %vm74_vm4, %v10440_v39 }
 0x233   :  { %v10206_v53 = vadd.f32 -1.0, %v13924_v47  ;;  %11880 = vmatprep.mubr.msk.f32.mxu1 %vm14255_vm1, %v14256_v6  ;;  %12293 = vmatprep.mubr.msk.f32.mxu0 %vm14255_vm1, %v14256_v6  ;;  %v10470_v47 = vld [vmem:[%s18308_s20 + $0x2a0] sm:$0xff] }
 0x234   :  { %13929 = vpow2.f32 %v1112_v48  ;;  %v1103_v56 = vmin.f32 %v15149_v50, 0.0  ;;  %13535 = vmatpush3.bf16.msk.msra.mxu0 %vm14374_vm3, %v14369_v7  ;;  %vm1096_vm9 = vcmp.gt.f32.partialorder %v15149_v50, 0.0 }
 0x235   :  { %v1127_v59 = vsel %vm1092_vm0, %v15076_v2, %v10206_v53  ;;  %v1083_v60 = vpop.f32.mrb[54].mxu0  ;;  %13539 = vmatprep.subr.bf16.mxu0 %v14254_v0  ;;  %v10442_v2 = vld [vmem:[%s18308_s20 + $0x280] sm:$0xff] }
 0x236   :  { %v13926_v61 = vpop.eup %13925  ;;  %v1114_v62 = vmul.f32 1.442695, %v1103_v56  ;;  %v15168_v58 = vadd.f32 %v15108_v23, %v1083_v60  ;;  %v11872_v63 = vpop.f32.mrb[55].mxu0  ;;  %11881 = vmatmul.mubr.msk.f32.vlgmr.msra.gmra.mrb[40].mxu1 %vm418_vm5, %v1127_v59  ;;  %12294 = vmatmul.mubr.msk.f32.gmra.mrb[160].mxu0 %vm74_vm4, %v10441_v54  ;;  %v10471_v60 = vld [vmem:[%s18308_s20 + $0x2a8] sm:$0xff] }
 0x237   :  { %13458 = vmatpush3.bf16.msra.mxu1 %v13457_v55  ;;  %11883 = vmatprep.mubr.msk.f32.mxu1 %vm14255_vm1, %v14256_v6  ;;  %v10207_v1 = vadd.f32 -1.0, %v13926_v61 }
 0x238   :  { %13931 = vpow2.f32 %v1114_v62  ;;  %v1104_v3 = vmin.f32 %v15168_v58, 0.0  ;;  %12296 = vmatprep.mubr.msk.f32.mxu0 %vm14255_vm1, %v14256_v6  ;;  %13466 = vmatprep.subr.bf16.mxu1 %v14254_v0  ;;  %vm1097_vm10 = vcmp.gt.f32.partialorder %v15168_v58, 0.0  ;;  %v10275_v62 = vld [vmem:[%s18285_s4 + $0x50] sm:$0xff] }
 0x239   :  { %v1088_v5 = vpop.f32.mrb[56].mxu0  ;;  %v1128_v9 = vsel %vm1093_vm6, %v15091_v16, %v10207_v1  ;;  %v10443_v16 = vld [vmem:[%s18308_s20 + $0x288] sm:$0xff] }
 0x23a   :  { %v13928_v10 = vpop.eup %13927  ;;  %v1116_v11 = vmul.f32 1.442695, %v1104_v3  ;;  %v15184_v12 = vadd.f32 %v15108_v23, %v1088_v5  ;;  %v11875_v13 = vpop.f32.mrb[57].mxu0  ;;  %11884 = vmatmul.mubr.msk.f32.gmra.mrb[42].mxu1 %vm418_vm5, %v1128_v9  ;;  %12297 = vmatmul.mubr.msk.f32.gmra.mrb[162].mxu0 %vm74_vm4, %v10442_v2 }
 0x23b   :  { %11886 = vmatprep.mubr.msk.f32.mxu1 %vm14255_vm1, %v14256_v6  ;;  %12299 = vmatprep.mubr.msk.f32.mxu0 %vm14255_vm1, %v14256_v6  ;;  %v10208_v14 = vadd.f32 -1.0, %v13928_v10 }
 0x23c   :  { %13933 = vpow2.f32 %v1116_v11  ;;  %v1105_v15 = vmin.f32 %v15184_v12, 0.0  ;;  %vm1098_vm11 = vcmp.gt.f32.partialorder %v15184_v12, 0.0  ;;  %v10472_v11 = vld [vmem:[%s18308_s20 + $0x2b0] sm:$0xff] }
 0x23d   :  { %v1360_v17 = vpop.f32.mrb[58].mxu0  ;;  %v1129_v18 = vsel %vm1094_vm7, %v15111_v24, %v10208_v14  ;;  %v10444_v24 = vld [vmem:[%s18308_s20 + $0x290] sm:$0xff] }
 0x23e   :  { %v13930_v29 = vpop.eup %13929  ;;  %v1118_v19 = vmul.f32 1.442695, %v1105_v15  ;;  %v15199_v20 = vadd.f32 %v15108_v23, %v1360_v17  ;;  %11887 = vmatmul.mubr.msk.f32.gmra.mrb[44].mxu1 %vm418_vm5, %v1129_v18  ;;  %v11911_v21 = vpop.f32.mrb[59].mxu0  ;;  %12300 = vmatmul.mubr.msk.f32.gmra.mrb[164].mxu0 %vm74_vm4, %v10443_v16 }
 0x23f   :  { %11889 = vmatprep.mubr.msk.f32.mxu1 %vm14255_vm1, %v14256_v6  ;;  %12302 = vmatprep.mubr.msk.f32.mxu0 %vm14255_vm1, %v14256_v6  ;;  %v10209_v22 = vadd.f32 -1.0, %v13930_v29 }
 0x240   :  { %13935 = vpow2.f32 %v1118_v19  ;;  %v1401_v25 = vmin.f32 %v15199_v20, 0.0  ;;  %vm1394_vm12 = vcmp.gt.f32.partialorder %v15199_v20, 0.0 }
 0x241   :  { %v1365_v26 = vpop.f32.mrb[60].mxu0  ;;  %v1130_v27 = vsel %vm1095_vm8, %v15126_v35, %v10209_v22  ;;  %v10445_v35 = vld [vmem:[%s18308_s20 + $0x298] sm:$0x3] }
 0x242   :  { %v13932_v28 = vpop.eup %13931  ;;  %v1408_v30 = vmul.f32 1.442695, %v1401_v25  ;;  %v15214_v31 = vadd.f32 %v15108_v23, %v1365_v26  ;;  %11890 = vmatmul.mubr.msk.f32.gmra.mrb[46].mxu1 %vm418_vm5, %v1130_v27  ;;  %v11914_v32 = vpop.f32.mrb[61].mxu0  ;;  %12303 = vmatmul.mubr.msk.f32.gmra.mrb[166].mxu0 %vm74_vm4, %v10444_v24 }
 0x243   :  { %11892 = vmatprep.mubr.msk.f32.mxu1 %vm14255_vm1, %v14256_v6  ;;  %12305 = vmatprep.mubr.msk.f32.mxu0 %vm14255_vm1, %v14256_v6  ;;  %v10210_v34 = vadd.f32 -1.0, %v13932_v28 }
 0x244   :  { %13937 = vpow2.f32 %v1408_v30  ;;  %v1402_v36 = vmin.f32 %v15214_v31, 0.0  ;;  %vm1395_vm13 = vcmp.gt.f32.partialorder %v15214_v31, 0.0 }
 0x245   :  { %v1370_v38 = vpop.f32.mrb[62].mxu0  ;;  %v1131_v39 = vsel %vm1096_vm9, %v15149_v50, %v10210_v34 }
 0x246   :  { %v13934_v40 = vpop.eup %13933  ;;  %v1410_v42 = vmul.f32 1.442695, %v1402_v36  ;;  %v15229_v43 = vadd.f32 %v15108_v23, %v1370_v38  ;;  %11893 = vmatmul.mubr.msk.f32.gmra.mrb[48].mxu1 %vm418_vm5, %v1131_v39  ;;  %v11917_v44 = vpop.f32.mrb[63].mxu0  ;;  %12306 = vmatmul.mubr.msk.f32.gmra.mrb[168].mxu0 %vm74_vm4, %v10445_v35 }
 0x247   :  { %11895 = vmatprep.mubr.msk.f32.mxu1 %vm14255_vm1, %v14256_v6  ;;  %12341 = vmatprep.mubr.msk.f32.mxu0 %vm14255_vm1, %v14256_v6  ;;  %v10211_v46 = vadd.f32 -1.0, %v13934_v40 }
 0x248   :  { %13939 = vpow2.f32 %v1410_v42  ;;  %v1403_v48 = vmin.f32 %v15229_v43, 0.0  ;;  %vm1396_vm14 = vcmp.gt.f32.partialorder %v15229_v43, 0.0 }
 0x249   :  { %v1375_v50 = vpop.f32.mrb[64].mxu0  ;;  %v1132_v52 = vsel %vm1097_vm10, %v15168_v58, %v10211_v46  ;;  %v10276_v58 = vld [vmem:[%s18285_s4 + $0x58] sm:$0xff] }
 0x24a   :  { %v13936_v53 = vpop.eup %13935  ;;  %v1412_v54 = vmul.f32 1.442695, %v1403_v48  ;;  %v15244_v55 = vadd.f32 %v15108_v23, %v1375_v50  ;;  %11896 = vmatmul.mubr.msk.f32.gmra.mrb[50].mxu1 %vm418_vm5, %v1132_v52  ;;  %v11920_v56 = vpop.f32.mrb[65].mxu0  ;;  %12342 = vmatmul.mubr.msk.f32.vlgmr.msra.gmra.mrb[170].mxu0 %vm74_vm4, %v10470_v47 }
 0x24b   :  { %13541 = vmatpush3.bf16.msra.mxu0 %v14359_v4  ;;  %11898 = vmatprep.mubr.msk.f32.mxu1 %vm14255_vm1, %v14256_v6  ;;  %v10212_v59 = vadd.f32 -1.0, %v13936_v53 }
 0x24c   :  { %13941 = vpow2.f32 %v1412_v54  ;;  %v1404_v61 = vmin.f32 %v15244_v55, 0.0  ;;  %12344 = vmatprep.mubr.msk.f32.mxu0 %vm14255_vm1, %v14256_v6  ;;  %13542 = vmatprep.subr.bf16.mxu0 %v14254_v0  ;;  %vm1397_vm15 = vcmp.gt.f32.partialorder %v15244_v55, 0.0 }
 0x24d   :  { %v1380_v63 = vpop.f32.mrb[66].mxu0  ;;  %v1133_v1 = vsel %vm1098_vm11, %v15184_v12, %v10212_v59  ;;  %v13467_v12 = vpack.c.bf16 %v10276_v58, %v10275_v62 }
 0x24e   :  { %v13938_v2 = vpop.eup %13937  ;;  %v1414_v3 = vmul.f32 1.442695, %v1404_v61  ;;  %v15267_v5 = vadd.f32 %v15108_v23, %v1380_v63  ;;  %11899 = vmatmul.mubr.msk.f32.gmra.mrb[52].mxu1 %vm418_vm5, %v1133_v1  ;;  %v11923_v9 = vpop.f32.mrb[67].mxu0  ;;  %12345 = vmatmul.mubr.msk.f32.gmra.mrb[172].mxu0 %vm74_vm4, %v10471_v60 }
 0x24f   :  { %v10237_v10 = vadd.f32 -1.0, %v13938_v2  ;;  %11934 = vmatprep.mubr.msk.f32.mxu1 %vm14255_vm1, %v14256_v6  ;;  %12347 = vmatprep.mubr.msk.f32.mxu0 %vm14255_vm1, %v14256_v6  ;;  %v10501_v2 = vld [vmem:[%s18308_s20 + $0x2d8] sm:$0xff] }
 0x250   :  { %13943 = vpow2.f32 %v1414_v3  ;;  %v1405_v13 = vmin.f32 %v15267_v5, 0.0  ;;  %13545 = vmatpush3.bf16.msk.msra.mxu0 %vm14374_vm3, %v14369_v7  ;;  %vm1398_vm0 = vcmp.gt.f32.partialorder %v15267_v5, 0.0 }
 0x251   :  { %v1429_v14 = vsel %vm1394_vm12, %v15199_v20, %v10237_v10  ;;  %v1385_v16 = vpop.f32.mrb[68].mxu0  ;;  %13549 = vmatprep.subr.bf16.mxu0 %v14254_v0  ;;  %v10473_v20 = vld [vmem:[%s18308_s20 + $0x2b8] sm:$0xff] }
 0x252   :  { %v13940_v15 = vpop.eup %13939  ;;  %v1416_v17 = vmul.f32 1.442695, %v1405_v13  ;;  %v15286_v18 = vadd.f32 %v15108_v23, %v1385_v16  ;;  %v11926_v29 = vpop.f32.mrb[69].mxu0  ;;  %11935 = vmatmul.mubr.msk.f32.vlgmr.msra.gmra.mrb[54].mxu1 %vm418_vm5, %v1429_v14  ;;  %12348 = vmatmul.mubr.msk.f32.gmra.mrb[174].mxu0 %vm74_vm4, %v10472_v11  ;;  %v10502_v16 = vld [vmem:[%s18308_s20 + $0x2e0] sm:$0xff] }
 0x253   :  { %13468 = vmatpush3.bf16.msra.mxu1 %v13467_v12  ;;  %11937 = vmatprep.mubr.msk.f32.mxu1 %vm14255_vm1, %v14256_v6  ;;  %v10238_v19 = vadd.f32 -1.0, %v13940_v15 }
 0x254   :  { %13945 = vpow2.f32 %v1416_v17  ;;  %v1406_v21 = vmin.f32 %v15286_v18, 0.0  ;;  %12350 = vmatprep.mubr.msk.f32.mxu0 %vm14255_vm1, %v14256_v6  ;;  %13476 = vmatprep.subr.bf16.mxu1 %v14254_v0  ;;  %vm1399_vm6 = vcmp.gt.f32.partialorder %v15286_v18, 0.0  ;;  %v10306_v17 = vld [vmem:[%s18285_s4 + $0x60] sm:$0xff] }
 0x255   :  { %v1390_v22 = vpop.f32.mrb[70].mxu0  ;;  %v1430_v24 = vsel %vm1395_vm13, %v15214_v31, %v10238_v19  ;;  %v10474_v31 = vld [vmem:[%s18308_s20 + $0x2c0] sm:$0xff] }
 0x256   :  { %v13942_v25 = vpop.eup %13941  ;;  %v1418_v26 = vmul.f32 1.442695, %v1406_v21  ;;  %v15302_v27 = vadd.f32 %v15108_v23, %v1390_v22  ;;  %v11929_v28 = vpop.f32.mrb[71].mxu0  ;;  %11938 = vmatmul.mubr.msk.f32.gmra.mrb[56].mxu1 %vm418_vm5, %v1430_v24  ;;  %12351 = vmatmul.mubr.msk.f32.gmra.mrb[176].mxu0 %vm74_vm4, %v10473_v20 }
 0x257   :  { %11940 = vmatprep.mubr.msk.f32.mxu1 %vm14255_vm1, %v14256_v6  ;;  %12353 = vmatprep.mubr.msk.f32.mxu0 %vm14255_vm1, %v14256_v6  ;;  %v10239_v30 = vadd.f32 -1.0, %v13942_v25 }
 0x258   :  { %13947 = vpow2.f32 %v1418_v26  ;;  %v1407_v32 = vmin.f32 %v15302_v27, 0.0  ;;  %vm1400_vm7 = vcmp.gt.f32.partialorder %v15302_v27, 0.0  ;;  %v10503_v26 = vld [vmem:[%s18308_s20 + $0x2e8] sm:$0xff] }
 0x259   :  { %v1662_v34 = vpop.f32.mrb[72].mxu0  ;;  %v1431_v35 = vsel %vm1396_vm14, %v15229_v43, %v10239_v30  ;;  %v10475_v43 = vld [vmem:[%s18308_s20 + $0x2c8] sm:$0xff] }
 0x25a   :  { %v13944_v36 = vpop.eup %13943  ;;  %v1420_v38 = vmul.f32 1.442695, %v1407_v32  ;;  %v15317_v39 = vadd.f32 %v15108_v23, %v1662_v34  ;;  %11941 = vmatmul.mubr.msk.f32.gmra.mrb[58].mxu1 %vm418_vm5, %v1431_v35  ;;  %v11965_v40 = vpop.f32.mrb[73].mxu0  ;;  %12354 = vmatmul.mubr.msk.f32.gmra.mrb[178].mxu0 %vm74_vm4, %v10474_v31 }
 0x25b   :  { %11943 = vmatprep.mubr.msk.f32.mxu1 %vm14255_vm1, %v14256_v6  ;;  %12356 = vmatprep.mubr.msk.f32.mxu0 %vm14255_vm1, %v14256_v6  ;;  %v10240_v42 = vadd.f32 -1.0, %v13944_v36 }
 0x25c   :  { %13949 = vpow2.f32 %v1420_v38  ;;  %v1703_v44 = vmin.f32 %v15317_v39, 0.0  ;;  %vm1696_vm8 = vcmp.gt.f32.partialorder %v15317_v39, 0.0 }
 0x25d   :  { %v1667_v46 = vpop.f32.mrb[74].mxu0  ;;  %v1432_v47 = vsel %vm1397_vm15, %v15244_v55, %v10240_v42  ;;  %v10476_v55 = vld [vmem:[%s18308_s20 + $0x2d0] sm:$0x3] }
 0x25e   :  { %v13946_v48 = vpop.eup %13945  ;;  %v1710_v50 = vmul.f32 1.442695, %v1703_v44  ;;  %v15332_v52 = vadd.f32 %v15108_v23, %v1667_v46  ;;  %11944 = vmatmul.mubr.msk.f32.gmra.mrb[60].mxu1 %vm418_vm5, %v1432_v47  ;;  %v11968_v53 = vpop.f32.mrb[75].mxu0  ;;  %12357 = vmatmul.mubr.msk.f32.gmra.mrb[180].mxu0 %vm74_vm4, %v10475_v43 }
 0x25f   :  { %11946 = vmatprep.mubr.msk.f32.mxu1 %vm14255_vm1, %v14256_v6  ;;  %12359 = vmatprep.mubr.msk.f32.mxu0 %vm14255_vm1, %v14256_v6  ;;  %v10241_v54 = vadd.f32 -1.0, %v13946_v48 }
 0x260   :  { %13951 = vpow2.f32 %v1710_v50  ;;  %v1704_v56 = vmin.f32 %v15332_v52, 0.0  ;;  %vm1697_vm9 = vcmp.gt.f32.partialorder %v15332_v52, 0.0 }
 0x261   :  { %v1672_v59 = vpop.f32.mrb[76].mxu0  ;;  %v1433_v60 = vsel %vm1398_vm0, %v15267_v5, %v10241_v54 }
 0x262   :  { %v13948_v61 = vpop.eup %13947  ;;  %v1712_v62 = vmul.f32 1.442695, %v1704_v56  ;;  %v15347_v58 = vadd.f32 %v15108_v23, %v1672_v59  ;;  %11947 = vmatmul.mubr.msk.f32.gmra.mrb[62].mxu1 %vm418_vm5, %v1433_v60  ;;  %v11971_v63 = vpop.f32.mrb[77].mxu0  ;;  %12360 = vmatmul.mubr.msk.f32.gmra.mrb[182].mxu0 %vm74_vm4, %v10476_v55 }
 0x263   :  { %11949 = vmatprep.mubr.msk.f32.mxu1 %vm14255_vm1, %v14256_v6  ;;  %12395 = vmatprep.mubr.msk.f32.mxu0 %vm14255_vm1, %v14256_v6  ;;  %v10242_v1 = vadd.f32 -1.0, %v13948_v61 }
 0x264   :  { %13953 = vpow2.f32 %v1712_v62  ;;  %v1705_v3 = vmin.f32 %v15347_v58, 0.0  ;;  %vm1698_vm10 = vcmp.gt.f32.partialorder %v15347_v58, 0.0 }
 0x265   :  { %v1677_v5 = vpop.f32.mrb[78].mxu0  ;;  %v1434_v9 = vsel %vm1399_vm6, %v15286_v18, %v10242_v1  ;;  %v10307_v18 = vld [vmem:[%s18285_s4 + $0x68] sm:$0xff] }
 0x266   :  { %v13950_v10 = vpop.eup %13949  ;;  %v1714_v11 = vmul.f32 1.442695, %v1705_v3  ;;  %v15362_v12 = vadd.f32 %v15108_v23, %v1677_v5  ;;  %11950 = vmatmul.mubr.msk.f32.gmra.mrb[64].mxu1 %vm418_vm5, %v1434_v9  ;;  %v11974_v13 = vpop.f32.mrb[79].mxu0  ;;  %12396 = vmatmul.mubr.msk.f32.vlgmr.msra.gmra.mrb[184].mxu0 %vm74_vm4, %v10501_v2 }
 0x267   :  { %13551 = vmatpush3.bf16.msra.mxu0 %v14359_v4  ;;  %11952 = vmatprep.mubr.msk.f32.mxu1 %vm14255_vm1, %v14256_v6  ;;  %v10243_v14 = vadd.f32 -1.0, %v13950_v10 }
 0x268   :  { %13955 = vpow2.f32 %v1714_v11  ;;  %v1706_v15 = vmin.f32 %v15362_v12, 0.0  ;;  %12398 = vmatprep.mubr.msk.f32.mxu0 %vm14255_vm1, %v14256_v6  ;;  %13552 = vmatprep.subr.bf16.mxu0 %v14254_v0  ;;  %vm1699_vm11 = vcmp.gt.f32.partialorder %v15362_v12, 0.0 }
 0x269   :  { %v1682_v29 = vpop.f32.mrb[80].mxu0  ;;  %v1435_v19 = vsel %vm1400_vm7, %v15302_v27, %v10243_v14  ;;  %v13477_v27 = vpack.c.bf16 %v10307_v18, %v10306_v17 }
 0x26a   :  { %v13952_v20 = vpop.eup %13951  ;;  %v1716_v21 = vmul.f32 1.442695, %v1706_v15  ;;  %v15385_v22 = vadd.f32 %v15108_v23, %v1682_v29  ;;  %11953 = vmatmul.mubr.msk.f32.gmra.mrb[66].mxu1 %vm418_vm5, %v1435_v19  ;;  %v11977_v24 = vpop.f32.mrb[81].mxu0  ;;  %12399 = vmatmul.mubr.msk.f32.gmra.mrb[186].mxu0 %vm74_vm4, %v10502_v16 }
 0x26b   :  { %v10268_v25 = vadd.f32 -1.0, %v13952_v20  ;;  %11988 = vmatprep.mubr.msk.f32.mxu1 %vm14255_vm1, %v14256_v6  ;;  %12401 = vmatprep.mubr.msk.f32.mxu0 %vm14255_vm1, %v14256_v6  ;;  %v10532_v20 = vld [vmem:[%s18308_s20 + $0x310] sm:$0xff] }
 0x26c   :  { %13957 = vpow2.f32 %v1716_v21  ;;  %v1707_v28 = vmin.f32 %v15385_v22, 0.0  ;;  %13555 = vmatpush3.bf16.msk.msra.mxu0 %vm14374_vm3, %v14369_v7  ;;  %vm1700_vm12 = vcmp.gt.f32.partialorder %v15385_v22, 0.0 }
 0x26d   :  { %v1731_v30 = vsel %vm1696_vm8, %v15317_v39, %v10268_v25  ;;  %v1687_v31 = vpop.f32.mrb[82].mxu0  ;;  %13559 = vmatprep.subr.bf16.mxu0 %v14254_v0  ;;  %v10504_v39 = vld [vmem:[%s18308_s20 + $0x2f0] sm:$0xff] }
 0x26e   :  { %v13954_v32 = vpop.eup %13953  ;;  %v1718_v34 = vmul.f32 1.442695, %v1707_v28  ;;  %v15404_v35 = vadd.f32 %v15108_v23, %v1687_v31  ;;  %v11980_v36 = vpop.f32.mrb[83].mxu0  ;;  %11989 = vmatmul.mubr.msk.f32.vlgmr.msra.gmra.mrb[68].mxu1 %vm418_vm5, %v1731_v30  ;;  %12402 = vmatmul.mubr.msk.f32.gmra.mrb[188].mxu0 %vm74_vm4, %v10503_v26  ;;  %v10533_v31 = vld [vmem:[%s18308_s20 + $0x318] sm:$0xff] }
 0x26f   :  { %13478 = vmatpush3.bf16.msra.mxu1 %v13477_v27  ;;  %11991 = vmatprep.mubr.msk.f32.mxu1 %vm14255_vm1, %v14256_v6  ;;  %v10269_v38 = vadd.f32 -1.0, %v13954_v32 }
 0x270   :  { %13959 = vpow2.f32 %v1718_v34  ;;  %v1708_v40 = vmin.f32 %v15404_v35, 0.0  ;;  %12404 = vmatprep.mubr.msk.f32.mxu0 %vm14255_vm1, %v14256_v6  ;;  %13486 = vmatprep.subr.bf16.mxu1 %v14254_v0  ;;  %vm1701_vm13 = vcmp.gt.f32.partialorder %v15404_v35, 0.0  ;;  %v10337_v34 = vld [vmem:[%s18285_s4 + $0x70] sm:$0xff] }
 0x271   :  { %v1692_v42 = vpop.f32.mrb[84].mxu0  ;;  %v1732_v43 = vsel %vm1697_vm9, %v15332_v52, %v10269_v38  ;;  %v10505_v52 = vld [vmem:[%s18308_s20 + $0x2f8] sm:$0xff] }
 0x272   :  { %v13956_v44 = vpop.eup %13955  ;;  %v1720_v46 = vmul.f32 1.442695, %v1708_v40  ;;  %v15420_v47 = vadd.f32 %v15108_v23, %v1692_v42  ;;  %v11983_v48 = vpop.f32.mrb[85].mxu0  ;;  %11992 = vmatmul.mubr.msk.f32.gmra.mrb[70].mxu1 %vm418_vm5, %v1732_v43  ;;  %12405 = vmatmul.mubr.msk.f32.gmra.mrb[190].mxu0 %vm74_vm4, %v10504_v39 }
 0x273   :  { %11994 = vmatprep.mubr.msk.f32.mxu1 %vm14255_vm1, %v14256_v6  ;;  %12407 = vmatprep.mubr.msk.f32.mxu0 %vm14255_vm1, %v14256_v6  ;;  %v10270_v50 = vadd.f32 -1.0, %v13956_v44 }
 0x274   :  { %13961 = vpow2.f32 %v1720_v46  ;;  %v1709_v53 = vmin.f32 %v15420_v47, 0.0  ;;  %vm1702_vm14 = vcmp.gt.f32.partialorder %v15420_v47, 0.0  ;;  %v10534_v46 = vld [vmem:[%s18308_s20 + $0x320] sm:$0xff] }
 0x275   :  { %v1964_v54 = vpop.f32.mrb[86].mxu0  ;;  %v1733_v55 = vsel %vm1698_vm10, %v15347_v58, %v10270_v50  ;;  %v10506_v58 = vld [vmem:[%s18308_s20 + $0x300] sm:$0xff] }
 0x276   :  { %v13958_v56 = vpop.eup %13957  ;;  %v1722_v59 = vmul.f32 1.442695, %v1709_v53  ;;  %v15435_v60 = vadd.f32 %v15108_v23, %v1964_v54  ;;  %11995 = vmatmul.mubr.msk.f32.gmra.mrb[72].mxu1 %vm418_vm5, %v1733_v55  ;;  %v12019_v61 = vpop.f32.mrb[87].mxu0  ;;  %12408 = vmatmul.mubr.msk.f32.gmra.mrb[192].mxu0 %vm74_vm4, %v10505_v52 }
 0x277   :  { %11997 = vmatprep.mubr.msk.f32.mxu1 %vm14255_vm1, %v14256_v6  ;;  %12410 = vmatprep.mubr.msk.f32.mxu0 %vm14255_vm1, %v14256_v6  ;;  %v10271_v62 = vadd.f32 -1.0, %v13958_v56 }
 0x278   :  { %13963 = vpow2.f32 %v1722_v59  ;;  %v2005_v63 = vmin.f32 %v15435_v60, 0.0  ;;  %vm1998_vm15 = vcmp.gt.f32.partialorder %v15435_v60, 0.0 }
 0x279   :  { %v1969_v1 = vpop.f32.mrb[88].mxu0  ;;  %v1734_v2 = vsel %vm1699_vm11, %v15362_v12, %v10271_v62  ;;  %v10507_v12 = vld [vmem:[%s18308_s20 + $0x308] sm:$0x3] }
 0x27a   :  { %v13960_v3 = vpop.eup %13959  ;;  %v2012_v5 = vmul.f32 1.442695, %v2005_v63  ;;  %v15450_v9 = vadd.f32 %v15108_v23, %v1969_v1  ;;  %11998 = vmatmul.mubr.msk.f32.gmra.mrb[74].mxu1 %vm418_vm5, %v1734_v2  ;;  %v12022_v10 = vpop.f32.mrb[89].mxu0  ;;  %12411 = vmatmul.mubr.msk.f32.gmra.mrb[194].mxu0 %vm74_vm4, %v10506_v58 }
 0x27b   :  { %12000 = vmatprep.mubr.msk.f32.mxu1 %vm14255_vm1, %v14256_v6  ;;  %12413 = vmatprep.mubr.msk.f32.mxu0 %vm14255_vm1, %v14256_v6  ;;  %v10272_v11 = vadd.f32 -1.0, %v13960_v3 }
 0x27c   :  { %13965 = vpow2.f32 %v2012_v5  ;;  %v2006_v13 = vmin.f32 %v15450_v9, 0.0  ;;  %vm1999_vm0 = vcmp.gt.f32.partialorder %v15450_v9, 0.0 }
 0x27d   :  { %v1974_v14 = vpop.f32.mrb[90].mxu0  ;;  %v1735_v16 = vsel %vm1700_vm12, %v15385_v22, %v10272_v11 }
 0x27e   :  { %v13962_v15 = vpop.eup %13961  ;;  %v2014_v17 = vmul.f32 1.442695, %v2006_v13  ;;  %v15465_v18 = vadd.f32 %v15108_v23, %v1974_v14  ;;  %12001 = vmatmul.mubr.msk.f32.gmra.mrb[76].mxu1 %vm418_vm5, %v1735_v16  ;;  %v12025_v29 = vpop.f32.mrb[91].mxu0  ;;  %12414 = vmatmul.mubr.msk.f32.gmra.mrb[196].mxu0 %vm74_vm4, %v10507_v12 }
 0x27f   :  { %12003 = vmatprep.mubr.msk.f32.mxu1 %vm14255_vm1, %v14256_v6  ;;  %12449 = vmatprep.mubr.msk.f32.mxu0 %vm14255_vm1, %v14256_v6  ;;  %v10273_v19 = vadd.f32 -1.0, %v13962_v15 }
 0x280   :  { %13967 = vpow2.f32 %v2014_v17  ;;  %v2007_v21 = vmin.f32 %v15465_v18, 0.0  ;;  %vm2000_vm6 = vcmp.gt.f32.partialorder %v15465_v18, 0.0 }
 0x281   :  { %v1979_v22 = vpop.f32.mrb[92].mxu0  ;;  %v1736_v24 = vsel %vm1701_vm13, %v15404_v35, %v10273_v19  ;;  %v10338_v35 = vld [vmem:[%s18285_s4 + $0x78] sm:$0xff] }
 0x282   :  { %v13964_v25 = vpop.eup %13963  ;;  %v2016_v26 = vmul.f32 1.442695, %v2007_v21  ;;  %v15480_v27 = vadd.f32 %v15108_v23, %v1979_v22  ;;  %12004 = vmatmul.mubr.msk.f32.gmra.mrb[78].mxu1 %vm418_vm5, %v1736_v24  ;;  %v12028_v28 = vpop.f32.mrb[93].mxu0  ;;  %12450 = vmatmul.mubr.msk.f32.vlgmr.msra.gmra.mrb[198].mxu0 %vm74_vm4, %v10532_v20 }
 0x283   :  { %13561 = vmatpush3.bf16.msra.mxu0 %v14359_v4  ;;  %12006 = vmatprep.mubr.msk.f32.mxu1 %vm14255_vm1, %v14256_v6  ;;  %v10274_v30 = vadd.f32 -1.0, %v13964_v25 }
 0x284   :  { %13969 = vpow2.f32 %v2016_v26  ;;  %v2008_v32 = vmin.f32 %v15480_v27, 0.0  ;;  %12452 = vmatprep.mubr.msk.f32.mxu0 %vm14255_vm1, %v14256_v6  ;;  %13562 = vmatprep.subr.bf16.mxu0 %v14254_v0  ;;  %vm2001_vm7 = vcmp.gt.f32.partialorder %v15480_v27, 0.0 }
 0x285   :  { %v1984_v36 = vpop.f32.mrb[94].mxu0  ;;  %v1737_v38 = vsel %vm1702_vm14, %v15420_v47, %v10274_v30  ;;  %v13487_v47 = vpack.c.bf16 %v10338_v35, %v10337_v34 }
 0x286   :  { %v13966_v39 = vpop.eup %13965  ;;  %v2018_v40 = vmul.f32 1.442695, %v2008_v32  ;;  %v15503_v42 = vadd.f32 %v15108_v23, %v1984_v36  ;;  %12007 = vmatmul.mubr.msk.f32.gmra.mrb[80].mxu1 %vm418_vm5, %v1737_v38  ;;  %v12031_v43 = vpop.f32.mrb[95].mxu0  ;;  %12453 = vmatmul.mubr.msk.f32.gmra.mrb[200].mxu0 %vm74_vm4, %v10533_v31 }
 0x287   :  { %v10299_v44 = vadd.f32 -1.0, %v13966_v39  ;;  %12042 = vmatprep.mubr.msk.f32.mxu1 %vm14255_vm1, %v14256_v6  ;;  %12455 = vmatprep.mubr.msk.f32.mxu0 %vm14255_vm1, %v14256_v6  ;;  %v10563_v39 = vld [vmem:[%s18308_s20 + $0x348] sm:$0xff] }
 0x288   :  { %13971 = vpow2.f32 %v2018_v40  ;;  %v2009_v48 = vmin.f32 %v15503_v42, 0.0  ;;  %13565 = vmatpush3.bf16.msk.msra.mxu0 %vm14374_vm3, %v14369_v7  ;;  %vm2002_vm8 = vcmp.gt.f32.partialorder %v15503_v42, 0.0 }
 0x289   :  { %v2033_v50 = vsel %vm1998_vm15, %v15435_v60, %v10299_v44  ;;  %v1989_v52 = vpop.f32.mrb[96].mxu0  ;;  %13569 = vmatprep.subr.bf16.mxu0 %v14254_v0  ;;  %v10535_v60 = vld [vmem:[%s18308_s20 + $0x328] sm:$0xff] }
 0x28a   :  { %v13968_v53 = vpop.eup %13967  ;;  %v2020_v54 = vmul.f32 1.442695, %v2009_v48  ;;  %v15522_v55 = vadd.f32 %v15108_v23, %v1989_v52  ;;  %v12034_v56 = vpop.f32.mrb[97].mxu0  ;;  %12043 = vmatmul.mubr.msk.f32.vlgmr.msra.gmra.mrb[82].mxu1 %vm418_vm5, %v2033_v50  ;;  %12456 = vmatmul.mubr.msk.f32.gmra.mrb[202].mxu0 %vm74_vm4, %v10534_v46  ;;  %v10564_v52 = vld [vmem:[%s18308_s20 + $0x350] sm:$0xff] }
 0x28b   :  { %13488 = vmatpush3.bf16.msra.mxu1 %v13487_v47  ;;  %12045 = vmatprep.mubr.msk.f32.mxu1 %vm14255_vm1, %v14256_v6  ;;  %v10300_v59 = vadd.f32 -1.0, %v13968_v53 }
 0x28c   :  { %13973 = vpow2.f32 %v2020_v54  ;;  %v2010_v61 = vmin.f32 %v15522_v55, 0.0  ;;  %12458 = vmatprep.mubr.msk.f32.mxu0 %vm14255_vm1, %v14256_v6  ;;  %13496 = vmatprep.subr.bf16.mxu1 %v14254_v0  ;;  %vm2003_vm9 = vcmp.gt.f32.partialorder %v15522_v55, 0.0  ;;  %v10368_v54 = vld [vmem:[%s18285_s4 + $0x80] sm:$0xff] }
 0x28d   :  { %v1994_v62 = vpop.f32.mrb[98].mxu0  ;;  %v2034_v58 = vsel %vm1999_vm0, %v15450_v9, %v10300_v59  ;;  %v10536_v9 = vld [vmem:[%s18308_s20 + $0x330] sm:$0xff] }
 0x28e   :  { %v13970_v63 = vpop.eup %13969  ;;  %v2022_v1 = vmul.f32 1.442695, %v2010_v61  ;;  %v15538_v2 = vadd.f32 %v15108_v23, %v1994_v62  ;;  %v12037_v3 = vpop.f32.mrb[99].mxu0  ;;  %12046 = vmatmul.mubr.msk.f32.gmra.mrb[84].mxu1 %vm418_vm5, %v2034_v58  ;;  %12459 = vmatmul.mubr.msk.f32.gmra.mrb[204].mxu0 %vm74_vm4, %v10535_v60 }
 0x28f   :  { %12048 = vmatprep.mubr.msk.f32.mxu1 %vm14255_vm1, %v14256_v6  ;;  %12461 = vmatprep.mubr.msk.f32.mxu0 %vm14255_vm1, %v14256_v6  ;;  %v10301_v5 = vadd.f32 -1.0, %v13970_v63 }
 0x290   :  { %13975 = vpow2.f32 %v2022_v1  ;;  %v2011_v10 = vmin.f32 %v15538_v2, 0.0  ;;  %vm2004_vm10 = vcmp.gt.f32.partialorder %v15538_v2, 0.0  ;;  %v10565_v1 = vld [vmem:[%s18308_s20 + $0x358] sm:$0xff] }
 0x291   :  { %v2266_v11 = vpop.f32.mrb[100].mxu0  ;;  %v2035_v12 = vsel %vm2000_vm6, %v15465_v18, %v10301_v5  ;;  %v10537_v18 = vld [vmem:[%s18308_s20 + $0x338] sm:$0xff] }
 0x292   :  { %v13972_v13 = vpop.eup %13971  ;;  %v2024_v14 = vmul.f32 1.442695, %v2011_v10  ;;  %v15553_v16 = vadd.f32 %v15108_v23, %v2266_v11  ;;  %12049 = vmatmul.mubr.msk.f32.gmra.mrb[86].mxu1 %vm418_vm5, %v2035_v12  ;;  %v12073_v15 = vpop.f32.mrb[101].mxu0  ;;  %12462 = vmatmul.mubr.msk.f32.gmra.mrb[206].mxu0 %vm74_vm4, %v10536_v9 }
 0x293   :  { %12051 = vmatprep.mubr.msk.f32.mxu1 %vm14255_vm1, %v14256_v6  ;;  %12464 = vmatprep.mubr.msk.f32.mxu0 %vm14255_vm1, %v14256_v6  ;;  %v10302_v17 = vadd.f32 -1.0, %v13972_v13 }
 0x294   :  { %13977 = vpow2.f32 %v2024_v14  ;;  %v2307_v29 = vmin.f32 %v15553_v16, 0.0  ;;  %vm2300_vm11 = vcmp.gt.f32.partialorder %v15553_v16, 0.0 }
 0x295   :  { %v2271_v19 = vpop.f32.mrb[102].mxu0  ;;  %v2036_v20 = vsel %vm2001_vm7, %v15480_v27, %v10302_v17  ;;  %v10538_v27 = vld [vmem:[%s18308_s20 + $0x340] sm:$0x3] }
 0x296   :  { %v13974_v21 = vpop.eup %13973  ;;  %v2314_v22 = vmul.f32 1.442695, %v2307_v29  ;;  %v15568_v24 = vadd.f32 %v15108_v23, %v2271_v19  ;;  %12052 = vmatmul.mubr.msk.f32.gmra.mrb[88].mxu1 %vm418_vm5, %v2036_v20  ;;  %v12076_v25 = vpop.f32.mrb[103].mxu0  ;;  %12465 = vmatmul.mubr.msk.f32.gmra.mrb[208].mxu0 %vm74_vm4, %v10537_v18  ;;  %v15658_v19 = vld [vmem:[%s18286_s3] ss:$0 sm:$0xff] }
 0x297   :  { %12054 = vmatprep.mubr.msk.f32.mxu1 %vm14255_vm1, %v14256_v6  ;;  %12467 = vmatprep.mubr.msk.f32.mxu0 %vm14255_vm1, %v14256_v6  ;;  %v10303_v26 = vadd.f32 -1.0, %v13974_v21 }
 0x298   :  { %13979 = vpow2.f32 %v2314_v22  ;;  %v2308_v28 = vmin.f32 %v15568_v24, 0.0  ;;  %vm2301_vm12 = vcmp.gt.f32.partialorder %v15568_v24, 0.0 }
 0x299   :  { %v2276_v30 = vpop.f32.mrb[104].mxu0  ;;  %v2037_v31 = vsel %vm2002_vm8, %v15503_v42, %v10303_v26 }
 0x29a   :  { %v13976_v32 = vpop.eup %13975  ;;  %v2316_v34 = vmul.f32 1.442695, %v2308_v28  ;;  %v15583_v35 = vadd.f32 %v15108_v23, %v2276_v30  ;;  %12055 = vmatmul.mubr.msk.f32.gmra.mrb[90].mxu1 %vm418_vm5, %v2037_v31  ;;  %v12079_v36 = vpop.f32.mrb[105].mxu0  ;;  %12468 = vmatmul.mubr.msk.f32.gmra.mrb[210].mxu0 %vm74_vm4, %v10538_v27 }
 0x29b   :  { %12057 = vmatprep.mubr.msk.f32.mxu1 %vm14255_vm1, %v14256_v6  ;;  %12503 = vmatprep.mubr.msk.f32.mxu0 %vm14255_vm1, %v14256_v6  ;;  %v10304_v38 = vadd.f32 -1.0, %v13976_v32 }
 0x29c   :  { %13981 = vpow2.f32 %v2316_v34  ;;  %v2309_v40 = vmin.f32 %v15583_v35, 0.0  ;;  %vm2302_vm13 = vcmp.gt.f32.partialorder %v15583_v35, 0.0 }
 0x29d   :  { %v2281_v42 = vpop.f32.mrb[106].mxu0  ;;  %v2038_v43 = vsel %vm2003_vm9, %v15522_v55, %v10304_v38  ;;  %v10369_v55 = vld [vmem:[%s18285_s4 + $0x88] sm:$0xff] }
 0x29e   :  { %v13978_v44 = vpop.eup %13977  ;;  %v2318_v46 = vmul.f32 1.442695, %v2309_v40  ;;  %v15598_v47 = vadd.f32 %v15108_v23, %v2281_v42  ;;  %12058 = vmatmul.mubr.msk.f32.gmra.mrb[92].mxu1 %vm418_vm5, %v2038_v43  ;;  %v12082_v48 = vpop.f32.mrb[107].mxu0  ;;  %12504 = vmatmul.mubr.msk.f32.vlgmr.msra.gmra.mrb[212].mxu0 %vm74_vm4, %v10563_v39 }
 0x29f   :  { %13571 = vmatpush3.bf16.msra.mxu0 %v14359_v4  ;;  %12060 = vmatprep.mubr.msk.f32.mxu1 %vm14255_vm1, %v14256_v6  ;;  %v10305_v50 = vadd.f32 -1.0, %v13978_v44 }
 0x2a0   :  { %13983 = vpow2.f32 %v2318_v46  ;;  %v2310_v53 = vmin.f32 %v15598_v47, 0.0  ;;  %12506 = vmatprep.mubr.msk.f32.mxu0 %vm14255_vm1, %v14256_v6  ;;  %13572 = vmatprep.subr.bf16.mxu0 %v14254_v0  ;;  %vm2303_vm14 = vcmp.gt.f32.partialorder %v15598_v47, 0.0 }
 0x2a1   :  { %v2286_v56 = vpop.f32.mrb[108].mxu0  ;;  %v2039_v59 = vsel %vm2004_vm10, %v15538_v2, %v10305_v50  ;;  %v13497_v2 = vpack.c.bf16 %v10369_v55, %v10368_v54 }
 0x2a2   :  { %v13980_v60 = vpop.eup %13979  ;;  %v2320_v61 = vmul.f32 1.442695, %v2310_v53  ;;  %v15621_v62 = vadd.f32 %v15108_v23, %v2286_v56  ;;  %12061 = vmatmul.mubr.msk.f32.gmra.mrb[94].mxu1 %vm418_vm5, %v2039_v59  ;;  %v12085_v58 = vpop.f32.mrb[109].mxu0  ;;  %12507 = vmatmul.mubr.msk.f32.gmra.mrb[214].mxu0 %vm74_vm4, %v10564_v52 }
 0x2a3   :  { %v10330_v63 = vadd.f32 -1.0, %v13980_v60  ;;  %12096 = vmatprep.mubr.msk.f32.mxu1 %vm14255_vm1, %v14256_v6  ;;  %12509 = vmatprep.mubr.msk.f32.mxu0 %vm14255_vm1, %v14256_v6  ;;  %v10594_v60 = vld [vmem:[%s18308_s20 + $0x380] sm:$0xff] }
 0x2a4   :  { %13985 = vpow2.f32 %v2320_v61  ;;  %v2311_v3 = vmin.f32 %v15621_v62, 0.0  ;;  %13575 = vmatpush3.bf16.msk.msra.mxu0 %vm14374_vm3, %v14369_v7  ;;  %vm2304_vm15 = vcmp.gt.f32.partialorder %v15621_v62, 0.0 }
 0x2a5   :  { %v2335_v5 = vsel %vm2300_vm11, %v15553_v16, %v10330_v63  ;;  %v2291_v9 = vpop.f32.mrb[110].mxu0  ;;  %13579 = vmatprep.subr.bf16.mxu0 %v14254_v0  ;;  %v10566_v16 = vld [vmem:[%s18308_s20 + $0x360] sm:$0xff] }
 0x2a6   :  { %v13982_v10 = vpop.eup %13981  ;;  %v2322_v11 = vmul.f32 1.442695, %v2311_v3  ;;  %v15640_v12 = vadd.f32 %v15108_v23, %v2291_v9  ;;  %v12088_v13 = vpop.f32.mrb[111].mxu0  ;;  %12097 = vmatmul.mubr.msk.f32.vlgmr.msra.gmra.mrb[96].mxu1 %vm418_vm5, %v2335_v5  ;;  %12510 = vmatmul.mubr.msk.f32.gmra.mrb[216].mxu0 %vm74_vm4, %v10565_v1  ;;  %v10595_v9 = vld [vmem:[%s18308_s20 + $0x388] sm:$0xff] }
 0x2a7   :  { %13498 = vmatpush3.bf16.msra.mxu1 %v13497_v2  ;;  %12099 = vmatprep.mubr.msk.f32.mxu1 %vm14255_vm1, %v14256_v6  ;;  %v10331_v14 = vadd.f32 -1.0, %v13982_v10 }
 0x2a8   :  { %13987 = vpow2.f32 %v2322_v11  ;;  %v2312_v15 = vmin.f32 %v15640_v12, 0.0  ;;  %12512 = vmatprep.mubr.msk.f32.mxu0 %vm14255_vm1, %v14256_v6  ;;  %13506 = vmatprep.subr.bf16.mxu1 %v14254_v0  ;;  %vm2305_vm0 = vcmp.gt.f32.partialorder %v15640_v12, 0.0  ;;  %v10399_v11 = vld [vmem:[%s18285_s4 + $0x90] sm:$0xff] }
 0x2a9   :  { %v2296_v23 = vpop.f32.mrb[112].mxu0  ;;  %v2336_v17 = vsel %vm2301_vm12, %v15568_v24, %v10331_v14  ;;  %v10567_v24 = vld [vmem:[%s18308_s20 + $0x368] sm:$0xff] }
 0x2aa   :  { %v13984_v18 = vpop.eup %13983  ;;  %v2324_v29 = vmul.f32 1.442695, %v2312_v15  ;;  %v15661_v20 = vadd.f32 %v15658_v19, %v2296_v23  ;;  %v12091_v21 = vpop.f32.mrb[113].mxu0  ;;  %12100 = vmatmul.mubr.msk.f32.gmra.mrb[98].mxu1 %vm418_vm5, %v2336_v17  ;;  %12513 = vmatmul.mubr.msk.f32.gmra.mrb[218].mxu0 %vm74_vm4, %v10566_v16 }
 0x2ab   :  { %12102 = vmatprep.mubr.msk.f32.mxu1 %vm14255_vm1, %v14256_v6  ;;  %12515 = vmatprep.mubr.msk.f32.mxu0 %vm14255_vm1, %v14256_v6  ;;  %v10332_v22 = vadd.f32 -1.0, %v13984_v18 }
 0x2ac   :  { %13989 = vpow2.f32 %v2324_v29  ;;  %v2313_v25 = vmin.f32 %v15661_v20, 0.0  ;;  %vm2306_vm6 = vcmp.gt.f32.partialorder %v15661_v20, 0.0  ;;  %v10596_v29 = vld [vmem:[%s18308_s20 + $0x390] sm:$0xff] }
 0x2ad   :  { %v2568_v26 = vpop.f32.mrb[114].mxu0  ;;  %v2337_v27 = vsel %vm2302_vm13, %v15583_v35, %v10332_v22  ;;  %v10568_v35 = vld [vmem:[%s18308_s20 + $0x370] sm:$0xff] }
 0x2ae   :  { %v13986_v28 = vpop.eup %13985  ;;  %v2326_v30 = vmul.f32 1.442695, %v2313_v25  ;;  %v15676_v31 = vadd.f32 %v15658_v19, %v2568_v26  ;;  %12103 = vmatmul.mubr.msk.f32.gmra.mrb[100].mxu1 %vm418_vm5, %v2337_v27  ;;  %v12127_v32 = vpop.f32.mrb[115].mxu0  ;;  %12516 = vmatmul.mubr.msk.f32.gmra.mrb[220].mxu0 %vm74_vm4, %v10567_v24 }
 0x2af   :  { %12105 = vmatprep.mubr.msk.f32.mxu1 %vm14255_vm1, %v14256_v6  ;;  %12518 = vmatprep.mubr.msk.f32.mxu0 %vm14255_vm1, %v14256_v6  ;;  %v10333_v34 = vadd.f32 -1.0, %v13986_v28 }
 0x2b0   :  { %13991 = vpow2.f32 %v2326_v30  ;;  %v2609_v36 = vmin.f32 %v15676_v31, 0.0  ;;  %vm2602_vm7 = vcmp.gt.f32.partialorder %v15676_v31, 0.0 }
 0x2b1   :  { %v2573_v38 = vpop.f32.mrb[116].mxu0  ;;  %v2338_v39 = vsel %vm2303_vm14, %v15598_v47, %v10333_v34  ;;  %v10569_v47 = vld [vmem:[%s18308_s20 + $0x378] sm:$0x3] }
 0x2b2   :  { %v13988_v40 = vpop.eup %13987  ;;  %v2616_v42 = vmul.f32 1.442695, %v2609_v36  ;;  %v15691_v43 = vadd.f32 %v15658_v19, %v2573_v38  ;;  %12106 = vmatmul.mubr.msk.f32.gmra.mrb[102].mxu1 %vm418_vm5, %v2338_v39  ;;  %v12130_v44 = vpop.f32.mrb[117].mxu0  ;;  %12519 = vmatmul.mubr.msk.f32.gmra.mrb[222].mxu0 %vm74_vm4, %v10568_v35 }
 0x2b3   :  { %12108 = vmatprep.mubr.msk.f32.mxu1 %vm14255_vm1, %v14256_v6  ;;  %12521 = vmatprep.mubr.msk.f32.mxu0 %vm14255_vm1, %v14256_v6  ;;  %v10334_v46 = vadd.f32 -1.0, %v13988_v40 }
 0x2b4   :  { %13993 = vpow2.f32 %v2616_v42  ;;  %v2610_v48 = vmin.f32 %v15691_v43, 0.0  ;;  %vm2603_vm8 = vcmp.gt.f32.partialorder %v15691_v43, 0.0 }
 0x2b5   :  { %v2578_v50 = vpop.f32.mrb[118].mxu0  ;;  %v2339_v52 = vsel %vm2304_vm15, %v15621_v62, %v10334_v46 }
 0x2b6   :  { %v13990_v53 = vpop.eup %13989  ;;  %v2618_v54 = vmul.f32 1.442695, %v2610_v48  ;;  %v15706_v55 = vadd.f32 %v15658_v19, %v2578_v50  ;;  %12109 = vmatmul.mubr.msk.f32.gmra.mrb[104].mxu1 %vm418_vm5, %v2339_v52  ;;  %v12133_v56 = vpop.f32.mrb[119].mxu0  ;;  %12522 = vmatmul.mubr.msk.f32.gmra.mrb[224].mxu0 %vm74_vm4, %v10569_v47 }
 0x2b7   :  { %12111 = vmatprep.mubr.msk.f32.mxu1 %vm14255_vm1, %v14256_v6  ;;  %12557 = vmatprep.mubr.msk.f32.mxu0 %vm14255_vm1, %v14256_v6  ;;  %v10335_v59 = vadd.f32 -1.0, %v13990_v53 }
 0x2b8   :  { %13995 = vpow2.f32 %v2618_v54  ;;  %v2611_v61 = vmin.f32 %v15706_v55, 0.0  ;;  %vm2604_vm9 = vcmp.gt.f32.partialorder %v15706_v55, 0.0 }
 0x2b9   :  { %v2583_v62 = vpop.f32.mrb[120].mxu0  ;;  %v2340_v58 = vsel %vm2305_vm0, %v15640_v12, %v10335_v59  ;;  %v10400_v12 = vld [vmem:[%s18285_s4 + $0x98] sm:$0xff] }
 0x2ba   :  { %v13992_v63 = vpop.eup %13991  ;;  %v2620_v1 = vmul.f32 1.442695, %v2611_v61  ;;  %v15721_v2 = vadd.f32 %v15658_v19, %v2583_v62  ;;  %12112 = vmatmul.mubr.msk.f32.gmra.mrb[106].mxu1 %vm418_vm5, %v2340_v58  ;;  %v12136_v3 = vpop.f32.mrb[121].mxu0  ;;  %12558 = vmatmul.mubr.msk.f32.vlgmr.msra.gmra.mrb[226].mxu0 %vm74_vm4, %v10594_v60 }
 0x2bb   :  { %13581 = vmatpush3.bf16.msra.mxu0 %v14359_v4  ;;  %12114 = vmatprep.mubr.msk.f32.mxu1 %vm14255_vm1, %v14256_v6  ;;  %v10336_v5 = vadd.f32 -1.0, %v13992_v63 }
 0x2bc   :  { %13997 = vpow2.f32 %v2620_v1  ;;  %v2612_v10 = vmin.f32 %v15721_v2, 0.0  ;;  %12560 = vmatprep.mubr.msk.f32.mxu0 %vm14255_vm1, %v14256_v6  ;;  %13582 = vmatprep.subr.bf16.mxu0 %v14254_v0  ;;  %vm2605_vm10 = vcmp.gt.f32.partialorder %v15721_v2, 0.0 }
 0x2bd   :  { %v2588_v13 = vpop.f32.mrb[122].mxu0  ;;  %v2341_v14 = vsel %vm2306_vm6, %v15661_v20, %v10336_v5  ;;  %v13507_v20 = vpack.c.bf16 %v10400_v12, %v10399_v11 }
 0x2be   :  { %v13994_v16 = vpop.eup %13993  ;;  %v2622_v15 = vmul.f32 1.442695, %v2612_v10  ;;  %v15744_v23 = vadd.f32 %v15658_v19, %v2588_v13  ;;  %12115 = vmatmul.mubr.msk.f32.gmra.mrb[108].mxu1 %vm418_vm5, %v2341_v14  ;;  %v12139_v17 = vpop.f32.mrb[123].mxu0  ;;  %12561 = vmatmul.mubr.msk.f32.gmra.mrb[228].mxu0 %vm74_vm4, %v10595_v9 }
 0x2bf   :  { %v10361_v18 = vadd.f32 -1.0, %v13994_v16  ;;  %12150 = vmatprep.mubr.msk.f32.mxu1 %vm14255_vm1, %v14256_v6  ;;  %12563 = vmatprep.mubr.msk.f32.mxu0 %vm14255_vm1, %v14256_v6  ;;  %v10625_v16 = vld [vmem:[%s18308_s20 + $0x3b8] sm:$0xff] }
 0x2c0   :  { %13999 = vpow2.f32 %v2622_v15  ;;  %v2613_v21 = vmin.f32 %v15744_v23, 0.0  ;;  %13585 = vmatpush3.bf16.msk.msra.mxu0 %vm14374_vm3, %v14369_v7  ;;  %vm2606_vm11 = vcmp.gt.f32.partialorder %v15744_v23, 0.0 }
 0x2c1   :  { %v2637_v22 = vsel %vm2602_vm7, %v15676_v31, %v10361_v18  ;;  %v2593_v24 = vpop.f32.mrb[124].mxu0  ;;  %13589 = vmatprep.subr.bf16.mxu0 %v14254_v0  ;;  %v10597_v31 = vld [vmem:[%s18308_s20 + $0x398] sm:$0xff] }
 0x2c2   :  { %v13996_v25 = vpop.eup %13995  ;;  %v2624_v26 = vmul.f32 1.442695, %v2613_v21  ;;  %v15763_v27 = vadd.f32 %v15658_v19, %v2593_v24  ;;  %v12142_v28 = vpop.f32.mrb[125].mxu0  ;;  %12151 = vmatmul.mubr.msk.f32.vlgmr.msra.gmra.mrb[110].mxu1 %vm418_vm5, %v2637_v22  ;;  %12564 = vmatmul.mubr.msk.f32.gmra.mrb[230].mxu0 %vm74_vm4, %v10596_v29  ;;  %v10626_v24 = vld [vmem:[%s18308_s20 + $0x3c0] sm:$0xff] }
 0x2c3   :  { %13508 = vmatpush3.bf16.msra.mxu1 %v13507_v20  ;;  %12153 = vmatprep.mubr.msk.f32.mxu1 %vm14255_vm1, %v14256_v6  ;;  %v10362_v30 = vadd.f32 -1.0, %v13996_v25 }
 0x2c4   :  { %14001 = vpow2.f32 %v2624_v26  ;;  %v2614_v32 = vmin.f32 %v15763_v27, 0.0  ;;  %12566 = vmatprep.mubr.msk.f32.mxu0 %vm14255_vm1, %v14256_v6  ;;  %13516 = vmatprep.subr.bf16.mxu1 %v14254_v0  ;;  %vm2607_vm12 = vcmp.gt.f32.partialorder %v15763_v27, 0.0  ;;  %v10430_v26 = vld [vmem:[%s18285_s4 + $0xa0] sm:$0xff] }
 0x2c5   :  { %v2598_v34 = vpop.f32.mrb[126].mxu0  ;;  %v2638_v35 = vsel %vm2603_vm8, %v15691_v43, %v10362_v30  ;;  %v10598_v43 = vld [vmem:[%s18308_s20 + $0x3a0] sm:$0xff] }
 0x2c6   :  { %v13998_v36 = vpop.eup %13997  ;;  %v2626_v38 = vmul.f32 1.442695, %v2614_v32  ;;  %v15779_v39 = vadd.f32 %v15658_v19, %v2598_v34  ;;  %v12145_v40 = vpop.f32.mrb[127].mxu0  ;;  %12154 = vmatmul.mubr.msk.f32.gmra.mrb[112].mxu1 %vm418_vm5, %v2638_v35  ;;  %12567 = vmatmul.mubr.msk.f32.gmra.mrb[232].mxu0 %vm74_vm4, %v10597_v31 }
 0x2c7   :  { %12156 = vmatprep.mubr.msk.f32.mxu1 %vm14255_vm1, %v14256_v6  ;;  %12569 = vmatprep.mubr.msk.f32.mxu0 %vm14255_vm1, %v14256_v6  ;;  %v10363_v42 = vadd.f32 -1.0, %v13998_v36 }
 0x2c8   :  { %14003 = vpow2.f32 %v2626_v38  ;;  %v2615_v44 = vmin.f32 %v15779_v39, 0.0  ;;  %vm2608_vm13 = vcmp.gt.f32.partialorder %v15779_v39, 0.0  ;;  %v10627_v38 = vld [vmem:[%s18308_s20 + $0x3c8] sm:$0xff] }
 0x2c9   :  { %v2870_v46 = vpop.f32.mrb[128].mxu0  ;;  %v2639_v47 = vsel %vm2604_vm9, %v15706_v55, %v10363_v42  ;;  %v10599_v55 = vld [vmem:[%s18308_s20 + $0x3a8] sm:$0xff] }
 0x2ca   :  { %v14000_v48 = vpop.eup %13999  ;;  %v2628_v50 = vmul.f32 1.442695, %v2615_v44  ;;  %v15794_v52 = vadd.f32 %v15658_v19, %v2870_v46  ;;  %12157 = vmatmul.mubr.msk.f32.gmra.mrb[114].mxu1 %vm418_vm5, %v2639_v47  ;;  %v12181_v53 = vpop.f32.mrb[129].mxu0  ;;  %12570 = vmatmul.mubr.msk.f32.gmra.mrb[234].mxu0 %vm74_vm4, %v10598_v43 }
 0x2cb   :  { %12159 = vmatprep.mubr.msk.f32.mxu1 %vm14255_vm1, %v14256_v6  ;;  %12572 = vmatprep.mubr.msk.f32.mxu0 %vm14255_vm1, %v14256_v6  ;;  %v10364_v54 = vadd.f32 -1.0, %v14000_v48 }
 0x2cc   :  { %14005 = vpow2.f32 %v2628_v50  ;;  %v2911_v56 = vmin.f32 %v15794_v52, 0.0  ;;  %vm2904_vm14 = vcmp.gt.f32.partialorder %v15794_v52, 0.0 }
 0x2cd   :  { %v2875_v59 = vpop.f32.mrb[130].mxu0  ;;  %v2640_v60 = vsel %vm2605_vm10, %v15721_v2, %v10364_v54  ;;  %v10600_v2 = vld [vmem:[%s18308_s20 + $0x3b0] sm:$0x3] }
 0x2ce   :  { %v14002_v61 = vpop.eup %14001  ;;  %v2918_v62 = vmul.f32 1.442695, %v2911_v56  ;;  %v15809_v58 = vadd.f32 %v15658_v19, %v2875_v59  ;;  %12160 = vmatmul.mubr.msk.f32.gmra.mrb[116].mxu1 %vm418_vm5, %v2640_v60  ;;  %v12184_v63 = vpop.f32.mrb[131].mxu0  ;;  %12573 = vmatmul.mubr.msk.f32.gmra.mrb[236].mxu0 %vm74_vm4, %v10599_v55 }
 0x2cf   :  { %12162 = vmatprep.mubr.msk.f32.mxu1 %vm14255_vm1, %v14256_v6  ;;  %12575 = vmatprep.mubr.msk.f32.mxu0 %vm14255_vm1, %v14256_v6  ;;  %v10365_v1 = vadd.f32 -1.0, %v14002_v61 }
 0x2d0   :  { %14007 = vpow2.f32 %v2918_v62  ;;  %v2912_v3 = vmin.f32 %v15809_v58, 0.0  ;;  %vm2905_vm15 = vcmp.gt.f32.partialorder %v15809_v58, 0.0 }
 0x2d1   :  { %v2880_v5 = vpop.f32.mrb[132].mxu0  ;;  %v2641_v9 = vsel %vm2606_vm11, %v15744_v23, %v10365_v1 }
 0x2d2   :  { %v14004_v10 = vpop.eup %14003  ;;  %v2920_v11 = vmul.f32 1.442695, %v2912_v3  ;;  %v15824_v12 = vadd.f32 %v15658_v19, %v2880_v5  ;;  %12163 = vmatmul.mubr.msk.f32.gmra.mrb[118].mxu1 %vm418_vm5, %v2641_v9  ;;  %v12187_v13 = vpop.f32.mrb[133].mxu0  ;;  %12576 = vmatmul.mubr.msk.f32.gmra.mrb[238].mxu0 %vm74_vm4, %v10600_v2 }
 0x2d3   :  { %12165 = vmatprep.mubr.msk.f32.mxu1 %vm14255_vm1, %v14256_v6  ;;  %12611 = vmatprep.mubr.msk.f32.mxu0 %vm14255_vm1, %v14256_v6  ;;  %v10366_v14 = vadd.f32 -1.0, %v14004_v10 }
 0x2d4   :  { %14009 = vpow2.f32 %v2920_v11  ;;  %v2913_v15 = vmin.f32 %v15824_v12, 0.0  ;;  %vm2906_vm0 = vcmp.gt.f32.partialorder %v15824_v12, 0.0 }
 0x2d5   :  { %v2885_v23 = vpop.f32.mrb[134].mxu0  ;;  %v2642_v17 = vsel %vm2607_vm12, %v15763_v27, %v10366_v14  ;;  %v10431_v27 = vld [vmem:[%s18285_s4 + $0xa8] sm:$0xff] }
 0x2d6   :  { %v14006_v18 = vpop.eup %14005  ;;  %v2922_v29 = vmul.f32 1.442695, %v2913_v15  ;;  %v15839_v20 = vadd.f32 %v15658_v19, %v2885_v23  ;;  %12166 = vmatmul.mubr.msk.f32.gmra.mrb[120].mxu1 %vm418_vm5, %v2642_v17  ;;  %v12190_v21 = vpop.f32.mrb[135].mxu0  ;;  %12612 = vmatmul.mubr.msk.f32.vlgmr.msra.gmra.mrb[240].mxu0 %vm74_vm4, %v10625_v16 }
 0x2d7   :  { %13591 = vmatpush3.bf16.msra.mxu0 %v14359_v4  ;;  %12168 = vmatprep.mubr.msk.f32.mxu1 %vm14255_vm1, %v14256_v6  ;;  %v10367_v22 = vadd.f32 -1.0, %v14006_v18 }
 0x2d8   :  { %14011 = vpow2.f32 %v2922_v29  ;;  %v2914_v25 = vmin.f32 %v15839_v20, 0.0  ;;  %12614 = vmatprep.mubr.msk.f32.mxu0 %vm14255_vm1, %v14256_v6  ;;  %13592 = vmatprep.subr.bf16.mxu0 %v14254_v0  ;;  %vm2907_vm6 = vcmp.gt.f32.partialorder %v15839_v20, 0.0 }
 0x2d9   :  { %v2890_v28 = vpop.f32.mrb[136].mxu0  ;;  %v2643_v30 = vsel %vm2608_vm13, %v15779_v39, %v10367_v22  ;;  %v13517_v39 = vpack.c.bf16 %v10431_v27, %v10430_v26 }
 0x2da   :  { %v14008_v31 = vpop.eup %14007  ;;  %v2924_v32 = vmul.f32 1.442695, %v2914_v25  ;;  %v15862_v34 = vadd.f32 %v15658_v19, %v2890_v28  ;;  %12169 = vmatmul.mubr.msk.f32.gmra.mrb[122].mxu1 %vm418_vm5, %v2643_v30  ;;  %v12193_v35 = vpop.f32.mrb[137].mxu0  ;;  %12615 = vmatmul.mubr.msk.f32.gmra.mrb[242].mxu0 %vm74_vm4, %v10626_v24 }
 0x2db   :  { %v10392_v36 = vadd.f32 -1.0, %v14008_v31  ;;  %12204 = vmatprep.mubr.msk.f32.mxu1 %vm14255_vm1, %v14256_v6  ;;  %12617 = vmatprep.mubr.msk.f32.mxu0 %vm14255_vm1, %v14256_v6 }
 0x2dc   :  { %14013 = vpow2.f32 %v2924_v32  ;;  %v2915_v40 = vmin.f32 %v15862_v34, 0.0  ;;  %13595 = vmatpush3.bf16.msk.msra.mxu0 %vm14374_vm3, %v14369_v7  ;;  %vm2908_vm7 = vcmp.gt.f32.partialorder %v15862_v34, 0.0 }
 0x2dd   :  { %v2939_v42 = vsel %vm2904_vm14, %v15794_v52, %v10392_v36  ;;  %v2895_v43 = vpop.f32.mrb[138].mxu0  ;;  %13599 = vmatprep.subr.bf16.mxu0 %v14254_v0  ;;  %v10628_v52 = vld [vmem:[%s18308_s20 + $0x3d0] sm:$0xff] }
 0x2de   :  { %v14010_v44 = vpop.eup %14009  ;;  %v2926_v46 = vmul.f32 1.442695, %v2915_v40  ;;  %v15881_v47 = vadd.f32 %v15658_v19, %v2895_v43  ;;  %v12196_v48 = vpop.f32.mrb[139].mxu0  ;;  %12205 = vmatmul.mubr.msk.f32.vlgmr.msra.gmra.mrb[124].mxu1 %vm418_vm5, %v2939_v42  ;;  %12618 = vmatmul.mubr.msk.f32.gmra.mrb[244].mxu0 %vm74_vm4, %v10627_v38 }
 0x2df   :  { %13518 = vmatpush3.bf16.msra.mxu1 %v13517_v39  ;;  %12207 = vmatprep.mubr.msk.f32.mxu1 %vm14255_vm1, %v14256_v6  ;;  %v10393_v50 = vadd.f32 -1.0, %v14010_v44 }
 0x2e0   :  { %14015 = vpow2.f32 %v2926_v46  ;;  %v2916_v53 = vmin.f32 %v15881_v47, 0.0  ;;  %12620 = vmatprep.mubr.msk.f32.mxu0 %vm14255_vm1, %v14256_v6  ;;  %13526 = vmatprep.subr.bf16.mxu1 %v14254_v0  ;;  %vm2909_vm8 = vcmp.gt.f32.partialorder %v15881_v47, 0.0 }
 0x2e1   :  { %v2900_v54 = vpop.f32.mrb[140].mxu0  ;;  %v2940_v55 = vsel %vm2905_vm15, %v15809_v58, %v10393_v50  ;;  %v10629_v58 = vld [vmem:[%s18308_s20 + $0x3d8] sm:$0xff] }
 0x2e2   :  { %v14012_v56 = vpop.eup %14011  ;;  %v2928_v59 = vmul.f32 1.442695, %v2916_v53  ;;  %v15897_v60 = vadd.f32 %v15658_v19, %v2900_v54  ;;  %v12199_v61 = vpop.f32.mrb[141].mxu0  ;;  %12208 = vmatmul.mubr.msk.f32.gmra.mrb[126].mxu1 %vm418_vm5, %v2940_v55  ;;  %12621 = vmatmul.mubr.msk.f32.gmra.mrb[246].mxu0 %vm74_vm4, %v10628_v52  ;;  %v10461_v52 = vld [vmem:[%s18285_s4 + $0xb0] sm:$0xff]  ;;  %v10462_v53 = vld [vmem:[%s18285_s4 + $0xb8] sm:$0xff] }
 0x2e3   :  { %12210 = vmatprep.mubr.msk.f32.mxu1 %vm14255_vm1, %v14256_v6  ;;  %12623 = vmatprep.mubr.msk.f32.mxu0 %vm14255_vm1, %v14256_v6  ;;  %v10394_v62 = vadd.f32 -1.0, %v14012_v56 }
 0x2e4   :  { %14017 = vpow2.f32 %v2928_v59  ;;  %v2917_v63 = vmin.f32 %v15897_v60, 0.0  ;;  %vm2910_vm9 = vcmp.gt.f32.partialorder %v15897_v60, 0.0 }
 0x2e5   :  { %v3172_v1 = vpop.f32.mrb[142].mxu0  ;;  %v2941_v2 = vsel %vm2906_vm0, %v15824_v12, %v10394_v62  ;;  %v10630_v12 = vld [vmem:[%s18308_s20 + $0x3e0] sm:$0xff] }
 0x2e6   :  { %v14014_v3 = vpop.eup %14013  ;;  %v2930_v5 = vmul.f32 1.442695, %v2917_v63  ;;  %v15912_v9 = vadd.f32 %v15658_v19, %v3172_v1  ;;  %12211 = vmatmul.mubr.msk.f32.gmra.mrb[128].mxu1 %vm418_vm5, %v2941_v2  ;;  %v12235_v10 = vpop.f32.mrb[143].mxu0  ;;  %12624 = vmatmul.mubr.msk.f32.gmra.mrb[248].mxu0 %vm74_vm4, %v10629_v58 }
 0x2e7   :  { %12213 = vmatprep.mubr.msk.f32.mxu1 %vm14255_vm1, %v14256_v6  ;;  %12626 = vmatprep.mubr.msk.f32.mxu0 %vm14255_vm1, %v14256_v6  ;;  %v10395_v11 = vadd.f32 -1.0, %v14014_v3 }
 0x2e8   :  { %14019 = vpow2.f32 %v2930_v5  ;;  %v3213_v13 = vmin.f32 %v15912_v9, 0.0  ;;  %vm3206_vm10 = vcmp.gt.f32.partialorder %v15912_v9, 0.0 }
 0x2e9   :  { %v3177_v14 = vpop.f32.mrb[144].mxu0  ;;  %v2942_v16 = vsel %vm2907_vm6, %v15839_v20, %v10395_v11  ;;  %v10631_v20 = vld [vmem:[%s18308_s20 + $0x3e8] sm:$0x3] }
 0x2ea   :  { %v14016_v15 = vpop.eup %14015  ;;  %v3220_v23 = vmul.f32 1.442695, %v3213_v13  ;;  %v15927_v17 = vadd.f32 %v15658_v19, %v3177_v14  ;;  %12214 = vmatmul.mubr.msk.f32.gmra.mrb[130].mxu1 %vm418_vm5, %v2942_v16  ;;  %v12238_v18 = vpop.f32.mrb[145].mxu0  ;;  %12627 = vmatmul.mubr.msk.f32.gmra.mrb[250].mxu0 %vm74_vm4, %v10630_v12 }
 0x2eb   :  { %12216 = vmatprep.mubr.msk.f32.mxu1 %vm14255_vm1, %v14256_v6  ;;  %12629 = vmatprep.mubr.msk.f32.mxu0 %vm14255_vm1, %v14256_v6  ;;  %v10396_v29 = vadd.f32 -1.0, %v14016_v15  ;;  %v10659_v18 = vld [vmem:[%s18308_s20 + $0x408] sm:$0xff] }
 0x2ec   :  { %14021 = vpow2.f32 %v3220_v23  ;;  %v3214_v21 = vmin.f32 %v15927_v17, 0.0  ;;  %vm3207_vm11 = vcmp.gt.f32.partialorder %v15927_v17, 0.0 }
 0x2ed   :  { %v922_v22 = vpop.f32.mrb[26].mxu1  ;;  %v3182_v24 = vpop.f32.mrb[146].mxu0  ;;  %v2943_v25 = vsel %vm2908_vm7, %v15862_v34, %v10396_v29 }
 0x2ee   :  { %v14018_v26 = vpop.eup %14017  ;;  %v3222_v27 = vmul.f32 1.442695, %v3214_v21  ;;  %v15942_v28 = vadd.f32 %v922_v22, %v14923_v33  ;;  %v15945_v30 = vadd.f32 %v15658_v19, %v3182_v24  ;;  %v11828_v31 = vpop.f32.mrb[27].mxu1  ;;  %12217 = vmatmul.mubr.msk.f32.gmra.mrb[132].mxu1 %vm418_vm5, %v2943_v25  ;;  %12630 = vmatmul.mubr.msk.f32.gmra.mrb[252].mxu0 %vm74_vm4, %v10631_v20  ;;  %v10656_v33 = vld [vmem:[%s18308_s20 + $0x3f0] sm:$0xff] }
 0x2ef   :  { %v12241_v32 = vpop.f32.mrb[147].mxu0  ;;  %12219 = vmatprep.mubr.msk.f32.mxu1 %vm14255_vm1, %v14256_v6  ;;  %12665 = vmatprep.mubr.msk.f32.mxu0 %vm14255_vm1, %v14256_v6  ;;  %v10397_v34 = vadd.f32 -1.0, %v14018_v26 }
 0x2f0   :  { %14023 = vpow2.f32 %v3222_v27  ;;  %v3215_v35 = vmin.f32 %v15945_v30, 0.0  ;;  %vm3208_vm12 = vcmp.gt.f32.partialorder %v15945_v30, 0.0 }
 0x2f1   :  { %v927_v36 = vpop.f32.mrb[28].mxu1  ;;  %v3187_v38 = vpop.f32.mrb[148].mxu0  ;;  %v2944_v39 = vsel %vm2909_vm8, %v15881_v47, %v10397_v34 }
 0x2f2   :  { %v14020_v40 = vpop.eup %14019  ;;  %v3224_v42 = vmul.f32 1.442695, %v3215_v35  ;;  %v15960_v43 = vadd.f32 %v927_v36, %v14931_v37  ;;  %v15963_v44 = vadd.f32 %v15658_v19, %v3187_v38  ;;  %v11831_v46 = vpop.f32.mrb[29].mxu1  ;;  %12220 = vmatmul.mubr.msk.f32.gmra.mrb[134].mxu1 %vm418_vm5, %v2944_v39  ;;  %12666 = vmatmul.mubr.msk.f32.vlgmr.msra.gmra.mrb[254].mxu0 %vm74_vm4, %v10656_v33  ;;  %v10657_v37 = vld [vmem:[%s18308_s20 + $0x3f8] sm:$0xff] }
 0x2f3   :  { %v12244_v48 = vpop.f32.mrb[149].mxu0  ;;  %13601 = vmatpush3.bf16.msra.mxu0 %v14359_v4  ;;  %12222 = vmatprep.mubr.msk.f32.mxu1 %vm14255_vm1, %v14256_v6  ;;  %v10398_v47 = vadd.f32 -1.0, %v14020_v40 }
 0x2f4   :  { %14025 = vpow2.f32 %v3224_v42  ;;  %v3216_v50 = vmin.f32 %v15963_v44, 0.0  ;;  %12668 = vmatprep.mubr.msk.f32.mxu0 %vm14255_vm1, %v14256_v6  ;;  %13602 = vmatprep.subr.bf16.mxu0 %v14254_v0  ;;  %vm3209_vm13 = vcmp.gt.f32.partialorder %v15963_v44, 0.0 }
 0x2f5   :  { %v932_v54 = vpop.f32.mrb[30].mxu1  ;;  %v3192_v55 = vpop.f32.mrb[150].mxu0  ;;  %v2945_v56 = vsel %vm2910_vm9, %v15897_v60, %v10398_v47  ;;  %v13527_v60 = vpack.c.bf16 %v10462_v53, %v10461_v52 }
 0x2f6   :  { %v14022_v59 = vpop.eup %14021  ;;  %v3226_v61 = vmul.f32 1.442695, %v3216_v50  ;;  %v15986_v62 = vadd.f32 %v932_v54, %v14939_v41  ;;  %v15989_v58 = vadd.f32 %v15658_v19, %v3192_v55  ;;  %v11834_v63 = vpop.f32.mrb[31].mxu1  ;;  %12223 = vmatmul.mubr.msk.f32.gmra.mrb[136].mxu1 %vm418_vm5, %v2945_v56  ;;  %12669 = vmatmul.mubr.msk.f32.gmra.mrb[0].mxu0 %vm74_vm4, %v10657_v37  ;;  %v10658_v41 = vld [vmem:[%s18308_s20 + $0x400] sm:$0xff] }
 0x2f7   :  { %v12247_v1 = vpop.f32.mrb[151].mxu0  ;;  %v10423_v2 = vadd.f32 -1.0, %v14022_v59  ;;  %12258 = vmatprep.mubr.msk.f32.mxu1 %vm14255_vm1, %v14256_v6  ;;  %12671 = vmatprep.mubr.msk.f32.mxu0 %vm14255_vm1, %v14256_v6 }
 0x2f8   :  { %14027 = vpow2.f32 %v3226_v61  ;;  %v3217_v3 = vmin.f32 %v15989_v58, 0.0  ;;  %13605 = vmatpush3.bf16.msk.msra.mxu0 %vm14374_vm3, %v14369_v7  ;;  %vm3210_vm14 = vcmp.gt.f32.partialorder %v15989_v58, 0.0 }
 0x2f9   :  { %v3241_v5 = vsel %vm3206_vm10, %v15912_v9, %v10423_v2  ;;  %v937_v10 = vpop.f32.mrb[32].mxu1  ;;  %v3197_v11 = vpop.f32.mrb[152].mxu0  ;;  %13609 = vmatprep.subr.bf16.mxu0 %v14254_v0 }
 0x2fa   :  { %v14024_v12 = vpop.eup %14023  ;;  %v3228_v13 = vmul.f32 1.442695, %v3217_v3  ;;  %v16008_v14 = vadd.f32 %v937_v10, %v14947_v45  ;;  %v16011_v16 = vadd.f32 %v15658_v19, %v3197_v11  ;;  %v11837_v15 = vpop.f32.mrb[33].mxu1  ;;  %12259 = vmatmul.mubr.msk.f32.vlgmr.msra.gmra.mrb[138].mxu1 %vm418_vm5, %v3241_v5  ;;  %12672 = vmatmul.mubr.msk.f32.gmra.mrb[2].mxu0 %vm74_vm4, %v10658_v41 }
 0x2fb   :  { %v12250_v23 = vpop.f32.mrb[153].mxu0  ;;  %13528 = vmatpush3.bf16.msra.mxu1 %v13527_v60  ;;  %12261 = vmatprep.mubr.msk.f32.mxu1 %vm14255_vm1, %v14256_v6  ;;  %v10424_v9 = vadd.f32 -1.0, %v14024_v12 }
 0x2fc   :  { %14029 = vpow2.f32 %v3228_v13  ;;  %v3218_v45 = vmin.f32 %v16011_v16, 0.0  ;;  %12674 = vmatprep.mubr.msk.f32.mxu0 %vm14255_vm1, %v14256_v6  ;;  %13536 = vmatprep.subr.bf16.mxu1 %v14254_v0  ;;  %vm3211_vm15 = vcmp.gt.f32.partialorder %v16011_v16, 0.0 }
 0x2fd   :  { %v942_v29 = vpop.f32.mrb[34].mxu1  ;;  %v3202_v20 = vpop.f32.mrb[154].mxu0  ;;  %v3242_v21 = vsel %vm3207_vm11, %v15927_v17, %v10424_v9 }
 0x2fe   :  { %v14026_v22 = vpop.eup %14025  ;;  %v3230_v24 = vmul.f32 1.442695, %v3218_v45  ;;  %v16027_v25 = vadd.f32 %v942_v29, %v14957_v49  ;;  %v16030_v26 = vadd.f32 %v15658_v19, %v3202_v20  ;;  %v11840_v27 = vpop.f32.mrb[35].mxu1  ;;  %12262 = vmatmul.mubr.msk.f32.gmra.mrb[140].mxu1 %vm418_vm5, %v3242_v21  ;;  %12675 = vmatmul.mubr.msk.f32.gmra.mrb[4].mxu0 %vm74_vm4, %v10659_v18  ;;  %v10660_v49 = vld [vmem:[%s18308_s20 + $0x410] sm:$0xff] }
 0x2ff   :  { %v12253_v31 = vpop.f32.mrb[155].mxu0  ;;  %12264 = vmatprep.mubr.msk.f32.mxu1 %vm14255_vm1, %v14256_v6  ;;  %12677 = vmatprep.mubr.msk.f32.mxu0 %vm14255_vm1, %v14256_v6  ;;  %v10425_v17 = vadd.f32 -1.0, %v14026_v22  ;;  %v10493_v27 = vld [vmem:[%s18285_s4 + $0xc8] sm:$0xff] }
 0x300   :  { %14031 = vpow2.f32 %v3230_v24  ;;  %v3219_v32 = vmin.f32 %v16030_v26, 0.0  ;;  %vm3212_vm0 = vcmp.gt.f32.partialorder %v16030_v26, 0.0  ;;  %v10492_v24 = vld [vmem:[%s18285_s4 + $0xc0] sm:$0xff] }
 0x301   :  { %v947_v34 = vpop.f32.mrb[36].mxu1  ;;  %v3474_v33 = vpop.f32.mrb[156].mxu0  ;;  %v3243_v35 = vsel %vm3208_vm12, %v15945_v30, %v10425_v17 }
 0x302   :  { %v14028_v36 = vpop.eup %14027  ;;  %v3232_v38 = vmul.f32 1.442695, %v3219_v32  ;;  %v16045_v39 = vadd.f32 %v947_v34, %v14969_v51  ;;  %v16048_v40 = vadd.f32 %v15658_v19, %v3474_v33  ;;  %v11843_v42 = vpop.f32.mrb[37].mxu1  ;;  %12265 = vmatmul.mubr.msk.f32.gmra.mrb[142].mxu1 %vm418_vm5, %v3243_v35  ;;  %12678 = vmatmul.mubr.msk.f32.gmra.mrb[6].mxu0 %vm74_vm4, %v10660_v49  ;;  %v10661_v51 = vld [vmem:[%s18308_s20 + $0x418] sm:$0xff] }
 0x303   :  { %v12289_v46 = vpop.f32.mrb[157].mxu0  ;;  %12267 = vmatprep.mubr.msk.f32.mxu1 %vm14255_vm1, %v14256_v6  ;;  %12680 = vmatprep.mubr.msk.f32.mxu0 %vm14255_vm1, %v14256_v6  ;;  %v10426_v30 = vadd.f32 -1.0, %v14028_v36 }
 0x304   :  { %14033 = vpow2.f32 %v3232_v38  ;;  %v3515_v48 = vmin.f32 %v16048_v40, 0.0  ;;  %vm3508_vm6 = vcmp.gt.f32.partialorder %v16048_v40, 0.0 }
 0x305   :  { %v952_v47 = vpop.f32.mrb[38].mxu1  ;;  %v3479_v37 = vpop.f32.mrb[158].mxu0  ;;  %v3244_v50 = vsel %vm3209_vm13, %v15963_v44, %v10426_v30 }
 0x306   :  { %v14030_v52 = vpop.eup %14029  ;;  %v3522_v53 = vmul.f32 1.442695, %v3515_v48  ;;  %v16063_v54 = vadd.f32 %v952_v47, %v14977_v57  ;;  %v16066_v55 = vadd.f32 %v15658_v19, %v3479_v37  ;;  %v11846_v56 = vpop.f32.mrb[39].mxu1  ;;  %12268 = vmatmul.mubr.msk.f32.gmra.mrb[144].mxu1 %vm418_vm5, %v3244_v50  ;;  %12681 = vmatmul.mubr.msk.f32.gmra.mrb[8].mxu0 %vm74_vm4, %v10661_v51  ;;  %v10662_v57 = vld [vmem:[%s18308_s20 + $0x420] sm:$0x3] }
 0x307   :  { %v12292_v59 = vpop.f32.mrb[159].mxu0  ;;  %12270 = vmatprep.mubr.msk.f32.mxu1 %vm14255_vm1, %v14256_v6  ;;  %12683 = vmatprep.mubr.msk.f32.mxu0 %vm14255_vm1, %v14256_v6  ;;  %v10427_v44 = vadd.f32 -1.0, %v14030_v52 }
 0x308   :  { %14035 = vpow2.f32 %v3522_v53  ;;  %v3516_v61 = vmin.f32 %v16066_v55, 0.0  ;;  %v10690_v59 = vld [vmem:[%s18308_s20 + $0x440] sm:$0xff]  ;;  %vm3509_vm7 = vcmp.gt.f32.partialorder %v16066_v55, 0.0 }
 0x309   :  { %v1224_v63 = vpop.f32.mrb[40].mxu1  ;;  %v3484_v1 = vpop.f32.mrb[160].mxu0  ;;  %v3245_v2 = vsel %vm3210_vm14, %v15989_v58, %v10427_v44 }
 0x30a   :  { %v14032_v41 = vpop.eup %14031  ;;  %v3524_v60 = vmul.f32 1.442695, %v3516_v61  ;;  %v16081_v3 = vadd.f32 %v1224_v63, %v15942_v28  ;;  %v16084_v5 = vadd.f32 %v15658_v19, %v3484_v1  ;;  %v11882_v10 = vpop.f32.mrb[41].mxu1  ;;  %12271 = vmatmul.mubr.msk.f32.gmra.mrb[146].mxu1 %vm418_vm5, %v3245_v2  ;;  %12684 = vmatmul.mubr.msk.f32.gmra.mrb[10].mxu0 %vm74_vm4, %v10662_v57  ;;  %v10687_v28 = vld [vmem:[%s18308_s20 + $0x428] sm:$0xff] }
 0x30b   :  { %v12295_v11 = vpop.f32.mrb[161].mxu0  ;;  %12273 = vmatprep.mubr.msk.f32.mxu1 %vm14255_vm1, %v14256_v6  ;;  %12719 = vmatprep.mubr.msk.f32.mxu0 %vm14255_vm1, %v14256_v6  ;;  %v10428_v58 = vadd.f32 -1.0, %v14032_v41 }
 0x30c   :  { %14037 = vpow2.f32 %v3524_v60  ;;  %v3517_v12 = vmin.f32 %v16084_v5, 0.0  ;;  %vm3510_vm8 = vcmp.gt.f32.partialorder %v16084_v5, 0.0 }
 0x30d   :  { %v1229_v13 = vpop.f32.mrb[42].mxu1  ;;  %v3489_v15 = vpop.f32.mrb[162].mxu0  ;;  %v3246_v23 = vsel %vm3211_vm15, %v16011_v16, %v10428_v58 }
 0x30e   :  { %v14034_v9 = vpop.eup %14033  ;;  %v3526_v18 = vmul.f32 1.442695, %v3517_v12  ;;  %v16099_v45 = vadd.f32 %v1229_v13, %v15960_v43  ;;  %v16102_v29 = vadd.f32 %v15658_v19, %v3489_v15  ;;  %v11885_v20 = vpop.f32.mrb[43].mxu1  ;;  %12274 = vmatmul.mubr.msk.f32.gmra.mrb[148].mxu1 %vm418_vm5, %v3246_v23  ;;  %12720 = vmatmul.mubr.msk.f32.vlgmr.msra.gmra.mrb[12].mxu0 %vm74_vm4, %v10687_v28  ;;  %v10688_v43 = vld [vmem:[%s18308_s20 + $0x430] sm:$0xff] }
 0x30f   :  { %v12298_v21 = vpop.f32.mrb[163].mxu0  ;;  %13611 = vmatpush3.bf16.msra.mxu0 %v14359_v4  ;;  %12276 = vmatprep.mubr.msk.f32.mxu1 %vm14255_vm1, %v14256_v6  ;;  %v10429_v16 = vadd.f32 -1.0, %v14034_v9 }
 0x310   :  { %14039 = vpow2.f32 %v3526_v18  ;;  %v3518_v22 = vmin.f32 %v16102_v29, 0.0  ;;  %12722 = vmatprep.mubr.msk.f32.mxu0 %vm14255_vm1, %v14256_v6  ;;  %13612 = vmatprep.subr.bf16.mxu0 %v14254_v0  ;;  %vm3511_vm9 = vcmp.gt.f32.partialorder %v16102_v29, 0.0 }
 0x311   :  { %v1234_v31 = vpop.f32.mrb[44].mxu1  ;;  %v3494_v17 = vpop.f32.mrb[164].mxu0  ;;  %v3247_v49 = vsel %vm3212_vm0, %v16030_v26, %v10429_v16  ;;  %v13537_v26 = vpack.c.bf16 %v10493_v27, %v10492_v24 }
 0x312   :  { %v14036_v32 = vpop.eup %14035  ;;  %v3528_v34 = vmul.f32 1.442695, %v3518_v22  ;;  %v16125_v33 = vadd.f32 %v1234_v31, %v15986_v62  ;;  %v16128_v35 = vadd.f32 %v15658_v19, %v3494_v17  ;;  %v11888_v36 = vpop.f32.mrb[45].mxu1  ;;  %12277 = vmatmul.mubr.msk.f32.gmra.mrb[150].mxu1 %vm418_vm5, %v3247_v49  ;;  %12723 = vmatmul.mubr.msk.f32.gmra.mrb[14].mxu0 %vm74_vm4, %v10688_v43  ;;  %v10689_v62 = vld [vmem:[%s18308_s20 + $0x438] sm:$0xff]  ;;  %v16207_v31 = vld [vmem:[%s18286_s3] ss:$0 sm:$0xff] }
 0x313   :  { %v12301_v38 = vpop.f32.mrb[165].mxu0  ;;  %v10454_v42 = vadd.f32 -1.0, %v14036_v32  ;;  %12312 = vmatprep.mubr.msk.f32.mxu1 %vm14255_vm1, %v14256_v6  ;;  %12725 = vmatprep.mubr.msk.f32.mxu0 %vm14255_vm1, %v14256_v6 }
 0x314   :  { %14041 = vpow2.f32 %v3528_v34  ;;  %v3519_v46 = vmin.f32 %v16128_v35, 0.0  ;;  %13615 = vmatpush3.bf16.msk.msra.mxu0 %vm14374_vm3, %v14369_v7  ;;  %vm3512_vm10 = vcmp.gt.f32.partialorder %v16128_v35, 0.0 }
 0x315   :  { %v3543_v30 = vsel %vm3508_vm6, %v16048_v40, %v10454_v42  ;;  %v1239_v51 = vpop.f32.mrb[46].mxu1  ;;  %v3499_v48 = vpop.f32.mrb[166].mxu0  ;;  %13619 = vmatprep.subr.bf16.mxu0 %v14254_v0 }
 0x316   :  { %v14038_v47 = vpop.eup %14037  ;;  %v3530_v37 = vmul.f32 1.442695, %v3519_v46  ;;  %v16147_v50 = vadd.f32 %v1239_v51, %v16008_v14  ;;  %v16150_v52 = vadd.f32 %v15658_v19, %v3499_v48  ;;  %v11891_v53 = vpop.f32.mrb[47].mxu1  ;;  %12313 = vmatmul.mubr.msk.f32.vlgmr.msra.gmra.mrb[152].mxu1 %vm418_vm5, %v3543_v30  ;;  %12726 = vmatmul.mubr.msk.f32.gmra.mrb[16].mxu0 %vm74_vm4, %v10689_v62 }
 0x317   :  { %v12304_v56 = vpop.f32.mrb[167].mxu0  ;;  %13538 = vmatpush3.bf16.msra.mxu1 %v13537_v26  ;;  %12315 = vmatprep.mubr.msk.f32.mxu1 %vm14255_vm1, %v14256_v6  ;;  %v10455_v40 = vadd.f32 -1.0, %v14038_v47 }
 0x318   :  { %14043 = vpow2.f32 %v3530_v37  ;;  %v3520_v14 = vmin.f32 %v16150_v52, 0.0  ;;  %12728 = vmatprep.mubr.msk.f32.mxu0 %vm14255_vm1, %v14256_v6  ;;  %13546 = vmatprep.subr.bf16.mxu1 %v14254_v0  ;;  %vm3513_vm11 = vcmp.gt.f32.partialorder %v16150_v52, 0.0 }
 0x319   :  { %v1244_v44 = vpop.f32.mrb[48].mxu1  ;;  %v3504_v57 = vpop.f32.mrb[168].mxu0  ;;  %v3544_v61 = vsel %vm3509_vm7, %v16066_v55, %v10455_v40 }
 0x31a   :  { %v14040_v63 = vpop.eup %14039  ;;  %v3532_v1 = vmul.f32 1.442695, %v3520_v14  ;;  %v16166_v2 = vadd.f32 %v1244_v44, %v16027_v25  ;;  %v16169_v41 = vadd.f32 %v15658_v19, %v3504_v57  ;;  %v11894_v60 = vpop.f32.mrb[49].mxu1  ;;  %12316 = vmatmul.mubr.msk.f32.gmra.mrb[154].mxu1 %vm418_vm5, %v3544_v61  ;;  %12729 = vmatmul.mubr.msk.f32.gmra.mrb[18].mxu0 %vm74_vm4, %v10690_v59  ;;  %v10691_v25 = vld [vmem:[%s18308_s20 + $0x448] sm:$0xff] }
 0x31b   :  { %v12307_v10 = vpop.f32.mrb[169].mxu0  ;;  %12318 = vmatprep.mubr.msk.f32.mxu1 %vm14255_vm1, %v14256_v6  ;;  %12731 = vmatprep.mubr.msk.f32.mxu0 %vm14255_vm1, %v14256_v6  ;;  %v10456_v55 = vadd.f32 -1.0, %v14040_v63  ;;  %v10524_v60 = vld [vmem:[%s18285_s4 + $0xd8] sm:$0xff] }
 0x31c   :  { %14045 = vpow2.f32 %v3532_v1  ;;  %v3521_v11 = vmin.f32 %v16169_v41, 0.0  ;;  %vm3514_vm12 = vcmp.gt.f32.partialorder %v16169_v41, 0.0  ;;  %v10523_v1 = vld [vmem:[%s18285_s4 + $0xd0] sm:$0xff] }
 0x31d   :  { %v1249_v58 = vpop.f32.mrb[50].mxu1  ;;  %v3776_v28 = vpop.f32.mrb[170].mxu0  ;;  %v3545_v12 = vsel %vm3510_vm8, %v16084_v5, %v10456_v55 }
 0x31e   :  { %v14042_v13 = vpop.eup %14041  ;;  %v3534_v15 = vmul.f32 1.442695, %v3521_v11  ;;  %v16184_v23 = vadd.f32 %v1249_v58, %v16045_v39  ;;  %v16187_v9 = vadd.f32 %v15658_v19, %v3776_v28  ;;  %v11897_v18 = vpop.f32.mrb[51].mxu1  ;;  %12319 = vmatmul.mubr.msk.f32.gmra.mrb[156].mxu1 %vm418_vm5, %v3545_v12  ;;  %12732 = vmatmul.mubr.msk.f32.gmra.mrb[20].mxu0 %vm74_vm4, %v10691_v25  ;;  %v10692_v39 = vld [vmem:[%s18308_s20 + $0x450] sm:$0xff] }
 0x31f   :  { %v12343_v20 = vpop.f32.mrb[171].mxu0  ;;  %12321 = vmatprep.mubr.msk.f32.mxu1 %vm14255_vm1, %v14256_v6  ;;  %12734 = vmatprep.mubr.msk.f32.mxu0 %vm14255_vm1, %v14256_v6  ;;  %v10457_v5 = vadd.f32 -1.0, %v14042_v13 }
 0x320   :  { %14047 = vpow2.f32 %v3534_v15  ;;  %v3817_v19 = vmin.f32 %v16187_v9, 0.0  ;;  %vm3810_vm13 = vcmp.gt.f32.partialorder %v16187_v9, 0.0 }
 0x321   :  { %v1254_v21 = vpop.f32.mrb[52].mxu1  ;;  %v3781_v16 = vpop.f32.mrb[172].mxu0  ;;  %v3546_v43 = vsel %vm3511_vm9, %v16102_v29, %v10457_v5  ;;  %v10693_v29 = vld [vmem:[%s18308_s20 + $0x458] sm:$0x3] }
 0x322   :  { %v14044_v22 = vpop.eup %14043  ;;  %v3824_v24 = vmul.f32 1.442695, %v3817_v19  ;;  %v16202_v27 = vadd.f32 %v1254_v21, %v16063_v54  ;;  %v16210_v17 = vadd.f32 %v16207_v31, %v3781_v16  ;;  %v11900_v49 = vpop.f32.mrb[53].mxu1  ;;  %12322 = vmatmul.mubr.msk.f32.gmra.mrb[158].mxu1 %vm418_vm5, %v3546_v43  ;;  %12735 = vmatmul.mubr.msk.f32.gmra.mrb[22].mxu0 %vm74_vm4, %v10692_v39 }
 0x323   :  { %v12346_v32 = vpop.f32.mrb[173].mxu0  ;;  %12324 = vmatprep.mubr.msk.f32.mxu1 %vm14255_vm1, %v14256_v6  ;;  %12737 = vmatprep.mubr.msk.f32.mxu0 %vm14255_vm1, %v14256_v6  ;;  %v10458_v54 = vadd.f32 -1.0, %v14044_v22 }
 0x324   :  { %14049 = vpow2.f32 %v3824_v24  ;;  %v3818_v34 = vmin.f32 %v16210_v17, 0.0  ;;  %v10721_v32 = vld [vmem:[%s18308_s20 + $0x478] sm:$0xff]  ;;  %vm3811_vm14 = vcmp.gt.f32.partialorder %v16210_v17, 0.0 }
 0x325   :  { %v1526_v36 = vpop.f32.mrb[54].mxu1  ;;  %v3786_v38 = vpop.f32.mrb[174].mxu0  ;;  %v3547_v42 = vsel %vm3512_vm10, %v16128_v35, %v10458_v54 }
 0x326   :  { %v14046_v62 = vpop.eup %14045  ;;  %v3826_v26 = vmul.f32 1.442695, %v3818_v34  ;;  %v16225_v46 = vadd.f32 %v1526_v36, %v16081_v3  ;;  %v16228_v30 = vadd.f32 %v16207_v31, %v3786_v38  ;;  %v11936_v51 = vpop.f32.mrb[55].mxu1  ;;  %12325 = vmatmul.mubr.msk.f32.gmra.mrb[160].mxu1 %vm418_vm5, %v3547_v42  ;;  %12738 = vmatmul.mubr.msk.f32.gmra.mrb[24].mxu0 %vm74_vm4, %v10693_v29  ;;  %v10718_v3 = vld [vmem:[%s18308_s20 + $0x460] sm:$0xff] }
 0x327   :  { %v12349_v48 = vpop.f32.mrb[175].mxu0  ;;  %12327 = vmatprep.mubr.msk.f32.mxu1 %vm14255_vm1, %v14256_v6  ;;  %12773 = vmatprep.mubr.msk.f32.mxu0 %vm14255_vm1, %v14256_v6  ;;  %v10459_v35 = vadd.f32 -1.0, %v14046_v62 }
 0x328   :  { %14051 = vpow2.f32 %v3826_v26  ;;  %v3819_v47 = vmin.f32 %v16228_v30, 0.0  ;;  %vm3812_vm15 = vcmp.gt.f32.partialorder %v16228_v30, 0.0 }
 0x329   :  { %v1531_v37 = vpop.f32.mrb[56].mxu1  ;;  %v3791_v53 = vpop.f32.mrb[176].mxu0  ;;  %v3548_v56 = vsel %vm3513_vm11, %v16150_v52, %v10459_v35 }
 0x32a   :  { %v14048_v40 = vpop.eup %14047  ;;  %v3828_v59 = vmul.f32 1.442695, %v3819_v47  ;;  %v16243_v14 = vadd.f32 %v1531_v37, %v16099_v45  ;;  %v16246_v44 = vadd.f32 %v16207_v31, %v3791_v53  ;;  %v11939_v57 = vpop.f32.mrb[57].mxu1  ;;  %12328 = vmatmul.mubr.msk.f32.gmra.mrb[162].mxu1 %vm418_vm5, %v3548_v56  ;;  %12774 = vmatmul.mubr.msk.f32.vlgmr.msra.gmra.mrb[26].mxu0 %vm74_vm4, %v10718_v3  ;;  %v10719_v45 = vld [vmem:[%s18308_s20 + $0x468] sm:$0xff] }
 0x32b   :  { %v12352_v61 = vpop.f32.mrb[177].mxu0  ;;  %13621 = vmatpush3.bf16.msra.mxu0 %v14359_v4  ;;  %12330 = vmatprep.mubr.msk.f32.mxu1 %vm14255_vm1, %v14256_v6  ;;  %v10460_v52 = vadd.f32 -1.0, %v14048_v40 }
 0x32c   :  { %14053 = vpow2.f32 %v3828_v59  ;;  %v3820_v63 = vmin.f32 %v16246_v44, 0.0  ;;  %12776 = vmatprep.mubr.msk.f32.mxu0 %vm14255_vm1, %v14256_v6  ;;  %13622 = vmatprep.subr.bf16.mxu0 %v14254_v0  ;;  %vm3813_vm0 = vcmp.gt.f32.partialorder %v16246_v44, 0.0 }
 0x32d   :  { %v1536_v10 = vpop.f32.mrb[58].mxu1  ;;  %v3796_v55 = vpop.f32.mrb[178].mxu0  ;;  %v3549_v25 = vsel %vm3514_vm12, %v16169_v41, %v10460_v52  ;;  %v13547_v41 = vpack.c.bf16 %v10524_v60, %v10523_v1 }
 0x32e   :  { %v14050_v11 = vpop.eup %14049  ;;  %v3830_v58 = vmul.f32 1.442695, %v3820_v63  ;;  %v16269_v28 = vadd.f32 %v1536_v10, %v16125_v33  ;;  %v16272_v12 = vadd.f32 %v16207_v31, %v3796_v55  ;;  %v11942_v13 = vpop.f32.mrb[59].mxu1  ;;  %12331 = vmatmul.mubr.msk.f32.gmra.mrb[164].mxu1 %vm418_vm5, %v3549_v25  ;;  %12777 = vmatmul.mubr.msk.f32.gmra.mrb[28].mxu0 %vm74_vm4, %v10719_v45  ;;  %v10720_v33 = vld [vmem:[%s18308_s20 + $0x470] sm:$0xff] }
 0x32f   :  { %v12355_v15 = vpop.f32.mrb[179].mxu0  ;;  %v10485_v18 = vadd.f32 -1.0, %v14050_v11  ;;  %12366 = vmatprep.mubr.msk.f32.mxu1 %vm14255_vm1, %v14256_v6  ;;  %12779 = vmatprep.mubr.msk.f32.mxu0 %vm14255_vm1, %v14256_v6 }
 0x330   :  { %14055 = vpow2.f32 %v3830_v58  ;;  %v3821_v20 = vmin.f32 %v16272_v12, 0.0  ;;  %13625 = vmatpush3.bf16.msk.msra.mxu0 %vm14374_vm3, %v14369_v7  ;;  %vm3814_vm6 = vcmp.gt.f32.partialorder %v16272_v12, 0.0 }
 0x331   :  { %v3845_v5 = vsel %vm3810_vm13, %v16187_v9, %v10485_v18  ;;  %v1541_v39 = vpop.f32.mrb[60].mxu1  ;;  %v3801_v19 = vpop.f32.mrb[180].mxu0  ;;  %13629 = vmatprep.subr.bf16.mxu0 %v14254_v0 }
 0x332   :  { %v14052_v21 = vpop.eup %14051  ;;  %v3832_v16 = vmul.f32 1.442695, %v3821_v20  ;;  %v16291_v43 = vadd.f32 %v1541_v39, %v16147_v50  ;;  %v16294_v22 = vadd.f32 %v16207_v31, %v3801_v19  ;;  %v11945_v24 = vpop.f32.mrb[61].mxu1  ;;  %12367 = vmatmul.mubr.msk.f32.vlgmr.msra.gmra.mrb[166].mxu1 %vm418_vm5, %v3845_v5  ;;  %12780 = vmatmul.mubr.msk.f32.gmra.mrb[30].mxu0 %vm74_vm4, %v10720_v33 }
 0x333   :  { %v12358_v49 = vpop.f32.mrb[181].mxu0  ;;  %13548 = vmatpush3.bf16.msra.mxu1 %v13547_v41  ;;  %12369 = vmatprep.mubr.msk.f32.mxu1 %vm14255_vm1, %v14256_v6  ;;  %v10486_v9 = vadd.f32 -1.0, %v14052_v21 }
 0x334   :  { %14057 = vpow2.f32 %v3832_v16  ;;  %v3822_v50 = vmin.f32 %v16294_v22, 0.0  ;;  %12782 = vmatprep.mubr.msk.f32.mxu0 %vm14255_vm1, %v14256_v6  ;;  %13556 = vmatprep.subr.bf16.mxu1 %v14254_v0  ;;  %vm3815_vm7 = vcmp.gt.f32.partialorder %v16294_v22, 0.0 }
 0x335   :  { %v1546_v54 = vpop.f32.mrb[62].mxu1  ;;  %v3806_v29 = vpop.f32.mrb[182].mxu0  ;;  %v3846_v34 = vsel %vm3811_vm14, %v16210_v17, %v10486_v9 }
 0x336   :  { %v14054_v36 = vpop.eup %14053  ;;  %v3834_v38 = vmul.f32 1.442695, %v3822_v50  ;;  %v16310_v42 = vadd.f32 %v1546_v54, %v16166_v2  ;;  %v16313_v62 = vadd.f32 %v16207_v31, %v3806_v29  ;;  %v11948_v26 = vpop.f32.mrb[63].mxu1  ;;  %12370 = vmatmul.mubr.msk.f32.gmra.mrb[168].mxu1 %vm418_vm5, %v3846_v34  ;;  %12783 = vmatmul.mubr.msk.f32.gmra.mrb[32].mxu0 %vm74_vm4, %v10721_v32  ;;  %v10722_v2 = vld [vmem:[%s18308_s20 + $0x480] sm:$0xff] }
 0x337   :  { %v12361_v51 = vpop.f32.mrb[183].mxu0  ;;  %12372 = vmatprep.mubr.msk.f32.mxu1 %vm14255_vm1, %v14256_v6  ;;  %12785 = vmatprep.mubr.msk.f32.mxu0 %vm14255_vm1, %v14256_v6  ;;  %v10487_v17 = vadd.f32 -1.0, %v14054_v36  ;;  %v10555_v26 = vld [vmem:[%s18285_s4 + $0xe8] sm:$0xff] }
 0x338   :  { %14059 = vpow2.f32 %v3834_v38  ;;  %v3823_v48 = vmin.f32 %v16313_v62, 0.0  ;;  %vm3816_vm8 = vcmp.gt.f32.partialorder %v16313_v62, 0.0  ;;  %v10554_v38 = vld [vmem:[%s18285_s4 + $0xe0] sm:$0xff] }
 0x339   :  { %v1551_v35 = vpop.f32.mrb[64].mxu1  ;;  %v4078_v3 = vpop.f32.mrb[184].mxu0  ;;  %v3847_v47 = vsel %vm3812_vm15, %v16228_v30, %v10487_v17 }
 0x33a   :  { %v14056_v37 = vpop.eup %14055  ;;  %v3836_v53 = vmul.f32 1.442695, %v3823_v48  ;;  %v16328_v56 = vadd.f32 %v1551_v35, %v16184_v23  ;;  %v16331_v40 = vadd.f32 %v16207_v31, %v4078_v3  ;;  %v11951_v59 = vpop.f32.mrb[65].mxu1  ;;  %12373 = vmatmul.mubr.msk.f32.gmra.mrb[170].mxu1 %vm418_vm5, %v3847_v47  ;;  %12786 = vmatmul.mubr.msk.f32.gmra.mrb[34].mxu0 %vm74_vm4, %v10722_v2  ;;  %v10723_v23 = vld [vmem:[%s18308_s20 + $0x488] sm:$0xff] }
 0x33b   :  { %v12397_v57 = vpop.f32.mrb[185].mxu0  ;;  %12375 = vmatprep.mubr.msk.f32.mxu1 %vm14255_vm1, %v14256_v6  ;;  %12788 = vmatprep.mubr.msk.f32.mxu0 %vm14255_vm1, %v14256_v6  ;;  %v10488_v30 = vadd.f32 -1.0, %v14056_v37 }
 0x33c   :  { %14061 = vpow2.f32 %v3836_v53  ;;  %v4119_v61 = vmin.f32 %v16331_v40, 0.0  ;;  %vm4112_vm9 = vcmp.gt.f32.partialorder %v16331_v40, 0.0 }
 0x33d   :  { %v1556_v52 = vpop.f32.mrb[66].mxu1  ;;  %v4083_v45 = vpop.f32.mrb[186].mxu0  ;;  %v3848_v63 = vsel %vm3813_vm0, %v16246_v44, %v10488_v30 }
 0x33e   :  { %v14058_v1 = vpop.eup %14057  ;;  %v4126_v60 = vmul.f32 1.442695, %v4119_v61  ;;  %v16346_v10 = vadd.f32 %v1556_v52, %v16202_v27  ;;  %v16349_v55 = vadd.f32 %v16207_v31, %v4083_v45  ;;  %v11954_v25 = vpop.f32.mrb[67].mxu1  ;;  %12376 = vmatmul.mubr.msk.f32.gmra.mrb[172].mxu1 %vm418_vm5, %v3848_v63  ;;  %12789 = vmatmul.mubr.msk.f32.gmra.mrb[36].mxu0 %vm74_vm4, %v10723_v23  ;;  %v10724_v27 = vld [vmem:[%s18308_s20 + $0x490] sm:$0x3] }
 0x33f   :  { %v12400_v11 = vpop.f32.mrb[187].mxu0  ;;  %12378 = vmatprep.mubr.msk.f32.mxu1 %vm14255_vm1, %v14256_v6  ;;  %12791 = vmatprep.mubr.msk.f32.mxu0 %vm14255_vm1, %v14256_v6  ;;  %v10489_v44 = vadd.f32 -1.0, %v14058_v1 }
 0x340   :  { %14063 = vpow2.f32 %v4126_v60  ;;  %v4120_v58 = vmin.f32 %v16349_v55, 0.0  ;;  %v10752_v11 = vld [vmem:[%s18308_s20 + $0x4b0] sm:$0xff]  ;;  %vm4113_vm10 = vcmp.gt.f32.partialorder %v16349_v55, 0.0 }
 0x341   :  { %v1828_v13 = vpop.f32.mrb[68].mxu1  ;;  %v4088_v15 = vpop.f32.mrb[188].mxu0  ;;  %v3849_v18 = vsel %vm3814_vm6, %v16272_v12, %v10489_v44 }
 0x342   :  { %v14060_v33 = vpop.eup %14059  ;;  %v4128_v41 = vmul.f32 1.442695, %v4120_v58  ;;  %v16364_v20 = vadd.f32 %v1828_v13, %v16225_v46  ;;  %v16367_v5 = vadd.f32 %v16207_v31, %v4088_v15  ;;  %v11990_v39 = vpop.f32.mrb[69].mxu1  ;;  %12379 = vmatmul.mubr.msk.f32.gmra.mrb[174].mxu1 %vm418_vm5, %v3849_v18  ;;  %12792 = vmatmul.mubr.msk.f32.gmra.mrb[38].mxu0 %vm74_vm4, %v10724_v27  ;;  %v10749_v46 = vld [vmem:[%s18308_s20 + $0x498] sm:$0xff] }
 0x343   :  { %v12403_v19 = vpop.f32.mrb[189].mxu0  ;;  %12381 = vmatprep.mubr.msk.f32.mxu1 %vm14255_vm1, %v14256_v6  ;;  %12827 = vmatprep.mubr.msk.f32.mxu0 %vm14255_vm1, %v14256_v6  ;;  %v10490_v12 = vadd.f32 -1.0, %v14060_v33 }
 0x344   :  { %14065 = vpow2.f32 %v4128_v41  ;;  %v4121_v21 = vmin.f32 %v16367_v5, 0.0  ;;  %vm4114_vm11 = vcmp.gt.f32.partialorder %v16367_v5, 0.0 }
 0x345   :  { %v1833_v16 = vpop.f32.mrb[70].mxu1  ;;  %v4093_v24 = vpop.f32.mrb[190].mxu0  ;;  %v3850_v49 = vsel %vm3815_vm7, %v16294_v22, %v10490_v12 }
 0x346   :  { %v14062_v9 = vpop.eup %14061  ;;  %v4130_v32 = vmul.f32 1.442695, %v4121_v21  ;;  %v16382_v50 = vadd.f32 %v1833_v16, %v16243_v14  ;;  %v16385_v54 = vadd.f32 %v16207_v31, %v4093_v24  ;;  %v11993_v29 = vpop.f32.mrb[71].mxu1  ;;  %12382 = vmatmul.mubr.msk.f32.gmra.mrb[176].mxu1 %vm418_vm5, %v3850_v49  ;;  %12828 = vmatmul.mubr.msk.f32.vlgmr.msra.gmra.mrb[40].mxu0 %vm74_vm4, %v10749_v46  ;;  %v10750_v14 = vld [vmem:[%s18308_s20 + $0x4a0] sm:$0xff] }
 0x347   :  { %v12406_v34 = vpop.f32.mrb[191].mxu0  ;;  %13631 = vmatpush3.bf16.msra.mxu0 %v14359_v4  ;;  %12384 = vmatprep.mubr.msk.f32.mxu1 %vm14255_vm1, %v14256_v6  ;;  %v10491_v22 = vadd.f32 -1.0, %v14062_v9 }
 0x348   :  { %14067 = vpow2.f32 %v4130_v32  ;;  %v4122_v36 = vmin.f32 %v16385_v54, 0.0  ;;  %12830 = vmatprep.mubr.msk.f32.mxu0 %vm14255_vm1, %v14256_v6  ;;  %13632 = vmatprep.subr.bf16.mxu0 %v14254_v0  ;;  %vm4115_vm12 = vcmp.gt.f32.partialorder %v16385_v54, 0.0 }
 0x349   :  { %v1838_v51 = vpop.f32.mrb[72].mxu1  ;;  %v4098_v17 = vpop.f32.mrb[192].mxu0  ;;  %v3851_v2 = vsel %vm3816_vm8, %v16313_v62, %v10491_v22  ;;  %v13557_v62 = vpack.c.bf16 %v10555_v26, %v10554_v38 }
 0x34a   :  { %v14064_v48 = vpop.eup %14063  ;;  %v4132_v35 = vmul.f32 1.442695, %v4122_v36  ;;  %v16408_v3 = vadd.f32 %v1838_v51, %v16269_v28  ;;  %v16411_v47 = vadd.f32 %v16207_v31, %v4098_v17  ;;  %v11996_v37 = vpop.f32.mrb[73].mxu1  ;;  %12385 = vmatmul.mubr.msk.f32.gmra.mrb[178].mxu1 %vm418_vm5, %v3851_v2  ;;  %12831 = vmatmul.mubr.msk.f32.gmra.mrb[42].mxu0 %vm74_vm4, %v10750_v14  ;;  %v10751_v28 = vld [vmem:[%s18308_s20 + $0x4a8] sm:$0xff] }
 0x34b   :  { %v12409_v53 = vpop.f32.mrb[193].mxu0  ;;  %v10516_v59 = vadd.f32 -1.0, %v14064_v48  ;;  %12420 = vmatprep.mubr.msk.f32.mxu1 %vm14255_vm1, %v14256_v6  ;;  %12833 = vmatprep.mubr.msk.f32.mxu0 %vm14255_vm1, %v14256_v6 }
 0x34c   :  { %14069 = vpow2.f32 %v4132_v35  ;;  %v4123_v57 = vmin.f32 %v16411_v47, 0.0  ;;  %13635 = vmatpush3.bf16.msk.msra.mxu0 %vm14374_vm3, %v14369_v7  ;;  %vm4116_vm13 = vcmp.gt.f32.partialorder %v16411_v47, 0.0 }
 0x34d   :  { %v4147_v30 = vsel %vm4112_vm9, %v16331_v40, %v10516_v59  ;;  %v1843_v23 = vpop.f32.mrb[74].mxu1  ;;  %v4103_v61 = vpop.f32.mrb[194].mxu0  ;;  %13639 = vmatprep.subr.bf16.mxu0 %v14254_v0 }
 0x34e   :  { %v14066_v52 = vpop.eup %14065  ;;  %v4134_v45 = vmul.f32 1.442695, %v4123_v57  ;;  %v16430_v63 = vadd.f32 %v1843_v23, %v16291_v43  ;;  %v16433_v1 = vadd.f32 %v16207_v31, %v4103_v61  ;;  %v11999_v60 = vpop.f32.mrb[75].mxu1  ;;  %12421 = vmatmul.mubr.msk.f32.vlgmr.msra.gmra.mrb[180].mxu1 %vm418_vm5, %v4147_v30  ;;  %12834 = vmatmul.mubr.msk.f32.gmra.mrb[44].mxu0 %vm74_vm4, %v10751_v28 }
 0x34f   :  { %v12412_v25 = vpop.f32.mrb[195].mxu0  ;;  %13558 = vmatpush3.bf16.msra.mxu1 %v13557_v62  ;;  %12423 = vmatprep.mubr.msk.f32.mxu1 %vm14255_vm1, %v14256_v6  ;;  %v10517_v40 = vadd.f32 -1.0, %v14066_v52 }
 0x350   :  { %14071 = vpow2.f32 %v4134_v45  ;;  %v4124_v43 = vmin.f32 %v16433_v1, 0.0  ;;  %12836 = vmatprep.mubr.msk.f32.mxu0 %vm14255_vm1, %v14256_v6  ;;  %13566 = vmatprep.subr.bf16.mxu1 %v14254_v0  ;;  %vm4117_vm14 = vcmp.gt.f32.partialorder %v16433_v1, 0.0 }
 0x351   :  { %v1848_v44 = vpop.f32.mrb[76].mxu1  ;;  %v4108_v27 = vpop.f32.mrb[196].mxu0  ;;  %v4148_v58 = vsel %vm4113_vm10, %v16349_v55, %v10517_v40 }
 0x352   :  { %v14068_v13 = vpop.eup %14067  ;;  %v4136_v15 = vmul.f32 1.442695, %v4124_v43  ;;  %v16449_v18 = vadd.f32 %v1848_v44, %v16310_v42  ;;  %v16452_v33 = vadd.f32 %v16207_v31, %v4108_v27  ;;  %v12002_v41 = vpop.f32.mrb[77].mxu1  ;;  %12424 = vmatmul.mubr.msk.f32.gmra.mrb[182].mxu1 %vm418_vm5, %v4148_v58  ;;  %12837 = vmatmul.mubr.msk.f32.gmra.mrb[46].mxu0 %vm74_vm4, %v10752_v11  ;;  %v10753_v42 = vld [vmem:[%s18308_s20 + $0x4b8] sm:$0xff] }
 0x353   :  { %v12415_v39 = vpop.f32.mrb[197].mxu0  ;;  %12426 = vmatprep.mubr.msk.f32.mxu1 %vm14255_vm1, %v14256_v6  ;;  %12839 = vmatprep.mubr.msk.f32.mxu0 %vm14255_vm1, %v14256_v6  ;;  %v10518_v55 = vadd.f32 -1.0, %v14068_v13  ;;  %v10586_v41 = vld [vmem:[%s18285_s4 + $0xf8] sm:$0xff] }
 0x354   :  { %14073 = vpow2.f32 %v4136_v15  ;;  %v4125_v19 = vmin.f32 %v16452_v33, 0.0  ;;  %vm4118_vm15 = vcmp.gt.f32.partialorder %v16452_v33, 0.0  ;;  %v10585_v15 = vld [vmem:[%s18285_s4 + $0xf0] sm:$0xff] }
 0x355   :  { %v1853_v12 = vpop.f32.mrb[78].mxu1  ;;  %v4380_v46 = vpop.f32.mrb[198].mxu0  ;;  %v4149_v21 = vsel %vm4114_vm11, %v16367_v5, %v10518_v55 }
 0x356   :  { %v14070_v16 = vpop.eup %14069  ;;  %v4138_v24 = vmul.f32 1.442695, %v4125_v19  ;;  %v16467_v49 = vadd.f32 %v1853_v12, %v16328_v56  ;;  %v16470_v9 = vadd.f32 %v16207_v31, %v4380_v46  ;;  %v12005_v32 = vpop.f32.mrb[79].mxu1  ;;  %12427 = vmatmul.mubr.msk.f32.gmra.mrb[184].mxu1 %vm418_vm5, %v4149_v21  ;;  %12840 = vmatmul.mubr.msk.f32.gmra.mrb[48].mxu0 %vm74_vm4, %v10753_v42  ;;  %v10754_v56 = vld [vmem:[%s18308_s20 + $0x4c0] sm:$0xff] }
 0x357   :  { %v12451_v29 = vpop.f32.mrb[199].mxu0  ;;  %12429 = vmatprep.mubr.msk.f32.mxu1 %vm14255_vm1, %v14256_v6  ;;  %12842 = vmatprep.mubr.msk.f32.mxu0 %vm14255_vm1, %v14256_v6  ;;  %v10519_v5 = vadd.f32 -1.0, %v14070_v16 }
 0x358   :  { %14075 = vpow2.f32 %v4138_v24  ;;  %v4421_v34 = vmin.f32 %v16470_v9, 0.0  ;;  %vm4414_vm0 = vcmp.gt.f32.partialorder %v16470_v9, 0.0 }
 0x359   :  { %v1858_v22 = vpop.f32.mrb[80].mxu1  ;;  %v4385_v14 = vpop.f32.mrb[200].mxu0  ;;  %v4150_v36 = vsel %vm4115_vm12, %v16385_v54, %v10519_v5 }
 0x35a   :  { %v14072_v38 = vpop.eup %14071  ;;  %v4428_v26 = vmul.f32 1.442695, %v4421_v34  ;;  %v16485_v51 = vadd.f32 %v1858_v22, %v16346_v10  ;;  %v16488_v17 = vadd.f32 %v16207_v31, %v4385_v14  ;;  %v12008_v2 = vpop.f32.mrb[81].mxu1  ;;  %12430 = vmatmul.mubr.msk.f32.gmra.mrb[186].mxu1 %vm418_vm5, %v4150_v36  ;;  %12843 = vmatmul.mubr.msk.f32.gmra.mrb[50].mxu0 %vm74_vm4, %v10754_v56  ;;  %v10755_v10 = vld [vmem:[%s18308_s20 + $0x4c8] sm:$0x3] }
 0x35b   :  { %v12454_v48 = vpop.f32.mrb[201].mxu0  ;;  %12432 = vmatprep.mubr.msk.f32.mxu1 %vm14255_vm1, %v14256_v6  ;;  %12845 = vmatprep.mubr.msk.f32.mxu0 %vm14255_vm1, %v14256_v6  ;;  %v10520_v54 = vadd.f32 -1.0, %v14072_v38 }
 0x35c   :  { %14077 = vpow2.f32 %v4428_v26  ;;  %v4422_v35 = vmin.f32 %v16488_v17, 0.0  ;;  %v10783_v48 = vld [vmem:[%s18308_s20 + $0x4e8] sm:$0xff]  ;;  %vm4415_vm6 = vcmp.gt.f32.partialorder %v16488_v17, 0.0 }
 0x35d   :  { %v2130_v37 = vpop.f32.mrb[82].mxu1  ;;  %v4390_v53 = vpop.f32.mrb[202].mxu0  ;;  %v4151_v59 = vsel %vm4116_vm13, %v16411_v47, %v10520_v54 }
 0x35e   :  { %v14074_v28 = vpop.eup %14073  ;;  %v4430_v62 = vmul.f32 1.442695, %v4422_v35  ;;  %v16503_v57 = vadd.f32 %v2130_v37, %v16364_v20  ;;  %v16506_v30 = vadd.f32 %v16207_v31, %v4390_v53  ;;  %v12044_v23 = vpop.f32.mrb[83].mxu1  ;;  %12433 = vmatmul.mubr.msk.f32.gmra.mrb[188].mxu1 %vm418_vm5, %v4151_v59  ;;  %12846 = vmatmul.mubr.msk.f32.gmra.mrb[52].mxu0 %vm74_vm4, %v10755_v10  ;;  %v10780_v20 = vld [vmem:[%s18308_s20 + $0x4d0] sm:$0xff] }
 0x35f   :  { %v12457_v61 = vpop.f32.mrb[203].mxu0  ;;  %12435 = vmatprep.mubr.msk.f32.mxu1 %vm14255_vm1, %v14256_v6  ;;  %12881 = vmatprep.mubr.msk.f32.mxu0 %vm14255_vm1, %v14256_v6  ;;  %v10521_v47 = vadd.f32 -1.0, %v14074_v28 }
 0x360   :  { %14079 = vpow2.f32 %v4430_v62  ;;  %v4423_v52 = vmin.f32 %v16506_v30, 0.0  ;;  %vm4416_vm7 = vcmp.gt.f32.partialorder %v16506_v30, 0.0 }
 0x361   :  { %v2135_v45 = vpop.f32.mrb[84].mxu1  ;;  %v4395_v60 = vpop.f32.mrb[204].mxu0  ;;  %v4152_v25 = vsel %vm4117_vm14, %v16433_v1, %v10521_v47 }
 0x362   :  { %v14076_v40 = vpop.eup %14075  ;;  %v4432_v11 = vmul.f32 1.442695, %v4423_v52  ;;  %v16521_v43 = vadd.f32 %v2135_v45, %v16382_v50  ;;  %v16524_v44 = vadd.f32 %v16207_v31, %v4395_v60  ;;  %v12047_v27 = vpop.f32.mrb[85].mxu1  ;;  %12436 = vmatmul.mubr.msk.f32.gmra.mrb[190].mxu1 %vm418_vm5, %v4152_v25  ;;  %12882 = vmatmul.mubr.msk.f32.vlgmr.msra.gmra.mrb[54].mxu0 %vm74_vm4, %v10780_v20  ;;  %v10781_v50 = vld [vmem:[%s18308_s20 + $0x4d8] sm:$0xff] }
 0x363   :  { %v12460_v58 = vpop.f32.mrb[205].mxu0  ;;  %13641 = vmatpush3.bf16.msra.mxu0 %v14359_v4  ;;  %12438 = vmatprep.mubr.msk.f32.mxu1 %vm14255_vm1, %v14256_v6  ;;  %v10522_v1 = vadd.f32 -1.0, %v14076_v40 }
 0x364   :  { %14081 = vpow2.f32 %v4432_v11  ;;  %v4424_v13 = vmin.f32 %v16524_v44, 0.0  ;;  %12884 = vmatprep.mubr.msk.f32.mxu0 %vm14255_vm1, %v14256_v6  ;;  %13642 = vmatprep.subr.bf16.mxu0 %v14254_v0  ;;  %vm4417_vm8 = vcmp.gt.f32.partialorder %v16524_v44, 0.0 }
 0x365   :  { %v2140_v39 = vpop.f32.mrb[86].mxu1  ;;  %v4400_v55 = vpop.f32.mrb[206].mxu0  ;;  %v4153_v42 = vsel %vm4118_vm15, %v16452_v33, %v10522_v1  ;;  %v13567_v33 = vpack.c.bf16 %v10586_v41, %v10585_v15 }
 0x366   :  { %v14078_v19 = vpop.eup %14077  ;;  %v4434_v12 = vmul.f32 1.442695, %v4424_v13  ;;  %v16547_v46 = vadd.f32 %v2140_v39, %v16408_v3  ;;  %v16550_v21 = vadd.f32 %v16207_v31, %v4400_v55  ;;  %v12050_v16 = vpop.f32.mrb[87].mxu1  ;;  %12439 = vmatmul.mubr.msk.f32.gmra.mrb[192].mxu1 %vm418_vm5, %v4153_v42  ;;  %12885 = vmatmul.mubr.msk.f32.gmra.mrb[56].mxu0 %vm74_vm4, %v10781_v50  ;;  %v10782_v3 = vld [vmem:[%s18308_s20 + $0x4e0] sm:$0xff] }
 0x367   :  { %v12463_v24 = vpop.f32.mrb[207].mxu0  ;;  %v10547_v32 = vadd.f32 -1.0, %v14078_v19  ;;  %12474 = vmatprep.mubr.msk.f32.mxu1 %vm14255_vm1, %v14256_v6  ;;  %12887 = vmatprep.mubr.msk.f32.mxu0 %vm14255_vm1, %v14256_v6 }
 0x368   :  { %14083 = vpow2.f32 %v4434_v12  ;;  %v4425_v29 = vmin.f32 %v16550_v21, 0.0  ;;  %13645 = vmatpush3.bf16.msk.msra.mxu0 %vm14374_vm3, %v14369_v7  ;;  %vm4418_vm9 = vcmp.gt.f32.partialorder %v16550_v21, 0.0 }
 0x369   :  { %v4449_v5 = vsel %vm4414_vm0, %v16470_v9, %v10547_v32  ;;  %v2145_v56 = vpop.f32.mrb[88].mxu1  ;;  %v4405_v34 = vpop.f32.mrb[208].mxu0  ;;  %13649 = vmatprep.subr.bf16.mxu0 %v14254_v0 }
 0x36a   :  { %v14080_v22 = vpop.eup %14079  ;;  %v4436_v14 = vmul.f32 1.442695, %v4425_v29  ;;  %v16569_v36 = vadd.f32 %v2145_v56, %v16430_v63  ;;  %v16572_v38 = vadd.f32 %v16207_v31, %v4405_v34  ;;  %v12053_v26 = vpop.f32.mrb[89].mxu1  ;;  %12475 = vmatmul.mubr.msk.f32.vlgmr.msra.gmra.mrb[194].mxu1 %vm418_vm5, %v4449_v5  ;;  %12888 = vmatmul.mubr.msk.f32.gmra.mrb[58].mxu0 %vm74_vm4, %v10782_v3 }
 0x36b   :  { %v12466_v2 = vpop.f32.mrb[209].mxu0  ;;  %13568 = vmatpush3.bf16.msra.mxu1 %v13567_v33  ;;  %12477 = vmatprep.mubr.msk.f32.mxu1 %vm14255_vm1, %v14256_v6  ;;  %v10548_v9 = vadd.f32 -1.0, %v14080_v22 }
 0x36c   :  { %14085 = vpow2.f32 %v4436_v14  ;;  %v4426_v63 = vmin.f32 %v16572_v38, 0.0  ;;  %12890 = vmatprep.mubr.msk.f32.mxu0 %vm14255_vm1, %v14256_v6  ;;  %13576 = vmatprep.subr.bf16.mxu1 %v14254_v0  ;;  %vm4419_vm10 = vcmp.gt.f32.partialorder %v16572_v38, 0.0 }
 0x36d   :  { %v2150_v54 = vpop.f32.mrb[90].mxu1  ;;  %v4410_v10 = vpop.f32.mrb[210].mxu0  ;;  %v4450_v35 = vsel %vm4415_vm6, %v16488_v17, %v10548_v9 }
 0x36e   :  { %v14082_v37 = vpop.eup %14081  ;;  %v4438_v53 = vmul.f32 1.442695, %v4426_v63  ;;  %v16588_v59 = vadd.f32 %v2150_v54, %v16449_v18  ;;  %v16591_v28 = vadd.f32 %v16207_v31, %v4410_v10  ;;  %v12056_v62 = vpop.f32.mrb[91].mxu1  ;;  %12478 = vmatmul.mubr.msk.f32.gmra.mrb[196].mxu1 %vm418_vm5, %v4450_v35  ;;  %12891 = vmatmul.mubr.msk.f32.gmra.mrb[60].mxu0 %vm74_vm4, %v10783_v48  ;;  %v10784_v18 = vld [vmem:[%s18308_s20 + $0x4f0] sm:$0xff] }
 0x36f   :  { %v12469_v23 = vpop.f32.mrb[211].mxu0  ;;  %12480 = vmatprep.mubr.msk.f32.mxu1 %vm14255_vm1, %v14256_v6  ;;  %12893 = vmatprep.mubr.msk.f32.mxu0 %vm14255_vm1, %v14256_v6  ;;  %v10549_v17 = vadd.f32 -1.0, %v14082_v37 }
 0x370   :  { %14087 = vpow2.f32 %v4438_v53  ;;  %v4427_v61 = vmin.f32 %v16591_v28, 0.0  ;;  %vm4420_vm11 = vcmp.gt.f32.partialorder %v16591_v28, 0.0  ;;  %v10617_v53 = vld [vmem:[%s18285_s4 + $0x108] sm:$0xff] }
 0x371   :  { %v2155_v47 = vpop.f32.mrb[92].mxu1  ;;  %v4682_v20 = vpop.f32.mrb[212].mxu0  ;;  %v4451_v52 = vsel %vm4416_vm7, %v16506_v30, %v10549_v17 }
 0x372   :  { %v14084_v45 = vpop.eup %14083  ;;  %v4440_v60 = vmul.f32 1.442695, %v4427_v61  ;;  %v16606_v25 = vadd.f32 %v2155_v47, %v16467_v49  ;;  %v16609_v40 = vadd.f32 %v16207_v31, %v4682_v20  ;;  %v12059_v11 = vpop.f32.mrb[93].mxu1  ;;  %12481 = vmatmul.mubr.msk.f32.gmra.mrb[198].mxu1 %vm418_vm5, %v4451_v52  ;;  %12894 = vmatmul.mubr.msk.f32.gmra.mrb[62].mxu0 %vm74_vm4, %v10784_v18  ;;  %v10785_v49 = vld [vmem:[%s18308_s20 + $0x4f8] sm:$0xff] }
 0x373   :  { %v12505_v27 = vpop.f32.mrb[213].mxu0  ;;  %12483 = vmatprep.mubr.msk.f32.mxu1 %vm14255_vm1, %v14256_v6  ;;  %12896 = vmatprep.mubr.msk.f32.mxu0 %vm14255_vm1, %v14256_v6  ;;  %v10550_v30 = vadd.f32 -1.0, %v14084_v45 }
 0x374   :  { %14089 = vpow2.f32 %v4440_v60  ;;  %v4723_v58 = vmin.f32 %v16609_v40, 0.0  ;;  %vm4716_vm12 = vcmp.gt.f32.partialorder %v16609_v40, 0.0 }
 0x375   :  { %v2160_v1 = vpop.f32.mrb[94].mxu1  ;;  %v4687_v50 = vpop.f32.mrb[214].mxu0  ;;  %v4452_v13 = vsel %vm4417_vm8, %v16524_v44, %v10550_v30 }
 0x376   :  { %v14086_v15 = vpop.eup %14085  ;;  %v4730_v41 = vmul.f32 1.442695, %v4723_v58  ;;  %v16624_v39 = vadd.f32 %v2160_v1, %v16485_v51  ;;  %v16627_v55 = vadd.f32 %v16207_v31, %v4687_v50  ;;  %v12062_v42 = vpop.f32.mrb[95].mxu1  ;;  %12484 = vmatmul.mubr.msk.f32.gmra.mrb[200].mxu1 %vm418_vm5, %v4452_v13  ;;  %12897 = vmatmul.mubr.msk.f32.gmra.mrb[64].mxu0 %vm74_vm4, %v10785_v49  ;;  %v10786_v51 = vld [vmem:[%s18308_s20 + $0x500] sm:$0x3] }
 0x377   :  { %v12508_v19 = vpop.f32.mrb[215].mxu0  ;;  %12486 = vmatprep.mubr.msk.f32.mxu1 %vm14255_vm1, %v14256_v6  ;;  %12899 = vmatprep.mubr.msk.f32.mxu0 %vm14255_vm1, %v14256_v6  ;;  %v10551_v44 = vadd.f32 -1.0, %v14086_v15 }
 0x378   :  { %14091 = vpow2.f32 %v4730_v41  ;;  %v4724_v12 = vmin.f32 %v16627_v55, 0.0 }
 0x379   :  { %v2432_v16 = vpop.f32.mrb[96].mxu1  ;;  %v4692_v24 = vpop.f32.mrb[216].mxu0  ;;  %v4453_v32 = vsel %vm4418_vm9, %v16550_v21, %v10551_v44 }
 0x37a   :  { %v14088_v3 = vpop.eup %14087  ;;  %v4732_v33 = vmul.f32 1.442695, %v4724_v12  ;;  %v16642_v29 = vadd.f32 %v2432_v16, %v16503_v57  ;;  %v16645_v5 = vadd.f32 %v16207_v31, %v4692_v24  ;;  %v12098_v56 = vpop.f32.mrb[97].mxu1  ;;  %12487 = vmatmul.mubr.msk.f32.gmra.mrb[202].mxu1 %vm418_vm5, %v4453_v32  ;;  %12900 = vmatmul.mubr.msk.f32.gmra.mrb[66].mxu0 %vm74_vm4, %v10786_v51  ;;  %v10811_v57 = vld [vmem:[%s18308_s20 + $0x508] sm:$0xff] }
 0x37b   :  { %v12511_v34 = vpop.f32.mrb[217].mxu0  ;;  %12489 = vmatprep.mubr.msk.f32.mxu1 %vm14255_vm1, %v14256_v6  ;;  %12935 = vmatprep.mubr.msk.f32.mxu0 %vm14255_vm1, %v14256_v6  ;;  %v10552_v21 = vadd.f32 -1.0, %v14088_v3 }
 0x37c   :  { %14093 = vpow2.f32 %v4732_v33  ;;  %v4725_v22 = vmin.f32 %v16645_v5, 0.0  ;;  %vm4718_vm13 = vcmp.gt.f32.partialorder %v16645_v5, 0.0 }
 0x37d   :  { %v2437_v14 = vpop.f32.mrb[98].mxu1  ;;  %v4697_v26 = vpop.f32.mrb[218].mxu0  ;;  %v4454_v2 = vsel %vm4419_vm10, %v16572_v38, %v10552_v21 }
 0x37e   :  { %v14090_v9 = vpop.eup %14089  ;;  %v4734_v48 = vmul.f32 1.442695, %v4725_v22  ;;  %v16660_v63 = vadd.f32 %v2437_v14, %v16521_v43  ;;  %v16663_v54 = vadd.f32 %v16207_v31, %v4697_v26  ;;  %v12101_v10 = vpop.f32.mrb[99].mxu1  ;;  %12490 = vmatmul.mubr.msk.f32.gmra.mrb[204].mxu1 %vm418_vm5, %v4454_v2  ;;  %12936 = vmatmul.mubr.msk.f32.vlgmr.msra.gmra.mrb[68].mxu0 %vm74_vm4, %v10811_v57  ;;  %v10812_v43 = vld [vmem:[%s18308_s20 + $0x510] sm:$0xff]  ;;  %v16750_v22 = vld [vmem:[%s18286_s3] ss:$0 sm:$0xff] }
 0x37f   :  { %v12514_v35 = vpop.f32.mrb[219].mxu0  ;;  %13651 = vmatpush3.bf16.msra.mxu0 %v14359_v4  ;;  %12492 = vmatprep.mubr.msk.f32.mxu1 %vm14255_vm1, %v14256_v6  ;;  %v10553_v38 = vadd.f32 -1.0, %v14090_v9  ;;  %v10616_v4 = vld [vmem:[%s18285_s4 + $0x100] sm:$0xff] }
 0x380   :  { %14095 = vpow2.f32 %v4734_v48  ;;  %v4726_v37 = vmin.f32 %v16663_v54, 0.0  ;;  %12938 = vmatprep.mubr.msk.f32.mxu0 %vm14255_vm1, %v14256_v6  ;;  %13652 = vmatprep.subr.bf16.mxu0 %v14254_v0  ;;  %vm4719_vm14 = vcmp.gt.f32.partialorder %v16663_v54, 0.0 }
 0x381   :  { %v2442_v62 = vpop.f32.mrb[100].mxu1  ;;  %v4702_v23 = vpop.f32.mrb[220].mxu0  ;;  %v4455_v17 = vsel %vm4420_vm11, %v16591_v28, %v10553_v38  ;;  %v13577_v28 = vpack.c.bf16 %v10617_v53, %v10616_v4 }
 0x382   :  { %v14092_v18 = vpop.eup %14091  ;;  %v4736_v61 = vmul.f32 1.442695, %v4726_v37  ;;  %v16686_v47 = vadd.f32 %v2442_v62, %v16547_v46  ;;  %v16689_v20 = vadd.f32 %v16207_v31, %v4702_v23  ;;  %v12104_v52 = vpop.f32.mrb[101].mxu1  ;;  %12493 = vmatmul.mubr.msk.f32.gmra.mrb[206].mxu1 %vm418_vm5, %v4455_v17  ;;  %12939 = vmatmul.mubr.msk.f32.gmra.mrb[70].mxu0 %vm74_vm4, %v10812_v43  ;;  %v10813_v46 = vld [vmem:[%s18308_s20 + $0x518] sm:$0xff] }
 0x383   :  { %v12517_v45 = vpop.f32.mrb[221].mxu0  ;;  %v10578_v60 = vadd.f32 -1.0, %v14092_v18  ;;  %12528 = vmatprep.mubr.msk.f32.mxu1 %vm14255_vm1, %v14256_v6  ;;  %12941 = vmatprep.mubr.msk.f32.mxu0 %vm14255_vm1, %v14256_v6 }
 0x384   :  { %14097 = vpow2.f32 %v4736_v61  ;;  %v4727_v11 = vmin.f32 %v16689_v20, 0.0  ;;  %13655 = vmatpush3.bf16.msk.msra.mxu0 %vm14374_vm3, %v14369_v7  ;;  %vm4717_vm3 = vcmp.gt.f32.partialorder %v16627_v55, 0.0  ;;  %vm4720_vm15 = vcmp.gt.f32.partialorder %v16689_v20, 0.0 }
 0x385   :  { %v4751_v27 = vsel %vm4716_vm12, %v16609_v40, %v10578_v60  ;;  %v2447_v30 = vpop.f32.mrb[102].mxu1  ;;  %v4707_v49 = vpop.f32.mrb[222].mxu0  ;;  %13659 = vmatprep.subr.bf16.mxu0 %v14254_v0 }
 0x386   :  { %v14094_v58 = vpop.eup %14093  ;;  %v4738_v1 = vmul.f32 1.442695, %v4727_v11  ;;  %v16708_v50 = vadd.f32 %v2447_v30, %v16569_v36  ;;  %v16711_v13 = vadd.f32 %v16207_v31, %v4707_v49  ;;  %v12107_v15 = vpop.f32.mrb[103].mxu1  ;;  %12529 = vmatmul.mubr.msk.f32.vlgmr.msra.gmra.mrb[208].mxu1 %vm418_vm5, %v4751_v27  ;;  %12942 = vmatmul.mubr.msk.f32.gmra.mrb[72].mxu0 %vm74_vm4, %v10813_v46  ;;  %v10842_v27 = vld [vmem:[%s18308_s20 + $0x540] sm:$0xff] }
 0x387   :  { %v12520_v41 = vpop.f32.mrb[223].mxu0  ;;  %13578 = vmatpush3.bf16.msra.mxu1 %v13577_v28  ;;  %12531 = vmatprep.mubr.msk.f32.mxu1 %vm14255_vm1, %v14256_v6  ;;  %v10579_v7 = vadd.f32 -1.0, %v14094_v58 }
 0x388   :  { %14099 = vpow2.f32 %v4738_v1  ;;  %v4728_v36 = vmin.f32 %v16711_v13, 0.0  ;;  %12944 = vmatprep.mubr.msk.f32.mxu0 %vm14255_vm1, %v14256_v6  ;;  %13586 = vmatprep.subr.bf16.mxu1 %v14254_v0  ;;  %vm4721_vm0 = vcmp.gt.f32.partialorder %v16711_v13, 0.0 }
 0x389   :  { %v2452_v40 = vpop.f32.mrb[104].mxu1  ;;  %v4712_v42 = vpop.f32.mrb[224].mxu0  ;;  %v4752_v19 = vsel %vm4717_vm3, %v16627_v55, %v10579_v7 }
 0x38a   :  { %v14096_v44 = vpop.eup %14095  ;;  %v4740_v51 = vmul.f32 1.442695, %v4728_v36  ;;  %v16727_v12 = vadd.f32 %v2452_v40, %v16588_v59  ;;  %v16730_v16 = vadd.f32 %v16207_v31, %v4712_v42  ;;  %v12110_v24 = vpop.f32.mrb[105].mxu1  ;;  %12532 = vmatmul.mubr.msk.f32.gmra.mrb[210].mxu1 %vm418_vm5, %v4752_v19  ;;  %12945 = vmatmul.mubr.msk.f32.gmra.mrb[74].mxu0 %vm74_vm4, %v10814_v8  ;;  %v10815_v59 = vld [vmem:[%s18308_s20 + $0x528] sm:$0xff]  ;;  %v10648_v19 = vld [vmem:[%s18285_s4 + $0x118] sm:$0xff] }
 0x38b   :  { %v12523_v32 = vpop.f32.mrb[225].mxu0  ;;  %12534 = vmatprep.mubr.msk.f32.mxu1 %vm14255_vm1, %v14256_v6  ;;  %12947 = vmatprep.mubr.msk.f32.mxu0 %vm14255_vm1, %v14256_v6  ;;  %v10580_v55 = vadd.f32 -1.0, %v14096_v44  ;;  %v10843_v40 = vld [vmem:[%s18308_s20 + $0x548] sm:$0xff] }
 0x38c   :  { %14101 = vpow2.f32 %v4740_v51  ;;  %v4729_v31 = vmin.f32 %v16730_v16, 0.0  ;;  %vm4722_vm6 = vcmp.gt.f32.partialorder %v16730_v16, 0.0 }
 0x38d   :  { %v2457_v3 = vpop.f32.mrb[106].mxu1  ;;  %v4984_v33 = vpop.f32.mrb[226].mxu0  ;;  %v4753_v56 = vsel %vm4718_vm13, %v16645_v5, %v10580_v55  ;;  %v10816_v5 = vld [vmem:[%s18308_s20 + $0x530] sm:$0xff] }
 0x38e   :  { %v14098_v34 = vpop.eup %14097  ;;  %v4742_v21 = vmul.f32 1.442695, %v4729_v31  ;;  %v16745_v57 = vadd.f32 %v2457_v3, %v16606_v25  ;;  %v16753_v14 = vadd.f32 %v16750_v22, %v4984_v33  ;;  %v12113_v26 = vpop.f32.mrb[107].mxu1  ;;  %12535 = vmatmul.mubr.msk.f32.gmra.mrb[212].mxu1 %vm418_vm5, %v4753_v56  ;;  %12948 = vmatmul.mubr.msk.f32.gmra.mrb[76].mxu0 %vm74_vm4, %v10815_v59 }
 0x38f   :  { %v12559_v2 = vpop.f32.mrb[227].mxu0  ;;  %12537 = vmatprep.mubr.msk.f32.mxu1 %vm14255_vm1, %v14256_v6  ;;  %12950 = vmatprep.mubr.msk.f32.mxu0 %vm14255_vm1, %v14256_v6  ;;  %v10581_v25 = vadd.f32 -1.0, %v14098_v34 }
 0x390   :  { %14103 = vpow2.f32 %v4742_v21  ;;  %v5025_v9 = vmin.f32 %v16753_v14, 0.0  ;;  %vm5018_vm7 = vcmp.gt.f32.partialorder %v16753_v14, 0.0 }
 0x391   :  { %v2462_v48 = vpop.f32.mrb[108].mxu1  ;;  %v4989_v10 = vpop.f32.mrb[228].mxu0  ;;  %v4754_v35 = vsel %vm4719_vm14, %v16663_v54, %v10581_v25 }
 0x392   :  { %v14100_v38 = vpop.eup %14099  ;;  %v5032_v43 = vmul.f32 1.442695, %v5025_v9  ;;  %v16768_v37 = vadd.f32 %v2462_v48, %v16624_v39  ;;  %v16771_v4 = vadd.f32 %v16750_v22, %v4989_v10  ;;  %v12116_v53 = vpop.f32.mrb[109].mxu1  ;;  %12538 = vmatmul.mubr.msk.f32.gmra.mrb[214].mxu1 %vm418_vm5, %v4754_v35  ;;  %12951 = vmatmul.mubr.msk.f32.gmra.mrb[78].mxu0 %vm74_vm4, %v10816_v5  ;;  %v10817_v39 = vld [vmem:[%s18308_s20 + $0x538] sm:$0x3] }
 0x393   :  { %v12562_v62 = vpop.f32.mrb[229].mxu0  ;;  %12540 = vmatprep.mubr.msk.f32.mxu1 %vm14255_vm1, %v14256_v6  ;;  %12953 = vmatprep.mubr.msk.f32.mxu0 %vm14255_vm1, %v14256_v6  ;;  %v10582_v54 = vadd.f32 -1.0, %v14100_v38  ;;  %v10845_v38 = vld [vmem:[%s18308_s20 + $0x558] sm:$0xff] }
 0x394   :  { %14105 = vpow2.f32 %v5032_v43  ;;  %v5026_v23 = vmin.f32 %v16771_v4, 0.0  ;;  %vm5019_vm8 = vcmp.gt.f32.partialorder %v16771_v4, 0.0 }
 0x395   :  { %v2734_v17 = vpop.f32.mrb[110].mxu1  ;;  %v4994_v18 = vpop.f32.mrb[230].mxu0  ;;  %v4755_v61 = vsel %vm4720_vm15, %v16689_v20, %v10582_v54 }
 0x396   :  { %v14102_v52 = vpop.eup %14101  ;;  %v5034_v45 = vmul.f32 1.442695, %v5026_v23  ;;  %v16786_v60 = vadd.f32 %v16750_v22, %v4994_v18  ;;  %v12152_v46 = vpop.f32.mrb[111].mxu1  ;;  %12541 = vmatmul.mubr.msk.f32.gmra.mrb[216].mxu1 %vm418_vm5, %v4755_v61  ;;  %12954 = vmatmul.mubr.msk.f32.gmra.mrb[80].mxu0 %vm74_vm4, %v10817_v39  ;;  %v16791_v11 = vadd.f32 %v2734_v17, %v16642_v29 }
 0x397   :  { %v12565_v28 = vpop.f32.mrb[231].mxu0  ;;  %12543 = vmatprep.mubr.msk.f32.mxu1 %vm14255_vm1, %v14256_v6  ;;  %12989 = vmatprep.mubr.msk.f32.mxu0 %vm14255_vm1, %v14256_v6  ;;  %v10583_v20 = vadd.f32 -1.0, %v14102_v52  ;;  %v10846_v52 = vld [vmem:[%s18308_s20 + $0x560] sm:$0xff] }
 0x398   :  { %14107 = vpow2.f32 %v5034_v45  ;;  %v5027_v30 = vmin.f32 %v16786_v60, 0.0  ;;  %vm5020_vm9 = vcmp.gt.f32.partialorder %v16786_v60, 0.0 }
 0x399   :  { %v2739_v49 = vpop.f32.mrb[112].mxu1  ;;  %v4999_v58 = vpop.f32.mrb[232].mxu0  ;;  %v4756_v29 = vsel %vm4721_vm0, %v16711_v13, %v10583_v20 }
 0x39a   :  { %v14104_v1 = vpop.eup %14103  ;;  %v5036_v15 = vmul.f32 1.442695, %v5027_v30  ;;  %v16804_v41 = vadd.f32 %v16750_v22, %v4999_v58  ;;  %v12155_v7 = vpop.f32.mrb[113].mxu1  ;;  %12544 = vmatmul.mubr.msk.f32.gmra.mrb[218].mxu1 %vm418_vm5, %v4756_v29  ;;  %12990 = vmatmul.mubr.msk.f32.vlgmr.msra.gmra.mrb[82].mxu0 %vm74_vm4, %v10842_v27  ;;  %v16809_v36 = vadd.f32 %v2739_v49, %v16660_v63  ;;  %v10647_v63 = vld [vmem:[%s18285_s4 + $0x110] sm:$0xff] }
 0x39b   :  { %v12568_v8 = vpop.f32.mrb[233].mxu0  ;;  %12546 = vmatprep.mubr.msk.f32.mxu1 %vm14255_vm1, %v14256_v6  ;;  %12992 = vmatprep.mubr.msk.f32.mxu0 %vm14255_vm1, %v14256_v6  ;;  %v10584_v13 = vadd.f32 -1.0, %v14104_v1  ;;  %v13587_v34 = vpack.c.bf16 %v10648_v19, %v10647_v63  ;;  %v10847_v1 = vld [vmem:[%s18308_s20 + $0x568] sm:$0xff] }
 0x39c   :  { %14109 = vpow2.f32 %v5036_v15  ;;  %v5028_v42 = vmin.f32 %v16804_v41, 0.0  ;;  %vm5021_vm10 = vcmp.gt.f32.partialorder %v16804_v41, 0.0 }
 0x39d   :  { %v2744_v44 = vpop.f32.mrb[114].mxu1  ;;  %v5004_v51 = vpop.f32.mrb[234].mxu0  ;;  %v4757_v24 = vsel %vm4722_vm6, %v16730_v16, %v10584_v13  ;;  %v10844_v16 = vld [vmem:[%s18308_s20 + $0x550] sm:$0xff] }
 0x39e   :  { %v14106_v32 = vpop.eup %14105  ;;  %v5038_v55 = vmul.f32 1.442695, %v5028_v42  ;;  %v16828_v59 = vadd.f32 %v16750_v22, %v5004_v51  ;;  %v12158_v31 = vpop.f32.mrb[115].mxu1  ;;  %12547 = vmatmul.mubr.msk.f32.gmra.mrb[220].mxu1 %vm418_vm5, %v4757_v24  ;;  %12993 = vmatmul.mubr.msk.f32.gmra.mrb[84].mxu0 %vm74_vm4, %v10843_v40  ;;  %v16833_v33 = vadd.f32 %v2744_v44, %v16686_v47  ;;  %v10848_v51 = vld [vmem:[%s18308_s20 + $0x570] sm:$0x3] }
 0x39f   :  { %v12571_v3 = vpop.f32.mrb[235].mxu0  ;;  %v10609_v56 = vadd.f32 -1.0, %v14106_v32  ;;  %12582 = vmatprep.mubr.msk.f32.mxu1 %vm14255_vm1, %v14256_v6  ;;  %12995 = vmatprep.mubr.msk.f32.mxu0 %vm14255_vm1, %v14256_v6 }
 0x3a0   :  { %14111 = vpow2.f32 %v5038_v55  ;;  %v5029_v21 = vmin.f32 %v16828_v59, 0.0  ;;  %vm5022_vm11 = vcmp.gt.f32.partialorder %v16828_v59, 0.0 }
 0x3a1   :  { %v5053_v47 = vsel %vm5018_vm7, %v16753_v14, %v10609_v56  ;;  %v2749_v26 = vpop.f32.mrb[116].mxu1  ;;  %v5009_v2 = vpop.f32.mrb[236].mxu0 }
 0x3a2   :  { %v14108_v25 = vpop.eup %14107  ;;  %v5040_v5 = vmul.f32 1.442695, %v5029_v21  ;;  %v16846_v9 = vadd.f32 %v16750_v22, %v5009_v2  ;;  %v12161_v48 = vpop.f32.mrb[117].mxu1  ;;  %12583 = vmatmul.mubr.msk.f32.vlgmr.msra.gmra.mrb[222].mxu1 %vm418_vm5, %v5053_v47  ;;  %12996 = vmatmul.mubr.msk.f32.gmra.mrb[86].mxu0 %vm74_vm4, %v10844_v16  ;;  %v16851_v35 = vadd.f32 %v2749_v26, %v16708_v50 }
 0x3a3   :  { %v12574_v10 = vpop.f32.mrb[237].mxu0  ;;  %13588 = vmatpush3.bf16.msra.mxu1 %v13587_v34  ;;  %12585 = vmatprep.mubr.msk.f32.mxu1 %vm14255_vm1, %v14256_v6  ;;  %v10610_v14 = vadd.f32 -1.0, %v14108_v25 }
 0x3a4   :  { %14113 = vpow2.f32 %v5040_v5  ;;  %v5030_v43 = vmin.f32 %v16846_v9, 0.0  ;;  %12998 = vmatprep.mubr.msk.f32.mxu0 %vm14255_vm1, %v14256_v6  ;;  %13596 = vmatprep.subr.bf16.mxu1 %v14254_v0  ;;  %vm5023_vm12 = vcmp.gt.f32.partialorder %v16846_v9, 0.0 }
 0x3a5   :  { %v2754_v50 = vpop.f32.mrb[118].mxu1  ;;  %v5014_v53 = vpop.f32.mrb[238].mxu0  ;;  %v5054_v62 = vsel %vm5019_vm8, %v16771_v4, %v10610_v14 }
 0x3a6   :  { %v14110_v54 = vpop.eup %14109  ;;  %v5042_v39 = vmul.f32 1.442695, %v5030_v43  ;;  %v16865_v23 = vadd.f32 %v16750_v22, %v5014_v53  ;;  %v12164_v17 = vpop.f32.mrb[119].mxu1  ;;  %12586 = vmatmul.mubr.msk.f32.gmra.mrb[224].mxu1 %vm418_vm5, %v5054_v62  ;;  %12999 = vmatmul.mubr.msk.f32.gmra.mrb[88].mxu0 %vm74_vm4, %v10845_v38  ;;  %v16870_v61 = vadd.f32 %v2754_v50, %v16727_v12  ;;  %v10679_v50 = vld [vmem:[%s18285_s4 + $0x128] sm:$0xff] }
 0x3a7   :  { %v12577_v18 = vpop.f32.mrb[239].mxu0  ;;  %12588 = vmatprep.mubr.msk.f32.mxu1 %vm14255_vm1, %v14256_v6  ;;  %13001 = vmatprep.mubr.msk.f32.mxu0 %vm14255_vm1, %v14256_v6  ;;  %v10611_v4 = vadd.f32 -1.0, %v14110_v54 }
 0x3a8   :  { %14115 = vpow2.f32 %v5042_v39  ;;  %v5031_v45 = vmin.f32 %v16865_v23, 0.0 }
 0x3a9   :  { %v2759_v46 = vpop.f32.mrb[120].mxu1  ;;  %v5286_v28 = vpop.f32.mrb[240].mxu0  ;;  %v5055_v12 = vsel %vm5020_vm9, %v16786_v60, %v10611_v4 }
 0x3aa   :  { %v14112_v20 = vpop.eup %14111  ;;  %v5044_v27 = vmul.f32 1.442695, %v5031_v45  ;;  %v16883_v30 = vadd.f32 %v16750_v22, %v5286_v28  ;;  %v12167_v49 = vpop.f32.mrb[121].mxu1  ;;  %12589 = vmatmul.mubr.msk.f32.gmra.mrb[226].mxu1 %vm418_vm5, %v5055_v12  ;;  %13002 = vmatmul.mubr.msk.f32.gmra.mrb[90].mxu0 %vm74_vm4, %v10846_v52  ;;  %v16888_v29 = vadd.f32 %v2759_v46, %v16745_v57 }
 0x3ab   :  { %v12613_v58 = vpop.f32.mrb[241].mxu0  ;;  %12591 = vmatprep.mubr.msk.f32.mxu1 %vm14255_vm1, %v14256_v6  ;;  %13004 = vmatprep.mubr.msk.f32.mxu0 %vm14255_vm1, %v14256_v6  ;;  %v10612_v60 = vadd.f32 -1.0, %v14112_v20 }
 0x3ac   :  { %14117 = vpow2.f32 %v5044_v27  ;;  %v5327_v15 = vmin.f32 %v16883_v30, 0.0  ;;  %vm5320_vm3 = vcmp.gt.f32.partialorder %v16883_v30, 0.0 }
 0x3ad   :  { %v2764_v7 = vpop.f32.mrb[122].mxu1  ;;  %v5291_v8 = vpop.f32.mrb[242].mxu0  ;;  %v5056_v57 = vsel %vm5021_vm10, %v16804_v41, %v10612_v60 }
 0x3ae   :  { %v14114_v13 = vpop.eup %14113  ;;  %v5334_v40 = vmul.f32 1.442695, %v5327_v15  ;;  %v16901_v42 = vadd.f32 %v16750_v22, %v5291_v8  ;;  %v12170_v63 = vpop.f32.mrb[123].mxu1  ;;  %12592 = vmatmul.mubr.msk.f32.gmra.mrb[228].mxu1 %vm418_vm5, %v5056_v57  ;;  %13005 = vmatmul.mubr.msk.f32.gmra.mrb[92].mxu0 %vm74_vm4, %v10847_v1  ;;  %v16906_v44 = vadd.f32 %v2764_v7, %v16768_v37 }
 0x3af   :  { %v12616_v19 = vpop.f32.mrb[243].mxu0  ;;  %12594 = vmatprep.mubr.msk.f32.mxu1 %vm14255_vm1, %v14256_v6  ;;  %13007 = vmatprep.mubr.msk.f32.mxu0 %vm14255_vm1, %v14256_v6  ;;  %v10613_v41 = vadd.f32 -1.0, %v14114_v13 }
 0x3b0   :  { %14119 = vpow2.f32 %v5334_v40  ;;  %v5328_v24 = vmin.f32 %v16901_v42, 0.0  ;;  %vm5321_vm13 = vcmp.gt.f32.partialorder %v16901_v42, 0.0 }
 0x3b1   :  { %v3036_v32 = vpop.f32.mrb[124].mxu1  ;;  %v5296_v55 = vpop.f32.mrb[244].mxu0  ;;  %v5057_v37 = vsel %vm5022_vm11, %v16828_v59, %v10613_v41 }
 0x3b2   :  { %v14116_v31 = vpop.eup %14115  ;;  %v5336_v3 = vmul.f32 1.442695, %v5328_v24  ;;  %v16919_v56 = vadd.f32 %v3036_v32, %v16791_v11  ;;  %v16922_v16 = vadd.f32 %v16750_v22, %v5296_v55  ;;  %v12206_v34 = vpop.f32.mrb[125].mxu1  ;;  %12595 = vmatmul.mubr.msk.f32.gmra.mrb[230].mxu1 %vm418_vm5, %v5057_v37  ;;  %13008 = vmatmul.mubr.msk.f32.gmra.mrb[94].mxu0 %vm74_vm4, %v10848_v51  ;;  %vm5024_vm4 = vcmp.gt.f32.partialorder %v16865_v23, 0.0 }
 0x3b3   :  { %v12619_v21 = vpop.f32.mrb[245].mxu0  ;;  %12597 = vmatprep.mubr.msk.f32.mxu1 %vm14255_vm1, %v14256_v6  ;;  %v10614_v47 = vadd.f32 -1.0, %v14116_v31  ;;  %13043 = vmatprep.mubr.msk.f32.mxu0 %vm14255_vm1, %v14256_v6 }
 0x3b4   :  { %14121 = vpow2.f32 %v5336_v3  ;;  %v5329_v11 = vmin.f32 %v16922_v16, 0.0  ;;  %vm5322_vm14 = vcmp.gt.f32.partialorder %v16922_v16, 0.0 }
 0x3b5   :  { %v3041_v59 = vpop.f32.mrb[126].mxu1  ;;  %v5301_v26 = vpop.f32.mrb[246].mxu0  ;;  %v5058_v2 = vsel %vm5023_vm12, %v16846_v9, %v10614_v47 }
 0x3b6   :  { %v14118_v25 = vpop.eup %14117  ;;  %v5338_v5 = vmul.f32 1.442695, %v5329_v11  ;;  %v16934_v48 = vadd.f32 %v3041_v59, %v16809_v36  ;;  %v16937_v10 = vadd.f32 %v16750_v22, %v5301_v26  ;;  %v12209_v14 = vpop.f32.mrb[127].mxu1  ;;  %12598 = vmatmul.mubr.msk.f32.gmra.mrb[232].mxu1 %vm418_vm5, %v5058_v2  ;;  %v10678_v36 = vld [vmem:[%s18285_s4 + $0x120] sm:$0xff] }
 0x3b7   :  { %v12622_v38 = vpop.f32.mrb[247].mxu0  ;;  %12600 = vmatprep.mubr.msk.f32.mxu1 %vm14255_vm1, %v14256_v6  ;;  %v10615_v43 = vadd.f32 -1.0, %v14118_v25  ;;  %v13597_v28 = vpack.c.bf16 %v10679_v50, %v10678_v36 }
 0x3b8   :  { %14123 = vpow2.f32 %v5338_v5  ;;  %v5330_v9 = vmin.f32 %v16937_v10, 0.0  ;;  %vm5323_vm15 = vcmp.gt.f32.partialorder %v16937_v10, 0.0 }
 0x3b9   :  { %v3046_v53 = vpop.f32.mrb[128].mxu1  ;;  %v5306_v62 = vpop.f32.mrb[248].mxu0  ;;  %v5059_v54 = vsel %vm5024_vm4, %v16865_v23, %v10615_v43 }
 0x3ba   :  { %v14120_v39 = vpop.eup %14119  ;;  %v5340_v17 = vmul.f32 1.442695, %v5330_v9  ;;  %v16952_v18 = vadd.f32 %v3046_v53, %v16833_v33  ;;  %v16955_v4 = vadd.f32 %v16750_v22, %v5306_v62  ;;  %v12212_v52 = vpop.f32.mrb[129].mxu1  ;;  %12601 = vmatmul.mubr.msk.f32.gmra.mrb[234].mxu1 %vm418_vm5, %v5059_v54 }
 0x3bb   :  { %v12625_v45 = vpop.f32.mrb[249].mxu0  ;;  %v10640_v46 = vadd.f32 -1.0, %v14120_v39  ;;  %12636 = vmatprep.mubr.msk.f32.mxu1 %vm14255_vm1, %v14256_v6 }
 0x3bc   :  { %14125 = vpow2.f32 %v5340_v17  ;;  %v5331_v23 = vmin.f32 %v16955_v4, 0.0  ;;  %vm5324_vm0 = vcmp.gt.f32.partialorder %v16955_v4, 0.0 }
 0x3bd   :  { %v5355_v33 = vsel %vm5320_vm3, %v16883_v30, %v10640_v46  ;;  %v3051_v12 = vpop.f32.mrb[130].mxu1  ;;  %v5311_v20 = vpop.f32.mrb[250].mxu0 }
 0x3be   :  { %v14122_v27 = vpop.eup %14121  ;;  %v5342_v49 = vmul.f32 1.442695, %v5331_v23  ;;  %v16964_v58 = vadd.f32 %v3051_v12, %v16851_v35  ;;  %v16967_v60 = vadd.f32 %v16750_v22, %v5311_v20  ;;  %v12215_v1 = vpop.f32.mrb[131].mxu1  ;;  %12637 = vmatmul.mubr.msk.f32.vlgmr.msra.gmra.mrb[236].mxu1 %vm418_vm5, %v5355_v33 }
 0x3bf   :  { %v12628_v15 = vpop.f32.mrb[251].mxu0  ;;  %13598 = vmatpush3.bf16.msra.mxu1 %v13597_v28  ;;  %12639 = vmatprep.mubr.msk.f32.mxu1 %vm14255_vm1, %v14256_v6  ;;  %v10641_v7 = vadd.f32 -1.0, %v14122_v27 }
 0x3c0   :  { %14127 = vpow2.f32 %v5342_v49  ;;  %v5332_v30 = vmin.f32 %v16967_v60, 0.0  ;;  %13606 = vmatprep.subr.bf16.mxu1 %v14254_v0  ;;  %vm5325_vm6 = vcmp.gt.f32.partialorder %v16967_v60, 0.0  ;;  %v10710_v15 = vld [vmem:[%s18285_s4 + $0x138] sm:$0xff] }
 0x3c1   :  { %v3056_v35 = vpop.f32.mrb[132].mxu1  ;;  %v5316_v8 = vpop.f32.mrb[252].mxu0  ;;  %v5356_v57 = vsel %vm5321_vm13, %v16901_v42, %v10641_v7 }
 0x3c2   :  { %v14124_v13 = vpop.eup %14123  ;;  %v5344_v40 = vmul.f32 1.442695, %v5332_v30  ;;  %v16977_v63 = vadd.f32 %v3056_v35, %v16870_v61  ;;  %v16980_v19 = vadd.f32 %v16750_v22, %v5316_v8  ;;  %v12218_v41 = vpop.f32.mrb[133].mxu1  ;;  %12640 = vmatmul.mubr.msk.f32.gmra.mrb[238].mxu1 %vm418_vm5, %v5356_v57 }
 0x3c3   :  { %v12631_v51 = vpop.f32.mrb[253].mxu0  ;;  %12642 = vmatprep.mubr.msk.f32.mxu1 %vm14255_vm1, %v14256_v6  ;;  %v10642_v24 = vadd.f32 -1.0, %v14124_v13 }
 0x3c4   :  { %14129 = vpow2.f32 %v5344_v40  ;;  %v5333_v42 = vmin.f32 %v16980_v19, 0.0  ;;  %vm5326_vm7 = vcmp.gt.f32.partialorder %v16980_v19, 0.0 }
 0x3c5   :  { %v3061_v32 = vpop.f32.mrb[134].mxu1  ;;  %v5588_v55 = vpop.f32.mrb[254].mxu0  ;;  %v5357_v61 = vsel %vm5322_vm14, %v16922_v16, %v10642_v24 }
 0x3c6   :  { %v14126_v37 = vpop.eup %14125  ;;  %v5346_v31 = vmul.f32 1.442695, %v5333_v42  ;;  %v16989_v3 = vadd.f32 %v3061_v32, %v16888_v29  ;;  %v16992_v34 = vadd.f32 %v16750_v22, %v5588_v55  ;;  %v12221_v21 = vpop.f32.mrb[135].mxu1  ;;  %12643 = vmatmul.mubr.msk.f32.gmra.mrb[240].mxu1 %vm418_vm5, %v5357_v61 }
 0x3c7   :  { %v12667_v47 = vpop.f32.mrb[255].mxu0  ;;  %12645 = vmatprep.mubr.msk.f32.mxu1 %vm14255_vm1, %v14256_v6  ;;  %v10643_v11 = vadd.f32 -1.0, %v14126_v37 }
 0x3c8   :  { %14131 = vpow2.f32 %v5346_v31  ;;  %v5629_v16 = vmin.f32 %v16992_v34, 0.0  ;;  %vm5622_vm8 = vcmp.gt.f32.partialorder %v16992_v34, 0.0 }
 0x3c9   :  { %v3066_v59 = vpop.f32.mrb[136].mxu1  ;;  %v5593_v26 = vpop.f32.mrb[0].mxu0  ;;  %v5358_v29 = vsel %vm5323_vm15, %v16937_v10, %v10643_v11 }
 0x3ca   :  { %v14128_v2 = vpop.eup %14127  ;;  %v5636_v25 = vmul.f32 1.442695, %v5629_v16  ;;  %v17001_v5 = vadd.f32 %v3066_v59, %v16906_v44  ;;  %v17004_v14 = vadd.f32 %v16750_v22, %v5593_v26  ;;  %v12224_v38 = vpop.f32.mrb[137].mxu1  ;;  %12646 = vmatmul.mubr.msk.f32.gmra.mrb[242].mxu1 %vm418_vm5, %v5358_v29 }
 0x3cb   :  { %v12670_v43 = vpop.f32.mrb[1].mxu0  ;;  %12648 = vmatprep.mubr.msk.f32.mxu1 %vm14255_vm1, %v14256_v6  ;;  %v10644_v9 = vadd.f32 -1.0, %v14128_v2 }
 0x3cc   :  { %14133 = vpow2.f32 %v5636_v25  ;;  %v5630_v10 = vmin.f32 %v17004_v14, 0.0  ;;  %vm5623_vm9 = vcmp.gt.f32.partialorder %v17004_v14, 0.0 }
 0x3cd   :  { %v3338_v36 = vpop.f32.mrb[138].mxu1  ;;  %v5598_v50 = vpop.f32.mrb[2].mxu0  ;;  %v5359_v44 = vsel %vm5324_vm0, %v16955_v4, %v10644_v9 }
 0x3ce   :  { %v14130_v53 = vpop.eup %14129  ;;  %v5638_v62 = vmul.f32 1.442695, %v5630_v10  ;;  %v17013_v54 = vadd.f32 %v3338_v36, %v16919_v56  ;;  %v17016_v39 = vadd.f32 %v16750_v22, %v5598_v50  ;;  %v12260_v17 = vpop.f32.mrb[139].mxu1  ;;  %12649 = vmatmul.mubr.msk.f32.gmra.mrb[244].mxu1 %vm418_vm5, %v5359_v44 }
 0x3cf   :  { %v12673_v52 = vpop.f32.mrb[3].mxu0  ;;  %12651 = vmatprep.mubr.msk.f32.mxu1 %vm14255_vm1, %v14256_v6  ;;  %v10645_v45 = vadd.f32 -1.0, %v14130_v53 }
 0x3d0   :  { %14135 = vpow2.f32 %v5638_v62  ;;  %v5631_v4 = vmin.f32 %v17016_v39, 0.0  ;;  %vm5624_vm10 = vcmp.gt.f32.partialorder %v17016_v39, 0.0 }
 0x3d1   :  { %v3343_v46 = vpop.f32.mrb[140].mxu1  ;;  %v5603_v28 = vpop.f32.mrb[4].mxu0  ;;  %v5360_v56 = vsel %vm5325_vm6, %v16967_v60, %v10645_v45 }
 0x3d2   :  { %v14132_v23 = vpop.eup %14131  ;;  %v5640_v33 = vmul.f32 1.442695, %v5631_v4  ;;  %v17025_v12 = vadd.f32 %v3343_v46, %v16934_v48  ;;  %v17028_v20 = vadd.f32 %v16750_v22, %v5603_v28  ;;  %v12263_v27 = vpop.f32.mrb[141].mxu1  ;;  %12652 = vmatmul.mubr.msk.f32.gmra.mrb[246].mxu1 %vm418_vm5, %v5360_v56  ;;  %v10709_v48 = vld [vmem:[%s18285_s4 + $0x130] sm:$0xff] }
 0x3d3   :  { %v12676_v49 = vpop.f32.mrb[5].mxu0  ;;  %12654 = vmatprep.mubr.msk.f32.mxu1 %vm14255_vm1, %v14256_v6  ;;  %v10646_v1 = vadd.f32 -1.0, %v14132_v23  ;;  %v13607_v42 = vpack.c.bf16 %v10710_v15, %v10709_v48 }
 0x3d4   :  { %14137 = vpow2.f32 %v5640_v33  ;;  %v5632_v60 = vmin.f32 %v17028_v20, 0.0  ;;  %vm5625_vm11 = vcmp.gt.f32.partialorder %v17028_v20, 0.0 }
 0x3d5   :  { %v3348_v7 = vpop.f32.mrb[142].mxu1  ;;  %v5608_v30 = vpop.f32.mrb[6].mxu0  ;;  %v5361_v35 = vsel %vm5326_vm7, %v16980_v19, %v10646_v1 }
 0x3d6   :  { %v14134_v8 = vpop.eup %14133  ;;  %v5642_v57 = vmul.f32 1.442695, %v5632_v60  ;;  %v17043_v13 = vadd.f32 %v3348_v7, %v16952_v18  ;;  %v17046_v40 = vadd.f32 %v16750_v22, %v5608_v30  ;;  %v12266_v41 = vpop.f32.mrb[143].mxu1  ;;  %12655 = vmatmul.mubr.msk.f32.gmra.mrb[248].mxu1 %vm418_vm5, %v5361_v35 }
 0x3d7   :  { %v12679_v51 = vpop.f32.mrb[7].mxu0  ;;  %v10671_v24 = vadd.f32 -1.0, %v14134_v8  ;;  %12690 = vmatprep.mubr.msk.f32.mxu1 %vm14255_vm1, %v14256_v6 }
 0x3d8   :  { %14139 = vpow2.f32 %v5642_v57  ;;  %v5633_v19 = vmin.f32 %v17046_v40, 0.0  ;;  %vm5626_vm12 = vcmp.gt.f32.partialorder %v17046_v40, 0.0 }
 0x3d9   :  { %v5657_v18 = vsel %vm5622_vm8, %v16992_v34, %v10671_v24  ;;  %v3353_v32 = vpop.f32.mrb[144].mxu1  ;;  %v5613_v55 = vpop.f32.mrb[8].mxu0 }
 0x3da   :  { %v14136_v61 = vpop.eup %14135  ;;  %v5644_v37 = vmul.f32 1.442695, %v5633_v19  ;;  %v17055_v31 = vadd.f32 %v3353_v32, %v16964_v58  ;;  %v17058_v21 = vadd.f32 %v16750_v22, %v5613_v55  ;;  %v12269_v47 = vpop.f32.mrb[145].mxu1  ;;  %12691 = vmatmul.mubr.msk.f32.vlgmr.msra.gmra.mrb[250].mxu1 %vm418_vm5, %v5657_v18 }
 0x3db   :  { %v12682_v11 = vpop.f32.mrb[9].mxu0  ;;  %13608 = vmatpush3.bf16.msra.mxu1 %v13607_v42  ;;  %12693 = vmatprep.mubr.msk.f32.mxu1 %vm14255_vm1, %v14256_v6  ;;  %v10672_v16 = vadd.f32 -1.0, %v14136_v61 }
 0x3dc   :  { %14141 = vpow2.f32 %v5644_v37  ;;  %v5634_v34 = vmin.f32 %v17058_v21, 0.0  ;;  %13616 = vmatprep.subr.bf16.mxu1 %v14254_v0  ;;  %vm5627_vm4 = vcmp.gt.f32.partialorder %v17058_v21, 0.0  ;;  %v10741_v11 = vld [vmem:[%s18285_s4 + $0x148] sm:$0xff] }
 0x3dd   :  { %v3358_v58 = vpop.f32.mrb[146].mxu1  ;;  %v5618_v59 = vpop.f32.mrb[10].mxu0  ;;  %v5658_v26 = vsel %vm5623_vm9, %v17004_v14, %v10672_v16 }
 0x3de   :  { %v14138_v29 = vpop.eup %14137  ;;  %v5646_v2 = vmul.f32 1.442695, %v5634_v34  ;;  %v17068_v25 = vadd.f32 %v3358_v58, %v16977_v63  ;;  %v17071_v38 = vadd.f32 %v16750_v22, %v5618_v59  ;;  %v12272_v43 = vpop.f32.mrb[147].mxu1  ;;  %12694 = vmatmul.mubr.msk.f32.gmra.mrb[252].mxu1 %vm418_vm5, %v5658_v26 }
 0x3df   :  { %v12685_v9 = vpop.f32.mrb[11].mxu0  ;;  %12696 = vmatprep.mubr.msk.f32.mxu1 %vm14255_vm1, %v14256_v6  ;;  %v10673_v10 = vadd.f32 -1.0, %v14138_v29 }
 0x3e0   :  { %14143 = vpow2.f32 %v5646_v2  ;;  %v5635_v14 = vmin.f32 %v17071_v38, 0.0  ;;  %vm5628_vm3 = vcmp.gt.f32.partialorder %v17071_v38, 0.0 }
 0x3e1   :  { %v3363_v36 = vpop.f32.mrb[148].mxu1  ;;  %v5890_v50 = vpop.f32.mrb[12].mxu0  ;;  %v5659_v63 = vsel %vm5624_vm10, %v17016_v39, %v10673_v10 }
 0x3e2   :  { %v14140_v44 = vpop.eup %14139  ;;  %v5648_v53 = vmul.f32 1.442695, %v5635_v14  ;;  %v17080_v62 = vadd.f32 %v3363_v36, %v16989_v3  ;;  %v17083_v17 = vadd.f32 %v16750_v22, %v5890_v50  ;;  %v12275_v52 = vpop.f32.mrb[149].mxu1  ;;  %12697 = vmatmul.mubr.msk.f32.gmra.mrb[254].mxu1 %vm418_vm5, %v5659_v63 }
 0x3e3   :  { %v12721_v45 = vpop.f32.mrb[13].mxu0  ;;  %v10674_v4 = vadd.f32 -1.0, %v14140_v44  ;;  %12699 = vmatprep.mubr.msk.f32.mxu1 %vm14255_vm1, %v14256_v6 }
 0x3e4   :  { %14145 = vpow2.f32 %v5648_v53  ;;  %v5931_v39 = vmin.f32 %v17083_v17, 0.0  ;;  %vm5924_vm13 = vcmp.gt.f32.partialorder %v17083_v17, 0.0 }
 0x3e5   :  { %v5660_v46 = vsel %vm5625_vm11, %v17028_v20, %v10674_v4  ;;  %v3368_v3 = vpop.f32.mrb[150].mxu1  ;;  %v5895_v28 = vpop.f32.mrb[14].mxu0 }
 0x3e6   :  { %v14142_v56 = vpop.eup %14141  ;;  %v5938_v23 = vmul.f32 1.442695, %v5931_v39  ;;  %v17092_v33 = vadd.f32 %v3368_v3, %v17001_v5  ;;  %v17095_v27 = vadd.f32 %v16750_v22, %v5895_v28  ;;  %v12278_v49 = vpop.f32.mrb[151].mxu1  ;;  %12700 = vmatmul.mubr.msk.f32.gmra.mrb[0].mxu1 %vm418_vm5, %v5660_v46 }
 0x3e7   :  { %v12724_v1 = vpop.f32.mrb[15].mxu0  ;;  %v10675_v60 = vadd.f32 -1.0, %v14142_v56  ;;  %12702 = vmatprep.mubr.msk.f32.mxu1 %vm14255_vm1, %v14256_v6 }
 0x3e8   :  { %14147 = vpow2.f32 %v5938_v23  ;;  %v5932_v20 = vmin.f32 %v17095_v27, 0.0  ;;  %vm5925_vm14 = vcmp.gt.f32.partialorder %v17095_v27, 0.0 }
 0x3e9   :  { %v5661_v48 = vsel %vm5626_vm12, %v17046_v40, %v10675_v60  ;;  %v3640_v5 = vpop.f32.mrb[152].mxu1  ;;  %v5900_v15 = vpop.f32.mrb[16].mxu0 }
 0x3ea   :  { %v14144_v7 = vpop.eup %14143  ;;  %v5940_v30 = vmul.f32 1.442695, %v5932_v20  ;;  %v17104_v35 = vadd.f32 %v3640_v5, %v17013_v54  ;;  %v17107_v8 = vadd.f32 %v16750_v22, %v5900_v15  ;;  %v12314_v57 = vpop.f32.mrb[153].mxu1  ;;  %12703 = vmatmul.mubr.msk.f32.gmra.mrb[2].mxu1 %vm418_vm5, %v5661_v48 }
 0x3eb   :  { %v12727_v41 = vpop.f32.mrb[17].mxu0  ;;  %v10676_v51 = vadd.f32 -1.0, %v14144_v7  ;;  %12705 = vmatprep.mubr.msk.f32.mxu1 %vm14255_vm1, %v14256_v6 }
 0x3ec   :  { %14149 = vpow2.f32 %v5940_v30  ;;  %v5933_v40 = vmin.f32 %v17107_v8, 0.0  ;;  %vm5926_vm15 = vcmp.gt.f32.partialorder %v17107_v8, 0.0 }
 0x3ed   :  { %v5662_v24 = vsel %vm5627_vm4, %v17058_v21, %v10676_v51  ;;  %v3645_v54 = vpop.f32.mrb[154].mxu1  ;;  %v5905_v42 = vpop.f32.mrb[18].mxu0 }
 0x3ee   :  { %v14146_v19 = vpop.eup %14145  ;;  %v5942_v18 = vmul.f32 1.442695, %v5933_v40  ;;  %v17116_v32 = vadd.f32 %v3645_v54, %v17025_v12  ;;  %v17119_v55 = vadd.f32 %v16750_v22, %v5905_v42  ;;  %v12317_v61 = vpop.f32.mrb[155].mxu1  ;;  %12706 = vmatmul.mubr.msk.f32.gmra.mrb[4].mxu1 %vm418_vm5, %v5662_v24  ;;  %v10740_v12 = vld [vmem:[%s18285_s4 + $0x140] sm:$0xff] }
 0x3ef   :  { %v12730_v37 = vpop.f32.mrb[19].mxu0  ;;  %v10677_v47 = vadd.f32 -1.0, %v14146_v19  ;;  %12708 = vmatprep.mubr.msk.f32.mxu1 %vm14255_vm1, %v14256_v6  ;;  %v13617_v14 = vpack.c.bf16 %v10741_v11, %v10740_v12 }
 0x3f0   :  { %14151 = vpow2.f32 %v5942_v18  ;;  %v5934_v21 = vmin.f32 %v17119_v55, 0.0  ;;  %vm5927_vm0 = vcmp.gt.f32.partialorder %v17119_v55, 0.0 }
 0x3f1   :  { %v5663_v16 = vsel %vm5628_vm3, %v17071_v38, %v10677_v47  ;;  %v3650_v34 = vpop.f32.mrb[156].mxu1  ;;  %v5910_v58 = vpop.f32.mrb[20].mxu0 }
 0x3f2   :  { %v14148_v59 = vpop.eup %14147  ;;  %v5944_v26 = vmul.f32 1.442695, %v5934_v21  ;;  %v17134_v29 = vadd.f32 %v3650_v34, %v17043_v13  ;;  %v17137_v2 = vadd.f32 %v16750_v22, %v5910_v58  ;;  %v12320_v43 = vpop.f32.mrb[157].mxu1  ;;  %12709 = vmatmul.mubr.msk.f32.gmra.mrb[6].mxu1 %vm418_vm5, %v5663_v16 }
 0x3f3   :  { %v12733_v9 = vpop.f32.mrb[21].mxu0  ;;  %v10702_v10 = vadd.f32 -1.0, %v14148_v59  ;;  %12744 = vmatprep.mubr.msk.f32.mxu1 %vm14255_vm1, %v14256_v6 }
 0x3f4   :  { %14153 = vpow2.f32 %v5944_v26  ;;  %v5935_v38 = vmin.f32 %v17137_v2, 0.0  ;;  %vm5928_vm6 = vcmp.gt.f32.partialorder %v17137_v2, 0.0 }
 0x3f5   :  { %v5959_v13 = vsel %vm5924_vm13, %v17083_v17, %v10702_v10  ;;  %v3655_v36 = vpop.f32.mrb[158].mxu1  ;;  %v5915_v50 = vpop.f32.mrb[22].mxu0 }
 0x3f6   :  { %v14150_v63 = vpop.eup %14149  ;;  %v5946_v44 = vmul.f32 1.442695, %v5935_v38  ;;  %v17146_v53 = vadd.f32 %v3655_v36, %v17055_v31  ;;  %v17149_v52 = vadd.f32 %v16750_v22, %v5915_v50  ;;  %v12323_v45 = vpop.f32.mrb[159].mxu1  ;;  %12745 = vmatmul.mubr.msk.f32.vlgmr.msra.gmra.mrb[8].mxu1 %vm418_vm5, %v5959_v13  ;;  %v17212_v36 = vld [vmem:[%s18286_s3] ss:$0 sm:$0xff] }
 0x3f7   :  { %v12736_v4 = vpop.f32.mrb[23].mxu0  ;;  %v10703_v39 = vadd.f32 -1.0, %v14150_v63  ;;  %13618 = vmatpush3.bf16.msra.mxu1 %v13617_v14  ;;  %12747 = vmatprep.mubr.msk.f32.mxu1 %vm14255_vm1, %v14256_v6  ;;  %v10771_v45 = vld [vmem:[%s18285_s4 + $0x150] sm:$0xff] }
 0x3f8   :  { %14155 = vpow2.f32 %v5946_v44  ;;  %v5936_v17 = vmin.f32 %v17149_v52, 0.0  ;;  %13626 = vmatprep.subr.bf16.mxu1 %v14254_v0  ;;  %vm5929_vm7 = vcmp.gt.f32.partialorder %v17149_v52, 0.0  ;;  %v10772_v4 = vld [vmem:[%s18285_s4 + $0x158] sm:$0xff] }
 0x3f9   :  { %v5960_v31 = vsel %vm5925_vm14, %v17095_v27, %v10703_v39  ;;  %v3660_v46 = vpop.f32.mrb[160].mxu1  ;;  %v5920_v3 = vpop.f32.mrb[24].mxu0 }
 0x3fa   :  { %v14152_v28 = vpop.eup %14151  ;;  %v5948_v56 = vmul.f32 1.442695, %v5936_v17  ;;  %v17159_v23 = vadd.f32 %v3660_v46, %v17068_v25  ;;  %v17162_v49 = vadd.f32 %v16750_v22, %v5920_v3  ;;  %v12326_v1 = vpop.f32.mrb[161].mxu1  ;;  %12748 = vmatmul.mubr.msk.f32.gmra.mrb[10].mxu1 %vm418_vm5, %v5960_v31 }
 0x3fb   :  { %v12739_v60 = vpop.f32.mrb[25].mxu0  ;;  %v10704_v20 = vadd.f32 -1.0, %v14152_v28  ;;  %12750 = vmatprep.mubr.msk.f32.mxu1 %vm14255_vm1, %v14256_v6 }
 0x3fc   :  { %14157 = vpow2.f32 %v5948_v56  ;;  %v5937_v27 = vmin.f32 %v17162_v49, 0.0  ;;  %vm5930_vm8 = vcmp.gt.f32.partialorder %v17162_v49, 0.0 }
 0x3fd   :  { %v5961_v48 = vsel %vm5926_vm15, %v17107_v8, %v10704_v20  ;;  %v3665_v25 = vpop.f32.mrb[162].mxu1  ;;  %v6192_v5 = vpop.f32.mrb[26].mxu0 }
 0x3fe   :  { %v14154_v15 = vpop.eup %14153  ;;  %v5950_v7 = vmul.f32 1.442695, %v5937_v27  ;;  %v17171_v30 = vadd.f32 %v3665_v25, %v17080_v62  ;;  %v17174_v57 = vadd.f32 %v16750_v22, %v6192_v5  ;;  %v12329_v41 = vpop.f32.mrb[163].mxu1  ;;  %12751 = vmatmul.mubr.msk.f32.gmra.mrb[12].mxu1 %vm418_vm5, %v5961_v48  ;;  %v13627_v27 = vpack.c.bf16 %v10772_v4, %v10771_v45 }
 0x3ff   :  { %v12775_v51 = vpop.f32.mrb[27].mxu0  ;;  %v10705_v40 = vadd.f32 -1.0, %v14154_v15  ;;  %12753 = vmatprep.mubr.msk.f32.mxu1 %vm14255_vm1, %v14256_v6 }
 0x400   :  { %14159 = vpow2.f32 %v5950_v7  ;;  %v6233_v8 = vmin.f32 %v17174_v57, 0.0  ;;  %vm6226_vm9 = vcmp.gt.f32.partialorder %v17174_v57, 0.0 }
 0x401   :  { %v5962_v24 = vsel %vm5927_vm0, %v17119_v55, %v10705_v40  ;;  %v3670_v62 = vpop.f32.mrb[164].mxu1  ;;  %v6197_v54 = vpop.f32.mrb[28].mxu0 }
 0x402   :  { %v14156_v42 = vpop.eup %14155  ;;  %v6240_v19 = vmul.f32 1.442695, %v6233_v8  ;;  %v17183_v18 = vadd.f32 %v3670_v62, %v17092_v33  ;;  %v17186_v61 = vadd.f32 %v16750_v22, %v6197_v54  ;;  %v12332_v37 = vpop.f32.mrb[165].mxu1  ;;  %12754 = vmatmul.mubr.msk.f32.gmra.mrb[14].mxu1 %vm418_vm5, %v5962_v24 }
 0x403   :  { %v12778_v47 = vpop.f32.mrb[29].mxu0  ;;  %v10706_v21 = vadd.f32 -1.0, %v14156_v42  ;;  %12756 = vmatprep.mubr.msk.f32.mxu1 %vm14255_vm1, %v14256_v6 }
 0x404   :  { %14161 = vpow2.f32 %v6240_v19  ;;  %v6234_v55 = vmin.f32 %v17186_v61, 0.0  ;;  %vm6227_vm10 = vcmp.gt.f32.partialorder %v17186_v61, 0.0 }
 0x405   :  { %v5963_v12 = vsel %vm5928_vm6, %v17137_v2, %v10706_v21  ;;  %v3942_v33 = vpop.f32.mrb[166].mxu1  ;;  %v6202_v11 = vpop.f32.mrb[30].mxu0 }
 0x406   :  { %v14158_v16 = vpop.eup %14157  ;;  %v6242_v34 = vmul.f32 1.442695, %v6234_v55  ;;  %v17195_v58 = vadd.f32 %v3942_v33, %v17104_v35  ;;  %v17198_v59 = vadd.f32 %v16750_v22, %v6202_v11  ;;  %v12368_v26 = vpop.f32.mrb[167].mxu1  ;;  %12757 = vmatmul.mubr.msk.f32.gmra.mrb[16].mxu1 %vm418_vm5, %v5963_v12 }
 0x407   :  { %v12781_v43 = vpop.f32.mrb[31].mxu0  ;;  %v10707_v9 = vadd.f32 -1.0, %v14158_v16  ;;  %12759 = vmatprep.mubr.msk.f32.mxu1 %vm14255_vm1, %v14256_v6 }
 0x408   :  { %14163 = vpow2.f32 %v6242_v34  ;;  %v6235_v2 = vmin.f32 %v17198_v59, 0.0  ;;  %vm6228_vm11 = vcmp.gt.f32.partialorder %v17198_v59, 0.0 }
 0x409   :  { %v5964_v10 = vsel %vm5929_vm7, %v17149_v52, %v10707_v9  ;;  %v3947_v35 = vpop.f32.mrb[168].mxu1  ;;  %v6207_v14 = vpop.f32.mrb[32].mxu0 }
 0x40a   :  { %v14160_v38 = vpop.eup %14159  ;;  %v6244_v22 = vmul.f32 1.442695, %v6235_v2  ;;  %v17207_v13 = vadd.f32 %v3947_v35, %v17116_v32  ;;  %v17215_v50 = vadd.f32 %v17212_v36, %v6207_v14  ;;  %v12371_v63 = vpop.f32.mrb[169].mxu1  ;;  %12760 = vmatmul.mubr.msk.f32.gmra.mrb[18].mxu1 %vm418_vm5, %v5964_v10 }
 0x40b   :  { %v12784_v44 = vpop.f32.mrb[33].mxu0  ;;  %v10708_v52 = vadd.f32 -1.0, %v14160_v38  ;;  %12762 = vmatprep.mubr.msk.f32.mxu1 %vm14255_vm1, %v14256_v6 }
 0x40c   :  { %14165 = vpow2.f32 %v6244_v22  ;;  %v6236_v32 = vmin.f32 %v17215_v50, 0.0  ;;  %vm6229_vm12 = vcmp.gt.f32.partialorder %v17215_v50, 0.0 }
 0x40d   :  { %v5965_v39 = vsel %vm5930_vm8, %v17162_v49, %v10708_v52  ;;  %v3952_v17 = vpop.f32.mrb[170].mxu1  ;;  %v6212_v31 = vpop.f32.mrb[34].mxu0 }
 0x40e   :  { %v14162_v46 = vpop.eup %14161  ;;  %v6246_v3 = vmul.f32 1.442695, %v6236_v32  ;;  %v17230_v28 = vadd.f32 %v3952_v17, %v17134_v29  ;;  %v17233_v56 = vadd.f32 %v17212_v36, %v6212_v31  ;;  %v12374_v1 = vpop.f32.mrb[171].mxu1  ;;  %12763 = vmatmul.mubr.msk.f32.gmra.mrb[20].mxu1 %vm418_vm5, %v5965_v39 }
 0x40f   :  { %v12787_v60 = vpop.f32.mrb[35].mxu0  ;;  %v10733_v20 = vadd.f32 -1.0, %v14162_v46  ;;  %12798 = vmatprep.mubr.msk.f32.mxu1 %vm14255_vm1, %v14256_v6 }
 0x410   :  { %14167 = vpow2.f32 %v6246_v3  ;;  %v6237_v49 = vmin.f32 %v17233_v56, 0.0  ;;  %vm6230_vm4 = vcmp.gt.f32.partialorder %v17233_v56, 0.0 }
 0x411   :  { %v6261_v29 = vsel %vm6226_vm9, %v17174_v57, %v10733_v20  ;;  %v3957_v48 = vpop.f32.mrb[172].mxu1  ;;  %v6217_v25 = vpop.f32.mrb[36].mxu0 }
 0x412   :  { %v14164_v5 = vpop.eup %14163  ;;  %v6248_v15 = vmul.f32 1.442695, %v6237_v49  ;;  %v17242_v7 = vadd.f32 %v3957_v48, %v17146_v53  ;;  %v17245_v41 = vadd.f32 %v17212_v36, %v6217_v25  ;;  %v12377_v51 = vpop.f32.mrb[173].mxu1  ;;  %12799 = vmatmul.mubr.msk.f32.vlgmr.msra.gmra.mrb[22].mxu1 %vm418_vm5, %v6261_v29 }
 0x413   :  { %v12790_v40 = vpop.f32.mrb[37].mxu0  ;;  %v10734_v8 = vadd.f32 -1.0, %v14164_v5  ;;  %13628 = vmatpush3.bf16.msra.mxu1 %v13627_v27  ;;  %12801 = vmatprep.mubr.msk.f32.mxu1 %vm14255_vm1, %v14256_v6 }
 0x414   :  { %14169 = vpow2.f32 %v6248_v15  ;;  %v6238_v57 = vmin.f32 %v17245_v41, 0.0  ;;  %13636 = vmatprep.subr.bf16.mxu1 %v14254_v0  ;;  %vm6231_vm3 = vcmp.gt.f32.partialorder %v17245_v41, 0.0  ;;  %v10803_v40 = vld [vmem:[%s18285_s4 + $0x168] sm:$0xff] }
 0x415   :  { %v6262_v53 = vsel %vm6227_vm10, %v17186_v61, %v10734_v8  ;;  %v3962_v24 = vpop.f32.mrb[174].mxu1  ;;  %v6222_v62 = vpop.f32.mrb[38].mxu0 }
 0x416   :  { %v14166_v54 = vpop.eup %14165  ;;  %v6250_v42 = vmul.f32 1.442695, %v6238_v57  ;;  %v17255_v19 = vadd.f32 %v3962_v24, %v17159_v23  ;;  %v17258_v37 = vadd.f32 %v17212_v36, %v6222_v62  ;;  %v12380_v47 = vpop.f32.mrb[175].mxu1  ;;  %12802 = vmatmul.mubr.msk.f32.gmra.mrb[24].mxu1 %vm418_vm5, %v6262_v53 }
 0x417   :  { %v12793_v21 = vpop.f32.mrb[39].mxu0  ;;  %v10735_v55 = vadd.f32 -1.0, %v14166_v54  ;;  %12804 = vmatprep.mubr.msk.f32.mxu1 %vm14255_vm1, %v14256_v6 }
 0x418   :  { %14171 = vpow2.f32 %v6250_v42  ;;  %v6239_v61 = vmin.f32 %v17258_v37, 0.0  ;;  %vm6232_vm13 = vcmp.gt.f32.partialorder %v17258_v37, 0.0 }
 0x419   :  { %v6263_v12 = vsel %vm6228_vm11, %v17198_v59, %v10735_v55  ;;  %v3967_v23 = vpop.f32.mrb[176].mxu1  ;;  %v6494_v33 = vpop.f32.mrb[40].mxu0 }
 0x41a   :  { %v14168_v11 = vpop.eup %14167  ;;  %v6252_v16 = vmul.f32 1.442695, %v6239_v61  ;;  %v17267_v34 = vadd.f32 %v3967_v23, %v17171_v30  ;;  %v17270_v26 = vadd.f32 %v17212_v36, %v6494_v33  ;;  %v12383_v43 = vpop.f32.mrb[177].mxu1  ;;  %12805 = vmatmul.mubr.msk.f32.gmra.mrb[26].mxu1 %vm418_vm5, %v6263_v12 }
 0x41b   :  { %v12829_v9 = vpop.f32.mrb[41].mxu0  ;;  %v10736_v2 = vadd.f32 -1.0, %v14168_v11  ;;  %12807 = vmatprep.mubr.msk.f32.mxu1 %vm14255_vm1, %v14256_v6 }
 0x41c   :  { %14173 = vpow2.f32 %v6252_v16  ;;  %v6535_v59 = vmin.f32 %v17270_v26, 0.0  ;;  %vm6528_vm14 = vcmp.gt.f32.partialorder %v17270_v26, 0.0 }
 0x41d   :  { %v6264_v10 = vsel %vm6229_vm12, %v17215_v50, %v10736_v2  ;;  %v3972_v30 = vpop.f32.mrb[178].mxu1  ;;  %v6499_v35 = vpop.f32.mrb[42].mxu0 }
 0x41e   :  { %v14170_v14 = vpop.eup %14169  ;;  %v6542_v38 = vmul.f32 1.442695, %v6535_v59  ;;  %v17279_v22 = vadd.f32 %v3972_v30, %v17183_v18  ;;  %v17282_v63 = vadd.f32 %v17212_v36, %v6499_v35  ;;  %v12386_v44 = vpop.f32.mrb[179].mxu1  ;;  %12808 = vmatmul.mubr.msk.f32.gmra.mrb[28].mxu1 %vm418_vm5, %v6264_v10 }
 0x41f   :  { %v12832_v52 = vpop.f32.mrb[43].mxu0  ;;  %v10737_v32 = vadd.f32 -1.0, %v14170_v14  ;;  %12810 = vmatprep.mubr.msk.f32.mxu1 %vm14255_vm1, %v14256_v6 }
 0x420   :  { %14175 = vpow2.f32 %v6542_v38  ;;  %v6536_v50 = vmin.f32 %v17282_v63, 0.0  ;;  %vm6529_vm15 = vcmp.gt.f32.partialorder %v17282_v63, 0.0 }
 0x421   :  { %v6265_v45 = vsel %vm6230_vm4, %v17233_v56, %v10737_v32  ;;  %v4244_v18 = vpop.f32.mrb[180].mxu1  ;;  %v6504_v4 = vpop.f32.mrb[44].mxu0 }
 0x422   :  { %v14172_v39 = vpop.eup %14171  ;;  %v6544_v17 = vmul.f32 1.442695, %v6536_v50  ;;  %v17291_v31 = vadd.f32 %v4244_v18, %v17195_v58  ;;  %v17294_v46 = vadd.f32 %v17212_v36, %v6504_v4  ;;  %v12422_v3 = vpop.f32.mrb[181].mxu1  ;;  %12811 = vmatmul.mubr.msk.f32.gmra.mrb[30].mxu1 %vm418_vm5, %v6265_v45 }
 0x423   :  { %v12835_v1 = vpop.f32.mrb[45].mxu0  ;;  %v10738_v60 = vadd.f32 -1.0, %v14172_v39  ;;  %12813 = vmatprep.mubr.msk.f32.mxu1 %vm14255_vm1, %v14256_v6 }
 0x424   :  { %14177 = vpow2.f32 %v6544_v17  ;;  %v6537_v56 = vmin.f32 %v17294_v46, 0.0  ;;  %vm6530_vm0 = vcmp.gt.f32.partialorder %v17294_v46, 0.0 }
 0x425   :  { %v6266_v20 = vsel %vm6231_vm3, %v17245_v41, %v10738_v60  ;;  %v4249_v58 = vpop.f32.mrb[182].mxu1  ;;  %v6509_v27 = vpop.f32.mrb[46].mxu0 }
 0x426   :  { %v14174_v49 = vpop.eup %14173  ;;  %v6546_v29 = vmul.f32 1.442695, %v6537_v56  ;;  %v17303_v48 = vadd.f32 %v4249_v58, %v17207_v13  ;;  %v17306_v25 = vadd.f32 %v17212_v36, %v6509_v27  ;;  %v12425_v5 = vpop.f32.mrb[183].mxu1  ;;  %12814 = vmatmul.mubr.msk.f32.gmra.mrb[32].mxu1 %vm418_vm5, %v6266_v20  ;;  %v10802_v13 = vld [vmem:[%s18285_s4 + $0x160] sm:$0xff] }
 0x427   :  { %v12838_v15 = vpop.f32.mrb[47].mxu0  ;;  %v10739_v51 = vadd.f32 -1.0, %v14174_v49  ;;  %12816 = vmatprep.mubr.msk.f32.mxu1 %vm14255_vm1, %v14256_v6  ;;  %v13637_v61 = vpack.c.bf16 %v10803_v40, %v10802_v13 }
 0x428   :  { %14179 = vpow2.f32 %v6546_v29  ;;  %v6538_v41 = vmin.f32 %v17306_v25, 0.0  ;;  %vm6531_vm6 = vcmp.gt.f32.partialorder %v17306_v25, 0.0 }
 0x429   :  { %v6267_v8 = vsel %vm6232_vm13, %v17258_v37, %v10739_v51  ;;  %v4254_v57 = vpop.f32.mrb[184].mxu1  ;;  %v6514_v53 = vpop.f32.mrb[48].mxu0 }
 0x42a   :  { %v14176_v24 = vpop.eup %14175  ;;  %v6548_v62 = vmul.f32 1.442695, %v6538_v41  ;;  %v17321_v54 = vadd.f32 %v4254_v57, %v17230_v28  ;;  %v17324_v42 = vadd.f32 %v17212_v36, %v6514_v53  ;;  %v12428_v47 = vpop.f32.mrb[185].mxu1  ;;  %12817 = vmatmul.mubr.msk.f32.gmra.mrb[34].mxu1 %vm418_vm5, %v6267_v8 }
 0x42b   :  { %v12841_v21 = vpop.f32.mrb[49].mxu0  ;;  %v10764_v55 = vadd.f32 -1.0, %v14176_v24  ;;  %12852 = vmatprep.mubr.msk.f32.mxu1 %vm14255_vm1, %v14256_v6 }
 0x42c   :  { %14181 = vpow2.f32 %v6548_v62  ;;  %v6539_v37 = vmin.f32 %v17324_v42, 0.0  ;;  %vm6532_vm7 = vcmp.gt.f32.partialorder %v17324_v42, 0.0 }
 0x42d   :  { %v6563_v28 = vsel %vm6528_vm14, %v17270_v26, %v10764_v55  ;;  %v4259_v12 = vpop.f32.mrb[186].mxu1  ;;  %v6519_v23 = vpop.f32.mrb[50].mxu0 }
 0x42e   :  { %v14178_v33 = vpop.eup %14177  ;;  %v6550_v11 = vmul.f32 1.442695, %v6539_v37  ;;  %v17333_v16 = vadd.f32 %v4259_v12, %v17242_v7  ;;  %v17336_v43 = vadd.f32 %v17212_v36, %v6519_v23  ;;  %v12431_v9 = vpop.f32.mrb[187].mxu1  ;;  %12853 = vmatmul.mubr.msk.f32.vlgmr.msra.gmra.mrb[36].mxu1 %vm418_vm5, %v6563_v28 }
 0x42f   :  { %v12844_v2 = vpop.f32.mrb[51].mxu0  ;;  %v10765_v59 = vadd.f32 -1.0, %v14178_v33  ;;  %13638 = vmatpush3.bf16.msra.mxu1 %v13637_v61  ;;  %12855 = vmatprep.mubr.msk.f32.mxu1 %vm14255_vm1, %v14256_v6 }
 0x430   :  { %14183 = vpow2.f32 %v6550_v11  ;;  %v6540_v26 = vmin.f32 %v17336_v43, 0.0  ;;  %13646 = vmatprep.subr.bf16.mxu1 %v14254_v0  ;;  %vm6533_vm8 = vcmp.gt.f32.partialorder %v17336_v43, 0.0  ;;  %v10834_v2 = vld [vmem:[%s18285_s4 + $0x178] sm:$0xff] }
 0x431   :  { %v6564_v7 = vsel %vm6529_vm15, %v17282_v63, %v10765_v59  ;;  %v4264_v10 = vpop.f32.mrb[188].mxu1  ;;  %v6524_v30 = vpop.f32.mrb[52].mxu0 }
 0x432   :  { %v14180_v35 = vpop.eup %14179  ;;  %v6552_v14 = vmul.f32 1.442695, %v6540_v26  ;;  %v17346_v38 = vadd.f32 %v4264_v10, %v17255_v19  ;;  %v17349_v44 = vadd.f32 %v17212_v36, %v6524_v30  ;;  %v12434_v52 = vpop.f32.mrb[189].mxu1  ;;  %12856 = vmatmul.mubr.msk.f32.gmra.mrb[38].mxu1 %vm418_vm5, %v6564_v7 }
 0x433   :  { %v12847_v32 = vpop.f32.mrb[53].mxu0  ;;  %v10766_v50 = vadd.f32 -1.0, %v14180_v35  ;;  %12858 = vmatprep.mubr.msk.f32.mxu1 %vm14255_vm1, %v14256_v6 }
 0x434   :  { %14185 = vpow2.f32 %v6552_v14  ;;  %v6541_v63 = vmin.f32 %v17349_v44, 0.0  ;;  %vm6534_vm9 = vcmp.gt.f32.partialorder %v17349_v44, 0.0 }
 0x435   :  { %v6565_v45 = vsel %vm6530_vm0, %v17294_v46, %v10766_v50  ;;  %v4269_v19 = vpop.f32.mrb[190].mxu1  ;;  %v6796_v18 = vpop.f32.mrb[54].mxu0 }
 0x436   :  { %v14182_v4 = vpop.eup %14181  ;;  %v6554_v39 = vmul.f32 1.442695, %v6541_v63  ;;  %v17358_v17 = vadd.f32 %v4269_v19, %v17267_v34  ;;  %v17361_v3 = vadd.f32 %v17212_v36, %v6796_v18  ;;  %v12437_v1 = vpop.f32.mrb[191].mxu1  ;;  %12859 = vmatmul.mubr.msk.f32.gmra.mrb[40].mxu1 %vm418_vm5, %v6565_v45 }
 0x437   :  { %v12883_v60 = vpop.f32.mrb[55].mxu0  ;;  %v10767_v56 = vadd.f32 -1.0, %v14182_v4  ;;  %12861 = vmatprep.mubr.msk.f32.mxu1 %vm14255_vm1, %v14256_v6 }
 0x438   :  { %14187 = vpow2.f32 %v6554_v39  ;;  %v6837_v46 = vmin.f32 %v17361_v3, 0.0  ;;  %vm6830_vm10 = vcmp.gt.f32.partialorder %v17361_v3, 0.0 }
 0x439   :  { %v6566_v20 = vsel %vm6531_vm6, %v17306_v25, %v10767_v56  ;;  %v4274_v34 = vpop.f32.mrb[192].mxu1  ;;  %v6801_v58 = vpop.f32.mrb[56].mxu0 }
 0x43a   :  { %v14184_v27 = vpop.eup %14183  ;;  %v6844_v49 = vmul.f32 1.442695, %v6837_v46  ;;  %v17370_v29 = vadd.f32 %v4274_v34, %v17279_v22  ;;  %v17373_v5 = vadd.f32 %v17212_v36, %v6801_v58  ;;  %v12440_v15 = vpop.f32.mrb[193].mxu1  ;;  %12862 = vmatmul.mubr.msk.f32.gmra.mrb[42].mxu1 %vm418_vm5, %v6566_v20 }
 0x43b   :  { %v12886_v51 = vpop.f32.mrb[57].mxu0  ;;  %v10768_v41 = vadd.f32 -1.0, %v14184_v27  ;;  %12864 = vmatprep.mubr.msk.f32.mxu1 %vm14255_vm1, %v14256_v6 }
 0x43c   :  { %14189 = vpow2.f32 %v6844_v49  ;;  %v6838_v25 = vmin.f32 %v17373_v5, 0.0  ;;  %vm6831_vm11 = vcmp.gt.f32.partialorder %v17373_v5, 0.0 }
 0x43d   :  { %v6567_v13 = vsel %vm6532_vm7, %v17324_v42, %v10768_v41  ;;  %v4546_v22 = vpop.f32.mrb[194].mxu1  ;;  %v6806_v40 = vpop.f32.mrb[58].mxu0 }
 0x43e   :  { %v14186_v8 = vpop.eup %14185  ;;  %v6846_v57 = vmul.f32 1.442695, %v6838_v25  ;;  %v17382_v53 = vadd.f32 %v4546_v22, %v17291_v31  ;;  %v17385_v24 = vadd.f32 %v17212_v36, %v6806_v40  ;;  %v12476_v62 = vpop.f32.mrb[195].mxu1  ;;  %12865 = vmatmul.mubr.msk.f32.gmra.mrb[44].mxu1 %vm418_vm5, %v6567_v13 }
 0x43f   :  { %v12889_v47 = vpop.f32.mrb[59].mxu0  ;;  %v10769_v21 = vadd.f32 -1.0, %v14186_v8  ;;  %12867 = vmatprep.mubr.msk.f32.mxu1 %vm14255_vm1, %v14256_v6 }
 0x440   :  { %14191 = vpow2.f32 %v6846_v57  ;;  %v6839_v42 = vmin.f32 %v17385_v24, 0.0  ;;  %vm6832_vm12 = vcmp.gt.f32.partialorder %v17385_v24, 0.0 }
 0x441   :  { %v6568_v55 = vsel %vm6533_vm8, %v17336_v43, %v10769_v21  ;;  %v4551_v31 = vpop.f32.mrb[196].mxu1  ;;  %v6811_v61 = vpop.f32.mrb[60].mxu0 }
 0x442   :  { %v14188_v37 = vpop.eup %14187  ;;  %v6848_v28 = vmul.f32 1.442695, %v6839_v42  ;;  %v17394_v12 = vadd.f32 %v4551_v31, %v17303_v48  ;;  %v17397_v23 = vadd.f32 %v17212_v36, %v6811_v61  ;;  %v12479_v33 = vpop.f32.mrb[197].mxu1  ;;  %12868 = vmatmul.mubr.msk.f32.gmra.mrb[46].mxu1 %vm418_vm5, %v6568_v55  ;;  %v10833_v48 = vld [vmem:[%s18285_s4 + $0x170] sm:$0xff] }
 0x443   :  { %v12892_v11 = vpop.f32.mrb[61].mxu0  ;;  %v10770_v9 = vadd.f32 -1.0, %v14188_v37  ;;  %12870 = vmatprep.mubr.msk.f32.mxu1 %vm14255_vm1, %v14256_v6  ;;  %v13647_v63 = vpack.c.bf16 %v10834_v2, %v10833_v48 }
 0x444   :  { %14193 = vpow2.f32 %v6848_v28  ;;  %v6840_v43 = vmin.f32 %v17397_v23, 0.0  ;;  %vm6833_vm4 = vcmp.gt.f32.partialorder %v17397_v23, 0.0 }
 0x445   :  { %v6569_v59 = vsel %vm6534_vm9, %v17349_v44, %v10770_v9  ;;  %v4556_v26 = vpop.f32.mrb[198].mxu1  ;;  %v6816_v7 = vpop.f32.mrb[62].mxu0 }
 0x446   :  { %v14190_v10 = vpop.eup %14189  ;;  %v6850_v30 = vmul.f32 1.442695, %v6840_v43  ;;  %v17412_v35 = vadd.f32 %v4556_v26, %v17321_v54  ;;  %v17415_v14 = vadd.f32 %v17212_v36, %v6816_v7  ;;  %v12482_v52 = vpop.f32.mrb[199].mxu1  ;;  %12871 = vmatmul.mubr.msk.f32.gmra.mrb[48].mxu1 %vm418_vm5, %v6569_v59 }
 0x447   :  { %v12895_v32 = vpop.f32.mrb[63].mxu0  ;;  %v10795_v50 = vadd.f32 -1.0, %v14190_v10  ;;  %12906 = vmatprep.mubr.msk.f32.mxu1 %vm14255_vm1, %v14256_v6 }
 0x448   :  { %14195 = vpow2.f32 %v6850_v30  ;;  %v6841_v44 = vmin.f32 %v17415_v14, 0.0  ;;  %vm6834_vm3 = vcmp.gt.f32.partialorder %v17415_v14, 0.0 }
 0x449   :  { %v6865_v54 = vsel %vm6830_vm10, %v17361_v3, %v10795_v50  ;;  %v4561_v45 = vpop.f32.mrb[200].mxu1  ;;  %v6821_v19 = vpop.f32.mrb[64].mxu0 }
 0x44a   :  { %v14192_v18 = vpop.eup %14191  ;;  %v6852_v4 = vmul.f32 1.442695, %v6841_v44  ;;  %v17424_v39 = vadd.f32 %v4561_v45, %v17333_v16  ;;  %v17427_v1 = vadd.f32 %v17212_v36, %v6821_v19  ;;  %v12485_v60 = vpop.f32.mrb[201].mxu1  ;;  %12907 = vmatmul.mubr.msk.f32.vlgmr.msra.gmra.mrb[50].mxu1 %vm418_vm5, %v6865_v54 }
 0x44b   :  { %v12898_v56 = vpop.f32.mrb[65].mxu0  ;;  %v10796_v46 = vadd.f32 -1.0, %v14192_v18  ;;  %13648 = vmatpush3.bf16.msra.mxu1 %v13647_v63  ;;  %12909 = vmatprep.mubr.msk.f32.mxu1 %vm14255_vm1, %v14256_v6 }
 0x44c   :  { %14197 = vpow2.f32 %v6852_v4  ;;  %v6842_v3 = vmin.f32 %v17427_v1, 0.0  ;;  %13656 = vmatprep.subr.bf16.mxu1 %v14254_v0  ;;  %vm6835_vm13 = vcmp.gt.f32.partialorder %v17427_v1, 0.0  ;;  %v10865_v56 = vld [vmem:[%s18285_s4 + $0x188] sm:$0xff] }
 0x44d   :  { %v6866_v16 = vsel %vm6831_vm11, %v17373_v5, %v10796_v46  ;;  %v4566_v20 = vpop.f32.mrb[202].mxu1  ;;  %v6826_v34 = vpop.f32.mrb[66].mxu0 }
 0x44e   :  { %v14194_v58 = vpop.eup %14193  ;;  %v6854_v27 = vmul.f32 1.442695, %v6842_v3  ;;  %v17437_v49 = vadd.f32 %v4566_v20, %v17346_v38  ;;  %v17440_v15 = vadd.f32 %v17212_v36, %v6826_v34  ;;  %v12488_v51 = vpop.f32.mrb[203].mxu1  ;;  %12910 = vmatmul.mubr.msk.f32.gmra.mrb[52].mxu1 %vm418_vm5, %v6866_v16 }
 0x44f   :  { %v12901_v41 = vpop.f32.mrb[67].mxu0  ;;  %v10797_v25 = vadd.f32 -1.0, %v14194_v58  ;;  %12912 = vmatprep.mubr.msk.f32.mxu1 %vm14255_vm1, %v14256_v6 }
 0x450   :  { %14199 = vpow2.f32 %v6854_v27  ;;  %v6843_v5 = vmin.f32 %v17440_v15, 0.0  ;;  %vm6836_vm14 = vcmp.gt.f32.partialorder %v17440_v15, 0.0 }
 0x451   :  { %v6867_v13 = vsel %vm6832_vm12, %v17385_v24, %v10797_v25  ;;  %v4571_v38 = vpop.f32.mrb[204].mxu1  ;;  %v7098_v22 = vpop.f32.mrb[68].mxu0 }
 0x452   :  { %v14196_v40 = vpop.eup %14195  ;;  %v6856_v8 = vmul.f32 1.442695, %v6843_v5  ;;  %v17449_v57 = vadd.f32 %v4571_v38, %v17358_v17  ;;  %v17452_v62 = vadd.f32 %v17212_v36, %v7098_v22  ;;  %v12491_v47 = vpop.f32.mrb[205].mxu1  ;;  %12913 = vmatmul.mubr.msk.f32.gmra.mrb[54].mxu1 %vm418_vm5, %v6867_v13 }
 0x453   :  { %v12937_v21 = vpop.f32.mrb[69].mxu0  ;;  %v10798_v42 = vadd.f32 -1.0, %v14196_v40  ;;  %12915 = vmatprep.mubr.msk.f32.mxu1 %vm14255_vm1, %v14256_v6 }
 0x454   :  { %14201 = vpow2.f32 %v6856_v8  ;;  %v7139_v24 = vmin.f32 %v17452_v62, 0.0  ;;  %vm7132_vm15 = vcmp.gt.f32.partialorder %v17452_v62, 0.0 }
 0x455   :  { %v6868_v55 = vsel %vm6833_vm4, %v17397_v23, %v10798_v42  ;;  %v4576_v17 = vpop.f32.mrb[206].mxu1  ;;  %v7103_v31 = vpop.f32.mrb[70].mxu0 }
 0x456   :  { %v14198_v61 = vpop.eup %14197  ;;  %v7146_v37 = vmul.f32 1.442695, %v7139_v24  ;;  %v17461_v28 = vadd.f32 %v4576_v17, %v17370_v29  ;;  %v17464_v33 = vadd.f32 %v17212_v36, %v7103_v31  ;;  %v12494_v11 = vpop.f32.mrb[207].mxu1  ;;  %12916 = vmatmul.mubr.msk.f32.gmra.mrb[56].mxu1 %vm418_vm5, %v6868_v55 }
 0x457   :  { %v12940_v9 = vpop.f32.mrb[71].mxu0  ;;  %v10799_v43 = vadd.f32 -1.0, %v14198_v61  ;;  %12918 = vmatprep.mubr.msk.f32.mxu1 %vm14255_vm1, %v14256_v6 }
 0x458   :  { %14203 = vpow2.f32 %v7146_v37  ;;  %v7140_v23 = vmin.f32 %v17464_v33, 0.0  ;;  %vm7133_vm0 = vcmp.gt.f32.partialorder %v17464_v33, 0.0 }
 0x459   :  { %v6869_v48 = vsel %vm6834_vm3, %v17415_v14, %v10799_v43  ;;  %v4848_v29 = vpop.f32.mrb[208].mxu1  ;;  %v7108_v2 = vpop.f32.mrb[72].mxu0 }
 0x45a   :  { %v14200_v59 = vpop.eup %14199  ;;  %v7148_v26 = vmul.f32 1.442695, %v7140_v23  ;;  %v17473_v7 = vadd.f32 %v4848_v29, %v17382_v53  ;;  %v17476_v10 = vadd.f32 %v17212_v36, %v7108_v2  ;;  %v12530_v30 = vpop.f32.mrb[209].mxu1  ;;  %12919 = vmatmul.mubr.msk.f32.gmra.mrb[58].mxu1 %vm418_vm5, %v6869_v48 }
 0x45b   :  { %v12943_v52 = vpop.f32.mrb[73].mxu0  ;;  %v10800_v32 = vadd.f32 -1.0, %v14200_v59  ;;  %12921 = vmatprep.mubr.msk.f32.mxu1 %vm14255_vm1, %v14256_v6 }
 0x45c   :  { %14205 = vpow2.f32 %v7148_v26  ;;  %v7141_v14 = vmin.f32 %v17476_v10, 0.0  ;;  %vm7134_vm6 = vcmp.gt.f32.partialorder %v17476_v10, 0.0 }
 0x45d   :  { %v6870_v50 = vsel %vm6835_vm13, %v17427_v1, %v10800_v32  ;;  %v4853_v53 = vpop.f32.mrb[210].mxu1  ;;  %v7113_v63 = vpop.f32.mrb[74].mxu0 }
 0x45e   :  { %v14202_v44 = vpop.eup %14201  ;;  %v7150_v54 = vmul.f32 1.442695, %v7141_v14  ;;  %v17485_v45 = vadd.f32 %v4853_v53, %v17394_v12  ;;  %v17488_v19 = vadd.f32 %v17212_v36, %v7113_v63  ;;  %v12533_v18 = vpop.f32.mrb[211].mxu1  ;;  %12922 = vmatmul.mubr.msk.f32.gmra.mrb[60].mxu1 %vm418_vm5, %v6870_v50  ;;  %v10864_v12 = vld [vmem:[%s18285_s4 + $0x180] sm:$0xff] }
 0x45f   :  { %v12946_v4 = vpop.f32.mrb[75].mxu0  ;;  %v10801_v60 = vadd.f32 -1.0, %v14202_v44  ;;  %12924 = vmatprep.mubr.msk.f32.mxu1 %vm14255_vm1, %v14256_v6  ;;  %v13657_v5 = vpack.c.bf16 %v10865_v56, %v10864_v12 }
 0x460   :  { %14207 = vpow2.f32 %v7150_v54  ;;  %v7142_v1 = vmin.f32 %v17488_v19, 0.0  ;;  %vm7135_vm7 = vcmp.gt.f32.partialorder %v17488_v19, 0.0 }
 0x461   :  { %v6871_v46 = vsel %vm6836_vm14, %v17440_v15, %v10801_v60  ;;  %v4858_v3 = vpop.f32.mrb[212].mxu1  ;;  %v7118_v16 = vpop.f32.mrb[76].mxu0 }
 0x462   :  { %v14204_v20 = vpop.eup %14203  ;;  %v7152_v34 = vmul.f32 1.442695, %v7142_v1  ;;  %v17503_v58 = vadd.f32 %v4858_v3, %v17412_v35  ;;  %v17506_v27 = vadd.f32 %v17212_v36, %v7118_v16  ;;  %v12536_v51 = vpop.f32.mrb[213].mxu1  ;;  %12925 = vmatmul.mubr.msk.f32.gmra.mrb[62].mxu1 %vm418_vm5, %v6871_v46 }
 0x463   :  { %v12949_v41 = vpop.f32.mrb[77].mxu0  ;;  %v10826_v25 = vadd.f32 -1.0, %v14204_v20  ;;  %12960 = vmatprep.mubr.msk.f32.mxu1 %vm14255_vm1, %v14256_v6 }
 0x464   :  { %14209 = vpow2.f32 %v7152_v34  ;;  %v7143_v15 = vmin.f32 %v17506_v27, 0.0  ;;  %vm7136_vm8 = vcmp.gt.f32.partialorder %v17506_v27, 0.0 }
 0x465   :  { %v7167_v35 = vsel %vm7132_vm15, %v17452_v62, %v10826_v25  ;;  %v4863_v13 = vpop.f32.mrb[214].mxu1  ;;  %v7123_v38 = vpop.f32.mrb[78].mxu0 }
 0x466   :  { %v14206_v22 = vpop.eup %14205  ;;  %v7154_v40 = vmul.f32 1.442695, %v7143_v15  ;;  %v17515_v8 = vadd.f32 %v4863_v13, %v17424_v39  ;;  %v17518_v47 = vadd.f32 %v17212_v36, %v7123_v38  ;;  %v12539_v21 = vpop.f32.mrb[215].mxu1  ;;  %12961 = vmatmul.mubr.msk.f32.vlgmr.msra.gmra.mrb[64].mxu1 %vm418_vm5, %v7167_v35 }
 0x467   :  { %v12952_v42 = vpop.f32.mrb[79].mxu0  ;;  %v10827_v24 = vadd.f32 -1.0, %v14206_v22  ;;  %13658 = vmatpush3.bf16.msra.mxu1 %v13657_v5  ;;  %12963 = vmatprep.mubr.msk.f32.mxu1 %vm14255_vm1, %v14256_v6 }
 0x468   :  { %14211 = vpow2.f32 %v7154_v40  ;;  %v7144_v62 = vmin.f32 %v17518_v47, 0.0  ;;  %13665 = vmatprep.subr.bf16.mxu1 %v14254_v0  ;;  %vm7137_vm9 = vcmp.gt.f32.partialorder %v17518_v47, 0.0 }
 0x469   :  { %v7168_v39 = vsel %vm7133_vm0, %v17464_v33, %v10827_v24  ;;  %v4868_v55 = vpop.f32.mrb[216].mxu1  ;;  %v7128_v17 = vpop.f32.mrb[80].mxu0  ;;  %vm7674_vm0 = vcmask 261120  }
 0x46a   :  { %v14208_v31 = vpop.eup %14207  ;;  %v7156_v61 = vmul.f32 1.442695, %v7144_v62  ;;  %v17528_v37 = vadd.f32 %v4868_v55, %v17437_v49  ;;  %v17531_v11 = vadd.f32 %v17212_v36, %v7128_v17  ;;  %v12542_v9 = vpop.f32.mrb[217].mxu1  ;;  %12964 = vmatmul.mubr.msk.f32.gmra.mrb[66].mxu1 %vm418_vm5, %v7168_v39 }
 0x46b   :  { %v12955_v43 = vpop.f32.mrb[81].mxu0  ;;  %v10828_v23 = vadd.f32 -1.0, %v14208_v31  ;;  %12966 = vmatprep.mubr.msk.f32.mxu1 %vm14255_vm1, %v14256_v6 }
 0x46c   :  { %14213 = vpow2.f32 %v7156_v61  ;;  %v7145_v33 = vmin.f32 %v17531_v11, 0.0  ;;  %vm7138_vm10 = vcmp.gt.f32.partialorder %v17531_v11, 0.0 }
 0x46d   :  { %v7169_v48 = vsel %vm7134_vm6, %v17476_v10, %v10828_v23  ;;  %v4873_v49 = vpop.f32.mrb[218].mxu1  ;;  %v7400_v29 = vpop.f32.mrb[82].mxu0 }
 0x46e   :  { %v14210_v2 = vpop.eup %14209  ;;  %v7158_v59 = vmul.f32 1.442695, %v7145_v33  ;;  %v17540_v26 = vadd.f32 %v4873_v49, %v17449_v57  ;;  %v17543_v30 = vadd.f32 %v17212_v36, %v7400_v29  ;;  %v12545_v52 = vpop.f32.mrb[219].mxu1  ;;  %12967 = vmatmul.mubr.msk.f32.gmra.mrb[68].mxu1 %vm418_vm5, %v7169_v48 }
 0x46f   :  { %v12991_v32 = vpop.f32.mrb[83].mxu0  ;;  %v10829_v14 = vadd.f32 -1.0, %v14210_v2  ;;  %12969 = vmatprep.mubr.msk.f32.mxu1 %vm14255_vm1, %v14256_v6 }
 0x470   :  { %14215 = vpow2.f32 %v7158_v59  ;;  %v7441_v10 = vmin.f32 %v17543_v30, 0.0  ;;  %vm7434_vm11 = vcmp.gt.f32.partialorder %v17543_v30, 0.0 }
 0x471   :  { %v7170_v50 = vsel %vm7135_vm7, %v17488_v19, %v10829_v14  ;;  %v4878_v57 = vpop.f32.mrb[220].mxu1  ;;  %v7405_v53 = vpop.f32.mrb[84].mxu0 }
 0x472   :  { %v14212_v63 = vpop.eup %14211  ;;  %v7448_v44 = vmul.f32 1.442695, %v7441_v10  ;;  %v17552_v54 = vadd.f32 %v4878_v57, %v17461_v28  ;;  %v17555_v18 = vadd.f32 %v17212_v36, %v7405_v53  ;;  %v12548_v4 = vpop.f32.mrb[221].mxu1  ;;  %12970 = vmatmul.mubr.msk.f32.gmra.mrb[70].mxu1 %vm418_vm5, %v7170_v50 }
 0x473   :  { %v12994_v60 = vpop.f32.mrb[85].mxu0  ;;  %v10830_v1 = vadd.f32 -1.0, %v14212_v63  ;;  %12972 = vmatprep.mubr.msk.f32.mxu1 %vm14255_vm1, %v14256_v6 }
 0x474   :  { %14217 = vpow2.f32 %v7448_v44  ;;  %v7442_v19 = vmin.f32 %v17555_v18, 0.0  ;;  %vm7435_vm12 = vcmp.gt.f32.partialorder %v17555_v18, 0.0 }
 0x475   :  { %v7171_v12 = vsel %vm7136_vm8, %v17506_v27, %v10830_v1  ;;  %v5150_v28 = vpop.f32.mrb[222].mxu1  ;;  %v7410_v56 = vpop.f32.mrb[86].mxu0 }
 0x476   :  { %v14214_v46 = vpop.eup %14213  ;;  %v7450_v3 = vmul.f32 1.442695, %v7442_v19  ;;  %v17564_v16 = vadd.f32 %v5150_v28, %v17473_v7  ;;  %v17567_v20 = vadd.f32 %v17212_v36, %v7410_v56  ;;  %v12584_v34 = vpop.f32.mrb[223].mxu1  ;;  %12973 = vmatmul.mubr.msk.f32.gmra.mrb[72].mxu1 %vm418_vm5, %v7171_v12 }
 0x477   :  { %v12997_v51 = vpop.f32.mrb[87].mxu0  ;;  %v10831_v41 = vadd.f32 -1.0, %v14214_v46  ;;  %12975 = vmatprep.mubr.msk.f32.mxu1 %vm14255_vm1, %v14256_v6 }
 0x478   :  { %14219 = vpow2.f32 %v7450_v3  ;;  %v7443_v27 = vmin.f32 %v17567_v20, 0.0  ;;  %vm7436_vm4 = vcmp.gt.f32.partialorder %v17567_v20, 0.0 }
 0x479   :  { %v7172_v25 = vsel %vm7137_vm9, %v17518_v47, %v10831_v41  ;;  %v5155_v7 = vpop.f32.mrb[224].mxu1  ;;  %v7415_v5 = vpop.f32.mrb[88].mxu0 }
 0x47a   :  { %v14216_v15 = vpop.eup %14215  ;;  %v7452_v35 = vmul.f32 1.442695, %v7443_v27  ;;  %v17576_v13 = vadd.f32 %v5155_v7, %v17485_v45  ;;  %v17579_v38 = vadd.f32 %v17212_v36, %v7415_v5  ;;  %v12587_v22 = vpop.f32.mrb[225].mxu1  ;;  %12976 = vmatmul.mubr.msk.f32.gmra.mrb[74].mxu1 %vm418_vm5, %v7172_v25 }
 0x47b   :  { %v13000_v40 = vpop.f32.mrb[89].mxu0  ;;  %v10832_v21 = vadd.f32 -1.0, %v14216_v15  ;;  %12978 = vmatprep.mubr.msk.f32.mxu1 %vm14255_vm1, %v14256_v6 }
 0x47c   :  { %14221 = vpow2.f32 %v7452_v35  ;;  %v7444_v47 = vmin.f32 %v17579_v38, 0.0  ;;  %vm7437_vm3 = vcmp.gt.f32.partialorder %v17579_v38, 0.0 }
 0x47d   :  { %v7173_v42 = vsel %vm7138_vm10, %v17531_v11, %v10832_v21  ;;  %v5160_v45 = vpop.f32.mrb[226].mxu1  ;;  %v7420_v24 = vpop.f32.mrb[90].mxu0 }
 0x47e   :  { %v14218_v62 = vpop.eup %14217  ;;  %v7454_v39 = vmul.f32 1.442695, %v7444_v47  ;;  %v17588_v55 = vadd.f32 %v5160_v45, %v17503_v58  ;;  %v7421_v17 = vadd.f32 %v17212_v36, %v7420_v24  ;;  %v12590_v31 = vpop.f32.mrb[227].mxu1  ;;  %12979 = vmatmul.mubr.msk.f32.gmra.mrb[76].mxu1 %vm418_vm5, %v7173_v42 }
 0x47f   :  { %v13003_v61 = vpop.f32.mrb[91].mxu0  ;;  %v10857_v9 = vadd.f32 -1.0, %v14218_v62  ;;  %13014 = vmatprep.mubr.msk.f32.mxu1 %vm14255_vm1, %v14256_v6 }
 0x480   :  { %14223 = vpow2.f32 %v7454_v39  ;;  %v7445_v11 = vmin.f32 %v7421_v17, 0.0  ;;  %vm7438_vm13 = vcmp.gt.f32.partialorder %v7421_v17, 0.0 }
 0x481   :  { %v7469_v43 = vsel %vm7434_vm11, %v17543_v30, %v10857_v9  ;;  %v5165_v23 = vpop.f32.mrb[228].mxu1  ;;  %v7425_v33 = vpop.f32.mrb[92].mxu0 }
 0x482   :  { %v14220_v58 = vpop.eup %14219  ;;  %v7456_v48 = vmul.f32 1.442695, %v7445_v11  ;;  %v17597_v49 = vadd.f32 %v5165_v23, %v17515_v8  ;;  %v7426_v29 = vadd.f32 %v17212_v36, %v7425_v33  ;;  %v12593_v2 = vpop.f32.mrb[229].mxu1  ;;  %13015 = vmatmul.mubr.msk.f32.vlgmr.msra.gmra.mrb[78].mxu1 %vm418_vm5, %v7469_v43 }
 0x483   :  { %v13006_v59 = vpop.f32.mrb[93].mxu0  ;;  %v10858_v52 = vadd.f32 -1.0, %v14220_v58  ;;  %13017 = vmatprep.mubr.msk.f32.mxu1 %vm14255_vm1, %v14256_v6 }
 0x484   :  { %14225 = vpow2.f32 %v7456_v48  ;;  %v7446_v30 = vmin.f32 %v7426_v29, 0.0  ;;  %vm7439_vm14 = vcmp.gt.f32.partialorder %v7426_v29, 0.0 }
 0x485   :  { %v7470_v32 = vsel %vm7435_vm12, %v17555_v18, %v10858_v52  ;;  %v5170_v14 = vpop.f32.mrb[230].mxu1  ;;  %v7430_v10 = vpop.f32.mrb[94].mxu0  ;;  %vm9666_vm12 = vcmask 1043456  }
 0x486   :  { %v14222_v8 = vpop.eup %14221  ;;  %v7458_v50 = vmul.f32 1.442695, %v7446_v30  ;;  %v5188_v57 = vadd.f32 %v5170_v14, %v17528_v37  ;;  %v7431_v53 = vadd.f32 %v17212_v36, %v7430_v10  ;;  %v12596_v63 = vpop.f32.mrb[231].mxu1  ;;  %13018 = vmatmul.mubr.msk.f32.gmra.mrb[80].mxu1 %vm418_vm5, %v7470_v32 }
 0x487   :  { %v13009_v44 = vpop.f32.mrb[95].mxu0  ;;  %v10859_v4 = vadd.f32 -1.0, %v14222_v8  ;;  %13020 = vmatprep.mubr.msk.f32.mxu1 %vm14255_vm1, %v14256_v6 }
 0x488   :  { %14227 = vpow2.f32 %v7458_v50  ;;  %v7447_v18 = vmin.f32 %v7431_v53, 0.0  ;;  %vm7440_vm15 = vcmp.gt.f32.partialorder %v7431_v53, 0.0 }
 0x489   :  { %v7471_v60 = vsel %vm7436_vm4, %v17567_v20, %v10859_v4  ;;  %v5175_v1 = vpop.f32.mrb[232].mxu1  ;;  %vm13814_vm4 = vmpackc.low %vm9666_vm12, %vm14257_vm2 }
 0x48a   :  { %v14224_v19 = vpop.eup %14223  ;;  %v7460_v12 = vmul.f32 1.442695, %v7447_v18  ;;  %v5189_v37 = vadd.f32 %v5175_v1, %v17540_v26  ;;  %v12599_v36 = vpop.f32.mrb[233].mxu1  ;;  %13021 = vmatmul.mubr.msk.f32.gmra.mrb[82].mxu1 %vm418_vm5, %v7471_v60 }
 0x48b   :  { %v10860_v28 = vadd.f32 -1.0, %v14224_v19  ;;  %13023 = vmatprep.mubr.msk.f32.mxu1 %vm14255_vm1, %v14256_v6 }
 0x48c   :  { %14229 = vpow2.f32 %v7460_v12 }
 0x48d   :  { %v7472_v56 = vsel %vm7437_vm3, %v17579_v38, %v10860_v28  ;;  %v5180_v46 = vpop.f32.mrb[234].mxu1  ;;  %vm9662_vm3 = vcmask 228352  }
 0x48e   :  { %v14226_v3 = vpop.eup %14225  ;;  %v5190_v20 = vadd.f32 %v5180_v46, %v17552_v54  ;;  %v12602_v34 = vpop.f32.mrb[235].mxu1  ;;  %13024 = vmatmul.mubr.msk.f32.gmra.mrb[84].mxu1 %vm418_vm5, %v7472_v56 }
 0x48f   :  { %v10861_v51 = vadd.f32 -1.0, %v14226_v3  ;;  %13026 = vmatprep.mubr.msk.f32.mxu1 %vm14255_vm1, %v14256_v6  ;;  %v7663_v3 = vld [vmem:[%s18287_s6] sm:$0xff] }
 0x491   :  { %v7473_v26 = vsel %vm7438_vm13, %v7421_v17, %v10861_v51  ;;  %v5452_v41 = vpop.f32.mrb[236].mxu1 }
 0x492   :  { %v14228_v27 = vpop.eup %14227  ;;  %v5486_v25 = vadd.f32 %v5452_v41, %v17564_v16  ;;  %v12638_v7 = vpop.f32.mrb[237].mxu1  ;;  %13027 = vmatmul.mubr.msk.f32.gmra.mrb[86].mxu1 %vm418_vm5, %v7473_v26 }
 0x493   :  { %v10862_v5 = vadd.f32 -1.0, %v14228_v27  ;;  %13029 = vmatprep.mubr.msk.f32.mxu1 %vm14255_vm1, %v14256_v6 }
 0x495   :  { %v7474_v54 = vsel %vm7439_vm14, %v7426_v29, %v10862_v5  ;;  %v5457_v15 = vpop.f32.mrb[238].mxu1  ;;  %vm10100_vm14 = vcmask 58368  }
 0x496   :  { %v14230_v35 = vpop.eup %14229  ;;  %v5487_v38 = vadd.f32 %v5457_v15, %v17576_v13  ;;  %v12641_v22 = vpop.f32.mrb[239].mxu1  ;;  %13030 = vmatmul.mubr.msk.f32.gmra.mrb[88].mxu1 %vm418_vm5, %v7474_v54 }
 0x497   :  { %v10863_v40 = vadd.f32 -1.0, %v14230_v35  ;;  %13032 = vmatprep.mubr.msk.f32.mxu1 %vm14255_vm1, %v14256_v6 }
 0x499   :  { %v7475_v16 = vsel %vm7440_vm15, %v7431_v53, %v10863_v40  ;;  %v5462_v21 = vpop.f32.mrb[240].mxu1  ;;  %v10881_v40 = vld [vmem:[%s18287_s6 + $0x20] sm:$0xff] }
 0x49a   :  { %v5488_v47 = vadd.f32 %v5462_v21, %v17588_v55  ;;  %v12644_v42 = vpop.f32.mrb[241].mxu1  ;;  %13033 = vmatmul.mubr.msk.f32.gmra.mrb[90].mxu1 %vm418_vm5, %v7475_v16  ;;  %v10882_v16 = vld [vmem:[%s18287_s6 + $0x28] sm:$0xff] }
 0x49b   :  { %13054 = vmatprep.mubr.msk.f32.mxu1 %vm14255_vm1, %v14256_v6  ;;  %v13660_v21 = vpack.c.bf16 %v10882_v16, %v10881_v40  ;;  %v7665_v42 = vld [vmem:[%s18287_s6 + $0x10] sm:$0xff] }
 0x49d   :  { %v5467_v45 = vpop.f32.mrb[242].mxu1  ;;  %13661 = vmatpush3.bf16.msra.mxu0 %v13660_v21 }
 0x49e   :  { %v5489_v13 = vadd.f32 %v5467_v45, %v17597_v49  ;;  %v12647_v24 = vpop.f32.mrb[243].mxu1  ;;  %v7666_v45 = vld [vmem:[%s18287_s6 + $0x18] sm:$0xff]  ;;  %13662 = vmatprep.subr.bf16.mxu0 %v14254_v0 }
 0x4a1   :  { %v5472_v62 = vpop.f32.mrb[244].mxu1 }
 0x4a2   :  { %v5490_v39 = vadd.f32 %v5472_v62, %v5188_v57  ;;  %v12650_v17 = vpop.f32.mrb[245].mxu1  ;;  %v13669_v62 = vpack.c.bf16 %v7666_v45, %v7665_v42 }
 0x4a3   :  { %v10884_v17 = vld [vmem:[%s18287_s6 + $0x38] sm:$0xff] }
 0x4a5   :  { %v5477_v31 = vpop.f32.mrb[246].mxu1 }
 0x4a6   :  { %v5491_v61 = vadd.f32 %v5477_v31, %v5189_v37  ;;  %v12653_v9 = vpop.f32.mrb[247].mxu1 }
 0x4a9   :  { %v5482_v11 = vpop.f32.mrb[248].mxu1 }
 0x4aa   :  { %v5492_v43 = vadd.f32 %v5482_v11, %v5190_v20  ;;  %v12656_v23 = vpop.f32.mrb[249].mxu1  ;;  %v7664_v20 = vld [vmem:[%s18287_s6 + $0x8] sm:$0xff] }
 0x4ab   :  { %v13666_v34 = vpack.c.bf16 %v7664_v20, %v7663_v3 }
 0x4ad   :  { %v5754_v55 = vpop.f32.mrb[250].mxu1  ;;  %13667 = vmatpush3.bf16.msra.mxu1 %v13666_v34 }
 0x4ae   :  { %v5788_v33 = vadd.f32 %v5754_v55, %v5486_v25  ;;  %v12692_v58 = vpop.f32.mrb[251].mxu1  ;;  %13668 = vmatprep.subr.bf16.mxu1 %v14254_v0 }
 0x4b1   :  { %v5759_v48 = vpop.f32.mrb[252].mxu1  ;;  %13670 = vmatpush3.bf16.msra.mxu1 %v13669_v62 }
 0x4b2   :  { %v5789_v29 = vadd.f32 %v5759_v48, %v5487_v38  ;;  %v12695_v2 = vpop.f32.mrb[253].mxu1  ;;  %13677 = vmatprep.subr.bf16.mxu1 %v14254_v0 }
 0x4b5   :  { %v5764_v59 = vpop.f32.mrb[254].mxu1 }
 0x4b6   :  { %v5790_v52 = vadd.f32 %v5764_v59, %v5488_v47  ;;  %v12698_v30 = vpop.f32.mrb[255].mxu1 }
 0x4b9   :  { %v5769_v49 = vpop.f32.mrb[0].mxu1 }
 0x4ba   :  { %v5791_v32 = vadd.f32 %v5769_v49, %v5489_v13  ;;  %v12701_v14 = vpop.f32.mrb[1].mxu1 }
 0x4bd   :  { %v5774_v10 = vpop.f32.mrb[2].mxu1 }
 0x4be   :  { %v5792_v8 = vadd.f32 %v5774_v10, %v5490_v39  ;;  %v12704_v50 = vpop.f32.mrb[3].mxu1  ;;  %v10883_v39 = vld [vmem:[%s18287_s6 + $0x30] sm:$0xff] }
 0x4c1   :  { %v5779_v57 = vpop.f32.mrb[4].mxu1 }
 0x4c2   :  { %v5793_v53 = vadd.f32 %v5779_v57, %v5491_v61  ;;  %v12707_v63 = vpop.f32.mrb[5].mxu1  ;;  %v13663_v61 = vpack.c.bf16 %v10884_v17, %v10883_v39 }
 0x4c4   :  { %13664 = vmatpush3.bf16.msra.mxu0 %v13663_v61 }
 0x4c5   :  { %v5784_v44 = vpop.f32.mrb[6].mxu1  ;;  %13671 = vmatprep.subr.bf16.mxu0 %v14254_v0 }
 0x4c6   :  { %v5794_v4 = vadd.f32 %v5784_v44, %v5492_v43  ;;  %v12710_v18 = vpop.f32.mrb[7].mxu1 }
 0x4c9   :  { %v6056_v60 = vpop.f32.mrb[8].mxu1 }
 0x4ca   :  { %v6090_v1 = vadd.f32 %v6056_v60, %v5788_v33  ;;  %v12746_v19 = vpop.f32.mrb[9].mxu1 }
 0x4cd   :  { %v6061_v12 = vpop.f32.mrb[10].mxu1 }
 0x4ce   :  { %v6091_v37 = vadd.f32 %v6061_v12, %v5789_v29  ;;  %v12749_v36 = vpop.f32.mrb[11].mxu1 }
 0x4d1   :  { %v6066_v28 = vpop.f32.mrb[12].mxu1 }
 0x4d2   :  { %v6092_v56 = vadd.f32 %v6066_v28, %v5790_v52  ;;  %v12752_v46 = vpop.f32.mrb[13].mxu1 }
 0x4d5   :  { %v6071_v51 = vpop.f32.mrb[14].mxu1 }
 0x4d6   :  { %v6093_v26 = vadd.f32 %v6071_v51, %v5791_v32  ;;  %v12755_v41 = vpop.f32.mrb[15].mxu1 }
 0x4d9   :  { %v6076_v27 = vpop.f32.mrb[16].mxu1 }
 0x4da   :  { %v6094_v25 = vadd.f32 %v6076_v27, %v5792_v8  ;;  %v12758_v7 = vpop.f32.mrb[17].mxu1 }
 0x4dd   :  { %v6081_v5 = vpop.f32.mrb[18].mxu1 }
 0x4de   :  { %v6095_v54 = vadd.f32 %v6081_v5, %v5793_v53  ;;  %v12761_v15 = vpop.f32.mrb[19].mxu1 }
 0x4e1   :  { %v6086_v35 = vpop.f32.mrb[20].mxu1 }
 0x4e2   :  { %v6096_v38 = vadd.f32 %v6086_v35, %v5794_v4  ;;  %v12764_v22 = vpop.f32.mrb[21].mxu1 }
 0x4e5   :  { %v6358_v47 = vpop.f32.mrb[22].mxu1 }
 0x4e6   :  { %v6392_v13 = vadd.f32 %v6358_v47, %v6090_v1  ;;  %v12800_v24 = vpop.f32.mrb[23].mxu1 }
 0x4e9   :  { %v6363_v31 = vpop.f32.mrb[24].mxu1 }
 0x4ea   :  { %v6393_v9 = vadd.f32 %v6363_v31, %v6091_v37  ;;  %v12803_v11 = vpop.f32.mrb[25].mxu1 }
 0x4ed   :  { %v6368_v43 = vpop.f32.mrb[26].mxu1 }
 0x4ee   :  { %v6394_v23 = vadd.f32 %v6368_v43, %v6092_v56  ;;  %v12806_v55 = vpop.f32.mrb[27].mxu1 }
 0x4f1   :  { %v6373_v33 = vpop.f32.mrb[28].mxu1 }
 0x4f2   :  { %v6395_v58 = vadd.f32 %v6373_v33, %v6093_v26  ;;  %v12809_v48 = vpop.f32.mrb[29].mxu1 }
 0x4f5   :  { %v6378_v29 = vpop.f32.mrb[30].mxu1 }
 0x4f6   :  { %v6396_v2 = vadd.f32 %v6378_v29, %v6094_v25  ;;  %v12812_v59 = vpop.f32.mrb[31].mxu1 }
 0x4f9   :  { %v6383_v52 = vpop.f32.mrb[32].mxu1 }
 0x4fa   :  { %v6397_v30 = vadd.f32 %v6383_v52, %v6095_v54  ;;  %v12815_v49 = vpop.f32.mrb[33].mxu1 }
 0x4fd   :  { %v6388_v32 = vpop.f32.mrb[34].mxu1 }
 0x4fe   :  { %v6398_v14 = vadd.f32 %v6388_v32, %v6096_v38  ;;  %v12818_v10 = vpop.f32.mrb[35].mxu1 }
 0x501   :  { %v6660_v8 = vpop.f32.mrb[36].mxu1 }
 0x502   :  { %v6694_v50 = vadd.f32 %v6660_v8, %v6392_v13  ;;  %v12854_v57 = vpop.f32.mrb[37].mxu1 }
 0x503   :  { %v17666_v57 = vld [vmem:[%s18288_s5] ss:$0 sm:$0xff] }
 0x505   :  { %v6665_v53 = vpop.f32.mrb[38].mxu1 }
 0x506   :  { %v6695_v63 = vadd.f32 %v6665_v53, %v6393_v9  ;;  %v12857_v44 = vpop.f32.mrb[39].mxu1 }
 0x509   :  { %v6670_v4 = vpop.f32.mrb[40].mxu1 }
 0x50a   :  { %v6696_v18 = vadd.f32 %v6670_v4, %v6394_v23  ;;  %v12860_v60 = vpop.f32.mrb[41].mxu1 }
 0x50d   :  { %v6675_v1 = vpop.f32.mrb[42].mxu1 }
 0x50e   :  { %v6697_v19 = vadd.f32 %v6675_v1, %v6395_v58  ;;  %v12863_v12 = vpop.f32.mrb[43].mxu1 }
 0x511   :  { %v6680_v37 = vpop.f32.mrb[44].mxu1 }
 0x512   :  { %v6698_v36 = vadd.f32 %v6680_v37, %v6396_v2  ;;  %v12866_v28 = vpop.f32.mrb[45].mxu1 }
 0x515   :  { %v6685_v56 = vpop.f32.mrb[46].mxu1 }
 0x516   :  { %v6699_v46 = vadd.f32 %v6685_v56, %v6397_v30  ;;  %v12869_v3 = vpop.f32.mrb[47].mxu1 }
 0x519   :  { %v6690_v20 = vpop.f32.mrb[48].mxu1 }
 0x51a   :  { %v6700_v34 = vadd.f32 %v6690_v20, %v6398_v14  ;;  %v12872_v51 = vpop.f32.mrb[49].mxu1 }
 0x51d   :  { %v6962_v26 = vpop.f32.mrb[50].mxu1 }
 0x51e   :  { %v6996_v41 = vadd.f32 %v6962_v26, %v6694_v50  ;;  %v12908_v27 = vpop.f32.mrb[51].mxu1 }
 0x51f   :  { %v10892_v27 = vld [vmem:[%s18287_s6 + $0x60] sm:$0xff] }
 0x521   :  { %v6967_v25 = vpop.f32.mrb[52].mxu1 }
 0x522   :  { %v6997_v7 = vadd.f32 %v6967_v25, %v6695_v63  ;;  %v12911_v5 = vpop.f32.mrb[53].mxu1  ;;  %v10893_v25 = vld [vmem:[%s18287_s6 + $0x68] sm:$0xff] }
 0x523   :  { %v10887_v5 = vld [vmem:[%s18287_s6 + $0x40] sm:$0xff] }
 0x525   :  { %v6972_v54 = vpop.f32.mrb[54].mxu1 }
 0x526   :  { %v6998_v15 = vadd.f32 %v6972_v54, %v6696_v18  ;;  %v12914_v35 = vpop.f32.mrb[55].mxu1  ;;  %v10888_v54 = vld [vmem:[%s18287_s6 + $0x48] sm:$0xff] }
 0x529   :  { %v6977_v38 = vpop.f32.mrb[56].mxu1 }
 0x52a   :  { %v6999_v22 = vadd.f32 %v6977_v38, %v6697_v19  ;;  %v12917_v40 = vpop.f32.mrb[57].mxu1  ;;  %v13678_v38 = vpack.c.bf16 %v10893_v25, %v10892_v27 }
 0x52d   :  { %v6982_v16 = vpop.f32.mrb[58].mxu1 }
 0x52e   :  { %v7000_v21 = vadd.f32 %v6982_v16, %v6698_v36  ;;  %v12920_v47 = vpop.f32.mrb[59].mxu1 }
 0x52f   :  { %v10895_v47 = vld [vmem:[%s18287_s6 + $0x78] sm:$0xff] }
 0x531   :  { %v6987_v42 = vpop.f32.mrb[60].mxu1 }
 0x532   :  { %v7001_v45 = vadd.f32 %v6987_v42, %v6699_v46  ;;  %v12923_v13 = vpop.f32.mrb[61].mxu1 }
 0x535   :  { %v6992_v24 = vpop.f32.mrb[62].mxu1 }
 0x536   :  { %v7002_v62 = vadd.f32 %v6992_v24, %v6700_v34  ;;  %v12926_v39 = vpop.f32.mrb[63].mxu1  ;;  %v10889_v24 = vld [vmem:[%s18287_s6 + $0x50] sm:$0xff] }
 0x539   :  { %v7264_v17 = vpop.f32.mrb[64].mxu1 }
 0x53a   :  { %v7298_v31 = vadd.f32 %v7264_v17, %v6996_v41  ;;  %v12962_v61 = vpop.f32.mrb[65].mxu1 }
 0x53d   :  { %v7269_v9 = vpop.f32.mrb[66].mxu1 }
 0x53e   :  { %v7299_v11 = vadd.f32 %v7269_v9, %v6997_v7  ;;  %v12965_v43 = vpop.f32.mrb[67].mxu1 }
 0x53f   :  { %v10903_v43 = vld [vmem:[%s18287_s6 + $0xa8] sm:$0xff] }
 0x541   :  { %v7274_v23 = vpop.f32.mrb[68].mxu1 }
 0x542   :  { %v7300_v55 = vadd.f32 %v7274_v23, %v6998_v15  ;;  %v12968_v33 = vpop.f32.mrb[69].mxu1 }
 0x545   :  { %v7279_v58 = vpop.f32.mrb[70].mxu1 }
 0x546   :  { %v7301_v48 = vadd.f32 %v7279_v58, %v6999_v22  ;;  %v12971_v29 = vpop.f32.mrb[71].mxu1 }
 0x547   :  { %v10898_v29 = vld [vmem:[%s18287_s6 + $0x88] sm:$0xff] }
 0x549   :  { %v7284_v2 = vpop.f32.mrb[72].mxu1 }
 0x54a   :  { %v7302_v59 = vadd.f32 %v7284_v2, %v7000_v21  ;;  %v12974_v52 = vpop.f32.mrb[73].mxu1  ;;  %v10894_v21 = vld [vmem:[%s18287_s6 + $0x70] sm:$0xff] }
 0x54d   :  { %v7289_v30 = vpop.f32.mrb[74].mxu1 }
 0x54e   :  { %v7303_v49 = vadd.f32 %v7289_v30, %v7001_v45  ;;  %v12977_v32 = vpop.f32.mrb[75].mxu1  ;;  %v13672_v45 = vpack.c.bf16 %v10888_v54, %v10887_v5  ;;  %v10904_v30 = vld [vmem:[%s18287_s6 + $0xb0] sm:$0xff]  ;;  %v10918_v5 = vld [vmem:[%s18287_s6 + $0x108] sm:$0xff] }
 0x551   :  { %v7294_v14 = vpop.f32.mrb[76].mxu1 }
 0x552   :  { %v7304_v10 = vadd.f32 %v7294_v14, %v7002_v62  ;;  %v12980_v8 = vpop.f32.mrb[77].mxu1  ;;  %v10890_v62 = vld [vmem:[%s18287_s6 + $0x58] sm:$0xff] }
 0x553   :  { %v10899_v8 = vld [vmem:[%s18287_s6 + $0x90] sm:$0xff] }
 0x555   :  { %v7566_v50 = vpop.f32.mrb[78].mxu1 }
 0x556   :  { %v7600_v53 = vadd.f32 %v7566_v50, %v7298_v31  ;;  %v13016_v63 = vpop.f32.mrb[79].mxu1  ;;  %v13681_v31 = vpack.c.bf16 %v10895_v47, %v10894_v21  ;;  %v10900_v50 = vld [vmem:[%s18287_s6 + $0x98] sm:$0xff] }
 0x557   :  { %v10912_v63 = vld [vmem:[%s18287_s6 + $0xe0] sm:$0xff] }
 0x558   :  { %v7614_v44 = vadd.f32 %v17666_v57, %v7600_v53 }
 0x559   :  { %v7571_v4 = vpop.f32.mrb[80].mxu1 }
 0x55a   :  { %v7628_v18 = vmin.f32 %v7614_v44, 0.0  ;;  %v7601_v60 = vadd.f32 %v7571_v4, %v7299_v11  ;;  %v13019_v1 = vpop.f32.mrb[81].mxu1  ;;  %vm7621_vm6 = vcmp.gt.f32.partialorder %v7614_v44, 0.0  ;;  %v10902_v11 = vld [vmem:[%s18287_s6 + $0xa0] sm:$0xff] }
 0x55b   :  { %v13690_v2 = vpack.c.bf16 %v10903_v43, %v10902_v11  ;;  %v10908_v1 = vld [vmem:[%s18287_s6 + $0xc8] sm:$0xff] }
 0x55c   :  { %v7635_v19 = vmul.f32 1.442695, %v7628_v18  ;;  %v17670_v12 = vadd.f32 %v17666_v57, %v7601_v60  ;;  %v13687_v18 = vpack.c.bf16 %v10900_v50, %v10899_v8  ;;  %v10907_v60 = vld [vmem:[%s18287_s6 + $0xc0] sm:$0xff]  ;;  %v10944_v50 = vld [vmem:[%s18287_s6 + $0x1b0] sm:$0xff] }
 0x55d   :  { %v7576_v37 = vpop.f32.mrb[82].mxu1 }
 0x55e   :  { %14231 = vpow2.f32 %v7635_v19  ;;  %v7629_v36 = vmin.f32 %v17670_v12, 0.0  ;;  %v7602_v28 = vadd.f32 %v7576_v37, %v7300_v55  ;;  %v13022_v56 = vpop.f32.mrb[83].mxu1  ;;  %v13675_v55 = vpack.c.bf16 %v10890_v62, %v10889_v24  ;;  %v10932_v24 = vld [vmem:[%s18287_s6 + $0x160] sm:$0xff]  ;;  %v10933_v62 = vld [vmem:[%s18287_s6 + $0x168] sm:$0xff] }
 0x55f   :  { %vm7622_vm7 = vcmp.gt.f32.partialorder %v17670_v12, 0.0  ;;  %v13696_v56 = vpack.c.bf16 %v10908_v1, %v10907_v60  ;;  %v13726_v11 = vpack.c.bf16 %v10933_v62, %v10932_v24  ;;  %v10940_v60 = vld [vmem:[%s18287_s6 + $0x198] sm:$0xff] }
 0x560   :  { %v7637_v3 = vmul.f32 1.442695, %v7629_v36  ;;  %v17690_v22 = vadd.f32 %v17666_v57, %v7602_v28  ;;  %v10914_v36 = vld [vmem:[%s18287_s6 + $0xf0] sm:$0xff]  ;;  %v10915_v28 = vld [vmem:[%s18287_s6 + $0xf8] sm:$0xff] }
 0x561   :  { %v7581_v46 = vpop.f32.mrb[84].mxu1 }
 0x562   :  { %v17673_v20 = vadd.f32 %v7581_v46, %v7301_v48  ;;  %v13025_v34 = vpop.f32.mrb[85].mxu1  ;;  %14233 = vpow2.f32 %v7637_v3  ;;  %v7630_v61 = vmin.f32 %v17690_v22, 0.0  ;;  %v10897_v48 = vld [vmem:[%s18287_s6 + $0x80] sm:$0xff]  ;;  %v10909_v46 = vld [vmem:[%s18287_s6 + $0xd0] sm:$0xff]  ;;  %v10910_v3 = vld [vmem:[%s18287_s6 + $0xd8] sm:$0xff]  ;;  %vm7623_vm8 = vcmp.gt.f32.partialorder %v17690_v22, 0.0 }
 0x563   :  { %v13684_v14 = vpack.c.bf16 %v10898_v29, %v10897_v48  ;;  %v13699_v27 = vpack.c.bf16 %v10910_v3, %v10909_v46  ;;  %v10948_v46 = vld [vmem:[%s18287_s6 + $0x1c8] sm:$0xff] }
 0x564   :  { %v7639_v52 = vmul.f32 1.442695, %v7630_v61  ;;  %v10927_v61 = vld [vmem:[%s18287_s6 + $0x140] sm:$0xff] }
 0x565   :  { %v7586_v51 = vpop.f32.mrb[86].mxu1 }
 0x566   :  { %v17675_v26 = vadd.f32 %v7586_v51, %v7302_v59  ;;  %v13028_v41 = vpop.f32.mrb[87].mxu1  ;;  %14235 = vpow2.f32 %v7639_v52  ;;  %v10922_v51 = vld [vmem:[%s18287_s6 + $0x120] sm:$0xff] }
 0x567   :  { %v10923_v41 = vld [vmem:[%s18287_s6 + $0x128] sm:$0xff] }
 0x568   :  { %v14232_v7 = vpop.eup %14231  ;;  %v13714_v54 = vpack.c.bf16 %v10923_v41, %v10922_v51  ;;  %v10949_v41 = vld [vmem:[%s18287_s6 + $0x1d0] sm:$0xff] }
 0x569   :  { %v10874_v15 = vadd.f32 -1.0, %v14232_v7  ;;  %v7591_v35 = vpop.f32.mrb[88].mxu1  ;;  %v10917_v7 = vld [vmem:[%s18287_s6 + $0x100] sm:$0xff] }
 0x56a   :  { %v7605_v40 = vadd.f32 %v7591_v35, %v7303_v49  ;;  %v13031_v16 = vpop.f32.mrb[89].mxu1  ;;  %v10905_v49 = vld [vmem:[%s18287_s6 + $0xb8] sm:$0xff]  ;;  %v13708_v21 = vpack.c.bf16 %v10918_v5, %v10917_v7  ;;  %v10962_v5 = vld [vmem:[%s18287_s6 + $0x220] sm:$0xff] }
 0x56b   :  { %v7656_v42 = vsel %vm7621_vm6, %v7614_v44, %v10874_v15  ;;  %v13693_v53 = vpack.c.bf16 %v10905_v49, %v10904_v30  ;;  %v10913_v44 = vld [vmem:[%s18287_s6 + $0xe8] sm:$0xff]  ;;  %v10937_v49 = vld [vmem:[%s18287_s6 + $0x180] sm:$0xff] }
 0x56c   :  { %v7673_v13 = vrot.slane %v7656_v42, 2  ;;  %13055 = vmatmul.mubr.msk.f32.vlgmr.msra.gmra.mrb[92].mxu1 %vm7674_vm0, %v7656_v42  ;;  %v17706_v39 = vadd.f32 %v17666_v57, %v7605_v40  ;;  %v14234_v33 = vpop.eup %14233  ;;  %v7903_v59 = vrot.slane %v7656_v42, 6  ;;  %v13702_v19 = vpack.c.bf16 %v10913_v44, %v10912_v63  ;;  %v10925_v40 = vld [vmem:[%s18287_s6 + $0x138] sm:$0xff] }
 0x56d   :  { %13679 = vmatpush3.bf16.msra.mxu1 %v13678_v38  ;;  %v7596_v17 = vpop.f32.mrb[90].mxu1  ;;  %13076 = vmatprep.mubr.msk.f32.mxu1 %vm14255_vm1, %v14256_v6  ;;  %v10875_v32 = vadd.f32 -1.0, %v14234_v33  ;;  %v10924_v38 = vld [vmem:[%s18287_s6 + $0x130] sm:$0xff] }
 0x56e   :  { %v7606_v9 = vadd.f32 %v7596_v17, %v7304_v10  ;;  %13044 = vmatmul.mubr.msk.f32.vlgmr.msra.gmra.mrb[96].mxu0 %vm7674_vm0, %v7673_v13  ;;  %13680 = vmatprep.subr.bf16.mxu1 %v14254_v0  ;;  %v13034_v23 = vpop.f32.mrb[91].mxu1  ;;  %v7824_v10 = vrot.slane %v7656_v42, 4  ;;  %v10919_v42 = vld [vmem:[%s18287_s6 + $0x110] sm:$0xff]  ;;  %v13717_v13 = vpack.c.bf16 %v10925_v40, %v10924_v38  ;;  %v7633_v7 = vmin.f32 %v17706_v39, 0.0  ;;  %v10957_v38 = vld [vmem:[%s18287_s6 + $0x200] sm:$0xff]  ;;  %v10958_v40 = vld [vmem:[%s18287_s6 + $0x208] sm:$0xff] }
 0x56f   :  { %13673 = vmatpush3.bf16.msra.mxu0 %v13672_v45  ;;  %13065 = vmatprep.mubr.msk.f32.mxu0 %vm14255_vm1, %v14256_v6  ;;  %v7657_v4 = vsel %vm7622_vm7, %v17670_v12, %v10875_v32  ;;  %v17769_v12 = vadd.f32 %v17666_v57, %v17673_v20  ;;  %v13705_v20 = vpack.c.bf16 %v10915_v28, %v10914_v36  ;;  %v10920_v45 = vld [vmem:[%s18287_s6 + $0x118] sm:$0xff]  ;;  %v10934_v23 = vld [vmem:[%s18287_s6 + $0x170] sm:$0xff]  ;;  %v10938_v32 = vld [vmem:[%s18287_s6 + $0x188] sm:$0xff]  ;;  %vm7626_vm11 = vcmp.gt.f32.partialorder %v17706_v39, 0.0 }
 0x570   :  { %v17722_v58 = vadd.f32 %v17666_v57, %v7606_v9  ;;  %13674 = vmatprep.subr.bf16.mxu0 %v14254_v0  ;;  %v8061_v37 = vrot.slane %v7657_v4, 2  ;;  %v14236_v25 = vpop.eup %14235  ;;  %v8219_v15 = vrot.slane %v7657_v4, 6  ;;  %v8140_v47 = vrot.slane %v7657_v4, 4  ;;  %v10928_v9 = vld [vmem:[%s18287_s6 + $0x148] sm:$0xff] }
 0x571   :  { %13682 = vmatpush3.bf16.msra.mxu1 %v13681_v31  ;;  %v7631_v34 = vmin.f32 %v17769_v12, 0.0  ;;  %v10876_v16 = vadd.f32 -1.0, %v14236_v25  ;;  %v13711_v31 = vpack.c.bf16 %v10920_v45, %v10919_v42  ;;  %v13720_v33 = vpack.c.bf16 %v10928_v9, %v10927_v61  ;;  %v10964_v42 = vld [vmem:[%s18287_s6 + $0x230] sm:$0xff]  ;;  %v10965_v45 = vld [vmem:[%s18287_s6 + $0x238] sm:$0xff]  ;;  %v10972_v9 = vld [vmem:[%s18287_s6 + $0x260] sm:$0xff] }
 0x572   :  { %13689 = vmatprep.subr.bf16.mxu1 %v14254_v0  ;;  %v13732_v44 = vpack.c.bf16 %v10938_v32, %v10937_v49  ;;  %vm7624_vm9 = vcmp.gt.f32.partialorder %v17769_v12, 0.0  ;;  %v13756_v24 = vpack.c.bf16 %v10958_v40, %v10957_v38  ;;  %v13765_v61 = vpack.c.bf16 %v10965_v45, %v10964_v42  ;;  %v10983_v49 = vld [vmem:[%s18287_s6 + $0x2a8] sm:$0xff]  ;;  %v10997_v40 = vld [vmem:[%s18287_s6 + $0x300] sm:$0xff]  ;;  %v9653_v42 = vld [vmem:[%s18289_s8 + $0x10] sm:$0xff] }
 0x573   :  { %13676 = vmatpush3.bf16.msra.mxu0 %v13675_v55  ;;  %v7641_v35 = vmul.f32 1.442695, %v7631_v34  ;;  %v7658_v17 = vsel %vm7623_vm8, %v17690_v22, %v10876_v16  ;;  %v17844_v22 = vadd.f32 %v17666_v57, %v17675_v26  ;;  %v10935_v55 = vld [vmem:[%s18287_s6 + $0x178] sm:$0xff]  ;;  %v10929_v57 = vld [vmem:[%s18287_s6 + $0x150] sm:$0xff]  ;;  %vm7627_vm13 = vcmp.gt.f32.partialorder %v17722_v58, 0.0 }
 0x574   :  { %13077 = vmatmul.mubr.msk.f32.vlgmr.msra.gmra.mrb[94].mxu1 %vm7674_vm0, %v7903_v59  ;;  %13683 = vmatprep.subr.bf16.mxu0 %v14254_v0  ;;  %v8377_v43 = vrot.slane %v7658_v17, 2  ;;  %v10930_v26 = vld [vmem:[%s18287_s6 + $0x158] sm:$0xff]  ;;  %v13729_v48 = vpack.c.bf16 %v10935_v55, %v10934_v23  ;;  %v10943_v59 = vld [vmem:[%s18287_s6 + $0x1a8] sm:$0xff]  ;;  %v10967_v55 = vld [vmem:[%s18287_s6 + $0x240] sm:$0xff] }
 0x575   :  { %13691 = vmatpush3.bf16.msra.mxu1 %v13690_v2  ;;  %13098 = vmatprep.mubr.msk.f32.mxu1 %vm14255_vm1, %v14256_v6  ;;  %14237 = vpow2.f32 %v7641_v35  ;;  %v7632_v29 = vmin.f32 %v17844_v22, 0.0  ;;  %v10942_v2 = vld [vmem:[%s18287_s6 + $0x1a0] sm:$0xff]  ;;  %v13723_v52 = vpack.c.bf16 %v10930_v26, %v10929_v57  ;;  %v10955_v34 = vld [vmem:[%s18287_s6 + $0x1f8] sm:$0xff]  ;;  %vm7625_vm10 = vcmp.gt.f32.partialorder %v17844_v22, 0.0 }
 0x576   :  { %13066 = vmatmul.mubr.msk.f32.vlgmr.msra.gmra.mrb[98].mxu0 %vm7674_vm0, %v7824_v10  ;;  %13692 = vmatprep.subr.bf16.mxu1 %v14254_v0  ;;  %v8535_v10 = vrot.slane %v7658_v17, 6  ;;  %v9654_v45 = vld [vmem:[%s18289_s8 + $0x18] sm:$0xf] }
 0x577   :  { %13685 = vmatpush3.bf16.msra.mxu0 %v13684_v14  ;;  %13087 = vmatprep.mubr.msk.f32.mxu0 %vm14255_vm1, %v14256_v6  ;;  %v13738_v14 = vpack.c.bf16 %v10943_v59, %v10942_v2  ;;  %v7643_v8 = vmul.f32 1.442695, %v7632_v29  ;;  %v10969_v2 = vld [vmem:[%s18287_s6 + $0x250] sm:$0xff]  ;;  %v10970_v59 = vld [vmem:[%s18287_s6 + $0x258] sm:$0xff] }
 0x578   :  { %13686 = vmatprep.subr.bf16.mxu0 %v14254_v0  ;;  %v13771_v32 = vpack.c.bf16 %v10970_v59, %v10969_v2  ;;  %v9747_v59 = vld [vmem:[%s18291_s10 + $0x30] sm:$0xff] }
 0x579   :  { %13694 = vmatpush3.bf16.msra.mxu1 %v13693_v53  ;;  %v10945_v53 = vld [vmem:[%s18287_s6 + $0x1b8] sm:$0xff]  ;;  %14239 = vpow2.f32 %v7643_v8  ;;  %v10978_v8 = vld [vmem:[%s18287_s6 + $0x288] sm:$0xff] }
 0x57a   :  { %13701 = vmatprep.subr.bf16.mxu1 %v14254_v0  ;;  %v13741_v1 = vpack.c.bf16 %v10945_v53, %v10944_v50 }
 0x57b   :  { %13688 = vmatpush3.bf16.msra.mxu0 %v13687_v18  ;;  %v10939_v18 = vld [vmem:[%s18287_s6 + $0x190] sm:$0xff] }
 0x57c   :  { %13099 = vmatmul.mubr.msk.f32.vlgmr.msra.gmra.mrb[96].mxu1 %vm7674_vm0, %v8061_v37  ;;  %13695 = vmatprep.subr.bf16.mxu0 %v14254_v0  ;;  %v10953_v37 = vld [vmem:[%s18287_s6 + $0x1e8] sm:$0xff]  ;;  %v13735_v28 = vpack.c.bf16 %v10940_v60, %v10939_v18 }
 0x57d   :  { %13703 = vmatpush3.bf16.msra.mxu1 %v13702_v19  ;;  %13120 = vmatprep.mubr.msk.f32.mxu1 %vm14255_vm1, %v14256_v6  ;;  %v10952_v19 = vld [vmem:[%s18287_s6 + $0x1e0] sm:$0xff] }
 0x57e   :  { %13088 = vmatmul.mubr.msk.f32.vlgmr.msra.gmra.mrb[100].mxu0 %vm7674_vm0, %v7657_v4  ;;  %13704 = vmatprep.subr.bf16.mxu1 %v14254_v0  ;;  %v8456_v4 = vrot.slane %v7658_v17, 4  ;;  %v13750_v3 = vpack.c.bf16 %v10953_v37, %v10952_v19  ;;  %v10979_v19 = vld [vmem:[%s18287_s6 + $0x290] sm:$0xff]  ;;  %v10980_v37 = vld [vmem:[%s18287_s6 + $0x298] sm:$0xff] }
 0x57f   :  { %13697 = vmatpush3.bf16.msra.mxu0 %v13696_v56  ;;  %13109 = vmatprep.mubr.msk.f32.mxu0 %vm14255_vm1, %v14256_v6  ;;  %v14238_v30 = vpop.eup %14237  ;;  %v10947_v56 = vld [vmem:[%s18287_s6 + $0x1c0] sm:$0xff] }
 0x580   :  { %13698 = vmatprep.subr.bf16.mxu0 %v14254_v0  ;;  %v10877_v63 = vadd.f32 -1.0, %v14238_v30  ;;  %v13744_v51 = vpack.c.bf16 %v10948_v46, %v10947_v56  ;;  %v10982_v30 = vld [vmem:[%s18287_s6 + $0x2a0] sm:$0xff]  ;;  %v10993_v56 = vld [vmem:[%s18287_s6 + $0x2e8] sm:$0xff] }
 0x581   :  { %13706 = vmatpush3.bf16.msra.mxu1 %v13705_v20  ;;  %v13786_v50 = vpack.c.bf16 %v10983_v49, %v10982_v30  ;;  %v9749_v49 = vld [vmem:[%s18291_s10 + $0x40] sm:$0xff] }
 0x582   :  { %13713 = vmatprep.subr.bf16.mxu1 %v14254_v0  ;;  %v7659_v36 = vsel %vm7624_vm9, %v17769_v12, %v10877_v63  ;;  %v10954_v12 = vld [vmem:[%s18287_s6 + $0x1f0] sm:$0xff] }
 0x583   :  { %13700 = vmatpush3.bf16.msra.mxu0 %v13699_v27  ;;  %v8693_v20 = vrot.slane %v7659_v36, 2  ;;  %v10950_v27 = vld [vmem:[%s18287_s6 + $0x1d8] sm:$0xff]  ;;  %v13753_v25 = vpack.c.bf16 %v10955_v34, %v10954_v12  ;;  %v14240_v35 = vpop.eup %14239  ;;  %v8772_v62 = vrot.slane %v7659_v36, 4  ;;  %v10984_v63 = vld [vmem:[%s18287_s6 + $0x2b0] sm:$0xff]  ;;  %v10987_v12 = vld [vmem:[%s18287_s6 + $0x2c0] sm:$0xff] }
 0x584   :  { %13121 = vmatmul.mubr.msk.f32.vlgmr.msra.gmra.mrb[98].mxu1 %vm7674_vm0, %v8219_v15  ;;  %13707 = vmatprep.subr.bf16.mxu0 %v14254_v0  ;;  %v13747_v15 = vpack.c.bf16 %v10950_v27, %v10949_v41  ;;  %v10988_v34 = vld [vmem:[%s18287_s6 + $0x2c8] sm:$0xff]  ;;  %v10995_v27 = vld [vmem:[%s18287_s6 + $0x2f8] sm:$0xff] }
 0x585   :  { %13715 = vmatpush3.bf16.msra.mxu1 %v13714_v54  ;;  %13142 = vmatprep.mubr.msk.f32.mxu1 %vm14255_vm1, %v14256_v6  ;;  %v10963_v54 = vld [vmem:[%s18287_s6 + $0x228] sm:$0xff] }
 0x586   :  { %13110 = vmatmul.mubr.msk.f32.vlgmr.msra.gmra.mrb[102].mxu0 %vm7674_vm0, %v8140_v47  ;;  %13716 = vmatprep.subr.bf16.mxu1 %v14254_v0  ;;  %v13762_v16 = vpack.c.bf16 %v10963_v54, %v10962_v5  ;;  %v7645_v47 = vmul.f32 1.442695, %v7633_v7  ;;  %v10989_v7 = vld [vmem:[%s18287_s6 + $0x2d0] sm:$0xff]  ;;  %v10990_v5 = vld [vmem:[%s18287_s6 + $0x2d8] sm:$0xff] }
 0x587   :  { %13709 = vmatpush3.bf16.msra.mxu0 %v13708_v21  ;;  %13131 = vmatprep.mubr.msk.f32.mxu0 %vm14255_vm1, %v14256_v6  ;;  %v8851_v21 = vrot.slane %v7659_v36, 6  ;;  %v13795_v38 = vpack.c.bf16 %v10990_v5, %v10989_v7 }
 0x588   :  { %13710 = vmatprep.subr.bf16.mxu0 %v14254_v0  ;;  %14241 = vpow2.f32 %v7645_v47 }
 0x589   :  { %13718 = vmatpush3.bf16.msra.mxu1 %v13717_v13  ;;  %v10878_v13 = vadd.f32 -1.0, %v14240_v35  ;;  %v9652_v35 = vld [vmem:[%s18289_s8 + $0x8] sm:$0xff] }
 0x58a   :  { %13725 = vmatprep.subr.bf16.mxu1 %v14254_v0 }
 0x58b   :  { %13712 = vmatpush3.bf16.msra.mxu0 %v13711_v31  ;;  %v10960_v31 = vld [vmem:[%s18287_s6 + $0x218] sm:$0xff] }
 0x58c   :  { %13143 = vmatmul.mubr.msk.f32.vlgmr.msra.gmra.mrb[100].mxu1 %vm7674_vm0, %v8377_v43  ;;  %13719 = vmatprep.subr.bf16.mxu0 %v14254_v0  ;;  %v7660_v43 = vsel %vm7625_vm10, %v17844_v22, %v10878_v13  ;;  %v10974_v22 = vld [vmem:[%s18287_s6 + $0x270] sm:$0xff] }
 0x58d   :  { %13727 = vmatpush3.bf16.msra.mxu1 %v13726_v11  ;;  %13164 = vmatprep.mubr.msk.f32.mxu1 %vm14255_vm1, %v14256_v6  ;;  %v10973_v11 = vld [vmem:[%s18287_s6 + $0x268] sm:$0xff]  ;;  %v9009_v26 = vrot.slane %v7660_v43, 2  ;;  %v9167_v53 = vrot.slane %v7660_v43, 6  ;;  %v9088_v60 = vrot.slane %v7660_v43, 4 }
 0x58e   :  { %13132 = vmatmul.mubr.msk.f32.vlgmr.msra.gmra.mrb[104].mxu0 %vm7674_vm0, %v7658_v17  ;;  %13728 = vmatprep.subr.bf16.mxu1 %v14254_v0  ;;  %v10959_v17 = vld [vmem:[%s18287_s6 + $0x210] sm:$0xff]  ;;  %v13774_v57 = vpack.c.bf16 %v10973_v11, %v10972_v9 }
 0x58f   :  { %13721 = vmatpush3.bf16.msra.mxu0 %v13720_v33  ;;  %13153 = vmatprep.mubr.msk.f32.mxu0 %vm14255_vm1, %v14256_v6  ;;  %v13759_v23 = vpack.c.bf16 %v10960_v31, %v10959_v17  ;;  %v10968_v33 = vld [vmem:[%s18287_s6 + $0x248] sm:$0xff]  ;;  %v11000_v17 = vld [vmem:[%s18287_s6 + $0x318] sm:$0xff]  ;;  %v13813_v31 = vpack.c.bf16 %v9654_v45, %v9653_v42 }
 0x590   :  { %13722 = vmatprep.subr.bf16.mxu0 %v14254_v0  ;;  %v13768_v29 = vpack.c.bf16 %v10968_v33, %v10967_v55  ;;  %v9741_v55 = vld [vmem:[%s18291_s10] sm:$0xff]  ;;  %v9742_v33 = vld [vmem:[%s18291_s10 + $0x8] sm:$0xff] }
 0x591   :  { %13730 = vmatpush3.bf16.msra.mxu1 %v13729_v48  ;;  %v10975_v48 = vld [vmem:[%s18287_s6 + $0x278] sm:$0xff] }
 0x592   :  { %13737 = vmatprep.subr.bf16.mxu1 %v14254_v0 }
 0x593   :  { %13724 = vmatpush3.bf16.msra.mxu0 %v13723_v52  ;;  %v13777_v52 = vpack.c.bf16 %v10975_v48, %v10974_v22  ;;  %v9745_v48 = vld [vmem:[%s18291_s10 + $0x20] sm:$0xff] }
 0x594   :  { %13165 = vmatmul.mubr.msk.f32.vlgmr.msra.gmra.mrb[102].mxu1 %vm7674_vm0, %v8535_v10  ;;  %13731 = vmatprep.subr.bf16.mxu0 %v14254_v0  ;;  %v10977_v10 = vld [vmem:[%s18287_s6 + $0x280] sm:$0xff] }
 0x595   :  { %13739 = vmatpush3.bf16.msra.mxu1 %v13738_v14  ;;  %13186 = vmatprep.mubr.msk.f32.mxu1 %vm14255_vm1, %v14256_v6  ;;  %v14242_v14 = vpop.eup %14241  ;;  %v13780_v18 = vpack.c.bf16 %v10978_v8, %v10977_v10  ;;  %v9751_v10 = vld [vmem:[%s18291_s10 + $0x50] sm:$0xff]  ;;  %v9752_v8 = vld [vmem:[%s18291_s10 + $0x58] sm:$0xff] }
 0x596   :  { %13154 = vmatmul.mubr.msk.f32.vlgmr.msra.gmra.mrb[106].mxu0 %vm7674_vm0, %v8456_v4  ;;  %13740 = vmatprep.subr.bf16.mxu1 %v14254_v0  ;;  %v10879_v4 = vadd.f32 -1.0, %v14242_v14 }
 0x597   :  { %13733 = vmatpush3.bf16.msra.mxu0 %v13732_v44  ;;  %13175 = vmatprep.mubr.msk.f32.mxu0 %vm14255_vm1, %v14256_v6  ;;  %v10985_v44 = vld [vmem:[%s18287_s6 + $0x2b8] sm:$0xff] }
 0x598   :  { %13734 = vmatprep.subr.bf16.mxu0 %v14254_v0  ;;  %v7661_v46 = vsel %vm7626_vm11, %v17706_v39, %v10879_v4  ;;  %v10994_v39 = vld [vmem:[%s18287_s6 + $0x2f0] sm:$0xff] }
 0x599   :  { %13742 = vmatpush3.bf16.msra.mxu1 %v13741_v1  ;;  %v7634_v1 = vmin.f32 %v17722_v58, 0.0  ;;  %v9325_v41 = vrot.slane %v7661_v46, 2  ;;  %v13801_v54 = vpack.c.bf16 %v10995_v27, %v10994_v39  ;;  %v9483_v47 = vrot.slane %v7661_v46, 6  ;;  %v9755_v4 = vld [vmem:[%s18291_s10 + $0x70] sm:$0xff] }
 0x59a   :  { %13749 = vmatprep.subr.bf16.mxu1 %v14254_v0 }
 0x59b   :  { %13736 = vmatpush3.bf16.msra.mxu0 %v13735_v28  ;;  %v10992_v28 = vld [vmem:[%s18287_s6 + $0x2e0] sm:$0xff] }
 0x59c   :  { %13187 = vmatmul.mubr.msk.f32.vlgmr.msra.gmra.mrb[104].mxu1 %vm7674_vm0, %v8693_v20  ;;  %13743 = vmatprep.subr.bf16.mxu0 %v14254_v0  ;;  %v7647_v20 = vmul.f32 1.442695, %v7634_v1 }
 0x59d   :  { %13751 = vmatpush3.bf16.msra.mxu1 %v13750_v3  ;;  %13208 = vmatprep.mubr.msk.f32.mxu1 %vm14255_vm1, %v14256_v6  ;;  %v13783_v3 = vpack.c.bf16 %v10980_v37, %v10979_v19 }
 0x59e   :  { %13176 = vmatmul.mubr.msk.f32.vlgmr.msra.gmra.mrb[108].mxu0 %vm7674_vm0, %v7659_v36  ;;  %13752 = vmatprep.subr.bf16.mxu1 %v14254_v0  ;;  %v13789_v36 = vpack.c.bf16 %v10985_v44, %v10984_v63  ;;  %14243 = vpow2.f32 %v7647_v20  ;;  %v9754_v63 = vld [vmem:[%s18291_s10 + $0x68] sm:$0xff] }
 0x59f   :  { %13745 = vmatpush3.bf16.msra.mxu0 %v13744_v51  ;;  %13197 = vmatprep.mubr.msk.f32.mxu0 %vm14255_vm1, %v14256_v6  ;;  %v13798_v51 = vpack.c.bf16 %v10993_v56, %v10992_v28 }
 0x5a0   :  { %13746 = vmatprep.subr.bf16.mxu0 %v14254_v0 }
 0x5a1   :  { %13754 = vmatpush3.bf16.msra.mxu1 %v13753_v25  ;;  %v13792_v25 = vpack.c.bf16 %v10988_v34, %v10987_v12 }
 0x5a2   :  { %13761 = vmatprep.subr.bf16.mxu1 %v14254_v0 }
 0x5a3   :  { %13748 = vmatpush3.bf16.msra.mxu0 %v13747_v15  ;;  %v9651_v15 = vld [vmem:[%s18289_s8] sm:$0xff] }
 0x5a4   :  { %13209 = vmatmul.mubr.msk.f32.vlgmr.msra.gmra.mrb[106].mxu1 %vm7674_vm0, %v8851_v21  ;;  %13755 = vmatprep.subr.bf16.mxu0 %v14254_v0  ;;  %v13810_v21 = vpack.c.bf16 %v9652_v35, %v9651_v15 }
 0x5a5   :  { %13763 = vmatpush3.bf16.msra.mxu1 %v13762_v16  ;;  %13230 = vmatprep.mubr.msk.f32.mxu1 %vm14255_vm1, %v14256_v6  ;;  %v10998_v16 = vld [vmem:[%s18287_s6 + $0x308] sm:$0xff] }
 0x5a6   :  { %13198 = vmatmul.mubr.msk.f32.vlgmr.msra.gmra.mrb[110].mxu0 %vm7674_vm0, %v8772_v62  ;;  %13764 = vmatprep.subr.bf16.mxu1 %v14254_v0  ;;  %v13804_v13 = vpack.c.bf16 %v10998_v16, %v10997_v40  ;;  %v10999_v62 = vld [vmem:[%s18287_s6 + $0x310] sm:$0xff] }
 0x5a7   :  { %13757 = vmatpush3.bf16.msra.mxu0 %v13756_v24  ;;  %13219 = vmatprep.mubr.msk.f32.mxu0 %vm14255_vm1, %v14256_v6  ;;  %v9404_v24 = vrot.slane %v7661_v46, 4  ;;  %v13807_v9 = vpack.c.bf16 %v11000_v17, %v10999_v62 }
 0x5a8   :  { %13758 = vmatprep.subr.bf16.mxu0 %v14254_v0 }
 0x5a9   :  { %13766 = vmatpush3.bf16.msra.mxu1 %v13765_v61  ;;  %v14244_v61 = vpop.eup %14243 }
 0x5aa   :  { %13773 = vmatprep.subr.bf16.mxu1 %v14254_v0  ;;  %v10880_v11 = vadd.f32 -1.0, %v14244_v61 }
 0x5ab   :  { %13760 = vmatpush3.bf16.msra.mxu0 %v13759_v23 }
 0x5ac   :  { %13231 = vmatmul.mubr.msk.f32.vlgmr.msra.gmra.mrb[108].mxu1 %vm7674_vm0, %v9009_v26  ;;  %13767 = vmatprep.subr.bf16.mxu0 %v14254_v0  ;;  %v7662_v23 = vsel %vm7627_vm13, %v17722_v58, %v10880_v11  ;;  %v9743_v58 = vld [vmem:[%s18291_s10 + $0x10] sm:$0xff]  ;;  %v9744_v26 = vld [vmem:[%s18291_s10 + $0x18] sm:$0xff] }
 0x5ad   :  { %13775 = vmatpush3.bf16.msra.mxu1 %v13774_v57  ;;  %13252 = vmatprep.mubr.msk.f32.mxu1 %vm14255_vm1, %v14256_v6  ;;  %v13817_v57 = vpack.c.bf16 %v9742_v33, %v9741_v55  ;;  %v13820_v22 = vpack.c.bf16 %v9744_v26, %v9743_v58 }
 0x5ae   :  { %13220 = vmatmul.mubr.msk.f32.vlgmr.msra.gmra.mrb[112].mxu0 %vm7674_vm0, %v7660_v43  ;;  %13776 = vmatprep.subr.bf16.mxu1 %v14254_v0  ;;  %v9650_v43 = vld [vmem:[%s18290_s1] sm:$0x3] }
 0x5af   :  { %13769 = vmatpush3.bf16.msra.mxu0 %v13768_v29  ;;  %13241 = vmatprep.mubr.msk.f32.mxu0 %vm14255_vm1, %v14256_v6  ;;  %v9746_v29 = vld [vmem:[%s18291_s10 + $0x28] sm:$0xff] }
 0x5b0   :  { %13770 = vmatprep.subr.bf16.mxu0 %v14254_v0  ;;  %v13823_v2 = vpack.c.bf16 %v9746_v29, %v9745_v48 }
 0x5b1   :  { %13778 = vmatpush3.bf16.msra.mxu1 %v13777_v52  ;;  %v9748_v52 = vld [vmem:[%s18291_s10 + $0x38] sm:$0xff] }
 0x5b2   :  { %13785 = vmatprep.subr.bf16.mxu1 %v14254_v0  ;;  %v13826_v30 = vpack.c.bf16 %v9748_v52, %v9747_v59 }
 0x5b3   :  { %13772 = vmatpush3.bf16.msra.mxu0 %v13771_v32  ;;  %v9750_v32 = vld [vmem:[%s18291_s10 + $0x48] sm:$0xff] }
 0x5b4   :  { %13253 = vmatmul.mubr.msk.f32.vlgmr.msra.gmra.mrb[110].mxu1 %vm7674_vm0, %v9167_v53  ;;  %13779 = vmatprep.subr.bf16.mxu0 %v14254_v0  ;;  %v13829_v14 = vpack.c.bf16 %v9750_v32, %v9749_v49  ;;  %v9753_v53 = vld [vmem:[%s18291_s10 + $0x60] sm:$0xff] }
 0x5b5   :  { %13787 = vmatpush3.bf16.msra.mxu1 %v13786_v50  ;;  %13274 = vmatprep.mubr.msk.f32.mxu1 %vm14255_vm1, %v14256_v6  ;;  %v13832_v50 = vpack.c.bf16 %v9752_v8, %v9751_v10  ;;  %v13835_v44 = vpack.c.bf16 %v9754_v63, %v9753_v53 }
 0x5b6   :  { %13242 = vmatmul.mubr.msk.f32.vlgmr.msra.gmra.mrb[114].mxu0 %vm7674_vm0, %v9088_v60  ;;  %13788 = vmatprep.subr.bf16.mxu1 %v14254_v0 }
 0x5b7   :  { %13781 = vmatpush3.bf16.msra.mxu0 %v13780_v18  ;;  %13263 = vmatprep.mubr.msk.f32.mxu0 %vm14255_vm1, %v14256_v6  ;;  %v9756_v18 = vld [vmem:[%s18291_s10 + $0x78] sm:$0xff] }
 0x5b8   :  { %13782 = vmatprep.subr.bf16.mxu0 %v14254_v0  ;;  %v13838_v60 = vpack.c.bf16 %v9756_v18, %v9755_v4 }
 0x5b9   :  { %13790 = vmatpush3.bf16.msra.mxu1 %v13789_v36 }
 0x5ba   :  { %13797 = vmatprep.subr.bf16.mxu1 %v14254_v0 }
 0x5bb   :  { %13784 = vmatpush3.bf16.msra.mxu0 %v13783_v3 }
 0x5bc   :  { %13275 = vmatmul.mubr.msk.f32.vlgmr.msra.gmra.mrb[112].mxu1 %vm7674_vm0, %v9325_v41  ;;  %13791 = vmatprep.subr.bf16.mxu0 %v14254_v0 }
 0x5bd   :  { %13799 = vmatpush3.bf16.msra.mxu1 %v13798_v51  ;;  %13296 = vmatprep.mubr.msk.f32.mxu1 %vm14255_vm1, %v14256_v6 }
 0x5be   :  { %13264 = vmatmul.mubr.msk.f32.vlgmr.msra.gmra.mrb[116].mxu0 %vm7674_vm0, %v7661_v46  ;;  %13800 = vmatprep.subr.bf16.mxu1 %v14254_v0 }
 0x5bf   :  { %13793 = vmatpush3.bf16.msra.mxu0 %v13792_v25  ;;  %13285 = vmatprep.mubr.msk.f32.mxu0 %vm14255_vm1, %v14256_v6 }
 0x5c0   :  { %13794 = vmatprep.subr.bf16.mxu0 %v14254_v0 }
 0x5c1   :  { %13802 = vmatpush3.bf16.msra.mxu1 %v13801_v54 }
 0x5c2   :  { %13809 = vmatprep.subr.bf16.mxu1 %v14254_v0 }
 0x5c3   :  { %13796 = vmatpush3.bf16.msra.mxu0 %v13795_v38 }
 0x5c4   :  { %13297 = vmatmul.mubr.msk.f32.vlgmr.msra.gmra.mrb[114].mxu1 %vm7674_vm0, %v9483_v47  ;;  %13803 = vmatprep.subr.bf16.mxu0 %v14254_v0 }
 0x5c5   :  { %13811 = vmatpush3.bf16.msra.mxu1 %v13810_v21  ;;  %13318 = vmatprep.mubr.msk.f32.mxu1 %vm14255_vm1, %v14256_v6 }
 0x5c6   :  { %13286 = vmatmul.mubr.msk.f32.vlgmr.msra.gmra.mrb[118].mxu0 %vm7674_vm0, %v9404_v24  ;;  %13812 = vmatprep.subr.bf16.mxu1 %v14254_v0 }
 0x5c7   :  { %13805 = vmatpush3.bf16.msra.mxu0 %v13804_v13  ;;  %13307 = vmatprep.mubr.msk.f32.mxu0 %vm14255_vm1, %v14256_v6 }
 0x5c8   :  { %13806 = vmatprep.subr.bf16.mxu0 %v14254_v0 }
 0x5c9   :  { %13815 = vmatpush3.bf16.msk.msra.mxu1 %vm13814_vm4, %v13813_v31 }
 0x5ca   :  { %13840 = vmatprep.subr.bf16.mxu1 %v14254_v0 }
 0x5cb   :  { %13808 = vmatpush3.bf16.msra.mxu0 %v13807_v9 }
 0x5cc   :  { %13319 = vmatmul.mubr.msk.f32.vlgmr.msra.gmra.mrb[116].mxu1 %vm9662_vm3, %v9650_v43  ;;  %13816 = vmatprep.subr.bf16.mxu0 %v14254_v0 }
 0x5cd   :  { %13360 = vmatprep.mubr.msk.f32.mxu1 %vm14255_vm1, %v14256_v6 }
 0x5ce   :  { %13308 = vmatmul.mubr.msk.f32.vlgmr.msra.gmra.mrb[120].mxu0 %vm7674_vm0, %v7662_v23 }
 0x5cf   :  { %13353 = vmatprep.mubr.msk.f32.mxu0 %vm14255_vm1, %v14256_v6  ;;  %13818 = vmatpush3.bf16.msra.mxu0 %v13817_v57 }
 0x5d0   :  { %13819 = vmatprep.subr.bf16.mxu0 %v14254_v0 }
 0x5d3   :  { %13821 = vmatpush3.bf16.msra.mxu0 %v13820_v22 }
 0x5d4   :  { %13822 = vmatprep.subr.bf16.mxu0 %v14254_v0 }
 0x5d7   :  { %13824 = vmatpush3.bf16.msra.mxu0 %v13823_v2 }
 0x5d8   :  { %13825 = vmatprep.subr.bf16.mxu0 %v14254_v0 }
 0x5db   :  { %13827 = vmatpush3.bf16.msra.mxu0 %v13826_v30 }
 0x5dc   :  { %13828 = vmatprep.subr.bf16.mxu0 %v14254_v0 }
 0x5df   :  { %13830 = vmatpush3.bf16.msra.mxu0 %v13829_v14 }
 0x5e0   :  { %13831 = vmatprep.subr.bf16.mxu0 %v14254_v0 }
 0x5e3   :  { %13833 = vmatpush3.bf16.msra.mxu0 %v13832_v50 }
 0x5e4   :  { %13834 = vmatprep.subr.bf16.mxu0 %v14254_v0 }
 0x5e7   :  { %13836 = vmatpush3.bf16.msra.mxu0 %v13835_v44 }
 0x5e8   :  { %13837 = vmatprep.subr.bf16.mxu0 %v14254_v0 }
 0x5eb   :  { %13839 = vmatpush3.bf16.msra.mxu0 %v13838_v60 }
 0x63f   :  { %v7815_v1 = vpop.f32.mrb[92].mxu1 }
 0x640   :  { %v13056_v19 = vpop.f32.mrb[93].mxu1 }
 0x641   :  { %v7743_v37 = vpop.f32.mrb[96].mxu0 }
 0x642   :  { %v7816_v36 = vadd.f32 %v7815_v1, %v7743_v37  ;;  %v13045_v28 = vpop.f32.mrb[97].mxu0 }
 0x647   :  { %v7972_v56 = vpop.f32.mrb[94].mxu1 }
 0x648   :  { %v13078_v46 = vpop.f32.mrb[95].mxu1 }
 0x649   :  { %v7893_v3 = vpop.f32.mrb[98].mxu0 }
 0x64a   :  { %v7897_v20 = vadd.f32 %v7893_v3, %v7816_v36  ;;  %v13067_v12 = vpop.f32.mrb[99].mxu0 }
 0x64b   :  { %v11004_v12 = vld [vmem:[%s18292_s9] ss:$0 sm:$0xff] }
 0x64c   :  { %v7976_v34 = vadd.f32 %v7972_v56, %v7897_v20 }
 0x64f   :  { %v8130_v51 = vpop.f32.mrb[96].mxu1 }
 0x650   :  { %v13100_v41 = vpop.f32.mrb[97].mxu1 }
 0x651   :  { %v8051_v39 = vpop.f32.mrb[100].mxu0 }
 0x652   :  { %v8055_v27 = vadd.f32 %v8051_v39, %v7976_v34  ;;  %v13089_v25 = vpop.f32.mrb[101].mxu0 }
 0x654   :  { %v8134_v7 = vadd.f32 %v8130_v51, %v8055_v27 }
 0x657   :  { %v8288_v5 = vpop.f32.mrb[98].mxu1 }
 0x658   :  { %v13122_v54 = vpop.f32.mrb[99].mxu1 }
 0x659   :  { %v8209_v15 = vpop.f32.mrb[102].mxu0  ;;  %v9840_v54 = vld [vmem:[%s18293_s13 + $0x8] sm:$0xff] }
 0x65a   :  { %v8213_v35 = vadd.f32 %v8209_v15, %v8134_v7  ;;  %v13111_v38 = vpop.f32.mrb[103].mxu0 }
 0x65c   :  { %v8292_v40 = vadd.f32 %v8288_v5, %v8213_v35  ;;  %v9839_v5 = vld [vmem:[%s18293_s13] sm:$0xff] }
 0x65d   :  { %v13841_v15 = vpack.c.bf16 %v9840_v54, %v9839_v5  ;;  %v11002_v35 = vld [vmem:[%s18294_s7] ss:$0 sm:$0xff] }
 0x65f   :  { %v8446_v16 = vpop.f32.mrb[100].mxu1  ;;  %13842 = vmatpush3.bf16.msra.mxu1 %v13841_v15 }
 0x660   :  { %v13144_v21 = vpop.f32.mrb[101].mxu1  ;;  %13843 = vmatprep.subr.bf16.mxu1 %v14254_v0 }
 0x661   :  { %v8367_v47 = vpop.f32.mrb[104].mxu0  ;;  %v11007_v21 = vld [vmem:[%s18295_s11] ss:$0 sm:$0xff] }
 0x662   :  { %v8371_v42 = vadd.f32 %v8367_v47, %v8292_v40  ;;  %v13133_v45 = vpop.f32.mrb[105].mxu0  ;;  %v9835_v47 = vld [vmem:[%s18296_s12] sm:$0xff] }
 0x664   :  { %v8450_v13 = vadd.f32 %v8446_v16, %v8371_v42  ;;  %v9836_v42 = vld [vmem:[%s18296_s12 + $0x8] sm:$0xff] }
 0x667   :  { %v8604_v24 = vpop.f32.mrb[102].mxu1 }
 0x668   :  { %v13166_v62 = vpop.f32.mrb[103].mxu1 }
 0x669   :  { %v8525_v17 = vpop.f32.mrb[106].mxu0  ;;  %v13844_v62 = vpack.c.bf16 %v9836_v42, %v9835_v47 }
 0x66a   :  { %v8529_v31 = vadd.f32 %v8525_v17, %v8450_v13  ;;  %v13155_v61 = vpop.f32.mrb[107].mxu0 }
 0x66b   :  { %v9838_v61 = vld [vmem:[%s18296_s12 + $0x18] sm:$0xff] }
 0x66c   :  { %v8608_v9 = vadd.f32 %v8604_v24, %v8529_v31  ;;  %v9837_v31 = vld [vmem:[%s18296_s12 + $0x10] sm:$0xff] }
 0x66f   :  { %v8762_v11 = vpop.f32.mrb[104].mxu1 }
 0x670   :  { %v13188_v43 = vpop.f32.mrb[105].mxu1 }
 0x671   :  { %v8683_v23 = vpop.f32.mrb[108].mxu0  ;;  %v10001_v43 = vld [vmem:[%s18297_s15] sm:$0xff] }
 0x672   :  { %v8687_v55 = vadd.f32 %v8683_v23, %v8608_v9  ;;  %v13177_v33 = vpop.f32.mrb[109].mxu0  ;;  %v10002_v23 = vld [vmem:[%s18297_s15 + $0x8] sm:$0xff] }
 0x673   :  { %v13850_v33 = vpack.c.bf16 %v10002_v23, %v10001_v43 }
 0x674   :  { %v8766_v57 = vadd.f32 %v8762_v11, %v8687_v55  ;;  %v13847_v11 = vpack.c.bf16 %v9838_v61, %v9837_v31 }
 0x677   :  { %v8920_v58 = vpop.f32.mrb[106].mxu1 }
 0x678   :  { %v13210_v26 = vpop.f32.mrb[107].mxu1 }
 0x679   :  { %v8841_v22 = vpop.f32.mrb[110].mxu0  ;;  %v10004_v26 = vld [vmem:[%s18297_s15 + $0x18] sm:$0xff] }
 0x67a   :  { %v8845_v48 = vadd.f32 %v8841_v22, %v8766_v57  ;;  %v13199_v29 = vpop.f32.mrb[111].mxu0 }
 0x67c   :  { %v8924_v2 = vadd.f32 %v8920_v58, %v8845_v48  ;;  %v10003_v58 = vld [vmem:[%s18297_s15 + $0x10] sm:$0xff]  ;;  %v10005_v48 = vld [vmem:[%s18297_s15 + $0x20] sm:$0xff] }
 0x67d   :  { %v13853_v22 = vpack.c.bf16 %v10004_v26, %v10003_v58 }
 0x67f   :  { %v9078_v59 = vpop.f32.mrb[108].mxu1 }
 0x680   :  { %v13232_v52 = vpop.f32.mrb[109].mxu1 }
 0x681   :  { %v8999_v30 = vpop.f32.mrb[112].mxu0 }
 0x682   :  { %v9003_v49 = vadd.f32 %v8999_v30, %v8924_v2  ;;  %v13221_v32 = vpop.f32.mrb[113].mxu0  ;;  %v10007_v2 = vld [vmem:[%s18297_s15 + $0x30] sm:$0xff]  ;;  %v10009_v30 = vld [vmem:[%s18297_s15 + $0x40] sm:$0xff] }
 0x684   :  { %v9082_v14 = vadd.f32 %v9078_v59, %v9003_v49  ;;  %v10008_v59 = vld [vmem:[%s18297_s15 + $0x38] sm:$0xff]  ;;  %v10010_v49 = vld [vmem:[%s18297_s15 + $0x48] sm:$0xff] }
 0x685   :  { %v13859_v52 = vpack.c.bf16 %v10008_v59, %v10007_v2  ;;  %v13862_v32 = vpack.c.bf16 %v10010_v49, %v10009_v30 }
 0x687   :  { %v9236_v10 = vpop.f32.mrb[110].mxu1 }
 0x688   :  { %v13254_v8 = vpop.f32.mrb[111].mxu1 }
 0x689   :  { %v9157_v50 = vpop.f32.mrb[114].mxu0 }
 0x68a   :  { %v9161_v53 = vadd.f32 %v9157_v50, %v9082_v14  ;;  %v13243_v63 = vpop.f32.mrb[115].mxu0  ;;  %v10011_v14 = vld [vmem:[%s18297_s15 + $0x50] sm:$0xff]  ;;  %v10013_v50 = vld [vmem:[%s18297_s15 + $0x60] sm:$0xff] }
 0x68c   :  { %v9240_v44 = vadd.f32 %v9236_v10, %v9161_v53  ;;  %v10012_v10 = vld [vmem:[%s18297_s15 + $0x58] sm:$0xff]  ;;  %v10014_v53 = vld [vmem:[%s18297_s15 + $0x68] sm:$0xff] }
 0x68d   :  { %v13865_v8 = vpack.c.bf16 %v10012_v10, %v10011_v14  ;;  %v13868_v63 = vpack.c.bf16 %v10014_v53, %v10013_v50 }
 0x68f   :  { %v9394_v4 = vpop.f32.mrb[112].mxu1 }
 0x690   :  { %v13276_v18 = vpop.f32.mrb[113].mxu1 }
 0x691   :  { %v9315_v60 = vpop.f32.mrb[116].mxu0 }
 0x692   :  { %v9319_v1 = vadd.f32 %v9315_v60, %v9240_v44  ;;  %v13265_v19 = vpop.f32.mrb[117].mxu0  ;;  %v10015_v44 = vld [vmem:[%s18297_s15 + $0x70] sm:$0xff] }
 0x694   :  { %v9398_v37 = vadd.f32 %v9394_v4, %v9319_v1  ;;  %v10016_v4 = vld [vmem:[%s18297_s15 + $0x78] sm:$0xff] }
 0x695   :  { %v13871_v18 = vpack.c.bf16 %v10016_v4, %v10015_v44 }
 0x697   :  { %v9552_v36 = vpop.f32.mrb[114].mxu1 }
 0x698   :  { %v13298_v28 = vpop.f32.mrb[115].mxu1 }
 0x699   :  { %v9473_v56 = vpop.f32.mrb[118].mxu0 }
 0x69a   :  { %v9477_v46 = vadd.f32 %v9473_v56, %v9398_v37  ;;  %v13287_v3 = vpop.f32.mrb[119].mxu0  ;;  %v11010_v37 = vld [vmem:[%s18298_s14] ss:$0 sm:$0xff] }
 0x69c   :  { %v9556_v20 = vadd.f32 %v9552_v36, %v9477_v46 }
 0x69f   :  { %v9736_v34 = vpop.f32.mrb[116].mxu1 }
 0x6a0   :  { %v9737_v51 = vadd.f32 %v11004_v12, %v9736_v34  ;;  %v13320_v41 = vpop.f32.mrb[117].mxu1  ;;  %v10094_v34 = vlaneseq }
 0x6a1   :  { %v9631_v39 = vpop.f32.mrb[120].mxu0 }
 0x6a2   :  { %v9740_v27 = vmax.f32 %v9737_v51, 0.0  ;;  %v9635_v25 = vadd.f32 %v9631_v39, %v9556_v20  ;;  %v13309_v7 = vpop.f32.mrb[121].mxu0  ;;  %v11012_v51 = vld [vmem:[%s18299_s16] ss:$0 sm:$0xff]  ;;  %v10095_v39 = vand.u32 127, %v10094_v34 }
 0x6a4   :  { %13354 = vmatmul.mubr.f32.vlgmr.msra.gmra.mrb[122].mxu0 %v9740_v27  ;;  %v9643_v38 = vadd.f32 %v11002_v35, %v9635_v25 }
 0x6a6   :  { %v9645_v40 = vmin.f32 %v9643_v38, 0.0  ;;  %vm9644_vm2 = vcmp.gt.f32.partialorder %v9643_v38, 0.0 }
 0x6a8   :  { %v9646_v16 = vmul.f32 1.442695, %v9645_v40 }
 0x6aa   :  { %14245 = vpow2.f32 %v9646_v16 }
 0x6b4   :  { %v14246_v9 = vpop.eup %14245 }
 0x6b5   :  { %v11003_v55 = vadd.f32 -1.0, %v14246_v9 }
 0x6b7   :  { %v9649_v57 = vsel %vm9644_vm2, %v9643_v38, %v11003_v55 }
 0x777   :  { %v9830_v45 = vpop.f32.mrb[122].mxu0 }
 0x778   :  { %v9831_v13 = vadd.f32 %v11007_v21, %v9830_v45  ;;  %v13355_v24 = vpop.f32.mrb[123].mxu0 }
 0x77a   :  { %v9834_v17 = vmax.f32 %v9831_v13, 0.0 }
 0x77c   :  { %13361 = vmatmul.mubr.msk.f32.vlgmr.msra.gmra.mrb[118].mxu1 %vm418_vm5, %v9834_v17  ;;  %vm10096_vm5 = vcmp.ge.s32.totalorder %v10095_v39, 4 }
 0x77d   :  { %13845 = vmatpush3.bf16.msra.mxu1 %v13844_v62  ;;  %13371 = vmatprep.mubr.msk.f32.mxu1 %vm14255_vm1, %v14256_v6 }
 0x77e   :  { %13846 = vmatprep.subr.bf16.mxu1 %v14254_v0 }
 0x781   :  { %13848 = vmatpush3.bf16.msra.mxu1 %v13847_v11 }
 0x782   :  { %13849 = vmatprep.subr.bf16.mxu1 %v14254_v0 }
 0x784   :  { %13372 = vmatmul.mubr.msk.f32.vlgmr.msra.gmra.mrb[120].mxu1 %vm7674_vm0, %v9649_v57 }
 0x785   :  { %13851 = vmatpush3.bf16.msra.mxu1 %v13850_v33  ;;  %13406 = vmatprep.mubr.msk.f32.mxu1 %vm14255_vm1, %v14256_v6  ;;  %v10006_v6 = vld [vmem:[%s18297_s15 + $0x28] sm:$0xff] }
 0x786   :  { %13852 = vmatprep.subr.bf16.mxu1 %v14254_v0  ;;  %v13856_v29 = vpack.c.bf16 %v10006_v6, %v10005_v48 }
 0x789   :  { %13854 = vmatpush3.bf16.msra.mxu1 %v13853_v22 }
 0x78a   :  { %13855 = vmatprep.subr.bf16.mxu1 %v14254_v0 }
 0x78d   :  { %13857 = vmatpush3.bf16.msra.mxu1 %v13856_v29 }
 0x78e   :  { %13858 = vmatprep.subr.bf16.mxu1 %v14254_v0 }
 0x791   :  { %13860 = vmatpush3.bf16.msra.mxu1 %v13859_v52 }
 0x792   :  { %13861 = vmatprep.subr.bf16.mxu1 %v14254_v0 }
 0x795   :  { %13863 = vmatpush3.bf16.msra.mxu1 %v13862_v32 }
 0x796   :  { %13864 = vmatprep.subr.bf16.mxu1 %v14254_v0 }
 0x799   :  { %13866 = vmatpush3.bf16.msra.mxu1 %v13865_v8 }
 0x79a   :  { %13867 = vmatprep.subr.bf16.mxu1 %v14254_v0 }
 0x79d   :  { %13869 = vmatpush3.bf16.msra.mxu1 %v13868_v63 }
 0x79e   :  { %13870 = vmatprep.subr.bf16.mxu1 %v14254_v0 }
 0x7a1   :  { %13872 = vmatpush3.bf16.msra.mxu1 %v13871_v18 }
 0x84f   :  { %v9910_v60 = vpop.f32.mrb[118].mxu1 }
 0x850   :  { %v13362_v1 = vpop.f32.mrb[119].mxu1 }
 0x857   :  { %v9983_v19 = vpop.f32.mrb[120].mxu1 }
 0x858   :  { %v9984_v36 = vadd.f32 %v9983_v19, %v9910_v60  ;;  %v13373_v28 = vpop.f32.mrb[121].mxu1 }
 0x85a   :  { %v9994_v0 = vadd.f32 %v11010_v37, %v9984_v36 }
 0x85c   :  { %v9996_v56 = vmin.f32 %v9994_v0, 0.0  ;;  %vm9995_vm1 = vcmp.gt.f32.partialorder %v9994_v0, 0.0 }
 0x85e   :  { %v9997_v46 = vmul.f32 1.442695, %v9996_v56 }
 0x860   :  { %14247 = vpow2.f32 %v9997_v46 }
 0x86a   :  { %v14248_v3 = vpop.eup %14247 }
 0x86b   :  { %v11011_v20 = vadd.f32 -1.0, %v14248_v3 }
 0x86d   :  { %v10000_v12 = vsel %vm9995_vm1, %v9994_v0, %v11011_v20 }
 0x86e   :  { %13407 = vmatmul.mubr.f32.vlgmr.msra.gmra.mrb[122].mxu1 %v10000_v12 }
 0x941   :  { %v10090_v41 = vpop.f32.mrb[122].mxu1 }
 0x942   :  { %v10091_v27 = vadd.f32 %v11012_v51, %v10090_v41  ;;  %v13408_v25 = vpop.f32.mrb[123].mxu1 }
 0x944   :  { %v10097_v7 = vmax.f32 %v10091_v27, 1e-06 }
 0x946   :  { %v10098_v5 = vmin.f32 %v10097_v7, 1.0 }
 0x948   :  { %v10099_v54 = vsel %vm10096_vm5, %v10098_v5, %v10091_v27 }
 0x949   :  { %10101 = vst.msk [vmem:[%s18300_s17] sm:$0x3] %vm10100_vm14, %v10099_v54 }

</bundles_post_ra>
